<compile_context>
chip_gen: v7x
topology: tpu7x:2x2x1
jax: 0.10.0
libtpu: 0.0.40
codegen_flags: <defaults>
</compile_context>

<pallas_src>
import functools

import jax
import jax.numpy as jnp
from jax import lax
from jax.experimental import pallas as pl
from jax.experimental.pallas import tpu as pltpu

LEAKY_SLOPE = 0.2
ADAIN_EPS = 1e-5


def _adain_resblock_kernel(
    # scalar-prefetch refs (SMEM, loaded once per call)
    w1_ref, b1_ref, w2_ref, b2_ref, style_ref,
    # tensor input / output (VMEM blocks)
    x_ref, o_ref,
    # VMEM scratch (zero-padded feature maps)
    xpad_ref, ypad_ref,
    *, cin, cout, h, w,
):
    b = pl.program_id(0)
    f32 = jnp.float32

    # ---- zero-padded input (Conv2d padding=1 handled in-kernel) ----
    xpad_ref[...] = jnp.zeros_like(xpad_ref)
    ypad_ref[...] = jnp.zeros_like(ypad_ref)
    x_block = x_ref[0].astype(f32)                       # (cin, h, w), read once
    xpad_ref[:, 1:h + 1, 1:w + 1] = x_block

    def conv3x3(src_ref, w_ref, bias_ref, n_in, n_out, extra=None):
        # VPU formulation: each tap is a scalar(SMEM)-broadcast FMA over an
        # (H, W) tile.  One VMEM band load per (ci, kh); kw windows are
        # in-register slices reused across all n_out output channels.
        accs = [jnp.full((h, w), bias_ref[co], dtype=f32) for co in range(n_out)]
        if extra is not None:                            # fuse residual add
            accs = [a + e for a, e in zip(accs, extra)]
        for ci in range(n_in):
            for kh in range(3):
                band = src_ref[ci, kh:kh + h, :]         # (h, w+2), single load
                wins = [band[:, kw:kw + w] for kw in range(3)]
                for kw in range(3):
                    win = wins[kw]
                    for co in range(n_out):
                        wt = w_ref[((co * n_in + ci) * 3 + kh) * 3 + kw]
                        accs[co] = accs[co] + wt * win
        return accs

    # ---- layer1: conv3x3 + LeakyReLU(0.2) + AdaIN -> padded scratch ----
    y = conv3x3(xpad_ref, w1_ref, b1_ref, cin, cout)
    inv_hw = 1.0 / float(h * w)
    normed = []
    for co in range(cout):
        a = y[co]
        a = jnp.where(a > 0, a, LEAKY_SLOPE * a)                      # LeakyReLU
        mu = jnp.sum(a, keepdims=True) * inv_hw                       # (1, 1)
        d = a - mu
        var = jnp.sum(d * d, keepdims=True) * inv_hw                  # biased var
        inv_std = lax.rsqrt(var + ADAIN_EPS)
        # TODO(synk): AdaIn() is not defined in the provided snippet; assuming
        # instance-norm followed by affine with gamma=style[:,c,0], beta=style[:,c,1].
        gamma = style_ref[b, 2 * co]
        beta = style_ref[b, 2 * co + 1]
        normed.append(d * inv_std * gamma + beta)
    ypad_ref[:, 1:h + 1, 1:w + 1] = jnp.stack(normed, axis=0)         # one store

    # ---- layer2: conv3x3 with residual fused into accumulator init ----
    xin = [x_block[co] for co in range(cout)]
    z = conv3x3(ypad_ref, w2_ref, b2_ref, cout, cout, extra=xin)
    o_ref[0] = jnp.stack(z, axis=0).astype(o_ref.dtype)               # one store


def adain_residual_block(x, style, w1, b1, w2, b2):
    """Fused forward of AdainResidualBlock (NCHW in / NCHW out, PyTorch layout).

    x:     (N, Cin, H, W)
    style: (N, 2*Cout)  -> interpreted as (N, Cout, 2) = (gamma, beta)
    w1:    (Cout, Cin, 3, 3)   b1: (Cout,)
    w2:    (Cout, Cout, 3, 3)  b2: (Cout,)
    """
    n, cin, h, w = x.shape
    cout = w1.shape[0]
    assert cin == cout, "residual add requires in_channels == out_channels"
    assert style.size == n * 2 * cout

    w1_flat = w1.reshape(-1).astype(jnp.float32)
    w2_flat = w2.reshape(-1).astype(jnp.float32)
    b1_f = b1.astype(jnp.float32)
    b2_f = b2.astype(jnp.float32)
    style_flat = style.reshape(n, 2 * cout).astype(jnp.float32)

    kernel = functools.partial(_adain_resblock_kernel, cin=cin, cout=cout, h=h, w=w)

    conv_flops = 2 * n * h * w * 9 * (cin * cout + cout * cout)
    other_flops = n * cout * h * w * 10  # activation, norm, affine, residual
    bytes_accessed = 4 * (x.size + n * cout * h * w
                          + w1_flat.size + w2_flat.size
                          + b1_f.size + b2_f.size + style_flat.size)

    out = pl.pallas_call(
        kernel,
        out_shape=jax.ShapeDtypeStruct((n, cout, h, w), x.dtype),
        grid_spec=pltpu.PrefetchScalarGridSpec(
            num_scalar_prefetch=5,
            grid=(n,),
            in_specs=[
                pl.BlockSpec((1, cin, h, w), lambda i, *_: (i, 0, 0, 0)),
            ],
            out_specs=pl.BlockSpec((1, cout, h, w), lambda i, *_: (i, 0, 0, 0)),
            scratch_shapes=[
                pltpu.VMEM((cin, h + 2, w + 2), jnp.float32),
                pltpu.VMEM((cout, h + 2, w + 2), jnp.float32),
            ],
        ),
        compiler_params=pltpu.CompilerParams(
            dimension_semantics=("parallel",),
        ),
        cost_estimate=pl.CostEstimate(
            flops=conv_flops + other_flops,
            transcendentals=n * cout,
            bytes_accessed=bytes_accessed,
        ),
    )(w1_flat, b1_f, w2_flat, b2_f, style_flat, x)

    return out


def _reference(x, style, w1, b1, w2, b2):
    """Pure-JAX reference with identical semantics."""
    act = lax.conv_general_dilated(
        x, w1, window_strides=(1, 1), padding=((1, 1), (1, 1)),
        dimension_numbers=("NCHW", "OIHW", "NCHW"),
    ) + b1[None, :, None, None]
    act = jnp.where(act > 0, act, LEAKY_SLOPE * act)

    n, c, _, _ = act.shape
    s = style.reshape(n, c, 2)
    mu = act.mean(axis=(2, 3), keepdims=True)
    var = act.var(axis=(2, 3), keepdims=True)  # biased, matches kernel
    act = (act - mu) * lax.rsqrt(var + ADAIN_EPS)
    act = act * s[:, :, 0, None, None] + s[:, :, 1, None, None]

    out = lax.conv_general_dilated(
        act, w2, window_strides=(1, 1), padding=((1, 1), (1, 1)),
        dimension_numbers=("NCHW", "OIHW", "NCHW"),
    ) + b2[None, :, None, None]
    return out + x


if __name__ == "__main__":
    key = jax.random.PRNGKey(0)
    kx, ks, kw1, kb1, kw2, kb2 = jax.random.split(key, 6)

    N, C, H, W = 2, 4, 16, 16
    x = jax.random.normal(kx, (N, C, H, W), dtype=jnp.float32)
    style = jax.random.normal(ks, (N, 2 * C), dtype=jnp.float32)

    fan_in = C * 9
    bound = 1.0 / (fan_in ** 0.5)
    w1 = jax.random.uniform(kw1, (C, C, 3, 3), jnp.float32, -bound, bound)
    b1 = jax.random.uniform(kb1, (C,), jnp.float32, -bound, bound)
    w2 = jax.random.uniform(kw2, (C, C, 3, 3), jnp.float32, -bound, bound)
    b2 = jax.random.uniform(kb2, (C,), jnp.float32, -bound, bound)

    out = adain_residual_block(x, style, w1, b1, w2, b2)
    out = jax.block_until_ready(out)

    ref = _reference(x, style, w1, b1, w2, b2)
    assert out.shape == (N, C, H, W)
    max_err = float(jnp.max(jnp.abs(out - ref)))
    assert jnp.allclose(out, ref, atol=1e-4, rtol=1e-4), f"max abs err {max_err}"

    print("KERNEL_OK")
</pallas_src>

<mosaic_0001>
module attributes {stable_mosaic.version = 11 : i64} {
  func.func @_adain_resblock_kernel(%arg0: i32, %arg1: memref<144xf32, #tpu.memory_space<smem>>, %arg2: memref<4xf32, #tpu.memory_space<smem>>, %arg3: memref<144xf32, #tpu.memory_space<smem>>, %arg4: memref<4xf32, #tpu.memory_space<smem>>, %arg5: memref<2x8xf32, #tpu.memory_space<smem>>, %arg6: memref<1x4x16x16xf32, #tpu.memory_space<vmem>>, %arg7: memref<1x4x16x16xf32, #tpu.memory_space<vmem>>, %arg8: memref<4x18x18xf32, #tpu.memory_space<vmem>>, %arg9: memref<4x18x18xf32, #tpu.memory_space<vmem>>) attributes {dimension_semantics = [#tpu.dimension_semantics<parallel>], iteration_bounds = array<i64: 2>, scalar_prefetch = 5 : i64, scratch_operands = 2 : i64, tpu.core_type = #tpu.core_type<tc>, window_params = [{transform_indices = @transform_0, window_bounds = array<i64: 1, 4, 16, 16>}, {transform_indices = @transform_1, window_bounds = array<i64: 1, 4, 16, 16>}]} {
    %cst = arith.constant 0.000000e+00 : f32
    %0 = vector.broadcast %cst : f32 to vector<4x18x18xf32>
    %c0 = arith.constant 0 : index
    %c0_0 = arith.constant 0 : index
    %c0_1 = arith.constant 0 : index
    %1 = vector.load %arg8[%c0, %c0_0, %c0_1] : memref<4x18x18xf32, #tpu.memory_space<vmem>>, vector<4x18x18xf32>
    tpu.vector_store %arg8[%c0, %c0_0, %c0_1], %0 {strides = array<i32>} : memref<4x18x18xf32, #tpu.memory_space<vmem>>, vector<4x18x18xf32>,
    %cst_2 = arith.constant 0.000000e+00 : f32
    %2 = vector.broadcast %cst_2 : f32 to vector<4x18x18xf32>
    %c0_3 = arith.constant 0 : index
    %c0_4 = arith.constant 0 : index
    %c0_5 = arith.constant 0 : index
    %3 = vector.load %arg9[%c0_3, %c0_4, %c0_5] : memref<4x18x18xf32, #tpu.memory_space<vmem>>, vector<4x18x18xf32>
    tpu.vector_store %arg9[%c0_3, %c0_4, %c0_5], %2 {strides = array<i32>} : memref<4x18x18xf32, #tpu.memory_space<vmem>>, vector<4x18x18xf32>,
    %c0_6 = arith.constant 0 : index
    %c0_7 = arith.constant 0 : index
    %c0_8 = arith.constant 0 : index
    %c0_9 = arith.constant 0 : index
    %4 = vector.load %arg6[%c0_6, %c0_7, %c0_8, %c0_9] : memref<1x4x16x16xf32, #tpu.memory_space<vmem>>, vector<1x4x16x16xf32>
    %5 = vector.shape_cast %4 : vector<1x4x16x16xf32> to vector<4x16x16xf32>
    %c0_10 = arith.constant 0 : index
    %c1 = arith.constant 1 : index
    %c1_11 = arith.constant 1 : index
    %6 = vector.load %arg8[%c0_10, %c1, %c1_11] : memref<4x18x18xf32, #tpu.memory_space<vmem>>, vector<4x16x16xf32>
    tpu.vector_store %arg8[%c0_10, %c1, %c1_11], %5 {strides = array<i32>} : memref<4x18x18xf32, #tpu.memory_space<vmem>>, vector<4x16x16xf32>,
    %c0_12 = arith.constant 0 : index
    %7 = memref.load %arg2[%c0_12] : memref<4xf32, #tpu.memory_space<smem>>
    %8 = vector.broadcast %7 : f32 to vector<16x16xf32>
    %c1_13 = arith.constant 1 : index
    %9 = memref.load %arg2[%c1_13] : memref<4xf32, #tpu.memory_space<smem>>
    %10 = vector.broadcast %9 : f32 to vector<16x16xf32>
    %c2 = arith.constant 2 : index
    %11 = memref.load %arg2[%c2] : memref<4xf32, #tpu.memory_space<smem>>
    %12 = vector.broadcast %11 : f32 to vector<16x16xf32>
    %c3 = arith.constant 3 : index
    %13 = memref.load %arg2[%c3] : memref<4xf32, #tpu.memory_space<smem>>
    %14 = vector.broadcast %13 : f32 to vector<16x16xf32>
    %c0_14 = arith.constant 0 : index
    %c0_15 = arith.constant 0 : index
    %c0_16 = arith.constant 0 : index
    %15 = vector.load %arg8[%c0_14, %c0_15, %c0_16] : memref<4x18x18xf32, #tpu.memory_space<vmem>>, vector<1x16x18xf32>
    %16 = vector.shape_cast %15 : vector<1x16x18xf32> to vector<16x18xf32>
    %17 = vector.extract_strided_slice %16 {offsets = [0, 0], sizes = [16, 16], strides = [1, 1]} : vector<16x18xf32> to vector<16x16xf32>
    %18 = vector.extract_strided_slice %16 {offsets = [0, 1], sizes = [16, 16], strides = [1, 1]} : vector<16x18xf32> to vector<16x16xf32>
    %19 = vector.extract_strided_slice %16 {offsets = [0, 2], sizes = [16, 16], strides = [1, 1]} : vector<16x18xf32> to vector<16x16xf32>
    %c0_17 = arith.constant 0 : index
    %20 = memref.load %arg1[%c0_17] : memref<144xf32, #tpu.memory_space<smem>>
    %21 = vector.broadcast %20 : f32 to vector<16x16xf32>
    %22 = arith.mulf %21, %17 : vector<16x16xf32>
    %23 = arith.addf %8, %22 : vector<16x16xf32>
    %c36 = arith.constant 36 : index
    %24 = memref.load %arg1[%c36] : memref<144xf32, #tpu.memory_space<smem>>
    %25 = vector.broadcast %24 : f32 to vector<16x16xf32>
    %26 = arith.mulf %25, %17 : vector<16x16xf32>
    %27 = arith.addf %10, %26 : vector<16x16xf32>
    %c72 = arith.constant 72 : index
    %28 = memref.load %arg1[%c72] : memref<144xf32, #tpu.memory_space<smem>>
    %29 = vector.broadcast %28 : f32 to vector<16x16xf32>
    %30 = arith.mulf %29, %17 : vector<16x16xf32>
    %31 = arith.addf %12, %30 : vector<16x16xf32>
    %c108 = arith.constant 108 : index
    %32 = memref.load %arg1[%c108] : memref<144xf32, #tpu.memory_space<smem>>
    %33 = vector.broadcast %32 : f32 to vector<16x16xf32>
    %34 = arith.mulf %33, %17 : vector<16x16xf32>
    %35 = arith.addf %14, %34 : vector<16x16xf32>
    %c1_18 = arith.constant 1 : index
    %36 = memref.load %arg1[%c1_18] : memref<144xf32, #tpu.memory_space<smem>>
    %37 = vector.broadcast %36 : f32 to vector<16x16xf32>
    %38 = arith.mulf %37, %18 : vector<16x16xf32>
    %39 = arith.addf %23, %38 : vector<16x16xf32>
    %c37 = arith.constant 37 : index
    %40 = memref.load %arg1[%c37] : memref<144xf32, #tpu.memory_space<smem>>
    %41 = vector.broadcast %40 : f32 to vector<16x16xf32>
    %42 = arith.mulf %41, %18 : vector<16x16xf32>
    %43 = arith.addf %27, %42 : vector<16x16xf32>
    %c73 = arith.constant 73 : index
    %44 = memref.load %arg1[%c73] : memref<144xf32, #tpu.memory_space<smem>>
    %45 = vector.broadcast %44 : f32 to vector<16x16xf32>
    %46 = arith.mulf %45, %18 : vector<16x16xf32>
    %47 = arith.addf %31, %46 : vector<16x16xf32>
    %c109 = arith.constant 109 : index
    %48 = memref.load %arg1[%c109] : memref<144xf32, #tpu.memory_space<smem>>
    %49 = vector.broadcast %48 : f32 to vector<16x16xf32>
    %50 = arith.mulf %49, %18 : vector<16x16xf32>
    %51 = arith.addf %35, %50 : vector<16x16xf32>
    %c2_19 = arith.constant 2 : index
    %52 = memref.load %arg1[%c2_19] : memref<144xf32, #tpu.memory_space<smem>>
    %53 = vector.broadcast %52 : f32 to vector<16x16xf32>
    %54 = arith.mulf %53, %19 : vector<16x16xf32>
    %55 = arith.addf %39, %54 : vector<16x16xf32>
    %c38 = arith.constant 38 : index
    %56 = memref.load %arg1[%c38] : memref<144xf32, #tpu.memory_space<smem>>
    %57 = vector.broadcast %56 : f32 to vector<16x16xf32>
    %58 = arith.mulf %57, %19 : vector<16x16xf32>
    %59 = arith.addf %43, %58 : vector<16x16xf32>
    %c74 = arith.constant 74 : index
    %60 = memref.load %arg1[%c74] : memref<144xf32, #tpu.memory_space<smem>>
    %61 = vector.broadcast %60 : f32 to vector<16x16xf32>
    %62 = arith.mulf %61, %19 : vector<16x16xf32>
    %63 = arith.addf %47, %62 : vector<16x16xf32>
    %c110 = arith.constant 110 : index
    %64 = memref.load %arg1[%c110] : memref<144xf32, #tpu.memory_space<smem>>
    %65 = vector.broadcast %64 : f32 to vector<16x16xf32>
    %66 = arith.mulf %65, %19 : vector<16x16xf32>
    %67 = arith.addf %51, %66 : vector<16x16xf32>
    %c0_20 = arith.constant 0 : index
    %c1_21 = arith.constant 1 : index
    %c0_22 = arith.constant 0 : index
    %68 = vector.load %arg8[%c0_20, %c1_21, %c0_22] : memref<4x18x18xf32, #tpu.memory_space<vmem>>, vector<1x16x18xf32>
    %69 = vector.shape_cast %68 : vector<1x16x18xf32> to vector<16x18xf32>
    %70 = vector.extract_strided_slice %69 {offsets = [0, 0], sizes = [16, 16], strides = [1, 1]} : vector<16x18xf32> to vector<16x16xf32>
    %71 = vector.extract_strided_slice %69 {offsets = [0, 1], sizes = [16, 16], strides = [1, 1]} : vector<16x18xf32> to vector<16x16xf32>
    %72 = vector.extract_strided_slice %69 {offsets = [0, 2], sizes = [16, 16], strides = [1, 1]} : vector<16x18xf32> to vector<16x16xf32>
    %c3_23 = arith.constant 3 : index
    %73 = memref.load %arg1[%c3_23] : memref<144xf32, #tpu.memory_space<smem>>
    %74 = vector.broadcast %73 : f32 to vector<16x16xf32>
    %75 = arith.mulf %74, %70 : vector<16x16xf32>
    %76 = arith.addf %55, %75 : vector<16x16xf32>
    %c39 = arith.constant 39 : index
    %77 = memref.load %arg1[%c39] : memref<144xf32, #tpu.memory_space<smem>>
    %78 = vector.broadcast %77 : f32 to vector<16x16xf32>
    %79 = arith.mulf %78, %70 : vector<16x16xf32>
    %80 = arith.addf %59, %79 : vector<16x16xf32>
    %c75 = arith.constant 75 : index
    %81 = memref.load %arg1[%c75] : memref<144xf32, #tpu.memory_space<smem>>
    %82 = vector.broadcast %81 : f32 to vector<16x16xf32>
    %83 = arith.mulf %82, %70 : vector<16x16xf32>
    %84 = arith.addf %63, %83 : vector<16x16xf32>
    %c111 = arith.constant 111 : index
    %85 = memref.load %arg1[%c111] : memref<144xf32, #tpu.memory_space<smem>>
    %86 = vector.broadcast %85 : f32 to vector<16x16xf32>
    %87 = arith.mulf %86, %70 : vector<16x16xf32>
    %88 = arith.addf %67, %87 : vector<16x16xf32>
    %c4 = arith.constant 4 : index
    %89 = memref.load %arg1[%c4] : memref<144xf32, #tpu.memory_space<smem>>
    %90 = vector.broadcast %89 : f32 to vector<16x16xf32>
    %91 = arith.mulf %90, %71 : vector<16x16xf32>
    %92 = arith.addf %76, %91 : vector<16x16xf32>
    %c40 = arith.constant 40 : index
    %93 = memref.load %arg1[%c40] : memref<144xf32, #tpu.memory_space<smem>>
    %94 = vector.broadcast %93 : f32 to vector<16x16xf32>
    %95 = arith.mulf %94, %71 : vector<16x16xf32>
    %96 = arith.addf %80, %95 : vector<16x16xf32>
    %c76 = arith.constant 76 : index
    %97 = memref.load %arg1[%c76] : memref<144xf32, #tpu.memory_space<smem>>
    %98 = vector.broadcast %97 : f32 to vector<16x16xf32>
    %99 = arith.mulf %98, %71 : vector<16x16xf32>
    %100 = arith.addf %84, %99 : vector<16x16xf32>
    %c112 = arith.constant 112 : index
    %101 = memref.load %arg1[%c112] : memref<144xf32, #tpu.memory_space<smem>>
    %102 = vector.broadcast %101 : f32 to vector<16x16xf32>
    %103 = arith.mulf %102, %71 : vector<16x16xf32>
    %104 = arith.addf %88, %103 : vector<16x16xf32>
    %c5 = arith.constant 5 : index
    %105 = memref.load %arg1[%c5] : memref<144xf32, #tpu.memory_space<smem>>
    %106 = vector.broadcast %105 : f32 to vector<16x16xf32>
    %107 = arith.mulf %106, %72 : vector<16x16xf32>
    %108 = arith.addf %92, %107 : vector<16x16xf32>
    %c41 = arith.constant 41 : index
    %109 = memref.load %arg1[%c41] : memref<144xf32, #tpu.memory_space<smem>>
    %110 = vector.broadcast %109 : f32 to vector<16x16xf32>
    %111 = arith.mulf %110, %72 : vector<16x16xf32>
    %112 = arith.addf %96, %111 : vector<16x16xf32>
    %c77 = arith.constant 77 : index
    %113 = memref.load %arg1[%c77] : memref<144xf32, #tpu.memory_space<smem>>
    %114 = vector.broadcast %113 : f32 to vector<16x16xf32>
    %115 = arith.mulf %114, %72 : vector<16x16xf32>
    %116 = arith.addf %100, %115 : vector<16x16xf32>
    %c113 = arith.constant 113 : index
    %117 = memref.load %arg1[%c113] : memref<144xf32, #tpu.memory_space<smem>>
    %118 = vector.broadcast %117 : f32 to vector<16x16xf32>
    %119 = arith.mulf %118, %72 : vector<16x16xf32>
    %120 = arith.addf %104, %119 : vector<16x16xf32>
    %c0_24 = arith.constant 0 : index
    %c2_25 = arith.constant 2 : index
    %c0_26 = arith.constant 0 : index
    %121 = vector.load %arg8[%c0_24, %c2_25, %c0_26] : memref<4x18x18xf32, #tpu.memory_space<vmem>>, vector<1x16x18xf32>
    %122 = vector.shape_cast %121 : vector<1x16x18xf32> to vector<16x18xf32>
    %123 = vector.extract_strided_slice %122 {offsets = [0, 0], sizes = [16, 16], strides = [1, 1]} : vector<16x18xf32> to vector<16x16xf32>
    %124 = vector.extract_strided_slice %122 {offsets = [0, 1], sizes = [16, 16], strides = [1, 1]} : vector<16x18xf32> to vector<16x16xf32>
    %125 = vector.extract_strided_slice %122 {offsets = [0, 2], sizes = [16, 16], strides = [1, 1]} : vector<16x18xf32> to vector<16x16xf32>
    %c6 = arith.constant 6 : index
    %126 = memref.load %arg1[%c6] : memref<144xf32, #tpu.memory_space<smem>>
    %127 = vector.broadcast %126 : f32 to vector<16x16xf32>
    %128 = arith.mulf %127, %123 : vector<16x16xf32>
    %129 = arith.addf %108, %128 : vector<16x16xf32>
    %c42 = arith.constant 42 : index
    %130 = memref.load %arg1[%c42] : memref<144xf32, #tpu.memory_space<smem>>
    %131 = vector.broadcast %130 : f32 to vector<16x16xf32>
    %132 = arith.mulf %131, %123 : vector<16x16xf32>
    %133 = arith.addf %112, %132 : vector<16x16xf32>
    %c78 = arith.constant 78 : index
    %134 = memref.load %arg1[%c78] : memref<144xf32, #tpu.memory_space<smem>>
    %135 = vector.broadcast %134 : f32 to vector<16x16xf32>
    %136 = arith.mulf %135, %123 : vector<16x16xf32>
    %137 = arith.addf %116, %136 : vector<16x16xf32>
    %c114 = arith.constant 114 : index
    %138 = memref.load %arg1[%c114] : memref<144xf32, #tpu.memory_space<smem>>
    %139 = vector.broadcast %138 : f32 to vector<16x16xf32>
    %140 = arith.mulf %139, %123 : vector<16x16xf32>
    %141 = arith.addf %120, %140 : vector<16x16xf32>
    %c7 = arith.constant 7 : index
    %142 = memref.load %arg1[%c7] : memref<144xf32, #tpu.memory_space<smem>>
    %143 = vector.broadcast %142 : f32 to vector<16x16xf32>
    %144 = arith.mulf %143, %124 : vector<16x16xf32>
    %145 = arith.addf %129, %144 : vector<16x16xf32>
    %c43 = arith.constant 43 : index
    %146 = memref.load %arg1[%c43] : memref<144xf32, #tpu.memory_space<smem>>
    %147 = vector.broadcast %146 : f32 to vector<16x16xf32>
    %148 = arith.mulf %147, %124 : vector<16x16xf32>
    %149 = arith.addf %133, %148 : vector<16x16xf32>
    %c79 = arith.constant 79 : index
    %150 = memref.load %arg1[%c79] : memref<144xf32, #tpu.memory_space<smem>>
    %151 = vector.broadcast %150 : f32 to vector<16x16xf32>
    %152 = arith.mulf %151, %124 : vector<16x16xf32>
    %153 = arith.addf %137, %152 : vector<16x16xf32>
    %c115 = arith.constant 115 : index
    %154 = memref.load %arg1[%c115] : memref<144xf32, #tpu.memory_space<smem>>
    %155 = vector.broadcast %154 : f32 to vector<16x16xf32>
    %156 = arith.mulf %155, %124 : vector<16x16xf32>
    %157 = arith.addf %141, %156 : vector<16x16xf32>
    %c8 = arith.constant 8 : index
    %158 = memref.load %arg1[%c8] : memref<144xf32, #tpu.memory_space<smem>>
    %159 = vector.broadcast %158 : f32 to vector<16x16xf32>
    %160 = arith.mulf %159, %125 : vector<16x16xf32>
    %161 = arith.addf %145, %160 : vector<16x16xf32>
    %c44 = arith.constant 44 : index
    %162 = memref.load %arg1[%c44] : memref<144xf32, #tpu.memory_space<smem>>
    %163 = vector.broadcast %162 : f32 to vector<16x16xf32>
    %164 = arith.mulf %163, %125 : vector<16x16xf32>
    %165 = arith.addf %149, %164 : vector<16x16xf32>
    %c80 = arith.constant 80 : index
    %166 = memref.load %arg1[%c80] : memref<144xf32, #tpu.memory_space<smem>>
    %167 = vector.broadcast %166 : f32 to vector<16x16xf32>
    %168 = arith.mulf %167, %125 : vector<16x16xf32>
    %169 = arith.addf %153, %168 : vector<16x16xf32>
    %c116 = arith.constant 116 : index
    %170 = memref.load %arg1[%c116] : memref<144xf32, #tpu.memory_space<smem>>
    %171 = vector.broadcast %170 : f32 to vector<16x16xf32>
    %172 = arith.mulf %171, %125 : vector<16x16xf32>
    %173 = arith.addf %157, %172 : vector<16x16xf32>
    %c1_27 = arith.constant 1 : index
    %c0_28 = arith.constant 0 : index
    %c0_29 = arith.constant 0 : index
    %174 = vector.load %arg8[%c1_27, %c0_28, %c0_29] : memref<4x18x18xf32, #tpu.memory_space<vmem>>, vector<1x16x18xf32>
    %175 = vector.shape_cast %174 : vector<1x16x18xf32> to vector<16x18xf32>
    %176 = vector.extract_strided_slice %175 {offsets = [0, 0], sizes = [16, 16], strides = [1, 1]} : vector<16x18xf32> to vector<16x16xf32>
    %177 = vector.extract_strided_slice %175 {offsets = [0, 1], sizes = [16, 16], strides = [1, 1]} : vector<16x18xf32> to vector<16x16xf32>
    %178 = vector.extract_strided_slice %175 {offsets = [0, 2], sizes = [16, 16], strides = [1, 1]} : vector<16x18xf32> to vector<16x16xf32>
    %c9 = arith.constant 9 : index
    %179 = memref.load %arg1[%c9] : memref<144xf32, #tpu.memory_space<smem>>
    %180 = vector.broadcast %179 : f32 to vector<16x16xf32>
    %181 = arith.mulf %180, %176 : vector<16x16xf32>
    %182 = arith.addf %161, %181 : vector<16x16xf32>
    %c45 = arith.constant 45 : index
    %183 = memref.load %arg1[%c45] : memref<144xf32, #tpu.memory_space<smem>>
    %184 = vector.broadcast %183 : f32 to vector<16x16xf32>
    %185 = arith.mulf %184, %176 : vector<16x16xf32>
    %186 = arith.addf %165, %185 : vector<16x16xf32>
    %c81 = arith.constant 81 : index
    %187 = memref.load %arg1[%c81] : memref<144xf32, #tpu.memory_space<smem>>
    %188 = vector.broadcast %187 : f32 to vector<16x16xf32>
    %189 = arith.mulf %188, %176 : vector<16x16xf32>
    %190 = arith.addf %169, %189 : vector<16x16xf32>
    %c117 = arith.constant 117 : index
    %191 = memref.load %arg1[%c117] : memref<144xf32, #tpu.memory_space<smem>>
    %192 = vector.broadcast %191 : f32 to vector<16x16xf32>
    %193 = arith.mulf %192, %176 : vector<16x16xf32>
    %194 = arith.addf %173, %193 : vector<16x16xf32>
    %c10 = arith.constant 10 : index
    %195 = memref.load %arg1[%c10] : memref<144xf32, #tpu.memory_space<smem>>
    %196 = vector.broadcast %195 : f32 to vector<16x16xf32>
    %197 = arith.mulf %196, %177 : vector<16x16xf32>
    %198 = arith.addf %182, %197 : vector<16x16xf32>
    %c46 = arith.constant 46 : index
    %199 = memref.load %arg1[%c46] : memref<144xf32, #tpu.memory_space<smem>>
    %200 = vector.broadcast %199 : f32 to vector<16x16xf32>
    %201 = arith.mulf %200, %177 : vector<16x16xf32>
    %202 = arith.addf %186, %201 : vector<16x16xf32>
    %c82 = arith.constant 82 : index
    %203 = memref.load %arg1[%c82] : memref<144xf32, #tpu.memory_space<smem>>
    %204 = vector.broadcast %203 : f32 to vector<16x16xf32>
    %205 = arith.mulf %204, %177 : vector<16x16xf32>
    %206 = arith.addf %190, %205 : vector<16x16xf32>
    %c118 = arith.constant 118 : index
    %207 = memref.load %arg1[%c118] : memref<144xf32, #tpu.memory_space<smem>>
    %208 = vector.broadcast %207 : f32 to vector<16x16xf32>
    %209 = arith.mulf %208, %177 : vector<16x16xf32>
    %210 = arith.addf %194, %209 : vector<16x16xf32>
    %c11 = arith.constant 11 : index
    %211 = memref.load %arg1[%c11] : memref<144xf32, #tpu.memory_space<smem>>
    %212 = vector.broadcast %211 : f32 to vector<16x16xf32>
    %213 = arith.mulf %212, %178 : vector<16x16xf32>
    %214 = arith.addf %198, %213 : vector<16x16xf32>
    %c47 = arith.constant 47 : index
    %215 = memref.load %arg1[%c47] : memref<144xf32, #tpu.memory_space<smem>>
    %216 = vector.broadcast %215 : f32 to vector<16x16xf32>
    %217 = arith.mulf %216, %178 : vector<16x16xf32>
    %218 = arith.addf %202, %217 : vector<16x16xf32>
    %c83 = arith.constant 83 : index
    %219 = memref.load %arg1[%c83] : memref<144xf32, #tpu.memory_space<smem>>
    %220 = vector.broadcast %219 : f32 to vector<16x16xf32>
    %221 = arith.mulf %220, %178 : vector<16x16xf32>
    %222 = arith.addf %206, %221 : vector<16x16xf32>
    %c119 = arith.constant 119 : index
    %223 = memref.load %arg1[%c119] : memref<144xf32, #tpu.memory_space<smem>>
    %224 = vector.broadcast %223 : f32 to vector<16x16xf32>
    %225 = arith.mulf %224, %178 : vector<16x16xf32>
    %226 = arith.addf %210, %225 : vector<16x16xf32>
    %c1_30 = arith.constant 1 : index
    %c1_31 = arith.constant 1 : index
    %c0_32 = arith.constant 0 : index
    %227 = vector.load %arg8[%c1_30, %c1_31, %c0_32] : memref<4x18x18xf32, #tpu.memory_space<vmem>>, vector<1x16x18xf32>
    %228 = vector.shape_cast %227 : vector<1x16x18xf32> to vector<16x18xf32>
    %229 = vector.extract_strided_slice %228 {offsets = [0, 0], sizes = [16, 16], strides = [1, 1]} : vector<16x18xf32> to vector<16x16xf32>
    %230 = vector.extract_strided_slice %228 {offsets = [0, 1], sizes = [16, 16], strides = [1, 1]} : vector<16x18xf32> to vector<16x16xf32>
    %231 = vector.extract_strided_slice %228 {offsets = [0, 2], sizes = [16, 16], strides = [1, 1]} : vector<16x18xf32> to vector<16x16xf32>
    %c12 = arith.constant 12 : index
    %232 = memref.load %arg1[%c12] : memref<144xf32, #tpu.memory_space<smem>>
    %233 = vector.broadcast %232 : f32 to vector<16x16xf32>
    %234 = arith.mulf %233, %229 : vector<16x16xf32>
    %235 = arith.addf %214, %234 : vector<16x16xf32>
    %c48 = arith.constant 48 : index
    %236 = memref.load %arg1[%c48] : memref<144xf32, #tpu.memory_space<smem>>
    %237 = vector.broadcast %236 : f32 to vector<16x16xf32>
    %238 = arith.mulf %237, %229 : vector<16x16xf32>
    %239 = arith.addf %218, %238 : vector<16x16xf32>
    %c84 = arith.constant 84 : index
    %240 = memref.load %arg1[%c84] : memref<144xf32, #tpu.memory_space<smem>>
    %241 = vector.broadcast %240 : f32 to vector<16x16xf32>
    %242 = arith.mulf %241, %229 : vector<16x16xf32>
    %243 = arith.addf %222, %242 : vector<16x16xf32>
    %c120 = arith.constant 120 : index
    %244 = memref.load %arg1[%c120] : memref<144xf32, #tpu.memory_space<smem>>
    %245 = vector.broadcast %244 : f32 to vector<16x16xf32>
    %246 = arith.mulf %245, %229 : vector<16x16xf32>
    %247 = arith.addf %226, %246 : vector<16x16xf32>
    %c13 = arith.constant 13 : index
    %248 = memref.load %arg1[%c13] : memref<144xf32, #tpu.memory_space<smem>>
    %249 = vector.broadcast %248 : f32 to vector<16x16xf32>
    %250 = arith.mulf %249, %230 : vector<16x16xf32>
    %251 = arith.addf %235, %250 : vector<16x16xf32>
    %c49 = arith.constant 49 : index
    %252 = memref.load %arg1[%c49] : memref<144xf32, #tpu.memory_space<smem>>
    %253 = vector.broadcast %252 : f32 to vector<16x16xf32>
    %254 = arith.mulf %253, %230 : vector<16x16xf32>
    %255 = arith.addf %239, %254 : vector<16x16xf32>
    %c85 = arith.constant 85 : index
    %256 = memref.load %arg1[%c85] : memref<144xf32, #tpu.memory_space<smem>>
    %257 = vector.broadcast %256 : f32 to vector<16x16xf32>
    %258 = arith.mulf %257, %230 : vector<16x16xf32>
    %259 = arith.addf %243, %258 : vector<16x16xf32>
    %c121 = arith.constant 121 : index
    %260 = memref.load %arg1[%c121] : memref<144xf32, #tpu.memory_space<smem>>
    %261 = vector.broadcast %260 : f32 to vector<16x16xf32>
    %262 = arith.mulf %261, %230 : vector<16x16xf32>
    %263 = arith.addf %247, %262 : vector<16x16xf32>
    %c14 = arith.constant 14 : index
    %264 = memref.load %arg1[%c14] : memref<144xf32, #tpu.memory_space<smem>>
    %265 = vector.broadcast %264 : f32 to vector<16x16xf32>
    %266 = arith.mulf %265, %231 : vector<16x16xf32>
    %267 = arith.addf %251, %266 : vector<16x16xf32>
    %c50 = arith.constant 50 : index
    %268 = memref.load %arg1[%c50] : memref<144xf32, #tpu.memory_space<smem>>
    %269 = vector.broadcast %268 : f32 to vector<16x16xf32>
    %270 = arith.mulf %269, %231 : vector<16x16xf32>
    %271 = arith.addf %255, %270 : vector<16x16xf32>
    %c86 = arith.constant 86 : index
    %272 = memref.load %arg1[%c86] : memref<144xf32, #tpu.memory_space<smem>>
    %273 = vector.broadcast %272 : f32 to vector<16x16xf32>
    %274 = arith.mulf %273, %231 : vector<16x16xf32>
    %275 = arith.addf %259, %274 : vector<16x16xf32>
    %c122 = arith.constant 122 : index
    %276 = memref.load %arg1[%c122] : memref<144xf32, #tpu.memory_space<smem>>
    %277 = vector.broadcast %276 : f32 to vector<16x16xf32>
    %278 = arith.mulf %277, %231 : vector<16x16xf32>
    %279 = arith.addf %263, %278 : vector<16x16xf32>
    %c1_33 = arith.constant 1 : index
    %c2_34 = arith.constant 2 : index
    %c0_35 = arith.constant 0 : index
    %280 = vector.load %arg8[%c1_33, %c2_34, %c0_35] : memref<4x18x18xf32, #tpu.memory_space<vmem>>, vector<1x16x18xf32>
    %281 = vector.shape_cast %280 : vector<1x16x18xf32> to vector<16x18xf32>
    %282 = vector.extract_strided_slice %281 {offsets = [0, 0], sizes = [16, 16], strides = [1, 1]} : vector<16x18xf32> to vector<16x16xf32>
    %283 = vector.extract_strided_slice %281 {offsets = [0, 1], sizes = [16, 16], strides = [1, 1]} : vector<16x18xf32> to vector<16x16xf32>
    %284 = vector.extract_strided_slice %281 {offsets = [0, 2], sizes = [16, 16], strides = [1, 1]} : vector<16x18xf32> to vector<16x16xf32>
    %c15 = arith.constant 15 : index
    %285 = memref.load %arg1[%c15] : memref<144xf32, #tpu.memory_space<smem>>
    %286 = vector.broadcast %285 : f32 to vector<16x16xf32>
    %287 = arith.mulf %286, %282 : vector<16x16xf32>
    %288 = arith.addf %267, %287 : vector<16x16xf32>
    %c51 = arith.constant 51 : index
    %289 = memref.load %arg1[%c51] : memref<144xf32, #tpu.memory_space<smem>>
    %290 = vector.broadcast %289 : f32 to vector<16x16xf32>
    %291 = arith.mulf %290, %282 : vector<16x16xf32>
    %292 = arith.addf %271, %291 : vector<16x16xf32>
    %c87 = arith.constant 87 : index
    %293 = memref.load %arg1[%c87] : memref<144xf32, #tpu.memory_space<smem>>
    %294 = vector.broadcast %293 : f32 to vector<16x16xf32>
    %295 = arith.mulf %294, %282 : vector<16x16xf32>
    %296 = arith.addf %275, %295 : vector<16x16xf32>
    %c123 = arith.constant 123 : index
    %297 = memref.load %arg1[%c123] : memref<144xf32, #tpu.memory_space<smem>>
    %298 = vector.broadcast %297 : f32 to vector<16x16xf32>
    %299 = arith.mulf %298, %282 : vector<16x16xf32>
    %300 = arith.addf %279, %299 : vector<16x16xf32>
    %c16 = arith.constant 16 : index
    %301 = memref.load %arg1[%c16] : memref<144xf32, #tpu.memory_space<smem>>
    %302 = vector.broadcast %301 : f32 to vector<16x16xf32>
    %303 = arith.mulf %302, %283 : vector<16x16xf32>
    %304 = arith.addf %288, %303 : vector<16x16xf32>
    %c52 = arith.constant 52 : index
    %305 = memref.load %arg1[%c52] : memref<144xf32, #tpu.memory_space<smem>>
    %306 = vector.broadcast %305 : f32 to vector<16x16xf32>
    %307 = arith.mulf %306, %283 : vector<16x16xf32>
    %308 = arith.addf %292, %307 : vector<16x16xf32>
    %c88 = arith.constant 88 : index
    %309 = memref.load %arg1[%c88] : memref<144xf32, #tpu.memory_space<smem>>
    %310 = vector.broadcast %309 : f32 to vector<16x16xf32>
    %311 = arith.mulf %310, %283 : vector<16x16xf32>
    %312 = arith.addf %296, %311 : vector<16x16xf32>
    %c124 = arith.constant 124 : index
    %313 = memref.load %arg1[%c124] : memref<144xf32, #tpu.memory_space<smem>>
    %314 = vector.broadcast %313 : f32 to vector<16x16xf32>
    %315 = arith.mulf %314, %283 : vector<16x16xf32>
    %316 = arith.addf %300, %315 : vector<16x16xf32>
    %c17 = arith.constant 17 : index
    %317 = memref.load %arg1[%c17] : memref<144xf32, #tpu.memory_space<smem>>
    %318 = vector.broadcast %317 : f32 to vector<16x16xf32>
    %319 = arith.mulf %318, %284 : vector<16x16xf32>
    %320 = arith.addf %304, %319 : vector<16x16xf32>
    %c53 = arith.constant 53 : index
    %321 = memref.load %arg1[%c53] : memref<144xf32, #tpu.memory_space<smem>>
    %322 = vector.broadcast %321 : f32 to vector<16x16xf32>
    %323 = arith.mulf %322, %284 : vector<16x16xf32>
    %324 = arith.addf %308, %323 : vector<16x16xf32>
    %c89 = arith.constant 89 : index
    %325 = memref.load %arg1[%c89] : memref<144xf32, #tpu.memory_space<smem>>
    %326 = vector.broadcast %325 : f32 to vector<16x16xf32>
    %327 = arith.mulf %326, %284 : vector<16x16xf32>
    %328 = arith.addf %312, %327 : vector<16x16xf32>
    %c125 = arith.constant 125 : index
    %329 = memref.load %arg1[%c125] : memref<144xf32, #tpu.memory_space<smem>>
    %330 = vector.broadcast %329 : f32 to vector<16x16xf32>
    %331 = arith.mulf %330, %284 : vector<16x16xf32>
    %332 = arith.addf %316, %331 : vector<16x16xf32>
    %c2_36 = arith.constant 2 : index
    %c0_37 = arith.constant 0 : index
    %c0_38 = arith.constant 0 : index
    %333 = vector.load %arg8[%c2_36, %c0_37, %c0_38] : memref<4x18x18xf32, #tpu.memory_space<vmem>>, vector<1x16x18xf32>
    %334 = vector.shape_cast %333 : vector<1x16x18xf32> to vector<16x18xf32>
    %335 = vector.extract_strided_slice %334 {offsets = [0, 0], sizes = [16, 16], strides = [1, 1]} : vector<16x18xf32> to vector<16x16xf32>
    %336 = vector.extract_strided_slice %334 {offsets = [0, 1], sizes = [16, 16], strides = [1, 1]} : vector<16x18xf32> to vector<16x16xf32>
    %337 = vector.extract_strided_slice %334 {offsets = [0, 2], sizes = [16, 16], strides = [1, 1]} : vector<16x18xf32> to vector<16x16xf32>
    %c18 = arith.constant 18 : index
    %338 = memref.load %arg1[%c18] : memref<144xf32, #tpu.memory_space<smem>>
    %339 = vector.broadcast %338 : f32 to vector<16x16xf32>
    %340 = arith.mulf %339, %335 : vector<16x16xf32>
    %341 = arith.addf %320, %340 : vector<16x16xf32>
    %c54 = arith.constant 54 : index
    %342 = memref.load %arg1[%c54] : memref<144xf32, #tpu.memory_space<smem>>
    %343 = vector.broadcast %342 : f32 to vector<16x16xf32>
    %344 = arith.mulf %343, %335 : vector<16x16xf32>
    %345 = arith.addf %324, %344 : vector<16x16xf32>
    %c90 = arith.constant 90 : index
    %346 = memref.load %arg1[%c90] : memref<144xf32, #tpu.memory_space<smem>>
    %347 = vector.broadcast %346 : f32 to vector<16x16xf32>
    %348 = arith.mulf %347, %335 : vector<16x16xf32>
    %349 = arith.addf %328, %348 : vector<16x16xf32>
    %c126 = arith.constant 126 : index
    %350 = memref.load %arg1[%c126] : memref<144xf32, #tpu.memory_space<smem>>
    %351 = vector.broadcast %350 : f32 to vector<16x16xf32>
    %352 = arith.mulf %351, %335 : vector<16x16xf32>
    %353 = arith.addf %332, %352 : vector<16x16xf32>
    %c19 = arith.constant 19 : index
    %354 = memref.load %arg1[%c19] : memref<144xf32, #tpu.memory_space<smem>>
    %355 = vector.broadcast %354 : f32 to vector<16x16xf32>
    %356 = arith.mulf %355, %336 : vector<16x16xf32>
    %357 = arith.addf %341, %356 : vector<16x16xf32>
    %c55 = arith.constant 55 : index
    %358 = memref.load %arg1[%c55] : memref<144xf32, #tpu.memory_space<smem>>
    %359 = vector.broadcast %358 : f32 to vector<16x16xf32>
    %360 = arith.mulf %359, %336 : vector<16x16xf32>
    %361 = arith.addf %345, %360 : vector<16x16xf32>
    %c91 = arith.constant 91 : index
    %362 = memref.load %arg1[%c91] : memref<144xf32, #tpu.memory_space<smem>>
    %363 = vector.broadcast %362 : f32 to vector<16x16xf32>
    %364 = arith.mulf %363, %336 : vector<16x16xf32>
    %365 = arith.addf %349, %364 : vector<16x16xf32>
    %c127 = arith.constant 127 : index
    %366 = memref.load %arg1[%c127] : memref<144xf32, #tpu.memory_space<smem>>
    %367 = vector.broadcast %366 : f32 to vector<16x16xf32>
    %368 = arith.mulf %367, %336 : vector<16x16xf32>
    %369 = arith.addf %353, %368 : vector<16x16xf32>
    %c20 = arith.constant 20 : index
    %370 = memref.load %arg1[%c20] : memref<144xf32, #tpu.memory_space<smem>>
    %371 = vector.broadcast %370 : f32 to vector<16x16xf32>
    %372 = arith.mulf %371, %337 : vector<16x16xf32>
    %373 = arith.addf %357, %372 : vector<16x16xf32>
    %c56 = arith.constant 56 : index
    %374 = memref.load %arg1[%c56] : memref<144xf32, #tpu.memory_space<smem>>
    %375 = vector.broadcast %374 : f32 to vector<16x16xf32>
    %376 = arith.mulf %375, %337 : vector<16x16xf32>
    %377 = arith.addf %361, %376 : vector<16x16xf32>
    %c92 = arith.constant 92 : index
    %378 = memref.load %arg1[%c92] : memref<144xf32, #tpu.memory_space<smem>>
    %379 = vector.broadcast %378 : f32 to vector<16x16xf32>
    %380 = arith.mulf %379, %337 : vector<16x16xf32>
    %381 = arith.addf %365, %380 : vector<16x16xf32>
    %c128 = arith.constant 128 : index
    %382 = memref.load %arg1[%c128] : memref<144xf32, #tpu.memory_space<smem>>
    %383 = vector.broadcast %382 : f32 to vector<16x16xf32>
    %384 = arith.mulf %383, %337 : vector<16x16xf32>
    %385 = arith.addf %369, %384 : vector<16x16xf32>
    %c2_39 = arith.constant 2 : index
    %c1_40 = arith.constant 1 : index
    %c0_41 = arith.constant 0 : index
    %386 = vector.load %arg8[%c2_39, %c1_40, %c0_41] : memref<4x18x18xf32, #tpu.memory_space<vmem>>, vector<1x16x18xf32>
    %387 = vector.shape_cast %386 : vector<1x16x18xf32> to vector<16x18xf32>
    %388 = vector.extract_strided_slice %387 {offsets = [0, 0], sizes = [16, 16], strides = [1, 1]} : vector<16x18xf32> to vector<16x16xf32>
    %389 = vector.extract_strided_slice %387 {offsets = [0, 1], sizes = [16, 16], strides = [1, 1]} : vector<16x18xf32> to vector<16x16xf32>
    %390 = vector.extract_strided_slice %387 {offsets = [0, 2], sizes = [16, 16], strides = [1, 1]} : vector<16x18xf32> to vector<16x16xf32>
    %c21 = arith.constant 21 : index
    %391 = memref.load %arg1[%c21] : memref<144xf32, #tpu.memory_space<smem>>
    %392 = vector.broadcast %391 : f32 to vector<16x16xf32>
    %393 = arith.mulf %392, %388 : vector<16x16xf32>
    %394 = arith.addf %373, %393 : vector<16x16xf32>
    %c57 = arith.constant 57 : index
    %395 = memref.load %arg1[%c57] : memref<144xf32, #tpu.memory_space<smem>>
    %396 = vector.broadcast %395 : f32 to vector<16x16xf32>
    %397 = arith.mulf %396, %388 : vector<16x16xf32>
    %398 = arith.addf %377, %397 : vector<16x16xf32>
    %c93 = arith.constant 93 : index
    %399 = memref.load %arg1[%c93] : memref<144xf32, #tpu.memory_space<smem>>
    %400 = vector.broadcast %399 : f32 to vector<16x16xf32>
    %401 = arith.mulf %400, %388 : vector<16x16xf32>
    %402 = arith.addf %381, %401 : vector<16x16xf32>
    %c129 = arith.constant 129 : index
    %403 = memref.load %arg1[%c129] : memref<144xf32, #tpu.memory_space<smem>>
    %404 = vector.broadcast %403 : f32 to vector<16x16xf32>
    %405 = arith.mulf %404, %388 : vector<16x16xf32>
    %406 = arith.addf %385, %405 : vector<16x16xf32>
    %c22 = arith.constant 22 : index
    %407 = memref.load %arg1[%c22] : memref<144xf32, #tpu.memory_space<smem>>
    %408 = vector.broadcast %407 : f32 to vector<16x16xf32>
    %409 = arith.mulf %408, %389 : vector<16x16xf32>
    %410 = arith.addf %394, %409 : vector<16x16xf32>
    %c58 = arith.constant 58 : index
    %411 = memref.load %arg1[%c58] : memref<144xf32, #tpu.memory_space<smem>>
    %412 = vector.broadcast %411 : f32 to vector<16x16xf32>
    %413 = arith.mulf %412, %389 : vector<16x16xf32>
    %414 = arith.addf %398, %413 : vector<16x16xf32>
    %c94 = arith.constant 94 : index
    %415 = memref.load %arg1[%c94] : memref<144xf32, #tpu.memory_space<smem>>
    %416 = vector.broadcast %415 : f32 to vector<16x16xf32>
    %417 = arith.mulf %416, %389 : vector<16x16xf32>
    %418 = arith.addf %402, %417 : vector<16x16xf32>
    %c130 = arith.constant 130 : index
    %419 = memref.load %arg1[%c130] : memref<144xf32, #tpu.memory_space<smem>>
    %420 = vector.broadcast %419 : f32 to vector<16x16xf32>
    %421 = arith.mulf %420, %389 : vector<16x16xf32>
    %422 = arith.addf %406, %421 : vector<16x16xf32>
    %c23 = arith.constant 23 : index
    %423 = memref.load %arg1[%c23] : memref<144xf32, #tpu.memory_space<smem>>
    %424 = vector.broadcast %423 : f32 to vector<16x16xf32>
    %425 = arith.mulf %424, %390 : vector<16x16xf32>
    %426 = arith.addf %410, %425 : vector<16x16xf32>
    %c59 = arith.constant 59 : index
    %427 = memref.load %arg1[%c59] : memref<144xf32, #tpu.memory_space<smem>>
    %428 = vector.broadcast %427 : f32 to vector<16x16xf32>
    %429 = arith.mulf %428, %390 : vector<16x16xf32>
    %430 = arith.addf %414, %429 : vector<16x16xf32>
    %c95 = arith.constant 95 : index
    %431 = memref.load %arg1[%c95] : memref<144xf32, #tpu.memory_space<smem>>
    %432 = vector.broadcast %431 : f32 to vector<16x16xf32>
    %433 = arith.mulf %432, %390 : vector<16x16xf32>
    %434 = arith.addf %418, %433 : vector<16x16xf32>
    %c131 = arith.constant 131 : index
    %435 = memref.load %arg1[%c131] : memref<144xf32, #tpu.memory_space<smem>>
    %436 = vector.broadcast %435 : f32 to vector<16x16xf32>
    %437 = arith.mulf %436, %390 : vector<16x16xf32>
    %438 = arith.addf %422, %437 : vector<16x16xf32>
    %c2_42 = arith.constant 2 : index
    %c2_43 = arith.constant 2 : index
    %c0_44 = arith.constant 0 : index
    %439 = vector.load %arg8[%c2_42, %c2_43, %c0_44] : memref<4x18x18xf32, #tpu.memory_space<vmem>>, vector<1x16x18xf32>
    %440 = vector.shape_cast %439 : vector<1x16x18xf32> to vector<16x18xf32>
    %441 = vector.extract_strided_slice %440 {offsets = [0, 0], sizes = [16, 16], strides = [1, 1]} : vector<16x18xf32> to vector<16x16xf32>
    %442 = vector.extract_strided_slice %440 {offsets = [0, 1], sizes = [16, 16], strides = [1, 1]} : vector<16x18xf32> to vector<16x16xf32>
    %443 = vector.extract_strided_slice %440 {offsets = [0, 2], sizes = [16, 16], strides = [1, 1]} : vector<16x18xf32> to vector<16x16xf32>
    %c24 = arith.constant 24 : index
    %444 = memref.load %arg1[%c24] : memref<144xf32, #tpu.memory_space<smem>>
    %445 = vector.broadcast %444 : f32 to vector<16x16xf32>
    %446 = arith.mulf %445, %441 : vector<16x16xf32>
    %447 = arith.addf %426, %446 : vector<16x16xf32>
    %c60 = arith.constant 60 : index
    %448 = memref.load %arg1[%c60] : memref<144xf32, #tpu.memory_space<smem>>
    %449 = vector.broadcast %448 : f32 to vector<16x16xf32>
    %450 = arith.mulf %449, %441 : vector<16x16xf32>
    %451 = arith.addf %430, %450 : vector<16x16xf32>
    %c96 = arith.constant 96 : index
    %452 = memref.load %arg1[%c96] : memref<144xf32, #tpu.memory_space<smem>>
    %453 = vector.broadcast %452 : f32 to vector<16x16xf32>
    %454 = arith.mulf %453, %441 : vector<16x16xf32>
    %455 = arith.addf %434, %454 : vector<16x16xf32>
    %c132 = arith.constant 132 : index
    %456 = memref.load %arg1[%c132] : memref<144xf32, #tpu.memory_space<smem>>
    %457 = vector.broadcast %456 : f32 to vector<16x16xf32>
    %458 = arith.mulf %457, %441 : vector<16x16xf32>
    %459 = arith.addf %438, %458 : vector<16x16xf32>
    %c25 = arith.constant 25 : index
    %460 = memref.load %arg1[%c25] : memref<144xf32, #tpu.memory_space<smem>>
    %461 = vector.broadcast %460 : f32 to vector<16x16xf32>
    %462 = arith.mulf %461, %442 : vector<16x16xf32>
    %463 = arith.addf %447, %462 : vector<16x16xf32>
    %c61 = arith.constant 61 : index
    %464 = memref.load %arg1[%c61] : memref<144xf32, #tpu.memory_space<smem>>
    %465 = vector.broadcast %464 : f32 to vector<16x16xf32>
    %466 = arith.mulf %465, %442 : vector<16x16xf32>
    %467 = arith.addf %451, %466 : vector<16x16xf32>
    %c97 = arith.constant 97 : index
    %468 = memref.load %arg1[%c97] : memref<144xf32, #tpu.memory_space<smem>>
    %469 = vector.broadcast %468 : f32 to vector<16x16xf32>
    %470 = arith.mulf %469, %442 : vector<16x16xf32>
    %471 = arith.addf %455, %470 : vector<16x16xf32>
    %c133 = arith.constant 133 : index
    %472 = memref.load %arg1[%c133] : memref<144xf32, #tpu.memory_space<smem>>
    %473 = vector.broadcast %472 : f32 to vector<16x16xf32>
    %474 = arith.mulf %473, %442 : vector<16x16xf32>
    %475 = arith.addf %459, %474 : vector<16x16xf32>
    %c26 = arith.constant 26 : index
    %476 = memref.load %arg1[%c26] : memref<144xf32, #tpu.memory_space<smem>>
    %477 = vector.broadcast %476 : f32 to vector<16x16xf32>
    %478 = arith.mulf %477, %443 : vector<16x16xf32>
    %479 = arith.addf %463, %478 : vector<16x16xf32>
    %c62 = arith.constant 62 : index
    %480 = memref.load %arg1[%c62] : memref<144xf32, #tpu.memory_space<smem>>
    %481 = vector.broadcast %480 : f32 to vector<16x16xf32>
    %482 = arith.mulf %481, %443 : vector<16x16xf32>
    %483 = arith.addf %467, %482 : vector<16x16xf32>
    %c98 = arith.constant 98 : index
    %484 = memref.load %arg1[%c98] : memref<144xf32, #tpu.memory_space<smem>>
    %485 = vector.broadcast %484 : f32 to vector<16x16xf32>
    %486 = arith.mulf %485, %443 : vector<16x16xf32>
    %487 = arith.addf %471, %486 : vector<16x16xf32>
    %c134 = arith.constant 134 : index
    %488 = memref.load %arg1[%c134] : memref<144xf32, #tpu.memory_space<smem>>
    %489 = vector.broadcast %488 : f32 to vector<16x16xf32>
    %490 = arith.mulf %489, %443 : vector<16x16xf32>
    %491 = arith.addf %475, %490 : vector<16x16xf32>
    %c3_45 = arith.constant 3 : index
    %c0_46 = arith.constant 0 : index
    %c0_47 = arith.constant 0 : index
    %492 = vector.load %arg8[%c3_45, %c0_46, %c0_47] : memref<4x18x18xf32, #tpu.memory_space<vmem>>, vector<1x16x18xf32>
    %493 = vector.shape_cast %492 : vector<1x16x18xf32> to vector<16x18xf32>
    %494 = vector.extract_strided_slice %493 {offsets = [0, 0], sizes = [16, 16], strides = [1, 1]} : vector<16x18xf32> to vector<16x16xf32>
    %495 = vector.extract_strided_slice %493 {offsets = [0, 1], sizes = [16, 16], strides = [1, 1]} : vector<16x18xf32> to vector<16x16xf32>
    %496 = vector.extract_strided_slice %493 {offsets = [0, 2], sizes = [16, 16], strides = [1, 1]} : vector<16x18xf32> to vector<16x16xf32>
    %c27 = arith.constant 27 : index
    %497 = memref.load %arg1[%c27] : memref<144xf32, #tpu.memory_space<smem>>
    %498 = vector.broadcast %497 : f32 to vector<16x16xf32>
    %499 = arith.mulf %498, %494 : vector<16x16xf32>
    %500 = arith.addf %479, %499 : vector<16x16xf32>
    %c63 = arith.constant 63 : index
    %501 = memref.load %arg1[%c63] : memref<144xf32, #tpu.memory_space<smem>>
    %502 = vector.broadcast %501 : f32 to vector<16x16xf32>
    %503 = arith.mulf %502, %494 : vector<16x16xf32>
    %504 = arith.addf %483, %503 : vector<16x16xf32>
    %c99 = arith.constant 99 : index
    %505 = memref.load %arg1[%c99] : memref<144xf32, #tpu.memory_space<smem>>
    %506 = vector.broadcast %505 : f32 to vector<16x16xf32>
    %507 = arith.mulf %506, %494 : vector<16x16xf32>
    %508 = arith.addf %487, %507 : vector<16x16xf32>
    %c135 = arith.constant 135 : index
    %509 = memref.load %arg1[%c135] : memref<144xf32, #tpu.memory_space<smem>>
    %510 = vector.broadcast %509 : f32 to vector<16x16xf32>
    %511 = arith.mulf %510, %494 : vector<16x16xf32>
    %512 = arith.addf %491, %511 : vector<16x16xf32>
    %c28 = arith.constant 28 : index
    %513 = memref.load %arg1[%c28] : memref<144xf32, #tpu.memory_space<smem>>
    %514 = vector.broadcast %513 : f32 to vector<16x16xf32>
    %515 = arith.mulf %514, %495 : vector<16x16xf32>
    %516 = arith.addf %500, %515 : vector<16x16xf32>
    %c64 = arith.constant 64 : index
    %517 = memref.load %arg1[%c64] : memref<144xf32, #tpu.memory_space<smem>>
    %518 = vector.broadcast %517 : f32 to vector<16x16xf32>
    %519 = arith.mulf %518, %495 : vector<16x16xf32>
    %520 = arith.addf %504, %519 : vector<16x16xf32>
    %c100 = arith.constant 100 : index
    %521 = memref.load %arg1[%c100] : memref<144xf32, #tpu.memory_space<smem>>
    %522 = vector.broadcast %521 : f32 to vector<16x16xf32>
    %523 = arith.mulf %522, %495 : vector<16x16xf32>
    %524 = arith.addf %508, %523 : vector<16x16xf32>
    %c136 = arith.constant 136 : index
    %525 = memref.load %arg1[%c136] : memref<144xf32, #tpu.memory_space<smem>>
    %526 = vector.broadcast %525 : f32 to vector<16x16xf32>
    %527 = arith.mulf %526, %495 : vector<16x16xf32>
    %528 = arith.addf %512, %527 : vector<16x16xf32>
    %c29 = arith.constant 29 : index
    %529 = memref.load %arg1[%c29] : memref<144xf32, #tpu.memory_space<smem>>
    %530 = vector.broadcast %529 : f32 to vector<16x16xf32>
    %531 = arith.mulf %530, %496 : vector<16x16xf32>
    %532 = arith.addf %516, %531 : vector<16x16xf32>
    %c65 = arith.constant 65 : index
    %533 = memref.load %arg1[%c65] : memref<144xf32, #tpu.memory_space<smem>>
    %534 = vector.broadcast %533 : f32 to vector<16x16xf32>
    %535 = arith.mulf %534, %496 : vector<16x16xf32>
    %536 = arith.addf %520, %535 : vector<16x16xf32>
    %c101 = arith.constant 101 : index
    %537 = memref.load %arg1[%c101] : memref<144xf32, #tpu.memory_space<smem>>
    %538 = vector.broadcast %537 : f32 to vector<16x16xf32>
    %539 = arith.mulf %538, %496 : vector<16x16xf32>
    %540 = arith.addf %524, %539 : vector<16x16xf32>
    %c137 = arith.constant 137 : index
    %541 = memref.load %arg1[%c137] : memref<144xf32, #tpu.memory_space<smem>>
    %542 = vector.broadcast %541 : f32 to vector<16x16xf32>
    %543 = arith.mulf %542, %496 : vector<16x16xf32>
    %544 = arith.addf %528, %543 : vector<16x16xf32>
    %c3_48 = arith.constant 3 : index
    %c1_49 = arith.constant 1 : index
    %c0_50 = arith.constant 0 : index
    %545 = vector.load %arg8[%c3_48, %c1_49, %c0_50] : memref<4x18x18xf32, #tpu.memory_space<vmem>>, vector<1x16x18xf32>
    %546 = vector.shape_cast %545 : vector<1x16x18xf32> to vector<16x18xf32>
    %547 = vector.extract_strided_slice %546 {offsets = [0, 0], sizes = [16, 16], strides = [1, 1]} : vector<16x18xf32> to vector<16x16xf32>
    %548 = vector.extract_strided_slice %546 {offsets = [0, 1], sizes = [16, 16], strides = [1, 1]} : vector<16x18xf32> to vector<16x16xf32>
    %549 = vector.extract_strided_slice %546 {offsets = [0, 2], sizes = [16, 16], strides = [1, 1]} : vector<16x18xf32> to vector<16x16xf32>
    %c30 = arith.constant 30 : index
    %550 = memref.load %arg1[%c30] : memref<144xf32, #tpu.memory_space<smem>>
    %551 = vector.broadcast %550 : f32 to vector<16x16xf32>
    %552 = arith.mulf %551, %547 : vector<16x16xf32>
    %553 = arith.addf %532, %552 : vector<16x16xf32>
    %c66 = arith.constant 66 : index
    %554 = memref.load %arg1[%c66] : memref<144xf32, #tpu.memory_space<smem>>
    %555 = vector.broadcast %554 : f32 to vector<16x16xf32>
    %556 = arith.mulf %555, %547 : vector<16x16xf32>
    %557 = arith.addf %536, %556 : vector<16x16xf32>
    %c102 = arith.constant 102 : index
    %558 = memref.load %arg1[%c102] : memref<144xf32, #tpu.memory_space<smem>>
    %559 = vector.broadcast %558 : f32 to vector<16x16xf32>
    %560 = arith.mulf %559, %547 : vector<16x16xf32>
    %561 = arith.addf %540, %560 : vector<16x16xf32>
    %c138 = arith.constant 138 : index
    %562 = memref.load %arg1[%c138] : memref<144xf32, #tpu.memory_space<smem>>
    %563 = vector.broadcast %562 : f32 to vector<16x16xf32>
    %564 = arith.mulf %563, %547 : vector<16x16xf32>
    %565 = arith.addf %544, %564 : vector<16x16xf32>
    %c31 = arith.constant 31 : index
    %566 = memref.load %arg1[%c31] : memref<144xf32, #tpu.memory_space<smem>>
    %567 = vector.broadcast %566 : f32 to vector<16x16xf32>
    %568 = arith.mulf %567, %548 : vector<16x16xf32>
    %569 = arith.addf %553, %568 : vector<16x16xf32>
    %c67 = arith.constant 67 : index
    %570 = memref.load %arg1[%c67] : memref<144xf32, #tpu.memory_space<smem>>
    %571 = vector.broadcast %570 : f32 to vector<16x16xf32>
    %572 = arith.mulf %571, %548 : vector<16x16xf32>
    %573 = arith.addf %557, %572 : vector<16x16xf32>
    %c103 = arith.constant 103 : index
    %574 = memref.load %arg1[%c103] : memref<144xf32, #tpu.memory_space<smem>>
    %575 = vector.broadcast %574 : f32 to vector<16x16xf32>
    %576 = arith.mulf %575, %548 : vector<16x16xf32>
    %577 = arith.addf %561, %576 : vector<16x16xf32>
    %c139 = arith.constant 139 : index
    %578 = memref.load %arg1[%c139] : memref<144xf32, #tpu.memory_space<smem>>
    %579 = vector.broadcast %578 : f32 to vector<16x16xf32>
    %580 = arith.mulf %579, %548 : vector<16x16xf32>
    %581 = arith.addf %565, %580 : vector<16x16xf32>
    %c32 = arith.constant 32 : index
    %582 = memref.load %arg1[%c32] : memref<144xf32, #tpu.memory_space<smem>>
    %583 = vector.broadcast %582 : f32 to vector<16x16xf32>
    %584 = arith.mulf %583, %549 : vector<16x16xf32>
    %585 = arith.addf %569, %584 : vector<16x16xf32>
    %c68 = arith.constant 68 : index
    %586 = memref.load %arg1[%c68] : memref<144xf32, #tpu.memory_space<smem>>
    %587 = vector.broadcast %586 : f32 to vector<16x16xf32>
    %588 = arith.mulf %587, %549 : vector<16x16xf32>
    %589 = arith.addf %573, %588 : vector<16x16xf32>
    %c104 = arith.constant 104 : index
    %590 = memref.load %arg1[%c104] : memref<144xf32, #tpu.memory_space<smem>>
    %591 = vector.broadcast %590 : f32 to vector<16x16xf32>
    %592 = arith.mulf %591, %549 : vector<16x16xf32>
    %593 = arith.addf %577, %592 : vector<16x16xf32>
    %c140 = arith.constant 140 : index
    %594 = memref.load %arg1[%c140] : memref<144xf32, #tpu.memory_space<smem>>
    %595 = vector.broadcast %594 : f32 to vector<16x16xf32>
    %596 = arith.mulf %595, %549 : vector<16x16xf32>
    %597 = arith.addf %581, %596 : vector<16x16xf32>
    %c3_51 = arith.constant 3 : index
    %c2_52 = arith.constant 2 : index
    %c0_53 = arith.constant 0 : index
    %598 = vector.load %arg8[%c3_51, %c2_52, %c0_53] : memref<4x18x18xf32, #tpu.memory_space<vmem>>, vector<1x16x18xf32>
    %599 = vector.shape_cast %598 : vector<1x16x18xf32> to vector<16x18xf32>
    %600 = vector.extract_strided_slice %599 {offsets = [0, 0], sizes = [16, 16], strides = [1, 1]} : vector<16x18xf32> to vector<16x16xf32>
    %601 = vector.extract_strided_slice %599 {offsets = [0, 1], sizes = [16, 16], strides = [1, 1]} : vector<16x18xf32> to vector<16x16xf32>
    %602 = vector.extract_strided_slice %599 {offsets = [0, 2], sizes = [16, 16], strides = [1, 1]} : vector<16x18xf32> to vector<16x16xf32>
    %c33 = arith.constant 33 : index
    %603 = memref.load %arg1[%c33] : memref<144xf32, #tpu.memory_space<smem>>
    %604 = vector.broadcast %603 : f32 to vector<16x16xf32>
    %605 = arith.mulf %604, %600 : vector<16x16xf32>
    %606 = arith.addf %585, %605 : vector<16x16xf32>
    %c69 = arith.constant 69 : index
    %607 = memref.load %arg1[%c69] : memref<144xf32, #tpu.memory_space<smem>>
    %608 = vector.broadcast %607 : f32 to vector<16x16xf32>
    %609 = arith.mulf %608, %600 : vector<16x16xf32>
    %610 = arith.addf %589, %609 : vector<16x16xf32>
    %c105 = arith.constant 105 : index
    %611 = memref.load %arg1[%c105] : memref<144xf32, #tpu.memory_space<smem>>
    %612 = vector.broadcast %611 : f32 to vector<16x16xf32>
    %613 = arith.mulf %612, %600 : vector<16x16xf32>
    %614 = arith.addf %593, %613 : vector<16x16xf32>
    %c141 = arith.constant 141 : index
    %615 = memref.load %arg1[%c141] : memref<144xf32, #tpu.memory_space<smem>>
    %616 = vector.broadcast %615 : f32 to vector<16x16xf32>
    %617 = arith.mulf %616, %600 : vector<16x16xf32>
    %618 = arith.addf %597, %617 : vector<16x16xf32>
    %c34 = arith.constant 34 : index
    %619 = memref.load %arg1[%c34] : memref<144xf32, #tpu.memory_space<smem>>
    %620 = vector.broadcast %619 : f32 to vector<16x16xf32>
    %621 = arith.mulf %620, %601 : vector<16x16xf32>
    %622 = arith.addf %606, %621 : vector<16x16xf32>
    %c70 = arith.constant 70 : index
    %623 = memref.load %arg1[%c70] : memref<144xf32, #tpu.memory_space<smem>>
    %624 = vector.broadcast %623 : f32 to vector<16x16xf32>
    %625 = arith.mulf %624, %601 : vector<16x16xf32>
    %626 = arith.addf %610, %625 : vector<16x16xf32>
    %c106 = arith.constant 106 : index
    %627 = memref.load %arg1[%c106] : memref<144xf32, #tpu.memory_space<smem>>
    %628 = vector.broadcast %627 : f32 to vector<16x16xf32>
    %629 = arith.mulf %628, %601 : vector<16x16xf32>
    %630 = arith.addf %614, %629 : vector<16x16xf32>
    %c142 = arith.constant 142 : index
    %631 = memref.load %arg1[%c142] : memref<144xf32, #tpu.memory_space<smem>>
    %632 = vector.broadcast %631 : f32 to vector<16x16xf32>
    %633 = arith.mulf %632, %601 : vector<16x16xf32>
    %634 = arith.addf %618, %633 : vector<16x16xf32>
    %c35 = arith.constant 35 : index
    %635 = memref.load %arg1[%c35] : memref<144xf32, #tpu.memory_space<smem>>
    %636 = vector.broadcast %635 : f32 to vector<16x16xf32>
    %637 = arith.mulf %636, %602 : vector<16x16xf32>
    %638 = arith.addf %622, %637 : vector<16x16xf32>
    %c71 = arith.constant 71 : index
    %639 = memref.load %arg1[%c71] : memref<144xf32, #tpu.memory_space<smem>>
    %640 = vector.broadcast %639 : f32 to vector<16x16xf32>
    %641 = arith.mulf %640, %602 : vector<16x16xf32>
    %642 = arith.addf %626, %641 : vector<16x16xf32>
    %c107 = arith.constant 107 : index
    %643 = memref.load %arg1[%c107] : memref<144xf32, #tpu.memory_space<smem>>
    %644 = vector.broadcast %643 : f32 to vector<16x16xf32>
    %645 = arith.mulf %644, %602 : vector<16x16xf32>
    %646 = arith.addf %630, %645 : vector<16x16xf32>
    %c143 = arith.constant 143 : index
    %647 = memref.load %arg1[%c143] : memref<144xf32, #tpu.memory_space<smem>>
    %648 = vector.broadcast %647 : f32 to vector<16x16xf32>
    %649 = arith.mulf %648, %602 : vector<16x16xf32>
    %650 = arith.addf %634, %649 : vector<16x16xf32>
    %cst_54 = arith.constant 0.000000e+00 : f32
    %651 = vector.broadcast %cst_54 : f32 to vector<16x16xf32>
    %652 = arith.cmpf ogt, %638, %651 : vector<16x16xf32>
    %cst_55 = arith.constant 2.000000e-01 : f32
    %653 = vector.broadcast %cst_55 : f32 to vector<16x16xf32>
    %654 = arith.mulf %653, %638 : vector<16x16xf32>
    %655 = arith.select %652, %638, %654 : vector<16x16xi1>, vector<16x16xf32>
    %656 = vector.shape_cast %655 : vector<16x16xf32> to vector<1x16x16xf32>
    %cst_56 = arith.constant dense<0.000000e+00> : vector<1xf32>
    %657 = vector.multi_reduction <add>, %656, %cst_56 [1, 2] : vector<1x16x16xf32> to vector<1xf32>
    %658 = vector.shape_cast %657 : vector<1xf32> to vector<1x1x1xf32>
    %659 = vector.extract %658[0, 0, 0] : f32 from vector<1x1x1xf32>
    %660 = vector.broadcast %659 : f32 to vector<1x1xf32>
    %cst_57 = arith.constant 3.906250e-03 : f32
    %661 = vector.broadcast %cst_57 : f32 to vector<1x1xf32>
    %662 = arith.mulf %660, %661 : vector<1x1xf32>
    %663 = vector.broadcast %662 : vector<1x1xf32> to vector<16x16xf32>
    %664 = arith.subf %655, %663 : vector<16x16xf32>
    %665 = arith.mulf %664, %664 : vector<16x16xf32>
    %666 = vector.shape_cast %665 : vector<16x16xf32> to vector<1x16x16xf32>
    %cst_58 = arith.constant dense<0.000000e+00> : vector<1xf32>
    %667 = vector.multi_reduction <add>, %666, %cst_58 [1, 2] : vector<1x16x16xf32> to vector<1xf32>
    %668 = vector.shape_cast %667 : vector<1xf32> to vector<1x1x1xf32>
    %669 = vector.extract %668[0, 0, 0] : f32 from vector<1x1x1xf32>
    %670 = vector.broadcast %669 : f32 to vector<1x1xf32>
    %cst_59 = arith.constant 3.906250e-03 : f32
    %671 = vector.broadcast %cst_59 : f32 to vector<1x1xf32>
    %672 = arith.mulf %670, %671 : vector<1x1xf32>
    %cst_60 = arith.constant 9.99999974E-6 : f32
    %673 = vector.broadcast %cst_60 : f32 to vector<1x1xf32>
    %674 = arith.addf %672, %673 : vector<1x1xf32>
    %675 = math.rsqrt %674 : vector<1x1xf32>
    %676 = arith.index_cast %arg0 : i32 to index
    %c0_61 = arith.constant 0 : index
    %677 = memref.load %arg5[%676, %c0_61] : memref<2x8xf32, #tpu.memory_space<smem>>
    %678 = arith.index_cast %arg0 : i32 to index
    %c1_62 = arith.constant 1 : index
    %679 = memref.load %arg5[%678, %c1_62] : memref<2x8xf32, #tpu.memory_space<smem>>
    %680 = vector.broadcast %675 : vector<1x1xf32> to vector<16x16xf32>
    %681 = arith.mulf %664, %680 : vector<16x16xf32>
    %682 = vector.broadcast %677 : f32 to vector<16x16xf32>
    %683 = arith.mulf %681, %682 : vector<16x16xf32>
    %684 = vector.broadcast %679 : f32 to vector<16x16xf32>
    %685 = arith.addf %683, %684 : vector<16x16xf32>
    %cst_63 = arith.constant 0.000000e+00 : f32
    %686 = vector.broadcast %cst_63 : f32 to vector<16x16xf32>
    %687 = arith.cmpf ogt, %642, %686 : vector<16x16xf32>
    %cst_64 = arith.constant 2.000000e-01 : f32
    %688 = vector.broadcast %cst_64 : f32 to vector<16x16xf32>
    %689 = arith.mulf %688, %642 : vector<16x16xf32>
    %690 = arith.select %687, %642, %689 : vector<16x16xi1>, vector<16x16xf32>
    %691 = vector.shape_cast %690 : vector<16x16xf32> to vector<1x16x16xf32>
    %cst_65 = arith.constant dense<0.000000e+00> : vector<1xf32>
    %692 = vector.multi_reduction <add>, %691, %cst_65 [1, 2] : vector<1x16x16xf32> to vector<1xf32>
    %693 = vector.shape_cast %692 : vector<1xf32> to vector<1x1x1xf32>
    %694 = vector.extract %693[0, 0, 0] : f32 from vector<1x1x1xf32>
    %695 = vector.broadcast %694 : f32 to vector<1x1xf32>
    %cst_66 = arith.constant 3.906250e-03 : f32
    %696 = vector.broadcast %cst_66 : f32 to vector<1x1xf32>
    %697 = arith.mulf %695, %696 : vector<1x1xf32>
    %698 = vector.broadcast %697 : vector<1x1xf32> to vector<16x16xf32>
    %699 = arith.subf %690, %698 : vector<16x16xf32>
    %700 = arith.mulf %699, %699 : vector<16x16xf32>
    %701 = vector.shape_cast %700 : vector<16x16xf32> to vector<1x16x16xf32>
    %cst_67 = arith.constant dense<0.000000e+00> : vector<1xf32>
    %702 = vector.multi_reduction <add>, %701, %cst_67 [1, 2] : vector<1x16x16xf32> to vector<1xf32>
    %703 = vector.shape_cast %702 : vector<1xf32> to vector<1x1x1xf32>
    %704 = vector.extract %703[0, 0, 0] : f32 from vector<1x1x1xf32>
    %705 = vector.broadcast %704 : f32 to vector<1x1xf32>
    %cst_68 = arith.constant 3.906250e-03 : f32
    %706 = vector.broadcast %cst_68 : f32 to vector<1x1xf32>
    %707 = arith.mulf %705, %706 : vector<1x1xf32>
    %cst_69 = arith.constant 9.99999974E-6 : f32
    %708 = vector.broadcast %cst_69 : f32 to vector<1x1xf32>
    %709 = arith.addf %707, %708 : vector<1x1xf32>
    %710 = math.rsqrt %709 : vector<1x1xf32>
    %711 = arith.index_cast %arg0 : i32 to index
    %c2_70 = arith.constant 2 : index
    %712 = memref.load %arg5[%711, %c2_70] : memref<2x8xf32, #tpu.memory_space<smem>>
    %713 = arith.index_cast %arg0 : i32 to index
    %c3_71 = arith.constant 3 : index
    %714 = memref.load %arg5[%713, %c3_71] : memref<2x8xf32, #tpu.memory_space<smem>>
    %715 = vector.broadcast %710 : vector<1x1xf32> to vector<16x16xf32>
    %716 = arith.mulf %699, %715 : vector<16x16xf32>
    %717 = vector.broadcast %712 : f32 to vector<16x16xf32>
    %718 = arith.mulf %716, %717 : vector<16x16xf32>
    %719 = vector.broadcast %714 : f32 to vector<16x16xf32>
    %720 = arith.addf %718, %719 : vector<16x16xf32>
    %cst_72 = arith.constant 0.000000e+00 : f32
    %721 = vector.broadcast %cst_72 : f32 to vector<16x16xf32>
    %722 = arith.cmpf ogt, %646, %721 : vector<16x16xf32>
    %cst_73 = arith.constant 2.000000e-01 : f32
    %723 = vector.broadcast %cst_73 : f32 to vector<16x16xf32>
    %724 = arith.mulf %723, %646 : vector<16x16xf32>
    %725 = arith.select %722, %646, %724 : vector<16x16xi1>, vector<16x16xf32>
    %726 = vector.shape_cast %725 : vector<16x16xf32> to vector<1x16x16xf32>
    %cst_74 = arith.constant dense<0.000000e+00> : vector<1xf32>
    %727 = vector.multi_reduction <add>, %726, %cst_74 [1, 2] : vector<1x16x16xf32> to vector<1xf32>
    %728 = vector.shape_cast %727 : vector<1xf32> to vector<1x1x1xf32>
    %729 = vector.extract %728[0, 0, 0] : f32 from vector<1x1x1xf32>
    %730 = vector.broadcast %729 : f32 to vector<1x1xf32>
    %cst_75 = arith.constant 3.906250e-03 : f32
    %731 = vector.broadcast %cst_75 : f32 to vector<1x1xf32>
    %732 = arith.mulf %730, %731 : vector<1x1xf32>
    %733 = vector.broadcast %732 : vector<1x1xf32> to vector<16x16xf32>
    %734 = arith.subf %725, %733 : vector<16x16xf32>
    %735 = arith.mulf %734, %734 : vector<16x16xf32>
    %736 = vector.shape_cast %735 : vector<16x16xf32> to vector<1x16x16xf32>
    %cst_76 = arith.constant dense<0.000000e+00> : vector<1xf32>
    %737 = vector.multi_reduction <add>, %736, %cst_76 [1, 2] : vector<1x16x16xf32> to vector<1xf32>
    %738 = vector.shape_cast %737 : vector<1xf32> to vector<1x1x1xf32>
    %739 = vector.extract %738[0, 0, 0] : f32 from vector<1x1x1xf32>
    %740 = vector.broadcast %739 : f32 to vector<1x1xf32>
    %cst_77 = arith.constant 3.906250e-03 : f32
    %741 = vector.broadcast %cst_77 : f32 to vector<1x1xf32>
    %742 = arith.mulf %740, %741 : vector<1x1xf32>
    %cst_78 = arith.constant 9.99999974E-6 : f32
    %743 = vector.broadcast %cst_78 : f32 to vector<1x1xf32>
    %744 = arith.addf %742, %743 : vector<1x1xf32>
    %745 = math.rsqrt %744 : vector<1x1xf32>
    %746 = arith.index_cast %arg0 : i32 to index
    %c4_79 = arith.constant 4 : index
    %747 = memref.load %arg5[%746, %c4_79] : memref<2x8xf32, #tpu.memory_space<smem>>
    %748 = arith.index_cast %arg0 : i32 to index
    %c5_80 = arith.constant 5 : index
    %749 = memref.load %arg5[%748, %c5_80] : memref<2x8xf32, #tpu.memory_space<smem>>
    %750 = vector.broadcast %745 : vector<1x1xf32> to vector<16x16xf32>
    %751 = arith.mulf %734, %750 : vector<16x16xf32>
    %752 = vector.broadcast %747 : f32 to vector<16x16xf32>
    %753 = arith.mulf %751, %752 : vector<16x16xf32>
    %754 = vector.broadcast %749 : f32 to vector<16x16xf32>
    %755 = arith.addf %753, %754 : vector<16x16xf32>
    %cst_81 = arith.constant 0.000000e+00 : f32
    %756 = vector.broadcast %cst_81 : f32 to vector<16x16xf32>
    %757 = arith.cmpf ogt, %650, %756 : vector<16x16xf32>
    %cst_82 = arith.constant 2.000000e-01 : f32
    %758 = vector.broadcast %cst_82 : f32 to vector<16x16xf32>
    %759 = arith.mulf %758, %650 : vector<16x16xf32>
    %760 = arith.select %757, %650, %759 : vector<16x16xi1>, vector<16x16xf32>
    %761 = vector.shape_cast %760 : vector<16x16xf32> to vector<1x16x16xf32>
    %cst_83 = arith.constant dense<0.000000e+00> : vector<1xf32>
    %762 = vector.multi_reduction <add>, %761, %cst_83 [1, 2] : vector<1x16x16xf32> to vector<1xf32>
    %763 = vector.shape_cast %762 : vector<1xf32> to vector<1x1x1xf32>
    %764 = vector.extract %763[0, 0, 0] : f32 from vector<1x1x1xf32>
    %765 = vector.broadcast %764 : f32 to vector<1x1xf32>
    %cst_84 = arith.constant 3.906250e-03 : f32
    %766 = vector.broadcast %cst_84 : f32 to vector<1x1xf32>
    %767 = arith.mulf %765, %766 : vector<1x1xf32>
    %768 = vector.broadcast %767 : vector<1x1xf32> to vector<16x16xf32>
    %769 = arith.subf %760, %768 : vector<16x16xf32>
    %770 = arith.mulf %769, %769 : vector<16x16xf32>
    %771 = vector.shape_cast %770 : vector<16x16xf32> to vector<1x16x16xf32>
    %cst_85 = arith.constant dense<0.000000e+00> : vector<1xf32>
    %772 = vector.multi_reduction <add>, %771, %cst_85 [1, 2] : vector<1x16x16xf32> to vector<1xf32>
    %773 = vector.shape_cast %772 : vector<1xf32> to vector<1x1x1xf32>
    %774 = vector.extract %773[0, 0, 0] : f32 from vector<1x1x1xf32>
    %775 = vector.broadcast %774 : f32 to vector<1x1xf32>
    %cst_86 = arith.constant 3.906250e-03 : f32
    %776 = vector.broadcast %cst_86 : f32 to vector<1x1xf32>
    %777 = arith.mulf %775, %776 : vector<1x1xf32>
    %cst_87 = arith.constant 9.99999974E-6 : f32
    %778 = vector.broadcast %cst_87 : f32 to vector<1x1xf32>
    %779 = arith.addf %777, %778 : vector<1x1xf32>
    %780 = math.rsqrt %779 : vector<1x1xf32>
    %781 = arith.index_cast %arg0 : i32 to index
    %c6_88 = arith.constant 6 : index
    %782 = memref.load %arg5[%781, %c6_88] : memref<2x8xf32, #tpu.memory_space<smem>>
    %783 = arith.index_cast %arg0 : i32 to index
    %c7_89 = arith.constant 7 : index
    %784 = memref.load %arg5[%783, %c7_89] : memref<2x8xf32, #tpu.memory_space<smem>>
    %785 = vector.broadcast %780 : vector<1x1xf32> to vector<16x16xf32>
    %786 = arith.mulf %769, %785 : vector<16x16xf32>
    %787 = vector.broadcast %782 : f32 to vector<16x16xf32>
    %788 = arith.mulf %786, %787 : vector<16x16xf32>
    %789 = vector.broadcast %784 : f32 to vector<16x16xf32>
    %790 = arith.addf %788, %789 : vector<16x16xf32>
    %791 = vector.shape_cast %685 : vector<16x16xf32> to vector<1x16x16xf32>
    %792 = vector.shape_cast %720 : vector<16x16xf32> to vector<1x16x16xf32>
    %793 = vector.shape_cast %755 : vector<16x16xf32> to vector<1x16x16xf32>
    %794 = vector.shape_cast %790 : vector<16x16xf32> to vector<1x16x16xf32>
    %795 = tpu.concatenate %791, %792, %793, %794 in 0 : vector<1x16x16xf32>, vector<1x16x16xf32>, vector<1x16x16xf32>, vector<1x16x16xf32> -> vector<4x16x16xf32>
    %c0_90 = arith.constant 0 : index
    %c1_91 = arith.constant 1 : index
    %c1_92 = arith.constant 1 : index
    %796 = vector.load %arg9[%c0_90, %c1_91, %c1_92] : memref<4x18x18xf32, #tpu.memory_space<vmem>>, vector<4x16x16xf32>
    tpu.vector_store %arg9[%c0_90, %c1_91, %c1_92], %795 {strides = array<i32>} : memref<4x18x18xf32, #tpu.memory_space<vmem>>, vector<4x16x16xf32>,
    %797 = vector.extract_strided_slice %5 {offsets = [0, 0, 0], sizes = [1, 16, 16], strides = [1, 1, 1]} : vector<4x16x16xf32> to vector<1x16x16xf32>
    %798 = vector.shape_cast %797 : vector<1x16x16xf32> to vector<16x16xf32>
    %799 = vector.extract_strided_slice %5 {offsets = [1, 0, 0], sizes = [1, 16, 16], strides = [1, 1, 1]} : vector<4x16x16xf32> to vector<1x16x16xf32>
    %800 = vector.shape_cast %799 : vector<1x16x16xf32> to vector<16x16xf32>
    %801 = vector.extract_strided_slice %5 {offsets = [2, 0, 0], sizes = [1, 16, 16], strides = [1, 1, 1]} : vector<4x16x16xf32> to vector<1x16x16xf32>
    %802 = vector.shape_cast %801 : vector<1x16x16xf32> to vector<16x16xf32>
    %803 = vector.extract_strided_slice %5 {offsets = [3, 0, 0], sizes = [1, 16, 16], strides = [1, 1, 1]} : vector<4x16x16xf32> to vector<1x16x16xf32>
    %804 = vector.shape_cast %803 : vector<1x16x16xf32> to vector<16x16xf32>
    %c0_93 = arith.constant 0 : index
    %805 = memref.load %arg4[%c0_93] : memref<4xf32, #tpu.memory_space<smem>>
    %806 = vector.broadcast %805 : f32 to vector<16x16xf32>
    %c1_94 = arith.constant 1 : index
    %807 = memref.load %arg4[%c1_94] : memref<4xf32, #tpu.memory_space<smem>>
    %808 = vector.broadcast %807 : f32 to vector<16x16xf32>
    %c2_95 = arith.constant 2 : index
    %809 = memref.load %arg4[%c2_95] : memref<4xf32, #tpu.memory_space<smem>>
    %810 = vector.broadcast %809 : f32 to vector<16x16xf32>
    %c3_96 = arith.constant 3 : index
    %811 = memref.load %arg4[%c3_96] : memref<4xf32, #tpu.memory_space<smem>>
    %812 = vector.broadcast %811 : f32 to vector<16x16xf32>
    %813 = arith.addf %806, %798 : vector<16x16xf32>
    %814 = arith.addf %808, %800 : vector<16x16xf32>
    %815 = arith.addf %810, %802 : vector<16x16xf32>
    %816 = arith.addf %812, %804 : vector<16x16xf32>
    %c0_97 = arith.constant 0 : index
    %c0_98 = arith.constant 0 : index
    %c0_99 = arith.constant 0 : index
    %817 = vector.load %arg9[%c0_97, %c0_98, %c0_99] : memref<4x18x18xf32, #tpu.memory_space<vmem>>, vector<1x16x18xf32>
    %818 = vector.shape_cast %817 : vector<1x16x18xf32> to vector<16x18xf32>
    %819 = vector.extract_strided_slice %818 {offsets = [0, 0], sizes = [16, 16], strides = [1, 1]} : vector<16x18xf32> to vector<16x16xf32>
    %820 = vector.extract_strided_slice %818 {offsets = [0, 1], sizes = [16, 16], strides = [1, 1]} : vector<16x18xf32> to vector<16x16xf32>
    %821 = vector.extract_strided_slice %818 {offsets = [0, 2], sizes = [16, 16], strides = [1, 1]} : vector<16x18xf32> to vector<16x16xf32>
    %c0_100 = arith.constant 0 : index
    %822 = memref.load %arg3[%c0_100] : memref<144xf32, #tpu.memory_space<smem>>
    %823 = vector.broadcast %822 : f32 to vector<16x16xf32>
    %824 = arith.mulf %823, %819 : vector<16x16xf32>
    %825 = arith.addf %813, %824 : vector<16x16xf32>
    %c36_101 = arith.constant 36 : index
    %826 = memref.load %arg3[%c36_101] : memref<144xf32, #tpu.memory_space<smem>>
    %827 = vector.broadcast %826 : f32 to vector<16x16xf32>
    %828 = arith.mulf %827, %819 : vector<16x16xf32>
    %829 = arith.addf %814, %828 : vector<16x16xf32>
    %c72_102 = arith.constant 72 : index
    %830 = memref.load %arg3[%c72_102] : memref<144xf32, #tpu.memory_space<smem>>
    %831 = vector.broadcast %830 : f32 to vector<16x16xf32>
    %832 = arith.mulf %831, %819 : vector<16x16xf32>
    %833 = arith.addf %815, %832 : vector<16x16xf32>
    %c108_103 = arith.constant 108 : index
    %834 = memref.load %arg3[%c108_103] : memref<144xf32, #tpu.memory_space<smem>>
    %835 = vector.broadcast %834 : f32 to vector<16x16xf32>
    %836 = arith.mulf %835, %819 : vector<16x16xf32>
    %837 = arith.addf %816, %836 : vector<16x16xf32>
    %c1_104 = arith.constant 1 : index
    %838 = memref.load %arg3[%c1_104] : memref<144xf32, #tpu.memory_space<smem>>
    %839 = vector.broadcast %838 : f32 to vector<16x16xf32>
    %840 = arith.mulf %839, %820 : vector<16x16xf32>
    %841 = arith.addf %825, %840 : vector<16x16xf32>
    %c37_105 = arith.constant 37 : index
    %842 = memref.load %arg3[%c37_105] : memref<144xf32, #tpu.memory_space<smem>>
    %843 = vector.broadcast %842 : f32 to vector<16x16xf32>
    %844 = arith.mulf %843, %820 : vector<16x16xf32>
    %845 = arith.addf %829, %844 : vector<16x16xf32>
    %c73_106 = arith.constant 73 : index
    %846 = memref.load %arg3[%c73_106] : memref<144xf32, #tpu.memory_space<smem>>
    %847 = vector.broadcast %846 : f32 to vector<16x16xf32>
    %848 = arith.mulf %847, %820 : vector<16x16xf32>
    %849 = arith.addf %833, %848 : vector<16x16xf32>
    %c109_107 = arith.constant 109 : index
    %850 = memref.load %arg3[%c109_107] : memref<144xf32, #tpu.memory_space<smem>>
    %851 = vector.broadcast %850 : f32 to vector<16x16xf32>
    %852 = arith.mulf %851, %820 : vector<16x16xf32>
    %853 = arith.addf %837, %852 : vector<16x16xf32>
    %c2_108 = arith.constant 2 : index
    %854 = memref.load %arg3[%c2_108] : memref<144xf32, #tpu.memory_space<smem>>
    %855 = vector.broadcast %854 : f32 to vector<16x16xf32>
    %856 = arith.mulf %855, %821 : vector<16x16xf32>
    %857 = arith.addf %841, %856 : vector<16x16xf32>
    %c38_109 = arith.constant 38 : index
    %858 = memref.load %arg3[%c38_109] : memref<144xf32, #tpu.memory_space<smem>>
    %859 = vector.broadcast %858 : f32 to vector<16x16xf32>
    %860 = arith.mulf %859, %821 : vector<16x16xf32>
    %861 = arith.addf %845, %860 : vector<16x16xf32>
    %c74_110 = arith.constant 74 : index
    %862 = memref.load %arg3[%c74_110] : memref<144xf32, #tpu.memory_space<smem>>
    %863 = vector.broadcast %862 : f32 to vector<16x16xf32>
    %864 = arith.mulf %863, %821 : vector<16x16xf32>
    %865 = arith.addf %849, %864 : vector<16x16xf32>
    %c110_111 = arith.constant 110 : index
    %866 = memref.load %arg3[%c110_111] : memref<144xf32, #tpu.memory_space<smem>>
    %867 = vector.broadcast %866 : f32 to vector<16x16xf32>
    %868 = arith.mulf %867, %821 : vector<16x16xf32>
    %869 = arith.addf %853, %868 : vector<16x16xf32>
    %c0_112 = arith.constant 0 : index
    %c1_113 = arith.constant 1 : index
    %c0_114 = arith.constant 0 : index
    %870 = vector.load %arg9[%c0_112, %c1_113, %c0_114] : memref<4x18x18xf32, #tpu.memory_space<vmem>>, vector<1x16x18xf32>
    %871 = vector.shape_cast %870 : vector<1x16x18xf32> to vector<16x18xf32>
    %872 = vector.extract_strided_slice %871 {offsets = [0, 0], sizes = [16, 16], strides = [1, 1]} : vector<16x18xf32> to vector<16x16xf32>
    %873 = vector.extract_strided_slice %871 {offsets = [0, 1], sizes = [16, 16], strides = [1, 1]} : vector<16x18xf32> to vector<16x16xf32>
    %874 = vector.extract_strided_slice %871 {offsets = [0, 2], sizes = [16, 16], strides = [1, 1]} : vector<16x18xf32> to vector<16x16xf32>
    %c3_115 = arith.constant 3 : index
    %875 = memref.load %arg3[%c3_115] : memref<144xf32, #tpu.memory_space<smem>>
    %876 = vector.broadcast %875 : f32 to vector<16x16xf32>
    %877 = arith.mulf %876, %872 : vector<16x16xf32>
    %878 = arith.addf %857, %877 : vector<16x16xf32>
    %c39_116 = arith.constant 39 : index
    %879 = memref.load %arg3[%c39_116] : memref<144xf32, #tpu.memory_space<smem>>
    %880 = vector.broadcast %879 : f32 to vector<16x16xf32>
    %881 = arith.mulf %880, %872 : vector<16x16xf32>
    %882 = arith.addf %861, %881 : vector<16x16xf32>
    %c75_117 = arith.constant 75 : index
    %883 = memref.load %arg3[%c75_117] : memref<144xf32, #tpu.memory_space<smem>>
    %884 = vector.broadcast %883 : f32 to vector<16x16xf32>
    %885 = arith.mulf %884, %872 : vector<16x16xf32>
    %886 = arith.addf %865, %885 : vector<16x16xf32>
    %c111_118 = arith.constant 111 : index
    %887 = memref.load %arg3[%c111_118] : memref<144xf32, #tpu.memory_space<smem>>
    %888 = vector.broadcast %887 : f32 to vector<16x16xf32>
    %889 = arith.mulf %888, %872 : vector<16x16xf32>
    %890 = arith.addf %869, %889 : vector<16x16xf32>
    %c4_119 = arith.constant 4 : index
    %891 = memref.load %arg3[%c4_119] : memref<144xf32, #tpu.memory_space<smem>>
    %892 = vector.broadcast %891 : f32 to vector<16x16xf32>
    %893 = arith.mulf %892, %873 : vector<16x16xf32>
    %894 = arith.addf %878, %893 : vector<16x16xf32>
    %c40_120 = arith.constant 40 : index
    %895 = memref.load %arg3[%c40_120] : memref<144xf32, #tpu.memory_space<smem>>
    %896 = vector.broadcast %895 : f32 to vector<16x16xf32>
    %897 = arith.mulf %896, %873 : vector<16x16xf32>
    %898 = arith.addf %882, %897 : vector<16x16xf32>
    %c76_121 = arith.constant 76 : index
    %899 = memref.load %arg3[%c76_121] : memref<144xf32, #tpu.memory_space<smem>>
    %900 = vector.broadcast %899 : f32 to vector<16x16xf32>
    %901 = arith.mulf %900, %873 : vector<16x16xf32>
    %902 = arith.addf %886, %901 : vector<16x16xf32>
    %c112_122 = arith.constant 112 : index
    %903 = memref.load %arg3[%c112_122] : memref<144xf32, #tpu.memory_space<smem>>
    %904 = vector.broadcast %903 : f32 to vector<16x16xf32>
    %905 = arith.mulf %904, %873 : vector<16x16xf32>
    %906 = arith.addf %890, %905 : vector<16x16xf32>
    %c5_123 = arith.constant 5 : index
    %907 = memref.load %arg3[%c5_123] : memref<144xf32, #tpu.memory_space<smem>>
    %908 = vector.broadcast %907 : f32 to vector<16x16xf32>
    %909 = arith.mulf %908, %874 : vector<16x16xf32>
    %910 = arith.addf %894, %909 : vector<16x16xf32>
    %c41_124 = arith.constant 41 : index
    %911 = memref.load %arg3[%c41_124] : memref<144xf32, #tpu.memory_space<smem>>
    %912 = vector.broadcast %911 : f32 to vector<16x16xf32>
    %913 = arith.mulf %912, %874 : vector<16x16xf32>
    %914 = arith.addf %898, %913 : vector<16x16xf32>
    %c77_125 = arith.constant 77 : index
    %915 = memref.load %arg3[%c77_125] : memref<144xf32, #tpu.memory_space<smem>>
    %916 = vector.broadcast %915 : f32 to vector<16x16xf32>
    %917 = arith.mulf %916, %874 : vector<16x16xf32>
    %918 = arith.addf %902, %917 : vector<16x16xf32>
    %c113_126 = arith.constant 113 : index
    %919 = memref.load %arg3[%c113_126] : memref<144xf32, #tpu.memory_space<smem>>
    %920 = vector.broadcast %919 : f32 to vector<16x16xf32>
    %921 = arith.mulf %920, %874 : vector<16x16xf32>
    %922 = arith.addf %906, %921 : vector<16x16xf32>
    %c0_127 = arith.constant 0 : index
    %c2_128 = arith.constant 2 : index
    %c0_129 = arith.constant 0 : index
    %923 = vector.load %arg9[%c0_127, %c2_128, %c0_129] : memref<4x18x18xf32, #tpu.memory_space<vmem>>, vector<1x16x18xf32>
    %924 = vector.shape_cast %923 : vector<1x16x18xf32> to vector<16x18xf32>
    %925 = vector.extract_strided_slice %924 {offsets = [0, 0], sizes = [16, 16], strides = [1, 1]} : vector<16x18xf32> to vector<16x16xf32>
    %926 = vector.extract_strided_slice %924 {offsets = [0, 1], sizes = [16, 16], strides = [1, 1]} : vector<16x18xf32> to vector<16x16xf32>
    %927 = vector.extract_strided_slice %924 {offsets = [0, 2], sizes = [16, 16], strides = [1, 1]} : vector<16x18xf32> to vector<16x16xf32>
    %c6_130 = arith.constant 6 : index
    %928 = memref.load %arg3[%c6_130] : memref<144xf32, #tpu.memory_space<smem>>
    %929 = vector.broadcast %928 : f32 to vector<16x16xf32>
    %930 = arith.mulf %929, %925 : vector<16x16xf32>
    %931 = arith.addf %910, %930 : vector<16x16xf32>
    %c42_131 = arith.constant 42 : index
    %932 = memref.load %arg3[%c42_131] : memref<144xf32, #tpu.memory_space<smem>>
    %933 = vector.broadcast %932 : f32 to vector<16x16xf32>
    %934 = arith.mulf %933, %925 : vector<16x16xf32>
    %935 = arith.addf %914, %934 : vector<16x16xf32>
    %c78_132 = arith.constant 78 : index
    %936 = memref.load %arg3[%c78_132] : memref<144xf32, #tpu.memory_space<smem>>
    %937 = vector.broadcast %936 : f32 to vector<16x16xf32>
    %938 = arith.mulf %937, %925 : vector<16x16xf32>
    %939 = arith.addf %918, %938 : vector<16x16xf32>
    %c114_133 = arith.constant 114 : index
    %940 = memref.load %arg3[%c114_133] : memref<144xf32, #tpu.memory_space<smem>>
    %941 = vector.broadcast %940 : f32 to vector<16x16xf32>
    %942 = arith.mulf %941, %925 : vector<16x16xf32>
    %943 = arith.addf %922, %942 : vector<16x16xf32>
    %c7_134 = arith.constant 7 : index
    %944 = memref.load %arg3[%c7_134] : memref<144xf32, #tpu.memory_space<smem>>
    %945 = vector.broadcast %944 : f32 to vector<16x16xf32>
    %946 = arith.mulf %945, %926 : vector<16x16xf32>
    %947 = arith.addf %931, %946 : vector<16x16xf32>
    %c43_135 = arith.constant 43 : index
    %948 = memref.load %arg3[%c43_135] : memref<144xf32, #tpu.memory_space<smem>>
    %949 = vector.broadcast %948 : f32 to vector<16x16xf32>
    %950 = arith.mulf %949, %926 : vector<16x16xf32>
    %951 = arith.addf %935, %950 : vector<16x16xf32>
    %c79_136 = arith.constant 79 : index
    %952 = memref.load %arg3[%c79_136] : memref<144xf32, #tpu.memory_space<smem>>
    %953 = vector.broadcast %952 : f32 to vector<16x16xf32>
    %954 = arith.mulf %953, %926 : vector<16x16xf32>
    %955 = arith.addf %939, %954 : vector<16x16xf32>
    %c115_137 = arith.constant 115 : index
    %956 = memref.load %arg3[%c115_137] : memref<144xf32, #tpu.memory_space<smem>>
    %957 = vector.broadcast %956 : f32 to vector<16x16xf32>
    %958 = arith.mulf %957, %926 : vector<16x16xf32>
    %959 = arith.addf %943, %958 : vector<16x16xf32>
    %c8_138 = arith.constant 8 : index
    %960 = memref.load %arg3[%c8_138] : memref<144xf32, #tpu.memory_space<smem>>
    %961 = vector.broadcast %960 : f32 to vector<16x16xf32>
    %962 = arith.mulf %961, %927 : vector<16x16xf32>
    %963 = arith.addf %947, %962 : vector<16x16xf32>
    %c44_139 = arith.constant 44 : index
    %964 = memref.load %arg3[%c44_139] : memref<144xf32, #tpu.memory_space<smem>>
    %965 = vector.broadcast %964 : f32 to vector<16x16xf32>
    %966 = arith.mulf %965, %927 : vector<16x16xf32>
    %967 = arith.addf %951, %966 : vector<16x16xf32>
    %c80_140 = arith.constant 80 : index
    %968 = memref.load %arg3[%c80_140] : memref<144xf32, #tpu.memory_space<smem>>
    %969 = vector.broadcast %968 : f32 to vector<16x16xf32>
    %970 = arith.mulf %969, %927 : vector<16x16xf32>
    %971 = arith.addf %955, %970 : vector<16x16xf32>
    %c116_141 = arith.constant 116 : index
    %972 = memref.load %arg3[%c116_141] : memref<144xf32, #tpu.memory_space<smem>>
    %973 = vector.broadcast %972 : f32 to vector<16x16xf32>
    %974 = arith.mulf %973, %927 : vector<16x16xf32>
    %975 = arith.addf %959, %974 : vector<16x16xf32>
    %c1_142 = arith.constant 1 : index
    %c0_143 = arith.constant 0 : index
    %c0_144 = arith.constant 0 : index
    %976 = vector.load %arg9[%c1_142, %c0_143, %c0_144] : memref<4x18x18xf32, #tpu.memory_space<vmem>>, vector<1x16x18xf32>
    %977 = vector.shape_cast %976 : vector<1x16x18xf32> to vector<16x18xf32>
    %978 = vector.extract_strided_slice %977 {offsets = [0, 0], sizes = [16, 16], strides = [1, 1]} : vector<16x18xf32> to vector<16x16xf32>
    %979 = vector.extract_strided_slice %977 {offsets = [0, 1], sizes = [16, 16], strides = [1, 1]} : vector<16x18xf32> to vector<16x16xf32>
    %980 = vector.extract_strided_slice %977 {offsets = [0, 2], sizes = [16, 16], strides = [1, 1]} : vector<16x18xf32> to vector<16x16xf32>
    %c9_145 = arith.constant 9 : index
    %981 = memref.load %arg3[%c9_145] : memref<144xf32, #tpu.memory_space<smem>>
    %982 = vector.broadcast %981 : f32 to vector<16x16xf32>
    %983 = arith.mulf %982, %978 : vector<16x16xf32>
    %984 = arith.addf %963, %983 : vector<16x16xf32>
    %c45_146 = arith.constant 45 : index
    %985 = memref.load %arg3[%c45_146] : memref<144xf32, #tpu.memory_space<smem>>
    %986 = vector.broadcast %985 : f32 to vector<16x16xf32>
    %987 = arith.mulf %986, %978 : vector<16x16xf32>
    %988 = arith.addf %967, %987 : vector<16x16xf32>
    %c81_147 = arith.constant 81 : index
    %989 = memref.load %arg3[%c81_147] : memref<144xf32, #tpu.memory_space<smem>>
    %990 = vector.broadcast %989 : f32 to vector<16x16xf32>
    %991 = arith.mulf %990, %978 : vector<16x16xf32>
    %992 = arith.addf %971, %991 : vector<16x16xf32>
    %c117_148 = arith.constant 117 : index
    %993 = memref.load %arg3[%c117_148] : memref<144xf32, #tpu.memory_space<smem>>
    %994 = vector.broadcast %993 : f32 to vector<16x16xf32>
    %995 = arith.mulf %994, %978 : vector<16x16xf32>
    %996 = arith.addf %975, %995 : vector<16x16xf32>
    %c10_149 = arith.constant 10 : index
    %997 = memref.load %arg3[%c10_149] : memref<144xf32, #tpu.memory_space<smem>>
    %998 = vector.broadcast %997 : f32 to vector<16x16xf32>
    %999 = arith.mulf %998, %979 : vector<16x16xf32>
    %1000 = arith.addf %984, %999 : vector<16x16xf32>
    %c46_150 = arith.constant 46 : index
    %1001 = memref.load %arg3[%c46_150] : memref<144xf32, #tpu.memory_space<smem>>
    %1002 = vector.broadcast %1001 : f32 to vector<16x16xf32>
    %1003 = arith.mulf %1002, %979 : vector<16x16xf32>
    %1004 = arith.addf %988, %1003 : vector<16x16xf32>
    %c82_151 = arith.constant 82 : index
    %1005 = memref.load %arg3[%c82_151] : memref<144xf32, #tpu.memory_space<smem>>
    %1006 = vector.broadcast %1005 : f32 to vector<16x16xf32>
    %1007 = arith.mulf %1006, %979 : vector<16x16xf32>
    %1008 = arith.addf %992, %1007 : vector<16x16xf32>
    %c118_152 = arith.constant 118 : index
    %1009 = memref.load %arg3[%c118_152] : memref<144xf32, #tpu.memory_space<smem>>
    %1010 = vector.broadcast %1009 : f32 to vector<16x16xf32>
    %1011 = arith.mulf %1010, %979 : vector<16x16xf32>
    %1012 = arith.addf %996, %1011 : vector<16x16xf32>
    %c11_153 = arith.constant 11 : index
    %1013 = memref.load %arg3[%c11_153] : memref<144xf32, #tpu.memory_space<smem>>
    %1014 = vector.broadcast %1013 : f32 to vector<16x16xf32>
    %1015 = arith.mulf %1014, %980 : vector<16x16xf32>
    %1016 = arith.addf %1000, %1015 : vector<16x16xf32>
    %c47_154 = arith.constant 47 : index
    %1017 = memref.load %arg3[%c47_154] : memref<144xf32, #tpu.memory_space<smem>>
    %1018 = vector.broadcast %1017 : f32 to vector<16x16xf32>
    %1019 = arith.mulf %1018, %980 : vector<16x16xf32>
    %1020 = arith.addf %1004, %1019 : vector<16x16xf32>
    %c83_155 = arith.constant 83 : index
    %1021 = memref.load %arg3[%c83_155] : memref<144xf32, #tpu.memory_space<smem>>
    %1022 = vector.broadcast %1021 : f32 to vector<16x16xf32>
    %1023 = arith.mulf %1022, %980 : vector<16x16xf32>
    %1024 = arith.addf %1008, %1023 : vector<16x16xf32>
    %c119_156 = arith.constant 119 : index
    %1025 = memref.load %arg3[%c119_156] : memref<144xf32, #tpu.memory_space<smem>>
    %1026 = vector.broadcast %1025 : f32 to vector<16x16xf32>
    %1027 = arith.mulf %1026, %980 : vector<16x16xf32>
    %1028 = arith.addf %1012, %1027 : vector<16x16xf32>
    %c1_157 = arith.constant 1 : index
    %c1_158 = arith.constant 1 : index
    %c0_159 = arith.constant 0 : index
    %1029 = vector.load %arg9[%c1_157, %c1_158, %c0_159] : memref<4x18x18xf32, #tpu.memory_space<vmem>>, vector<1x16x18xf32>
    %1030 = vector.shape_cast %1029 : vector<1x16x18xf32> to vector<16x18xf32>
    %1031 = vector.extract_strided_slice %1030 {offsets = [0, 0], sizes = [16, 16], strides = [1, 1]} : vector<16x18xf32> to vector<16x16xf32>
    %1032 = vector.extract_strided_slice %1030 {offsets = [0, 1], sizes = [16, 16], strides = [1, 1]} : vector<16x18xf32> to vector<16x16xf32>
    %1033 = vector.extract_strided_slice %1030 {offsets = [0, 2], sizes = [16, 16], strides = [1, 1]} : vector<16x18xf32> to vector<16x16xf32>
    %c12_160 = arith.constant 12 : index
    %1034 = memref.load %arg3[%c12_160] : memref<144xf32, #tpu.memory_space<smem>>
    %1035 = vector.broadcast %1034 : f32 to vector<16x16xf32>
    %1036 = arith.mulf %1035, %1031 : vector<16x16xf32>
    %1037 = arith.addf %1016, %1036 : vector<16x16xf32>
    %c48_161 = arith.constant 48 : index
    %1038 = memref.load %arg3[%c48_161] : memref<144xf32, #tpu.memory_space<smem>>
    %1039 = vector.broadcast %1038 : f32 to vector<16x16xf32>
    %1040 = arith.mulf %1039, %1031 : vector<16x16xf32>
    %1041 = arith.addf %1020, %1040 : vector<16x16xf32>
    %c84_162 = arith.constant 84 : index
    %1042 = memref.load %arg3[%c84_162] : memref<144xf32, #tpu.memory_space<smem>>
    %1043 = vector.broadcast %1042 : f32 to vector<16x16xf32>
    %1044 = arith.mulf %1043, %1031 : vector<16x16xf32>
    %1045 = arith.addf %1024, %1044 : vector<16x16xf32>
    %c120_163 = arith.constant 120 : index
    %1046 = memref.load %arg3[%c120_163] : memref<144xf32, #tpu.memory_space<smem>>
    %1047 = vector.broadcast %1046 : f32 to vector<16x16xf32>
    %1048 = arith.mulf %1047, %1031 : vector<16x16xf32>
    %1049 = arith.addf %1028, %1048 : vector<16x16xf32>
    %c13_164 = arith.constant 13 : index
    %1050 = memref.load %arg3[%c13_164] : memref<144xf32, #tpu.memory_space<smem>>
    %1051 = vector.broadcast %1050 : f32 to vector<16x16xf32>
    %1052 = arith.mulf %1051, %1032 : vector<16x16xf32>
    %1053 = arith.addf %1037, %1052 : vector<16x16xf32>
    %c49_165 = arith.constant 49 : index
    %1054 = memref.load %arg3[%c49_165] : memref<144xf32, #tpu.memory_space<smem>>
    %1055 = vector.broadcast %1054 : f32 to vector<16x16xf32>
    %1056 = arith.mulf %1055, %1032 : vector<16x16xf32>
    %1057 = arith.addf %1041, %1056 : vector<16x16xf32>
    %c85_166 = arith.constant 85 : index
    %1058 = memref.load %arg3[%c85_166] : memref<144xf32, #tpu.memory_space<smem>>
    %1059 = vector.broadcast %1058 : f32 to vector<16x16xf32>
    %1060 = arith.mulf %1059, %1032 : vector<16x16xf32>
    %1061 = arith.addf %1045, %1060 : vector<16x16xf32>
    %c121_167 = arith.constant 121 : index
    %1062 = memref.load %arg3[%c121_167] : memref<144xf32, #tpu.memory_space<smem>>
    %1063 = vector.broadcast %1062 : f32 to vector<16x16xf32>
    %1064 = arith.mulf %1063, %1032 : vector<16x16xf32>
    %1065 = arith.addf %1049, %1064 : vector<16x16xf32>
    %c14_168 = arith.constant 14 : index
    %1066 = memref.load %arg3[%c14_168] : memref<144xf32, #tpu.memory_space<smem>>
    %1067 = vector.broadcast %1066 : f32 to vector<16x16xf32>
    %1068 = arith.mulf %1067, %1033 : vector<16x16xf32>
    %1069 = arith.addf %1053, %1068 : vector<16x16xf32>
    %c50_169 = arith.constant 50 : index
    %1070 = memref.load %arg3[%c50_169] : memref<144xf32, #tpu.memory_space<smem>>
    %1071 = vector.broadcast %1070 : f32 to vector<16x16xf32>
    %1072 = arith.mulf %1071, %1033 : vector<16x16xf32>
    %1073 = arith.addf %1057, %1072 : vector<16x16xf32>
    %c86_170 = arith.constant 86 : index
    %1074 = memref.load %arg3[%c86_170] : memref<144xf32, #tpu.memory_space<smem>>
    %1075 = vector.broadcast %1074 : f32 to vector<16x16xf32>
    %1076 = arith.mulf %1075, %1033 : vector<16x16xf32>
    %1077 = arith.addf %1061, %1076 : vector<16x16xf32>
    %c122_171 = arith.constant 122 : index
    %1078 = memref.load %arg3[%c122_171] : memref<144xf32, #tpu.memory_space<smem>>
    %1079 = vector.broadcast %1078 : f32 to vector<16x16xf32>
    %1080 = arith.mulf %1079, %1033 : vector<16x16xf32>
    %1081 = arith.addf %1065, %1080 : vector<16x16xf32>
    %c1_172 = arith.constant 1 : index
    %c2_173 = arith.constant 2 : index
    %c0_174 = arith.constant 0 : index
    %1082 = vector.load %arg9[%c1_172, %c2_173, %c0_174] : memref<4x18x18xf32, #tpu.memory_space<vmem>>, vector<1x16x18xf32>
    %1083 = vector.shape_cast %1082 : vector<1x16x18xf32> to vector<16x18xf32>
    %1084 = vector.extract_strided_slice %1083 {offsets = [0, 0], sizes = [16, 16], strides = [1, 1]} : vector<16x18xf32> to vector<16x16xf32>
    %1085 = vector.extract_strided_slice %1083 {offsets = [0, 1], sizes = [16, 16], strides = [1, 1]} : vector<16x18xf32> to vector<16x16xf32>
    %1086 = vector.extract_strided_slice %1083 {offsets = [0, 2], sizes = [16, 16], strides = [1, 1]} : vector<16x18xf32> to vector<16x16xf32>
    %c15_175 = arith.constant 15 : index
    %1087 = memref.load %arg3[%c15_175] : memref<144xf32, #tpu.memory_space<smem>>
    %1088 = vector.broadcast %1087 : f32 to vector<16x16xf32>
    %1089 = arith.mulf %1088, %1084 : vector<16x16xf32>
    %1090 = arith.addf %1069, %1089 : vector<16x16xf32>
    %c51_176 = arith.constant 51 : index
    %1091 = memref.load %arg3[%c51_176] : memref<144xf32, #tpu.memory_space<smem>>
    %1092 = vector.broadcast %1091 : f32 to vector<16x16xf32>
    %1093 = arith.mulf %1092, %1084 : vector<16x16xf32>
    %1094 = arith.addf %1073, %1093 : vector<16x16xf32>
    %c87_177 = arith.constant 87 : index
    %1095 = memref.load %arg3[%c87_177] : memref<144xf32, #tpu.memory_space<smem>>
    %1096 = vector.broadcast %1095 : f32 to vector<16x16xf32>
    %1097 = arith.mulf %1096, %1084 : vector<16x16xf32>
    %1098 = arith.addf %1077, %1097 : vector<16x16xf32>
    %c123_178 = arith.constant 123 : index
    %1099 = memref.load %arg3[%c123_178] : memref<144xf32, #tpu.memory_space<smem>>
    %1100 = vector.broadcast %1099 : f32 to vector<16x16xf32>
    %1101 = arith.mulf %1100, %1084 : vector<16x16xf32>
    %1102 = arith.addf %1081, %1101 : vector<16x16xf32>
    %c16_179 = arith.constant 16 : index
    %1103 = memref.load %arg3[%c16_179] : memref<144xf32, #tpu.memory_space<smem>>
    %1104 = vector.broadcast %1103 : f32 to vector<16x16xf32>
    %1105 = arith.mulf %1104, %1085 : vector<16x16xf32>
    %1106 = arith.addf %1090, %1105 : vector<16x16xf32>
    %c52_180 = arith.constant 52 : index
    %1107 = memref.load %arg3[%c52_180] : memref<144xf32, #tpu.memory_space<smem>>
    %1108 = vector.broadcast %1107 : f32 to vector<16x16xf32>
    %1109 = arith.mulf %1108, %1085 : vector<16x16xf32>
    %1110 = arith.addf %1094, %1109 : vector<16x16xf32>
    %c88_181 = arith.constant 88 : index
    %1111 = memref.load %arg3[%c88_181] : memref<144xf32, #tpu.memory_space<smem>>
    %1112 = vector.broadcast %1111 : f32 to vector<16x16xf32>
    %1113 = arith.mulf %1112, %1085 : vector<16x16xf32>
    %1114 = arith.addf %1098, %1113 : vector<16x16xf32>
    %c124_182 = arith.constant 124 : index
    %1115 = memref.load %arg3[%c124_182] : memref<144xf32, #tpu.memory_space<smem>>
    %1116 = vector.broadcast %1115 : f32 to vector<16x16xf32>
    %1117 = arith.mulf %1116, %1085 : vector<16x16xf32>
    %1118 = arith.addf %1102, %1117 : vector<16x16xf32>
    %c17_183 = arith.constant 17 : index
    %1119 = memref.load %arg3[%c17_183] : memref<144xf32, #tpu.memory_space<smem>>
    %1120 = vector.broadcast %1119 : f32 to vector<16x16xf32>
    %1121 = arith.mulf %1120, %1086 : vector<16x16xf32>
    %1122 = arith.addf %1106, %1121 : vector<16x16xf32>
    %c53_184 = arith.constant 53 : index
    %1123 = memref.load %arg3[%c53_184] : memref<144xf32, #tpu.memory_space<smem>>
    %1124 = vector.broadcast %1123 : f32 to vector<16x16xf32>
    %1125 = arith.mulf %1124, %1086 : vector<16x16xf32>
    %1126 = arith.addf %1110, %1125 : vector<16x16xf32>
    %c89_185 = arith.constant 89 : index
    %1127 = memref.load %arg3[%c89_185] : memref<144xf32, #tpu.memory_space<smem>>
    %1128 = vector.broadcast %1127 : f32 to vector<16x16xf32>
    %1129 = arith.mulf %1128, %1086 : vector<16x16xf32>
    %1130 = arith.addf %1114, %1129 : vector<16x16xf32>
    %c125_186 = arith.constant 125 : index
    %1131 = memref.load %arg3[%c125_186] : memref<144xf32, #tpu.memory_space<smem>>
    %1132 = vector.broadcast %1131 : f32 to vector<16x16xf32>
    %1133 = arith.mulf %1132, %1086 : vector<16x16xf32>
    %1134 = arith.addf %1118, %1133 : vector<16x16xf32>
    %c2_187 = arith.constant 2 : index
    %c0_188 = arith.constant 0 : index
    %c0_189 = arith.constant 0 : index
    %1135 = vector.load %arg9[%c2_187, %c0_188, %c0_189] : memref<4x18x18xf32, #tpu.memory_space<vmem>>, vector<1x16x18xf32>
    %1136 = vector.shape_cast %1135 : vector<1x16x18xf32> to vector<16x18xf32>
    %1137 = vector.extract_strided_slice %1136 {offsets = [0, 0], sizes = [16, 16], strides = [1, 1]} : vector<16x18xf32> to vector<16x16xf32>
    %1138 = vector.extract_strided_slice %1136 {offsets = [0, 1], sizes = [16, 16], strides = [1, 1]} : vector<16x18xf32> to vector<16x16xf32>
    %1139 = vector.extract_strided_slice %1136 {offsets = [0, 2], sizes = [16, 16], strides = [1, 1]} : vector<16x18xf32> to vector<16x16xf32>
    %c18_190 = arith.constant 18 : index
    %1140 = memref.load %arg3[%c18_190] : memref<144xf32, #tpu.memory_space<smem>>
    %1141 = vector.broadcast %1140 : f32 to vector<16x16xf32>
    %1142 = arith.mulf %1141, %1137 : vector<16x16xf32>
    %1143 = arith.addf %1122, %1142 : vector<16x16xf32>
    %c54_191 = arith.constant 54 : index
    %1144 = memref.load %arg3[%c54_191] : memref<144xf32, #tpu.memory_space<smem>>
    %1145 = vector.broadcast %1144 : f32 to vector<16x16xf32>
    %1146 = arith.mulf %1145, %1137 : vector<16x16xf32>
    %1147 = arith.addf %1126, %1146 : vector<16x16xf32>
    %c90_192 = arith.constant 90 : index
    %1148 = memref.load %arg3[%c90_192] : memref<144xf32, #tpu.memory_space<smem>>
    %1149 = vector.broadcast %1148 : f32 to vector<16x16xf32>
    %1150 = arith.mulf %1149, %1137 : vector<16x16xf32>
    %1151 = arith.addf %1130, %1150 : vector<16x16xf32>
    %c126_193 = arith.constant 126 : index
    %1152 = memref.load %arg3[%c126_193] : memref<144xf32, #tpu.memory_space<smem>>
    %1153 = vector.broadcast %1152 : f32 to vector<16x16xf32>
    %1154 = arith.mulf %1153, %1137 : vector<16x16xf32>
    %1155 = arith.addf %1134, %1154 : vector<16x16xf32>
    %c19_194 = arith.constant 19 : index
    %1156 = memref.load %arg3[%c19_194] : memref<144xf32, #tpu.memory_space<smem>>
    %1157 = vector.broadcast %1156 : f32 to vector<16x16xf32>
    %1158 = arith.mulf %1157, %1138 : vector<16x16xf32>
    %1159 = arith.addf %1143, %1158 : vector<16x16xf32>
    %c55_195 = arith.constant 55 : index
    %1160 = memref.load %arg3[%c55_195] : memref<144xf32, #tpu.memory_space<smem>>
    %1161 = vector.broadcast %1160 : f32 to vector<16x16xf32>
    %1162 = arith.mulf %1161, %1138 : vector<16x16xf32>
    %1163 = arith.addf %1147, %1162 : vector<16x16xf32>
    %c91_196 = arith.constant 91 : index
    %1164 = memref.load %arg3[%c91_196] : memref<144xf32, #tpu.memory_space<smem>>
    %1165 = vector.broadcast %1164 : f32 to vector<16x16xf32>
    %1166 = arith.mulf %1165, %1138 : vector<16x16xf32>
    %1167 = arith.addf %1151, %1166 : vector<16x16xf32>
    %c127_197 = arith.constant 127 : index
    %1168 = memref.load %arg3[%c127_197] : memref<144xf32, #tpu.memory_space<smem>>
    %1169 = vector.broadcast %1168 : f32 to vector<16x16xf32>
    %1170 = arith.mulf %1169, %1138 : vector<16x16xf32>
    %1171 = arith.addf %1155, %1170 : vector<16x16xf32>
    %c20_198 = arith.constant 20 : index
    %1172 = memref.load %arg3[%c20_198] : memref<144xf32, #tpu.memory_space<smem>>
    %1173 = vector.broadcast %1172 : f32 to vector<16x16xf32>
    %1174 = arith.mulf %1173, %1139 : vector<16x16xf32>
    %1175 = arith.addf %1159, %1174 : vector<16x16xf32>
    %c56_199 = arith.constant 56 : index
    %1176 = memref.load %arg3[%c56_199] : memref<144xf32, #tpu.memory_space<smem>>
    %1177 = vector.broadcast %1176 : f32 to vector<16x16xf32>
    %1178 = arith.mulf %1177, %1139 : vector<16x16xf32>
    %1179 = arith.addf %1163, %1178 : vector<16x16xf32>
    %c92_200 = arith.constant 92 : index
    %1180 = memref.load %arg3[%c92_200] : memref<144xf32, #tpu.memory_space<smem>>
    %1181 = vector.broadcast %1180 : f32 to vector<16x16xf32>
    %1182 = arith.mulf %1181, %1139 : vector<16x16xf32>
    %1183 = arith.addf %1167, %1182 : vector<16x16xf32>
    %c128_201 = arith.constant 128 : index
    %1184 = memref.load %arg3[%c128_201] : memref<144xf32, #tpu.memory_space<smem>>
    %1185 = vector.broadcast %1184 : f32 to vector<16x16xf32>
    %1186 = arith.mulf %1185, %1139 : vector<16x16xf32>
    %1187 = arith.addf %1171, %1186 : vector<16x16xf32>
    %c2_202 = arith.constant 2 : index
    %c1_203 = arith.constant 1 : index
    %c0_204 = arith.constant 0 : index
    %1188 = vector.load %arg9[%c2_202, %c1_203, %c0_204] : memref<4x18x18xf32, #tpu.memory_space<vmem>>, vector<1x16x18xf32>
    %1189 = vector.shape_cast %1188 : vector<1x16x18xf32> to vector<16x18xf32>
    %1190 = vector.extract_strided_slice %1189 {offsets = [0, 0], sizes = [16, 16], strides = [1, 1]} : vector<16x18xf32> to vector<16x16xf32>
    %1191 = vector.extract_strided_slice %1189 {offsets = [0, 1], sizes = [16, 16], strides = [1, 1]} : vector<16x18xf32> to vector<16x16xf32>
    %1192 = vector.extract_strided_slice %1189 {offsets = [0, 2], sizes = [16, 16], strides = [1, 1]} : vector<16x18xf32> to vector<16x16xf32>
    %c21_205 = arith.constant 21 : index
    %1193 = memref.load %arg3[%c21_205] : memref<144xf32, #tpu.memory_space<smem>>
    %1194 = vector.broadcast %1193 : f32 to vector<16x16xf32>
    %1195 = arith.mulf %1194, %1190 : vector<16x16xf32>
    %1196 = arith.addf %1175, %1195 : vector<16x16xf32>
    %c57_206 = arith.constant 57 : index
    %1197 = memref.load %arg3[%c57_206] : memref<144xf32, #tpu.memory_space<smem>>
    %1198 = vector.broadcast %1197 : f32 to vector<16x16xf32>
    %1199 = arith.mulf %1198, %1190 : vector<16x16xf32>
    %1200 = arith.addf %1179, %1199 : vector<16x16xf32>
    %c93_207 = arith.constant 93 : index
    %1201 = memref.load %arg3[%c93_207] : memref<144xf32, #tpu.memory_space<smem>>
    %1202 = vector.broadcast %1201 : f32 to vector<16x16xf32>
    %1203 = arith.mulf %1202, %1190 : vector<16x16xf32>
    %1204 = arith.addf %1183, %1203 : vector<16x16xf32>
    %c129_208 = arith.constant 129 : index
    %1205 = memref.load %arg3[%c129_208] : memref<144xf32, #tpu.memory_space<smem>>
    %1206 = vector.broadcast %1205 : f32 to vector<16x16xf32>
    %1207 = arith.mulf %1206, %1190 : vector<16x16xf32>
    %1208 = arith.addf %1187, %1207 : vector<16x16xf32>
    %c22_209 = arith.constant 22 : index
    %1209 = memref.load %arg3[%c22_209] : memref<144xf32, #tpu.memory_space<smem>>
    %1210 = vector.broadcast %1209 : f32 to vector<16x16xf32>
    %1211 = arith.mulf %1210, %1191 : vector<16x16xf32>
    %1212 = arith.addf %1196, %1211 : vector<16x16xf32>
    %c58_210 = arith.constant 58 : index
    %1213 = memref.load %arg3[%c58_210] : memref<144xf32, #tpu.memory_space<smem>>
    %1214 = vector.broadcast %1213 : f32 to vector<16x16xf32>
    %1215 = arith.mulf %1214, %1191 : vector<16x16xf32>
    %1216 = arith.addf %1200, %1215 : vector<16x16xf32>
    %c94_211 = arith.constant 94 : index
    %1217 = memref.load %arg3[%c94_211] : memref<144xf32, #tpu.memory_space<smem>>
    %1218 = vector.broadcast %1217 : f32 to vector<16x16xf32>
    %1219 = arith.mulf %1218, %1191 : vector<16x16xf32>
    %1220 = arith.addf %1204, %1219 : vector<16x16xf32>
    %c130_212 = arith.constant 130 : index
    %1221 = memref.load %arg3[%c130_212] : memref<144xf32, #tpu.memory_space<smem>>
    %1222 = vector.broadcast %1221 : f32 to vector<16x16xf32>
    %1223 = arith.mulf %1222, %1191 : vector<16x16xf32>
    %1224 = arith.addf %1208, %1223 : vector<16x16xf32>
    %c23_213 = arith.constant 23 : index
    %1225 = memref.load %arg3[%c23_213] : memref<144xf32, #tpu.memory_space<smem>>
    %1226 = vector.broadcast %1225 : f32 to vector<16x16xf32>
    %1227 = arith.mulf %1226, %1192 : vector<16x16xf32>
    %1228 = arith.addf %1212, %1227 : vector<16x16xf32>
    %c59_214 = arith.constant 59 : index
    %1229 = memref.load %arg3[%c59_214] : memref<144xf32, #tpu.memory_space<smem>>
    %1230 = vector.broadcast %1229 : f32 to vector<16x16xf32>
    %1231 = arith.mulf %1230, %1192 : vector<16x16xf32>
    %1232 = arith.addf %1216, %1231 : vector<16x16xf32>
    %c95_215 = arith.constant 95 : index
    %1233 = memref.load %arg3[%c95_215] : memref<144xf32, #tpu.memory_space<smem>>
    %1234 = vector.broadcast %1233 : f32 to vector<16x16xf32>
    %1235 = arith.mulf %1234, %1192 : vector<16x16xf32>
    %1236 = arith.addf %1220, %1235 : vector<16x16xf32>
    %c131_216 = arith.constant 131 : index
    %1237 = memref.load %arg3[%c131_216] : memref<144xf32, #tpu.memory_space<smem>>
    %1238 = vector.broadcast %1237 : f32 to vector<16x16xf32>
    %1239 = arith.mulf %1238, %1192 : vector<16x16xf32>
    %1240 = arith.addf %1224, %1239 : vector<16x16xf32>
    %c2_217 = arith.constant 2 : index
    %c2_218 = arith.constant 2 : index
    %c0_219 = arith.constant 0 : index
    %1241 = vector.load %arg9[%c2_217, %c2_218, %c0_219] : memref<4x18x18xf32, #tpu.memory_space<vmem>>, vector<1x16x18xf32>
    %1242 = vector.shape_cast %1241 : vector<1x16x18xf32> to vector<16x18xf32>
    %1243 = vector.extract_strided_slice %1242 {offsets = [0, 0], sizes = [16, 16], strides = [1, 1]} : vector<16x18xf32> to vector<16x16xf32>
    %1244 = vector.extract_strided_slice %1242 {offsets = [0, 1], sizes = [16, 16], strides = [1, 1]} : vector<16x18xf32> to vector<16x16xf32>
    %1245 = vector.extract_strided_slice %1242 {offsets = [0, 2], sizes = [16, 16], strides = [1, 1]} : vector<16x18xf32> to vector<16x16xf32>
    %c24_220 = arith.constant 24 : index
    %1246 = memref.load %arg3[%c24_220] : memref<144xf32, #tpu.memory_space<smem>>
    %1247 = vector.broadcast %1246 : f32 to vector<16x16xf32>
    %1248 = arith.mulf %1247, %1243 : vector<16x16xf32>
    %1249 = arith.addf %1228, %1248 : vector<16x16xf32>
    %c60_221 = arith.constant 60 : index
    %1250 = memref.load %arg3[%c60_221] : memref<144xf32, #tpu.memory_space<smem>>
    %1251 = vector.broadcast %1250 : f32 to vector<16x16xf32>
    %1252 = arith.mulf %1251, %1243 : vector<16x16xf32>
    %1253 = arith.addf %1232, %1252 : vector<16x16xf32>
    %c96_222 = arith.constant 96 : index
    %1254 = memref.load %arg3[%c96_222] : memref<144xf32, #tpu.memory_space<smem>>
    %1255 = vector.broadcast %1254 : f32 to vector<16x16xf32>
    %1256 = arith.mulf %1255, %1243 : vector<16x16xf32>
    %1257 = arith.addf %1236, %1256 : vector<16x16xf32>
    %c132_223 = arith.constant 132 : index
    %1258 = memref.load %arg3[%c132_223] : memref<144xf32, #tpu.memory_space<smem>>
    %1259 = vector.broadcast %1258 : f32 to vector<16x16xf32>
    %1260 = arith.mulf %1259, %1243 : vector<16x16xf32>
    %1261 = arith.addf %1240, %1260 : vector<16x16xf32>
    %c25_224 = arith.constant 25 : index
    %1262 = memref.load %arg3[%c25_224] : memref<144xf32, #tpu.memory_space<smem>>
    %1263 = vector.broadcast %1262 : f32 to vector<16x16xf32>
    %1264 = arith.mulf %1263, %1244 : vector<16x16xf32>
    %1265 = arith.addf %1249, %1264 : vector<16x16xf32>
    %c61_225 = arith.constant 61 : index
    %1266 = memref.load %arg3[%c61_225] : memref<144xf32, #tpu.memory_space<smem>>
    %1267 = vector.broadcast %1266 : f32 to vector<16x16xf32>
    %1268 = arith.mulf %1267, %1244 : vector<16x16xf32>
    %1269 = arith.addf %1253, %1268 : vector<16x16xf32>
    %c97_226 = arith.constant 97 : index
    %1270 = memref.load %arg3[%c97_226] : memref<144xf32, #tpu.memory_space<smem>>
    %1271 = vector.broadcast %1270 : f32 to vector<16x16xf32>
    %1272 = arith.mulf %1271, %1244 : vector<16x16xf32>
    %1273 = arith.addf %1257, %1272 : vector<16x16xf32>
    %c133_227 = arith.constant 133 : index
    %1274 = memref.load %arg3[%c133_227] : memref<144xf32, #tpu.memory_space<smem>>
    %1275 = vector.broadcast %1274 : f32 to vector<16x16xf32>
    %1276 = arith.mulf %1275, %1244 : vector<16x16xf32>
    %1277 = arith.addf %1261, %1276 : vector<16x16xf32>
    %c26_228 = arith.constant 26 : index
    %1278 = memref.load %arg3[%c26_228] : memref<144xf32, #tpu.memory_space<smem>>
    %1279 = vector.broadcast %1278 : f32 to vector<16x16xf32>
    %1280 = arith.mulf %1279, %1245 : vector<16x16xf32>
    %1281 = arith.addf %1265, %1280 : vector<16x16xf32>
    %c62_229 = arith.constant 62 : index
    %1282 = memref.load %arg3[%c62_229] : memref<144xf32, #tpu.memory_space<smem>>
    %1283 = vector.broadcast %1282 : f32 to vector<16x16xf32>
    %1284 = arith.mulf %1283, %1245 : vector<16x16xf32>
    %1285 = arith.addf %1269, %1284 : vector<16x16xf32>
    %c98_230 = arith.constant 98 : index
    %1286 = memref.load %arg3[%c98_230] : memref<144xf32, #tpu.memory_space<smem>>
    %1287 = vector.broadcast %1286 : f32 to vector<16x16xf32>
    %1288 = arith.mulf %1287, %1245 : vector<16x16xf32>
    %1289 = arith.addf %1273, %1288 : vector<16x16xf32>
    %c134_231 = arith.constant 134 : index
    %1290 = memref.load %arg3[%c134_231] : memref<144xf32, #tpu.memory_space<smem>>
    %1291 = vector.broadcast %1290 : f32 to vector<16x16xf32>
    %1292 = arith.mulf %1291, %1245 : vector<16x16xf32>
    %1293 = arith.addf %1277, %1292 : vector<16x16xf32>
    %c3_232 = arith.constant 3 : index
    %c0_233 = arith.constant 0 : index
    %c0_234 = arith.constant 0 : index
    %1294 = vector.load %arg9[%c3_232, %c0_233, %c0_234] : memref<4x18x18xf32, #tpu.memory_space<vmem>>, vector<1x16x18xf32>
    %1295 = vector.shape_cast %1294 : vector<1x16x18xf32> to vector<16x18xf32>
    %1296 = vector.extract_strided_slice %1295 {offsets = [0, 0], sizes = [16, 16], strides = [1, 1]} : vector<16x18xf32> to vector<16x16xf32>
    %1297 = vector.extract_strided_slice %1295 {offsets = [0, 1], sizes = [16, 16], strides = [1, 1]} : vector<16x18xf32> to vector<16x16xf32>
    %1298 = vector.extract_strided_slice %1295 {offsets = [0, 2], sizes = [16, 16], strides = [1, 1]} : vector<16x18xf32> to vector<16x16xf32>
    %c27_235 = arith.constant 27 : index
    %1299 = memref.load %arg3[%c27_235] : memref<144xf32, #tpu.memory_space<smem>>
    %1300 = vector.broadcast %1299 : f32 to vector<16x16xf32>
    %1301 = arith.mulf %1300, %1296 : vector<16x16xf32>
    %1302 = arith.addf %1281, %1301 : vector<16x16xf32>
    %c63_236 = arith.constant 63 : index
    %1303 = memref.load %arg3[%c63_236] : memref<144xf32, #tpu.memory_space<smem>>
    %1304 = vector.broadcast %1303 : f32 to vector<16x16xf32>
    %1305 = arith.mulf %1304, %1296 : vector<16x16xf32>
    %1306 = arith.addf %1285, %1305 : vector<16x16xf32>
    %c99_237 = arith.constant 99 : index
    %1307 = memref.load %arg3[%c99_237] : memref<144xf32, #tpu.memory_space<smem>>
    %1308 = vector.broadcast %1307 : f32 to vector<16x16xf32>
    %1309 = arith.mulf %1308, %1296 : vector<16x16xf32>
    %1310 = arith.addf %1289, %1309 : vector<16x16xf32>
    %c135_238 = arith.constant 135 : index
    %1311 = memref.load %arg3[%c135_238] : memref<144xf32, #tpu.memory_space<smem>>
    %1312 = vector.broadcast %1311 : f32 to vector<16x16xf32>
    %1313 = arith.mulf %1312, %1296 : vector<16x16xf32>
    %1314 = arith.addf %1293, %1313 : vector<16x16xf32>
    %c28_239 = arith.constant 28 : index
    %1315 = memref.load %arg3[%c28_239] : memref<144xf32, #tpu.memory_space<smem>>
    %1316 = vector.broadcast %1315 : f32 to vector<16x16xf32>
    %1317 = arith.mulf %1316, %1297 : vector<16x16xf32>
    %1318 = arith.addf %1302, %1317 : vector<16x16xf32>
    %c64_240 = arith.constant 64 : index
    %1319 = memref.load %arg3[%c64_240] : memref<144xf32, #tpu.memory_space<smem>>
    %1320 = vector.broadcast %1319 : f32 to vector<16x16xf32>
    %1321 = arith.mulf %1320, %1297 : vector<16x16xf32>
    %1322 = arith.addf %1306, %1321 : vector<16x16xf32>
    %c100_241 = arith.constant 100 : index
    %1323 = memref.load %arg3[%c100_241] : memref<144xf32, #tpu.memory_space<smem>>
    %1324 = vector.broadcast %1323 : f32 to vector<16x16xf32>
    %1325 = arith.mulf %1324, %1297 : vector<16x16xf32>
    %1326 = arith.addf %1310, %1325 : vector<16x16xf32>
    %c136_242 = arith.constant 136 : index
    %1327 = memref.load %arg3[%c136_242] : memref<144xf32, #tpu.memory_space<smem>>
    %1328 = vector.broadcast %1327 : f32 to vector<16x16xf32>
    %1329 = arith.mulf %1328, %1297 : vector<16x16xf32>
    %1330 = arith.addf %1314, %1329 : vector<16x16xf32>
    %c29_243 = arith.constant 29 : index
    %1331 = memref.load %arg3[%c29_243] : memref<144xf32, #tpu.memory_space<smem>>
    %1332 = vector.broadcast %1331 : f32 to vector<16x16xf32>
    %1333 = arith.mulf %1332, %1298 : vector<16x16xf32>
    %1334 = arith.addf %1318, %1333 : vector<16x16xf32>
    %c65_244 = arith.constant 65 : index
    %1335 = memref.load %arg3[%c65_244] : memref<144xf32, #tpu.memory_space<smem>>
    %1336 = vector.broadcast %1335 : f32 to vector<16x16xf32>
    %1337 = arith.mulf %1336, %1298 : vector<16x16xf32>
    %1338 = arith.addf %1322, %1337 : vector<16x16xf32>
    %c101_245 = arith.constant 101 : index
    %1339 = memref.load %arg3[%c101_245] : memref<144xf32, #tpu.memory_space<smem>>
    %1340 = vector.broadcast %1339 : f32 to vector<16x16xf32>
    %1341 = arith.mulf %1340, %1298 : vector<16x16xf32>
    %1342 = arith.addf %1326, %1341 : vector<16x16xf32>
    %c137_246 = arith.constant 137 : index
    %1343 = memref.load %arg3[%c137_246] : memref<144xf32, #tpu.memory_space<smem>>
    %1344 = vector.broadcast %1343 : f32 to vector<16x16xf32>
    %1345 = arith.mulf %1344, %1298 : vector<16x16xf32>
    %1346 = arith.addf %1330, %1345 : vector<16x16xf32>
    %c3_247 = arith.constant 3 : index
    %c1_248 = arith.constant 1 : index
    %c0_249 = arith.constant 0 : index
    %1347 = vector.load %arg9[%c3_247, %c1_248, %c0_249] : memref<4x18x18xf32, #tpu.memory_space<vmem>>, vector<1x16x18xf32>
    %1348 = vector.shape_cast %1347 : vector<1x16x18xf32> to vector<16x18xf32>
    %1349 = vector.extract_strided_slice %1348 {offsets = [0, 0], sizes = [16, 16], strides = [1, 1]} : vector<16x18xf32> to vector<16x16xf32>
    %1350 = vector.extract_strided_slice %1348 {offsets = [0, 1], sizes = [16, 16], strides = [1, 1]} : vector<16x18xf32> to vector<16x16xf32>
    %1351 = vector.extract_strided_slice %1348 {offsets = [0, 2], sizes = [16, 16], strides = [1, 1]} : vector<16x18xf32> to vector<16x16xf32>
    %c30_250 = arith.constant 30 : index
    %1352 = memref.load %arg3[%c30_250] : memref<144xf32, #tpu.memory_space<smem>>
    %1353 = vector.broadcast %1352 : f32 to vector<16x16xf32>
    %1354 = arith.mulf %1353, %1349 : vector<16x16xf32>
    %1355 = arith.addf %1334, %1354 : vector<16x16xf32>
    %c66_251 = arith.constant 66 : index
    %1356 = memref.load %arg3[%c66_251] : memref<144xf32, #tpu.memory_space<smem>>
    %1357 = vector.broadcast %1356 : f32 to vector<16x16xf32>
    %1358 = arith.mulf %1357, %1349 : vector<16x16xf32>
    %1359 = arith.addf %1338, %1358 : vector<16x16xf32>
    %c102_252 = arith.constant 102 : index
    %1360 = memref.load %arg3[%c102_252] : memref<144xf32, #tpu.memory_space<smem>>
    %1361 = vector.broadcast %1360 : f32 to vector<16x16xf32>
    %1362 = arith.mulf %1361, %1349 : vector<16x16xf32>
    %1363 = arith.addf %1342, %1362 : vector<16x16xf32>
    %c138_253 = arith.constant 138 : index
    %1364 = memref.load %arg3[%c138_253] : memref<144xf32, #tpu.memory_space<smem>>
    %1365 = vector.broadcast %1364 : f32 to vector<16x16xf32>
    %1366 = arith.mulf %1365, %1349 : vector<16x16xf32>
    %1367 = arith.addf %1346, %1366 : vector<16x16xf32>
    %c31_254 = arith.constant 31 : index
    %1368 = memref.load %arg3[%c31_254] : memref<144xf32, #tpu.memory_space<smem>>
    %1369 = vector.broadcast %1368 : f32 to vector<16x16xf32>
    %1370 = arith.mulf %1369, %1350 : vector<16x16xf32>
    %1371 = arith.addf %1355, %1370 : vector<16x16xf32>
    %c67_255 = arith.constant 67 : index
    %1372 = memref.load %arg3[%c67_255] : memref<144xf32, #tpu.memory_space<smem>>
    %1373 = vector.broadcast %1372 : f32 to vector<16x16xf32>
    %1374 = arith.mulf %1373, %1350 : vector<16x16xf32>
    %1375 = arith.addf %1359, %1374 : vector<16x16xf32>
    %c103_256 = arith.constant 103 : index
    %1376 = memref.load %arg3[%c103_256] : memref<144xf32, #tpu.memory_space<smem>>
    %1377 = vector.broadcast %1376 : f32 to vector<16x16xf32>
    %1378 = arith.mulf %1377, %1350 : vector<16x16xf32>
    %1379 = arith.addf %1363, %1378 : vector<16x16xf32>
    %c139_257 = arith.constant 139 : index
    %1380 = memref.load %arg3[%c139_257] : memref<144xf32, #tpu.memory_space<smem>>
    %1381 = vector.broadcast %1380 : f32 to vector<16x16xf32>
    %1382 = arith.mulf %1381, %1350 : vector<16x16xf32>
    %1383 = arith.addf %1367, %1382 : vector<16x16xf32>
    %c32_258 = arith.constant 32 : index
    %1384 = memref.load %arg3[%c32_258] : memref<144xf32, #tpu.memory_space<smem>>
    %1385 = vector.broadcast %1384 : f32 to vector<16x16xf32>
    %1386 = arith.mulf %1385, %1351 : vector<16x16xf32>
    %1387 = arith.addf %1371, %1386 : vector<16x16xf32>
    %c68_259 = arith.constant 68 : index
    %1388 = memref.load %arg3[%c68_259] : memref<144xf32, #tpu.memory_space<smem>>
    %1389 = vector.broadcast %1388 : f32 to vector<16x16xf32>
    %1390 = arith.mulf %1389, %1351 : vector<16x16xf32>
    %1391 = arith.addf %1375, %1390 : vector<16x16xf32>
    %c104_260 = arith.constant 104 : index
    %1392 = memref.load %arg3[%c104_260] : memref<144xf32, #tpu.memory_space<smem>>
    %1393 = vector.broadcast %1392 : f32 to vector<16x16xf32>
    %1394 = arith.mulf %1393, %1351 : vector<16x16xf32>
    %1395 = arith.addf %1379, %1394 : vector<16x16xf32>
    %c140_261 = arith.constant 140 : index
    %1396 = memref.load %arg3[%c140_261] : memref<144xf32, #tpu.memory_space<smem>>
    %1397 = vector.broadcast %1396 : f32 to vector<16x16xf32>
    %1398 = arith.mulf %1397, %1351 : vector<16x16xf32>
    %1399 = arith.addf %1383, %1398 : vector<16x16xf32>
    %c3_262 = arith.constant 3 : index
    %c2_263 = arith.constant 2 : index
    %c0_264 = arith.constant 0 : index
    %1400 = vector.load %arg9[%c3_262, %c2_263, %c0_264] : memref<4x18x18xf32, #tpu.memory_space<vmem>>, vector<1x16x18xf32>
    %1401 = vector.shape_cast %1400 : vector<1x16x18xf32> to vector<16x18xf32>
    %1402 = vector.extract_strided_slice %1401 {offsets = [0, 0], sizes = [16, 16], strides = [1, 1]} : vector<16x18xf32> to vector<16x16xf32>
    %1403 = vector.extract_strided_slice %1401 {offsets = [0, 1], sizes = [16, 16], strides = [1, 1]} : vector<16x18xf32> to vector<16x16xf32>
    %1404 = vector.extract_strided_slice %1401 {offsets = [0, 2], sizes = [16, 16], strides = [1, 1]} : vector<16x18xf32> to vector<16x16xf32>
    %c33_265 = arith.constant 33 : index
    %1405 = memref.load %arg3[%c33_265] : memref<144xf32, #tpu.memory_space<smem>>
    %1406 = vector.broadcast %1405 : f32 to vector<16x16xf32>
    %1407 = arith.mulf %1406, %1402 : vector<16x16xf32>
    %1408 = arith.addf %1387, %1407 : vector<16x16xf32>
    %c69_266 = arith.constant 69 : index
    %1409 = memref.load %arg3[%c69_266] : memref<144xf32, #tpu.memory_space<smem>>
    %1410 = vector.broadcast %1409 : f32 to vector<16x16xf32>
    %1411 = arith.mulf %1410, %1402 : vector<16x16xf32>
    %1412 = arith.addf %1391, %1411 : vector<16x16xf32>
    %c105_267 = arith.constant 105 : index
    %1413 = memref.load %arg3[%c105_267] : memref<144xf32, #tpu.memory_space<smem>>
    %1414 = vector.broadcast %1413 : f32 to vector<16x16xf32>
    %1415 = arith.mulf %1414, %1402 : vector<16x16xf32>
    %1416 = arith.addf %1395, %1415 : vector<16x16xf32>
    %c141_268 = arith.constant 141 : index
    %1417 = memref.load %arg3[%c141_268] : memref<144xf32, #tpu.memory_space<smem>>
    %1418 = vector.broadcast %1417 : f32 to vector<16x16xf32>
    %1419 = arith.mulf %1418, %1402 : vector<16x16xf32>
    %1420 = arith.addf %1399, %1419 : vector<16x16xf32>
    %c34_269 = arith.constant 34 : index
    %1421 = memref.load %arg3[%c34_269] : memref<144xf32, #tpu.memory_space<smem>>
    %1422 = vector.broadcast %1421 : f32 to vector<16x16xf32>
    %1423 = arith.mulf %1422, %1403 : vector<16x16xf32>
    %1424 = arith.addf %1408, %1423 : vector<16x16xf32>
    %c70_270 = arith.constant 70 : index
    %1425 = memref.load %arg3[%c70_270] : memref<144xf32, #tpu.memory_space<smem>>
    %1426 = vector.broadcast %1425 : f32 to vector<16x16xf32>
    %1427 = arith.mulf %1426, %1403 : vector<16x16xf32>
    %1428 = arith.addf %1412, %1427 : vector<16x16xf32>
    %c106_271 = arith.constant 106 : index
    %1429 = memref.load %arg3[%c106_271] : memref<144xf32, #tpu.memory_space<smem>>
    %1430 = vector.broadcast %1429 : f32 to vector<16x16xf32>
    %1431 = arith.mulf %1430, %1403 : vector<16x16xf32>
    %1432 = arith.addf %1416, %1431 : vector<16x16xf32>
    %c142_272 = arith.constant 142 : index
    %1433 = memref.load %arg3[%c142_272] : memref<144xf32, #tpu.memory_space<smem>>
    %1434 = vector.broadcast %1433 : f32 to vector<16x16xf32>
    %1435 = arith.mulf %1434, %1403 : vector<16x16xf32>
    %1436 = arith.addf %1420, %1435 : vector<16x16xf32>
    %c35_273 = arith.constant 35 : index
    %1437 = memref.load %arg3[%c35_273] : memref<144xf32, #tpu.memory_space<smem>>
    %1438 = vector.broadcast %1437 : f32 to vector<16x16xf32>
    %1439 = arith.mulf %1438, %1404 : vector<16x16xf32>
    %1440 = arith.addf %1424, %1439 : vector<16x16xf32>
    %c71_274 = arith.constant 71 : index
    %1441 = memref.load %arg3[%c71_274] : memref<144xf32, #tpu.memory_space<smem>>
    %1442 = vector.broadcast %1441 : f32 to vector<16x16xf32>
    %1443 = arith.mulf %1442, %1404 : vector<16x16xf32>
    %1444 = arith.addf %1428, %1443 : vector<16x16xf32>
    %c107_275 = arith.constant 107 : index
    %1445 = memref.load %arg3[%c107_275] : memref<144xf32, #tpu.memory_space<smem>>
    %1446 = vector.broadcast %1445 : f32 to vector<16x16xf32>
    %1447 = arith.mulf %1446, %1404 : vector<16x16xf32>
    %1448 = arith.addf %1432, %1447 : vector<16x16xf32>
    %c143_276 = arith.constant 143 : index
    %1449 = memref.load %arg3[%c143_276] : memref<144xf32, #tpu.memory_space<smem>>
    %1450 = vector.broadcast %1449 : f32 to vector<16x16xf32>
    %1451 = arith.mulf %1450, %1404 : vector<16x16xf32>
    %1452 = arith.addf %1436, %1451 : vector<16x16xf32>
    %1453 = vector.shape_cast %1440 : vector<16x16xf32> to vector<1x16x16xf32>
    %1454 = vector.shape_cast %1444 : vector<16x16xf32> to vector<1x16x16xf32>
    %1455 = vector.shape_cast %1448 : vector<16x16xf32> to vector<1x16x16xf32>
    %1456 = vector.shape_cast %1452 : vector<16x16xf32> to vector<1x16x16xf32>
    %1457 = tpu.concatenate %1453, %1454, %1455, %1456 in 0 : vector<1x16x16xf32>, vector<1x16x16xf32>, vector<1x16x16xf32>, vector<1x16x16xf32> -> vector<4x16x16xf32>
    %c0_277 = arith.constant 0 : index
    %c0_278 = arith.constant 0 : index
    %c0_279 = arith.constant 0 : index
    %c0_280 = arith.constant 0 : index
    %1458 = vector.load %arg7[%c0_277, %c0_278, %c0_279, %c0_280] : memref<1x4x16x16xf32, #tpu.memory_space<vmem>>, vector<1x4x16x16xf32>
    %1459 = vector.shape_cast %1458 : vector<1x4x16x16xf32> to vector<4x16x16xf32>
    %1460 = vector.shape_cast %1457 : vector<4x16x16xf32> to vector<1x4x16x16xf32>
    tpu.vector_store %arg7[%c0_277, %c0_278, %c0_279, %c0_280], %1460 {strides = array<i32>} : memref<1x4x16x16xf32, #tpu.memory_space<vmem>>, vector<1x4x16x16xf32>,
    return
  }
  func.func @transform_0(%arg0: i32, %arg1: memref<144xf32, #tpu.memory_space<smem>>, %arg2: memref<4xf32, #tpu.memory_space<smem>>, %arg3: memref<144xf32, #tpu.memory_space<smem>>, %arg4: memref<4xf32, #tpu.memory_space<smem>>, %arg5: memref<2x8xf32, #tpu.memory_space<smem>>) -> (i32, i32, i32, i32) {
    %c0_i32 = arith.constant 0 : i32
    %c0_i32_0 = arith.constant 0 : i32
    %c0_i32_1 = arith.constant 0 : i32
    %c0_i32_2 = arith.constant 0 : i32
    return %arg0, %c0_i32, %c0_i32_0, %c0_i32_1 : i32, i32, i32, i32
  }
  func.func @transform_1(%arg0: i32, %arg1: memref<144xf32, #tpu.memory_space<smem>>, %arg2: memref<4xf32, #tpu.memory_space<smem>>, %arg3: memref<144xf32, #tpu.memory_space<smem>>, %arg4: memref<4xf32, #tpu.memory_space<smem>>, %arg5: memref<2x8xf32, #tpu.memory_space<smem>>) -> (i32, i32, i32, i32) {
    %c0_i32 = arith.constant 0 : i32
    %c0_i32_0 = arith.constant 0 : i32
    %c0_i32_1 = arith.constant 0 : i32
    %c0_i32_2 = arith.constant 0 : i32
    return %arg0, %c0_i32, %c0_i32_0, %c0_i32_1 : i32, i32, i32, i32
  }
}

</mosaic_0001>

<bundles_post_ra>
// kernel: tpu_custom_call.1
= control target key start
LH: loop header
LB: loop body
LE: loop exit
PB: predicated region body
PF: predicated region fallthrough
CT: control target
= control target key end

     0   :  { %s7046_s0 = inlined_call_operand.hbm [shape: f32[144], index: 0, kind: input, shape index: {}]   ;;  %s7047_s5 = inlined_call_operand.hbm [shape: f32[2,4,16,16], index: 5, kind: input, shape index: {}]   ;;  %s7048_s6 = inlined_call_operand.hbm [shape: f32[2,4,16,16], index: 6, kind: output, shape index: {}]   ;;  %s7049_s1 = inlined_call_operand.vmem [shape: f32[4], index: 1, kind: input, shape index: {}]   ;;  %s7050_s2 = inlined_call_operand.vmem [shape: f32[144], index: 2, kind: input, shape index: {}]   ;;  %s7051_s3 = inlined_call_operand.vmem [shape: f32[4], index: 3, kind: input, shape index: {}]   ;;  %s7052_s4 = inlined_call_operand.vmem [shape: f32[2,8], index: 4, kind: input, shape index: {}]  }
   0x1   :  { %7063 = sst [smem:[#allocation20_spill]] %s7047_s5  ;;  %s4369_s23 = scalar_lea.hbm %s7046_s0, 32 }
   0x2   :  { %p4370_p0 = scmp.ne.s32.totalorder %s7046_s0, %s4369_s23  ;;  %p4373_p1 = scmp.lt.u32.totalorder %s4369_s23, %s7046_s0 }
   0x4   :  { %p4375_p2 = pnand %p4373_p1, %p4370_p0 }
   0x6   :  { %4378 = shalt.err (!%p4375_p2)  }
   0x7   :  { %s4527_s28 = smov [#allocation5]   ;;  %s13_s9 = sshll.u32 %s7049_s1, 4  ;;  %s14_s9 = int_to_ptr.vmem [resolvable:$true] %s13_s9 }
   0x8   :  { %12 = dma.hbm_to_smem %s7046_s0, 32, %s4527_s28, [#allocation4] }
   0x9   :  { %s17_s12 = sshll.u32 %s7050_s2, 4  ;;  %s4379_s13 = scalar_lea.vmem %s14_s9, 16  ;;  %s18_s12 = int_to_ptr.vmem [resolvable:$true] %s17_s12 }
   0xa   :  { %p4380_p3 = scmp.ne.s32.totalorder %s14_s9, %s4379_s13  ;;  %p4384_p4 = scmp.lt.s32.totalorder %s14_s9, %s14_s9 }
   0xb   :  { %p4385_p5 = scmp.lt.s32.totalorder %s4379_s13, %s4379_s13 }
   0xd   :  { %p4386_p6 = por %p4385_p5, %p4384_p4 }
   0xf   :  { %p4387_p7 = pnand %p4386_p6, %p4380_p3 }
  0x11   :  { %4390 = shalt.err (!%p4387_p7)  }
  0x12   :  { %s4528_s14 = smov [#allocation6]   ;;  %s21_s16 = sshll.u32 %s7051_s3, 4  ;;  %s22_s16 = int_to_ptr.vmem [resolvable:$true] %s21_s16 }
  0x13   :  { %16 = dma.vmem_to_smem %s14_s9, 16, %s4528_s14, [#allocation4] }
  0x14   :  { %s4391_s1 = scalar_lea.vmem %s18_s12, 32  ;;  %p4396_p9 = scmp.lt.s32.totalorder %s18_s12, %s18_s12 }
  0x15   :  { %p4392_p8 = scmp.ne.s32.totalorder %s18_s12, %s4391_s1  ;;  %p4397_p10 = scmp.lt.s32.totalorder %s4391_s1, %s4391_s1 }
  0x17   :  { %p4398_p11 = por %p4397_p10, %p4396_p9 }
  0x19   :  { %p4399_p12 = pnand %p4398_p11, %p4392_p8 }
  0x1b   :  { %4402 = shalt.err (!%p4399_p12)  }
  0x1c   :  { %s4529_s2 = smov [#allocation7]   ;;  %s4403_s17 = scalar_lea.vmem %s22_s16, 16 }
  0x1d   :  { %20 = dma.vmem_to_smem %s18_s12, 32, %s4529_s2, [#allocation4] }
  0x1e   :  { %p4404_p13 = scmp.ne.s32.totalorder %s22_s16, %s4403_s17  ;;  %p4408_p0 = scmp.lt.s32.totalorder %s22_s16, %s22_s16 }
  0x1f   :  { %p4409_p1 = scmp.lt.s32.totalorder %s4403_s17, %s4403_s17 }
  0x21   :  { %p4410_p2 = por %p4409_p1, %p4408_p0 }
  0x23   :  { %p4411_p3 = pnand %p4410_p2, %p4404_p13 }
  0x25   :  { %4414 = shalt.err (!%p4411_p3)  }
  0x26   :  { %s4530_s18 = smov [#allocation8]   ;;  %s25_s20 = sshll.u32 %s7052_s4, 4  ;;  %s26_s20 = int_to_ptr.vmem [resolvable:$true] %s25_s20 }
  0x27   :  { %24 = dma.vmem_to_smem %s22_s16, 16, %s4530_s18, [#allocation4] }
  0x28   :  { %s4415_s21 = scalar_lea.vmem %s26_s20, 32  ;;  %p4420_p5 = scmp.lt.s32.totalorder %s26_s20, %s26_s20 }
  0x29   :  { %p4416_p4 = scmp.ne.s32.totalorder %s26_s20, %s4415_s21  ;;  %p4421_p6 = scmp.lt.s32.totalorder %s4415_s21, %s4415_s21 }
  0x2b   :  { %p4422_p7 = por %p4421_p6, %p4420_p5 }
  0x2d   :  { %p4423_p8 = pnand %p4422_p7, %p4416_p4 }
  0x2f   :  { %4426 = shalt.err (!%p4423_p8)  }
  0x30   :  { %s4531_s22 = smov [#allocation9]  }
  0x31   :  { %28 = dma.vmem_to_smem %s26_s20, 32, %s4531_s22, [#allocation4] }
  0x32   :  { %4501 = dma.done.wait [#allocation4], 128 }
  0x33   :  { %4502 = vsyncadd [#allocation4], 4294967168 }
  0x34   :  { %30 = sfence }
  0x35   :  { %31 = vsyncpa [#allocation11], 0 }
  0x36   :  { %33 = vsyncpa [#allocation11 + $0x1], 0 }
  0x37   :  { %34 = vsyncpa [#allocation12], 0 }
  0x38   :  { %36 = vsyncpa [#allocation12 + $0x1], 0  ;;  %s4601_s23 = smov 0   ;;  %s4603_s4 = smov 0  }
  0x39   :  { %s4605_s24 = smov 0   ;;  %s4607_s25 = smov 0  }
  0x3a LB: > { %7064 = sst [smem:[#allocation17_spill]] %s4517_s4  ;;  %s4622_s26 = sadd.s32 4294967295, %s4525_s25   ;;  %s4525_s25 = sphi %s4607_s25, %s7083_s25   ;;  %s4521_s24 = sphi %s4605_s24, %s7082_s24   ;;  %s4517_s4 = sphi %s4603_s4, %s7081_s4   ;;  %s4513_s23 = sphi %s4601_s23, %s7080_s23  }
  0x3b   : > { %7065 = sst [smem:[#allocation18_spill]] %s4521_s24  ;;  %s3921_s27 = sadd.s32 4294967294, %s4525_s25  }
  0x3c   : > { %s4626_s28 = sadd.s32 1, %s4525_s25   ;;  %s49_s29 = sadd.s32 1, %s4521_s24 }
  0x3d   : > { %s46_s30 = ssub.s32 %s4525_s25, %s4626_s28  ;;  %p56_p9 = scmp.ne.s32.totalorder %s4521_s24, %s4517_s4 }
  0x3e   : > { %p47_p10 = scmp.eq.s32.totalorder %s46_s30, 0  ;;  %p57_p11 = scmp.eq.s32.totalorder %s4525_s25, 0 }
  0x3f   : > { %p62_p12 = scmp.ne.s32.totalorder %s4517_s4, %s4513_s23  ;;  %p63_p13 = scmp.eq.s32.totalorder %s4622_s26, 0 }
  0x40   : > { %s4638_s7 = scalar_select %p47_p10, %s4521_s24, %s49_s29  }
  0x41   : > { %p4640_p0 = por %p57_p11, %p56_p9  ;;  %p4644_p1 = por %p63_p13, %p62_p12 }
  0x42   : > { %7066 = sst [smem:[#allocation19_spill]] %s4638_s7  ;;  %p86_p2 = scmp.eq.s32.totalorder %s4622_s26, 1 }
  0x43   : > { %p92_p3 = scmp.eq.s32.totalorder %s3921_s27, 1  ;;  %p4258_p5 = scmp.lt.s32.totalorder %s4525_s25, 2 }
  0x44   : > { %p4651_p6 = por %p86_p2, %p56_p9  ;;  %s112_s12 = sand.u32 1, %s4521_s24  }
  0x45   : > { %p4655_p7 = por %p92_p3, %p62_p12  ;;  %s4228_s13 = sshll.u32 %s4525_s25, 10 }
  0x46   : > { %s7069_s10 = scalar_select %p4651_p6, 1, 0 }
  0x47   : > { %s7070_s11 = scalar_select %p4655_p7, 1, 0 }
  0x48   : > { %s3924_s14 = sshll.u32 %s112_s12, 6  ;;  %s7071_s5 = sld [smem:[#allocation20_spill]] }
  0x49   : > { %s116_s1 = scalar_lea.vmem [#allocation10], %s3924_s14  ;;  %p4668_p8 = pnand %p4258_p5, %p4640_p0 }
  0x4a   : > { %s123_s2 = sshll.u32 %s116_s1, 4  ;;  %s4674_s18 = scalar_lea.sflag [#allocation11], %s112_s12  ;;  %s4672_s2 = int_to_ptr.vmem [resolvable:$true] %s123_s2 }
  0x4b   : > { %p4429_p10 = pneg %p4668_p8 }
  0x4e   : > { %s4664_s16 = scalar_lea.hbm %s7071_s5, %s4228_s13  ;;  %s4432_s21 = scalar_lea.hbm %s7071_s5, 2048 }
  0x4f   : > { %s4427_s3 = scalar_lea.hbm %s4664_s16, 1024  ;;  %p4433_p13 = scmp.lt.u32.totalorder %s4664_s16, %s7071_s5 }
  0x50   : > { %p4428_p9 = scmp.ne.s32.totalorder %s4664_s16, %s4427_s3  ;;  %p4434_p0 = scmp.lt.u32.totalorder %s4432_s21, %s4427_s3 }
  0x51   : > { %p4436_p3 = scmp.lt.u32.totalorder %s4427_s3, %s4664_s16 }
  0x52   : > { %p4430_p11 = pnand %p4429_p10, %p4428_p9  ;;  %p4435_p2 = por %p4434_p0, %p4433_p13 }
  0x54   : > { %p4431_p12 = pneg %p4430_p11  ;;  %p4437_p5 = por %p4436_p3, %p4435_p2 }
  0x56   : > { %p4438_p4 = pnand %p4437_p5, %p4431_p12 }
  0x58   : > { %4441 = shalt.err (!%p4438_p4)
}
  0x59   : > { %s4442_s29 = scalar_lea.vmem %s4672_s2, 1024  ;;  %s4532_s30 = smov [#allocation10]  }
  0x5a   : > { %p4443_p9 = scmp.ne.s32.totalorder %s4672_s2, %s4442_s29  ;;  %s4447_s8 = sshll.u32 %s4532_s30, 4  ;;  %s4448_s8 = int_to_ptr.vmem [resolvable:$false] %s4447_s8 }
  0x5b   : > { %s4449_s12 = scalar_lea.vmem %s4448_s8, 2048  ;;  %p4450_p6 = scmp.lt.s32.totalorder %s4672_s2, %s4448_s8 }
  0x5c   : > { %p4445_p11 = pnand %p4443_p9, %p4429_p10  ;;  %p4451_p13 = scmp.lt.s32.totalorder %s4449_s12, %s4442_s29 }
  0x5e   : > { %p4446_p7 = pneg %p4445_p11  ;;  %p4452_p0 = por %p4451_p13, %p4450_p6 }
  0x60   : > { %p4453_p2 = pnand %p4452_p0, %p4446_p7 }
  0x62   : > { %4456 = shalt.err (!%p4453_p2)
}
  0x63   : > { %s4533_s13 = smov 128   ;;  %s4534_s14 = smov 8  }
  0x64   : > { %4253 = dma.hbm_to_vmem [thread:$0]  (!%p4668_p8), %s4664_s16, 1024, %s4672_s2, %s4674_s18, %s4533_s13, %s4533_s13, %s4534_s14  }
  0x65   : > { %p3927_p4 = scmp.ge.s32.totalorder %s4525_s25, 1  ;;  %p131_p10 = scmp.lt.s32.totalorder %s4525_s25, 3 }
  0x67   : > { %p132_p12 = pnand %p3927_p4, %p131_p10 }
  0x68   : > { %s4705_s0 = sand.u32 (!%p132_p12), 1, %s4517_s4  }
  0x69   : > { %135 = sbr.rel (%p132_p12) target bundleno = 2273 (0x8e1), region = 24  ;;  %s7054_s15 = sshll.u32 (!%p132_p12), %s4705_s0, 6 }
  0x6a   : > { %s138_s1 = scalar_lea.sflag (!%p132_p12), [#allocation11], %s4705_s0  ;;  %s4711_s3 = scalar_lea.vmem (!%p132_p12), [#allocation10], %s7054_s15 }
  0x70   : > { %4504 = dma.done.wait (%p4644_p1), %s138_s1, 1024  }
  0x71   : > { %4506 = vsyncadd (%p4644_p1), %s138_s1, 4294966272  ;;  %vm160_vm0 = vcmask 146432   ;;  %vm163_vm1 = vcmask 140288   ;;  %v4535_v0 = vmov 0.0   ;;  %v186_v1 = vld [vmem:[%s4711_s3] sm:$0xff]  ;;  %v188_v2 = vld [vmem:[%s4711_s3 + $0x10] sm:$0xff] }
  0x72   : > { %161 = vst.msk [vmem:[#allocation2] sm:$0xff] %vm160_vm0, %v4535_v0  ;;  %162 = vst.msk [vmem:[#allocation2 + $0x8] sm:$0xff] %vm160_vm0, %v4535_v0  ;;  %s7055_s9 = smov 1   ;;  %v187_v3 = vld [vmem:[%s4711_s3 + $0x8] sm:$0xff]  ;;  %v189_v4 = vld [vmem:[%s4711_s3 + $0x18] sm:$0xff]  ;;  %vm226_vm2 = vcmask 138248  }
  0x73   : > { %165 = vst.msk [vmem:[#allocation2 + $0x18] sm:$0xff] %vm160_vm0, %v4535_v0  ;;  %166 = vst.msk [vmem:[#allocation2 + $0x20] sm:$0xff] %vm160_vm0, %v4535_v0  ;;  %202 = vrot.lane.b32.xlu0 %v186_v1, %s7055_s9  ;;  %206 = vrot.lane.b32.xlu1 %v188_v2, %s7055_s9  ;;  %v190_v5 = vld [vmem:[%s4711_s3 + $0x20] sm:$0xff]  ;;  %v191_v6 = vld [vmem:[%s4711_s3 + $0x28] sm:$0xff]  ;;  %s3936_s16 = sld [smem:[#allocation5 + $0x1]]  ;;  %s4759_s2 = sld [smem:[#allocation5 + $0x2]] }
  0x74   : > { %168 = vst.msk [vmem:[#allocation2 + $0x30] sm:$0xff] %vm160_vm0, %v4535_v0  ;;  %169 = vst.msk [vmem:[#allocation2 + $0x38] sm:$0xff] %vm160_vm0, %v4535_v0  ;;  %v192_v7 = vld [vmem:[%s4711_s3 + $0x30] sm:$0xff]  ;;  %v193_v8 = vld [vmem:[%s4711_s3 + $0x38] sm:$0xff]  ;;  %s4763_s17 = sld [smem:[#allocation5 + $0x4]]  ;;  %s4771_s18 = sld [smem:[#allocation5 + $0x5]] }
  0x75   : > { %171 = vst.msk [vmem:[#allocation2 + $0x48] sm:$0xff] %vm160_vm0, %v4535_v0  ;;  %172 = vst.msk [vmem:[#allocation2 + $0x50] sm:$0xff] %vm160_vm0, %v4535_v0  ;;  %s7059_s19 = smov 127   ;;  %s3960_s20 = sld [smem:[#allocation5 + $0x7]]  ;;  %vm1908_vm5 = vcmask 130048  }
  0x76   : > { %174 = vst.msk [vmem:[#allocation3] sm:$0xff] %vm160_vm0, %v4535_v0  ;;  %175 = vst.msk [vmem:[#allocation3 + $0x8] sm:$0xff] %vm160_vm0, %v4535_v0  ;;  %s7057_s21 = smov 126   ;;  %s3964_s22 = sld [smem:[#allocation5 + $0x8]] }
  0x77   : > { %177 = vst.msk [vmem:[#allocation3 + $0x18] sm:$0xff] %vm160_vm0, %v4535_v0  ;;  %178 = vst.msk [vmem:[#allocation3 + $0x20] sm:$0xff] %vm160_vm0, %v4535_v0  ;;  %204 = vrot.lane.b32.xlu0 %v187_v3, %s7055_s9  ;;  %208 = vrot.lane.b32.xlu1 %v189_v4, %s7055_s9  ;;  %s3972_s27 = sld [smem:[#allocation5 + $0xa]]  ;;  %s3976_s29 = sld [smem:[#allocation5 + $0xb]] }
  0x78   : > { %180 = vst.msk [vmem:[#allocation3 + $0x30] sm:$0xff] %vm160_vm0, %v4535_v0  ;;  %181 = vst.msk [vmem:[#allocation3 + $0x38] sm:$0xff] %vm160_vm0, %v4535_v0  ;;  %s3984_s30 = sld [smem:[#allocation5 + $0xd]]  ;;  %s3988_s8 = sld [smem:[#allocation5 + $0xe]] }
  0x79   : > { %183 = vst.msk [vmem:[#allocation3 + $0x48] sm:$0xff] %vm160_vm0, %v4535_v0  ;;  %184 = vst.msk [vmem:[#allocation3 + $0x50] sm:$0xff] %vm160_vm0, %v4535_v0  ;;  %v270_v13 = vstv %s3936_s16  ;;  %v326_v18 = vstv %s4759_s2  ;;  %s3996_s12 = sld [smem:[#allocation5 + $0x10]]  ;;  %s4000_s13 = sld [smem:[#allocation5 + $0x11]] }
  0x7a   : > { %164 = vst.msk [vmem:[#allocation2 + $0x10] sm:$0x3] %vm163_vm1, %v4535_v0  ;;  %167 = vst.msk [vmem:[#allocation2 + $0x28] sm:$0x3] %vm163_vm1, %v4535_v0  ;;  %v408_v25 = vstv %s4763_s17  ;;  %v464_v29 = vstv %s4771_s18  ;;  %s4008_s14 = sld [smem:[#allocation5 + $0x13]]  ;;  %s4012_s1 = sld [smem:[#allocation5 + $0x14]] }
  0x7b   : > { %170 = vst.msk [vmem:[#allocation2 + $0x40] sm:$0x3] %vm163_vm1, %v4535_v0  ;;  %173 = vst.msk [vmem:[#allocation2 + $0x58] sm:$0x3] %vm163_vm1, %v4535_v0  ;;  %210 = vrot.lane.b32.xlu0 %v190_v5, %s7055_s9  ;;  %212 = vrot.lane.b32.xlu1 %v191_v6, %s7055_s9  ;;  %v546_v33 = vstv %s3960_s20  ;;  %s4020_s16 = sld [smem:[#allocation5 + $0x16]]  ;;  %s4024_s2 = sld [smem:[#allocation5 + $0x17]] }
  0x7c   : > { %176 = vst.msk [vmem:[#allocation3 + $0x10] sm:$0x3] %vm163_vm1, %v4535_v0  ;;  %179 = vst.msk [vmem:[#allocation3 + $0x28] sm:$0x3] %vm163_vm1, %v4535_v0  ;;  %v602_v37 = vstv %s3964_s22  ;;  %s4032_s17 = sld [smem:[#allocation5 + $0x19]]  ;;  %s4858_s18 = sld [smem:[#allocation5 + $0x6e]] }
  0x7d   : > { %182 = vst.msk [vmem:[#allocation3 + $0x40] sm:$0x3] %vm163_vm1, %v4535_v0  ;;  %185 = vst.msk [vmem:[#allocation3 + $0x58] sm:$0x3] %vm163_vm1, %v4535_v0  ;;  %v685_v39 = vstv %s3972_s27  ;;  %v741_v45 = vstv %s3976_s29  ;;  %s4036_s20 = sld [smem:[#allocation5 + $0x1a]]  ;;  %s4866_s22 = sld [smem:[#allocation5 + $0x1c]] }
  0x7e   : > { %v823_v49 = vstv %s3984_s30  ;;  %v879_v53 = vstv %s3988_s8  ;;  %s4048_s27 = sld [smem:[#allocation5 + $0x1d]]  ;;  %s4056_s29 = sld [smem:[#allocation5 + $0x1f]] }
  0x7f   : > { %214 = vrot.lane.b32.xlu0 %v192_v7, %s7055_s9  ;;  %216 = vrot.lane.b32.xlu1 %v193_v8, %s7055_s9  ;;  %v961_v57 = vstv %s3996_s12  ;;  %v1017_v61 = vstv %s4000_s13  ;;  %s4060_s30 = sld [smem:[#allocation5 + $0x20]]  ;;  %s4068_s8 = sld [smem:[#allocation5 + $0x22]] }
  0x80   : > { %v1100_v63 = vstv %s4008_s14  ;;  %v1156_v4 = vstv %s4012_s1  ;;  %s4072_s12 = sld [smem:[#allocation5 + $0x23]]  ;;  %s3937_s14 = sld [smem:[#allocation5 + $0x25]] }
  0x81   : > { %s4915_s13 = sld [smem:[#allocation5 + $0x2b]]  ;;  %s4923_s1 = sld [smem:[#allocation5 + $0x2f]] }
  0x82   : > { %s5030_s15 = sld [smem:[#allocation5 + $0x9]]  ;;  %s5051_s9 = sld [smem:[#allocation5 + $0x2e]] }
  0x83   : > { %s7073_s5 = smov 126   ;;  %s5100_s7 = sld [smem:[#allocation5 + $0x46]] }
  0x84   : > { %s5105_s24 = sld [smem:[#allocation5 + $0x12]]  ;;  %s5776_s4 = sld [smem:[#allocation5 + $0x69]] }
  0x85   : > { %p7077_p6 = scmp.ne.s32.totalorder %s7069_s10, 0 }
  0xe5   : > { %v203_v9 = vpop.permute.xlu0 %202  ;;  %v207_v10 = vpop.permute.xlu1 %206 }
  0xe6   : > { %227 = vst.msk [vmem:[#allocation2 + $0x1] sm:$0xff] %vm226_vm2, %v203_v9  ;;  %229 = vst.msk [vmem:[#allocation2 + $0x19] sm:$0xff] %vm226_vm2, %v207_v10  ;;  %v1238_v9 = vstv %s4020_s16  ;;  %s4932_s16 = sld [smem:[#allocation5 + $0x31]] }
  0xe9   : > { %v205_v11 = vpop.permute.xlu0 %204  ;;  %v209_v12 = vpop.permute.xlu1 %208 }
  0xea   : > { %228 = vst.msk [vmem:[#allocation2 + $0x9] sm:$0xff] %vm226_vm2, %v205_v11  ;;  %230 = vst.msk [vmem:[#allocation2 + $0x21] sm:$0xff] %vm226_vm2, %v209_v12 }
  0xed   : > { %v4765_v14 = vld [vmem:[#allocation2] sm:$0xff]  ;;  %v211_v15 = vpop.permute.xlu0 %210  ;;  %v213_v16 = vpop.permute.xlu1 %212  ;;  %v4804_v38 = vld [vmem:[#allocation2 + $0x18] sm:$0xff] }
  0xee   : > { %v271_v17 = vmul.f32 %v270_v13, %v4765_v14  ;;  %231 = vst.msk [vmem:[#allocation2 + $0x31] sm:$0xff] %vm226_vm2, %v211_v15  ;;  %232 = vst.msk [vmem:[#allocation2 + $0x39] sm:$0xff] %vm226_vm2, %v213_v16  ;;  %v327_v23 = vmul.f32 %v326_v18, %v4765_v14  ;;  %v4780_v24 = vld [vmem:[#allocation2 + $0x1] sm:$0xff]  ;;  %v686_v42 = vmul.f32 %v685_v39, %v4804_v38  ;;  %v4818_v48 = vld [vmem:[#allocation2 + $0x19] sm:$0xff] }
  0xef   : > { %v409_v27 = vmul.f32 %v408_v25, %v4780_v24  ;;  %v465_v31 = vmul.f32 %v464_v29, %v4780_v24  ;;  %v742_v47 = vmul.f32 %v741_v45, %v4804_v38  ;;  %v824_v51 = vmul.f32 %v823_v49, %v4818_v48 }
  0xf0   : > { %275 = vrot.lane.b32.xlu0 %v271_v17, %s7059_s19  ;;  %v880_v55 = vmul.f32 %v879_v53, %v4818_v48 }
  0xf1   : > { %v4774_v19 = vld [vmem:[#allocation2 + $0x8] sm:$0xff]  ;;  %v215_v20 = vpop.permute.xlu0 %214  ;;  %v217_v21 = vpop.permute.xlu1 %216  ;;  %v4812_v44 = vld [vmem:[#allocation2 + $0x20] sm:$0xff] }
  0xf2   : > { %v272_v22 = vmul.f32 %v270_v13, %v4774_v19  ;;  %233 = vst.msk [vmem:[#allocation2 + $0x49] sm:$0xff] %vm226_vm2, %v215_v20  ;;  %234 = vst.msk [vmem:[#allocation2 + $0x51] sm:$0xff] %vm226_vm2, %v217_v21  ;;  %v328_v26 = vmul.f32 %v326_v18, %v4774_v19  ;;  %v4787_v28 = vld [vmem:[#allocation2 + $0x9] sm:$0xff]  ;;  %v687_v46 = vmul.f32 %v685_v39, %v4812_v44  ;;  %v4824_v52 = vld [vmem:[#allocation2 + $0x21] sm:$0xff]  ;;  %v1294_v13 = vstv %s4024_s2  ;;  %s3941_s2 = sld [smem:[#allocation5 + $0x26]] }
  0xf3   : > { %v410_v30 = vmul.f32 %v408_v25, %v4787_v28  ;;  %v4794_v32 = vld [vmem:[#allocation2 + $0x2] sm:$0xff]  ;;  %v466_v34 = vmul.f32 %v464_v29, %v4787_v28  ;;  %v4800_v36 = vld [vmem:[#allocation2 + $0xa] sm:$0xff]  ;;  %v743_v50 = vmul.f32 %v741_v45, %v4812_v44  ;;  %v825_v54 = vmul.f32 %v823_v49, %v4824_v52  ;;  %v4830_v56 = vld [vmem:[#allocation2 + $0x1a] sm:$0xff] }
  0xf4   : > { %277 = vrot.lane.b32.xlu1 %v272_v22, %s7059_s19  ;;  %331 = vrot.lane.b32.xlu0 %v327_v23, %s7057_s21  ;;  %v547_v35 = vmul.f32 %v546_v33, %v4794_v32  ;;  %v548_v40 = vmul.f32 %v546_v33, %v4800_v36  ;;  %v603_v41 = vmul.f32 %v602_v37, %v4794_v32  ;;  %v4836_v60 = vld [vmem:[#allocation2 + $0x22] sm:$0xff]  ;;  %v1376_v18 = vstv %s4032_s17  ;;  %s4941_s17 = sld [smem:[#allocation5 + $0x32]] }
  0xf5   : > { %v604_v43 = vmul.f32 %v602_v37, %v4800_v36  ;;  %v881_v58 = vmul.f32 %v879_v53, %v4824_v52  ;;  %v962_v59 = vmul.f32 %v961_v57, %v4830_v56  ;;  %v4840_v62 = vld [vmem:[#allocation2 + $0x30] sm:$0xff]  ;;  %v963_v0 = vmul.f32 %v961_v57, %v4836_v60  ;;  %v4847_v3 = vld [vmem:[#allocation2 + $0x38] sm:$0xff] }
  0xf6   : > { %v1018_v1 = vmul.f32 %v1017_v61, %v4830_v56  ;;  %v1101_v2 = vmul.f32 %v1100_v63, %v4840_v62  ;;  %v1019_v5 = vmul.f32 %v1017_v61, %v4836_v60  ;;  %v1102_v6 = vmul.f32 %v1100_v63, %v4847_v3  ;;  %v4854_v8 = vld [vmem:[#allocation2 + $0x31] sm:$0xff]  ;;  %v4862_v12 = vld [vmem:[#allocation2 + $0x39] sm:$0xff] }
  0xf7   : > { %v1157_v7 = vmul.f32 %v1156_v4, %v4840_v62  ;;  %v1158_v10 = vmul.f32 %v1156_v4, %v4847_v3  ;;  %v1239_v11 = vmul.f32 %v1238_v9, %v4854_v8  ;;  %v1240_v15 = vmul.f32 %v1238_v9, %v4862_v12  ;;  %v4870_v17 = vld [vmem:[#allocation2 + $0x32] sm:$0xff]  ;;  %v4882_v25 = vld [vmem:[#allocation2 + $0x3a] sm:$0xff] }
  0xf8   : > { %333 = vrot.lane.b32.xlu1 %v328_v26, %s7057_s21  ;;  %413 = vrot.lane.b32.xlu0 %v409_v27, %s7059_s19  ;;  %v1295_v16 = vmul.f32 %v1294_v13, %v4854_v8  ;;  %v368_v20 = vstv %s4858_s18  ;;  %v1296_v22 = vmul.f32 %v1294_v13, %v4862_v12  ;;  %v1377_v23 = vmul.f32 %v1376_v18, %v4870_v17  ;;  %s5660_s18 = sld [smem:[#allocation5 + $0x74]] }
  0xf9   : > { %v4878_v21 = vmul.f32 %v368_v20, %v4774_v19  ;;  %v1432_v26 = vstv %s4036_s20  ;;  %v4886_v27 = vld [vmem:[#allocation2 + $0x48] sm:$0xff]  ;;  %v1515_v29 = vstv %s4866_s22  ;;  %v1791_v53 = vstv %s4068_s8  ;;  %v4921_v57 = vld [vmem:[#allocation2 + $0x52] sm:$0xff]  ;;  %s4949_s20 = sld [smem:[#allocation5]]  ;;  %s4952_s22 = sld [smem:[#allocation5 + $0x34]] }
  0xfa   : > { %v1516_v33 = vmul.f32 %v1515_v29, %v4886_v27  ;;  %v1434_v37 = vmul.f32 %v1432_v26, %v4882_v25  ;;  %v560_v63 = vstv %s4915_s13  ;;  %v755_v4 = vstv %s4923_s1  ;;  %s4971_s8 = sld [smem:[#allocation5 + $0x37]]  ;;  %s5058_s13 = sld [smem:[#allocation5 + $0xc]] }
  0xfb   : > { %v893_v13 = vstv %s4941_s17  ;;  %s5158_s1 = sld [smem:[#allocation5 + $0x1b]]  ;;  %s5184_s17 = sld [smem:[#allocation5 + $0x21]] }
  0xfc   : > { %415 = vrot.lane.b32.xlu1 %v410_v30, %s7059_s19  ;;  %469 = vrot.lane.b32.xlu0 %v465_v31, %s7057_s21  ;;  %v1378_v30 = vmul.f32 %v1376_v18, %v4882_v25  ;;  %v1433_v31 = vmul.f32 %v1432_v26, %v4870_v17 }
  0xff   : > { %v246_v18 = vstv %s4949_s20  ;;  %s4999_s20 = sld [smem:[#allocation5 + $0x3a]] }
 0x100   : > { %471 = vrot.lane.b32.xlu1 %v466_v34, %s7057_s21  ;;  %551 = vrot.lane.b32.xlu0 %v547_v35, %s7059_s19  ;;  %v4894_v34 = vld [vmem:[#allocation2 + $0x50] sm:$0xff]  ;;  %v1571_v35 = vstv %s4048_s27  ;;  %s4958_s27 = sld [smem:[#allocation5 + $0x28]] }
 0x101   : > { %v1517_v39 = vmul.f32 %v1515_v29, %v4894_v34  ;;  %v247_v29 = vmul.f32 %v246_v18, %v4765_v14 }
 0x104   : > { %553 = vrot.lane.b32.xlu1 %v548_v40, %s7059_s19  ;;  %607 = vrot.lane.b32.xlu0 %v603_v41, %s7057_s21  ;;  %v1572_v40 = vmul.f32 %v1571_v35, %v4886_v27  ;;  %v4901_v41 = vld [vmem:[#allocation2 + $0x49] sm:$0xff] }
 0x108   : > { %609 = vrot.lane.b32.xlu1 %v604_v43, %s7057_s21  ;;  %690 = vrot.lane.b32.xlu0 %v686_v42, %s7059_s19  ;;  %v1653_v42 = vstv %s4056_s29  ;;  %v1573_v43 = vmul.f32 %v1571_v35, %v4894_v34  ;;  %s4962_s29 = sld [smem:[#allocation6]] }
 0x109   : > { %v1654_v45 = vmul.f32 %v1653_v42, %v4901_v41 }
 0x10c   : > { %692 = vrot.lane.b32.xlu1 %v687_v46, %s7059_s19  ;;  %746 = vrot.lane.b32.xlu0 %v742_v47, %s7057_s21  ;;  %v4907_v46 = vld [vmem:[#allocation2 + $0x51] sm:$0xff]  ;;  %v1709_v47 = vstv %s4060_s30  ;;  %s4965_s30 = sld [smem:[#allocation5 + $0x35]] }
 0x10d   : > { %v1655_v49 = vmul.f32 %v1653_v42, %v4907_v46  ;;  %v1114_v42 = vstv %s4971_s8  ;;  %s5243_s8 = sld [smem:[#allocation5 + $0x4d]] }
 0x110   : > { %748 = vrot.lane.b32.xlu1 %v743_v50, %s7057_s21  ;;  %828 = vrot.lane.b32.xlu0 %v824_v51, %s7059_s19  ;;  %v1710_v50 = vmul.f32 %v1709_v47, %v4901_v41  ;;  %v4913_v51 = vld [vmem:[#allocation2 + $0x4a] sm:$0xff] }
 0x114   : > { %830 = vrot.lane.b32.xlu1 %v825_v54, %s7059_s19  ;;  %884 = vrot.lane.b32.xlu0 %v880_v55, %s7057_s21  ;;  %v1711_v54 = vmul.f32 %v1709_v47, %v4907_v46  ;;  %v1792_v55 = vmul.f32 %v1791_v53, %v4913_v51 }
 0x118   : > { %886 = vrot.lane.b32.xlu1 %v881_v58, %s7057_s21  ;;  %966 = vrot.lane.b32.xlu0 %v962_v59, %s7059_s19  ;;  %v1847_v58 = vstv %s4072_s12  ;;  %v1793_v59 = vmul.f32 %v1791_v53, %v4921_v57  ;;  %s4976_s12 = sld [smem:[#allocation5 + $0x3]]  ;;  %v1116_v53 = vmul.f32 %v1114_v42, %v4847_v3 }
 0x119   : > { %v1848_v61 = vmul.f32 %v1847_v58, %v4913_v51 }
 0x11c   : > { %968 = vrot.lane.b32.xlu1 %v963_v0, %s7059_s19  ;;  %1022 = vrot.lane.b32.xlu0 %v1018_v1, %s7057_s21  ;;  %v1849_v0 = vmul.f32 %v1847_v58, %v4921_v57  ;;  %v561_v1 = vmul.f32 %v560_v63, %v4794_v32 }
 0x120   : > { %1024 = vrot.lane.b32.xlu1 %v1019_v5, %s7057_s21  ;;  %1105 = vrot.lane.b32.xlu0 %v1101_v2, %s7059_s19  ;;  %v284_v2 = vstv %s3937_s14  ;;  %s4983_s14 = sld [smem:[#allocation5 + $0x29]] }
 0x121   : > { %v285_v5 = vmul.f32 %v284_v2, %v4765_v14  ;;  %v286_v9 = vmul.f32 %v284_v2, %v4774_v19 }
 0x124   : > { %1107 = vrot.lane.b32.xlu1 %v1102_v6, %s7059_s19  ;;  %1161 = vrot.lane.b32.xlu0 %v1157_v7, %s7057_s21  ;;  %v757_v6 = vmul.f32 %v755_v4, %v4812_v44  ;;  %v837_v7 = vstv %s4932_s16  ;;  %s5171_s16 = sld [smem:[#allocation5 + $0x1e]] }
 0x128   : > { %1163 = vrot.lane.b32.xlu1 %v1158_v10, %s7057_s21  ;;  %1243 = vrot.lane.b32.xlu0 %v1239_v11, %s7059_s19  ;;  %v839_v10 = vmul.f32 %v837_v7, %v4824_v52  ;;  %v340_v11 = vstv %s3941_s2  ;;  %s4987_s2 = sld [smem:[#allocation5 + $0x38]] }
 0x12c   : > { %1245 = vrot.lane.b32.xlu1 %v1240_v15, %s7059_s19  ;;  %1299 = vrot.lane.b32.xlu0 %v1295_v16, %s7057_s21  ;;  %v341_v15 = vmul.f32 %v340_v11, %v4765_v14  ;;  %v895_v16 = vmul.f32 %v893_v13, %v4824_v52  ;;  %v248_v14 = vmul.f32 %v246_v18, %v4774_v19 }
 0x130   : > { %1301 = vrot.lane.b32.xlu1 %v1296_v22, %s7057_s21  ;;  %1381 = vrot.lane.b32.xlu0 %v1377_v23, %s7059_s19  ;;  %v975_v22 = vstv %s4952_s22  ;;  %v342_v23 = vmul.f32 %v340_v11, %v4774_v19  ;;  %s5213_s22 = sld [smem:[#allocation5 + $0x49]] }
 0x131   : > { %v977_v26 = vmul.f32 %v975_v22, %v4836_v60 }
 0x134   : > { %1383 = vrot.lane.b32.xlu1 %v1378_v30, %s7059_s19  ;;  %1437 = vrot.lane.b32.xlu0 %v1433_v31, %s7057_s21  ;;  %v422_v30 = vstv %s4958_s27  ;;  %v236_v31 = vstv %s4962_s29  ;;  %s5004_s27 = sld [smem:[#allocation5 + $0x6]]  ;;  %s5013_s29 = sld [smem:[#allocation5 + $0x3b]] }
 0x138   : > { %1439 = vrot.lane.b32.xlu1 %v1434_v37, %s7057_s21  ;;  %1520 = vrot.lane.b32.xlu0 %v1516_v33, %s7059_s19  ;;  %v1031_v33 = vstv %s4965_s30  ;;  %v423_v37 = vmul.f32 %v422_v30, %v4780_v24  ;;  %s5219_s30 = sld [smem:[#allocation5 + $0x4a]] }
 0x13c   : > { %1522 = vrot.lane.b32.xlu1 %v1517_v39, %s7059_s19  ;;  %1576 = vrot.lane.b32.xlu0 %v1572_v40, %s7057_s21  ;;  %v1033_v39 = vmul.f32 %v1031_v33, %v4836_v60  ;;  %v249_v40 = vadd.f32 %v247_v29, %v236_v31 }
 0x140   : > { %1578 = vrot.lane.b32.xlu1 %v1573_v43, %s7057_s21  ;;  %1658 = vrot.lane.b32.xlu0 %v1654_v45, %s7059_s19  ;;  %v384_v43 = vstv %s4976_s12  ;;  %s5023_s12 = sld [smem:[#allocation5 + $0x2c]] }
 0x141   : > { %v386_v11 = vmul.f32 %v384_v43, %v4787_v28 }
 0x144   : > { %1660 = vrot.lane.b32.xlu1 %v1655_v49, %s7059_s19  ;;  %1714 = vrot.lane.b32.xlu0 %v1710_v50, %s7057_s21  ;;  %v424_v50 = vmul.f32 %v422_v30, %v4787_v28 }
 0x148   : > { %1716 = vrot.lane.b32.xlu1 %v1711_v54, %s7057_s21  ;;  %1796 = vrot.lane.b32.xlu0 %v1792_v55, %s7059_s19  ;;  %v478_v54 = vstv %s4983_s14  ;;  %v250_v55 = vadd.f32 %v248_v14, %v236_v31  ;;  %s5025_s14 = sld [smem:[#allocation5 + $0x3d]] }
 0x149   : > { %v480_v30 = vmul.f32 %v478_v54, %v4787_v28 }
 0x14c   : > { %1798 = vrot.lane.b32.xlu1 %v1793_v59, %s7059_s19  ;;  %1852 = vrot.lane.b32.xlu0 %v1848_v61, %s7057_s21  ;;  %v385_v59 = vmul.f32 %v384_v43, %v4780_v24  ;;  %v1170_v61 = vstv %s4987_s2  ;;  %s3933_s2 = sld [smem:[#allocation5 + $0x24]] }
 0x150   : > { %1854 = vrot.lane.b32.xlu1 %v1849_v0, %s7057_s21  ;;  %565 = vrot.lane.b32.xlu0 %v561_v1, %s7059_s19 }
 0x154   : > { %289 = vrot.lane.b32.xlu1 %v285_v5, %s7059_s19  ;;  %762 = vrot.lane.b32.xlu0 %v757_v6, %s7057_s21  ;;  %v479_v6 = vmul.f32 %v478_v54, %v4780_v24  ;;  %v1390_v54 = vstv %s5025_s14  ;;  %s5261_s14 = sld [smem:[#allocation5 + $0x50]] }
 0x158   : > { %291 = vrot.lane.b32.xlu1 %v286_v9, %s7059_s19  ;;  %844 = vrot.lane.b32.xlu0 %v839_v10, %s7059_s19  ;;  %v1172_v9 = vmul.f32 %v1170_v61, %v4847_v3 }
 0x15c   : > { %345 = vrot.lane.b32.xlu1 %v341_v15, %s7057_s21  ;;  %900 = vrot.lane.b32.xlu0 %v895_v16, %s7057_s21  ;;  %v1252_v15 = vstv %s4999_s20  ;;  %v522_v16 = vstv %s5004_s27  ;;  %s5038_s27 = sld [smem:[#allocation5 + $0x3e]]  ;;  %s5254_s20 = sld [smem:[#allocation5 + $0x4f]] }
 0x15d   : > { %v1254_v31 = vmul.f32 %v1252_v15, %v4862_v12 }
 0x160   : > { %347 = vrot.lane.b32.xlu1 %v342_v23, %s7057_s21  ;;  %982 = vrot.lane.b32.xlu0 %v977_v26, %s7059_s19 }
 0x162   : > { %v276_v35 = vpop.permute.xlu0 %275 }
 0x163   : > { %v281_v45 = vadd.f32 %v276_v35, %v249_v40 }
 0x164   : > { %427 = vrot.lane.b32.xlu1 %v423_v37, %s7059_s19  ;;  %1038 = vrot.lane.b32.xlu0 %v1033_v39, %s7057_s21  ;;  %v523_v37 = vmul.f32 %v522_v16, %v4794_v32  ;;  %v1308_v39 = vstv %s5013_s29  ;;  %s3930_s29 = sld [smem:[#allocation6 + $0x1]] }
 0x166   : > { %v278_v47 = vpop.permute.xlu1 %277  ;;  %v332_v49 = vpop.permute.xlu0 %331 }
 0x167   : > { %v337_v58 = vadd.f32 %v332_v49, %v281_v45  ;;  %v282_v0 = vadd.f32 %v278_v47, %v250_v55  ;;  %v562_v45 = vmul.f32 %v560_v63, %v4800_v36  ;;  %v1310_v47 = vmul.f32 %v1308_v39, %v4862_v12 }
 0x168   : > { %429 = vrot.lane.b32.xlu1 %v424_v50, %s7059_s19  ;;  %1121 = vrot.lane.b32.xlu0 %v1116_v53, %s7059_s19  ;;  %v524_v50 = vmul.f32 %v522_v16, %v4800_v36  ;;  %v616_v53 = vstv %s5023_s12  ;;  %v661_v55 = vstv %s5030_s15  ;;  %s5066_s12 = sld [smem:[#allocation5 + $0x41]]  ;;  %s5077_s15 = sld [smem:[#allocation5 + $0x43]] }
 0x169   : > { %v387_v1 = vadd.f32 %v385_v59, %v337_v58 }
 0x16a   : > { %v334_v2 = vpop.permute.xlu1 %333  ;;  %v414_v5 = vpop.permute.xlu0 %413 }
 0x16b   : > { %v338_v10 = vadd.f32 %v334_v2, %v282_v0  ;;  %v419_v18 = vadd.f32 %v414_v5, %v387_v1  ;;  %v617_v1 = vmul.f32 %v616_v53, %v4794_v32  ;;  %v1392_v2 = vmul.f32 %v1390_v54, %v4882_v25 }
 0x16c   : > { %483 = vrot.lane.b32.xlu1 %v479_v6, %s7057_s21  ;;  %1177 = vrot.lane.b32.xlu0 %v1172_v9, %s7057_s21  ;;  %v662_v6 = vmul.f32 %v661_v55, %v4804_v38  ;;  %v1446_v9 = vstv %s5038_s27  ;;  %s5273_s27 = sld [smem:[#allocation5 + $0x52]] }
 0x16d   : > { %v388_v23 = vadd.f32 %v386_v11, %v338_v10 }
 0x16e   : > { %v416_v26 = vpop.permute.xlu1 %415  ;;  %v470_v29 = vpop.permute.xlu0 %469 }
 0x16f   : > { %v475_v35 = vadd.f32 %v470_v29, %v419_v18  ;;  %v420_v40 = vadd.f32 %v416_v26, %v388_v23  ;;  %v618_v23 = vmul.f32 %v616_v53, %v4800_v36  ;;  %v1448_v26 = vmul.f32 %v1446_v9, %v4882_v25 }
 0x170   : > { %485 = vrot.lane.b32.xlu1 %v480_v30, %s7057_s21  ;;  %1259 = vrot.lane.b32.xlu0 %v1254_v31, %s7059_s19  ;;  %s5053_s21 = sld [smem:[#allocation5 + $0x40]]  ;;  %v663_v30 = vmul.f32 %v661_v55, %v4812_v44  ;;  %v699_v31 = vstv %s5051_s9  ;;  %s5090_s9 = sld [smem:[#allocation5 + $0x44]] }
 0x171   : > { %v525_v14 = vadd.f32 %v523_v37, %v475_v35  ;;  %v799_v37 = vstv %s5058_s13  ;;  %s7074_s13 = smov 127  }
 0x172   : > { %v472_v43 = vpop.permute.xlu1 %471  ;;  %v552_v28 = vpop.permute.xlu0 %551 }
 0x173   : > { %v476_v49 = vadd.f32 %v472_v43, %v420_v40  ;;  %v557_v63 = vadd.f32 %v552_v28, %v525_v14  ;;  %v700_v28 = vmul.f32 %v699_v31, %v4804_v38 }
 0x174   : > { %567 = vrot.lane.b32.xlu1 %v562_v45, %s7059_s19  ;;  %1315 = vrot.lane.b32.xlu0 %v1310_v47, %s7073_s5 }
 0x175   : > { %v526_v58 = vadd.f32 %v524_v50, %v476_v49  ;;  %v800_v49 = vmul.f32 %v799_v37, %v4818_v48  ;;  %v1585_v50 = vstv %s5066_s12  ;;  %s5275_s12 = sld [smem:[#allocation5 + $0x27]] }
 0x176   : > { %v554_v59 = vpop.permute.xlu1 %553  ;;  %v608_v0 = vpop.permute.xlu0 %607  ;;  %v1529_v35 = vstv %s5053_s21  ;;  %s5206_s21 = sld [smem:[#allocation5 + $0x47]] }
 0x177   : > { %v613_v5 = vadd.f32 %v608_v0, %v557_v63  ;;  %v558_v10 = vadd.f32 %v554_v59, %v526_v58  ;;  %v1531_v45 = vmul.f32 %v1529_v35, %v4894_v34  ;;  %v701_v59 = vmul.f32 %v699_v31, %v4812_v44 }
 0x178   : > { %621 = vrot.lane.b32.xlu1 %v617_v1, %s7073_s5  ;;  %1397 = vrot.lane.b32.xlu0 %v1392_v2, %s7059_s19  ;;  %s5082_s19 = sld [smem:[#allocation5 + $0xf]]  ;;  %v1587_v0 = vmul.f32 %v1585_v50, %v4894_v34  ;;  %v801_v2 = vmul.f32 %v799_v37, %v4824_v52  ;;  %v756_v52 = vmul.f32 %v755_v4, %v4804_v38 }
 0x179   : > { %v664_v11 = vadd.f32 %v662_v6, %v613_v5  ;;  %v1667_v5 = vstv %s5077_s15  ;;  %v838_v38 = vmul.f32 %v837_v7, %v4818_v48  ;;  %s5285_s15 = sld [smem:[#allocation5 + $0x53]] }
 0x17a   : > { %v610_v16 = vpop.permute.xlu1 %609  ;;  %v691_v18 = vpop.permute.xlu0 %690 }
 0x17b   : > { %v614_v29 = vadd.f32 %v610_v16, %v558_v10  ;;  %v696_v36 = vadd.f32 %v691_v18, %v664_v11  ;;  %v1669_v18 = vmul.f32 %v1667_v5, %v4907_v46 }
 0x17c   : > { %623 = vrot.lane.b32.xlu1 %v618_v23, %s7073_s5  ;;  %1453 = vrot.lane.b32.xlu0 %v1448_v26, %s7073_s5 }
 0x17d   : > { %v665_v40 = vadd.f32 %v663_v30, %v614_v29  ;;  %v1723_v29 = vstv %s5090_s9  ;;  %s5288_s9 = sld [smem:[#allocation5 + $0x2a]] }
 0x17e   : > { %v693_v14 = vpop.permute.xlu1 %692  ;;  %v747_v43 = vpop.permute.xlu0 %746  ;;  %v937_v6 = vstv %s5082_s19  ;;  %v1725_v4 = vmul.f32 %v1723_v29, %v4907_v46  ;;  %s5128_s19 = sld [smem:[#allocation5 + $0x15]] }
 0x17f   : > { %v752_v47 = vadd.f32 %v747_v43, %v696_v36  ;;  %v697_v53 = vadd.f32 %v693_v14, %v665_v40  ;;  %v938_v26 = vmul.f32 %v937_v6, %v4830_v56  ;;  %v939_v14 = vmul.f32 %v937_v6, %v4836_v60 }
 0x180   : > { %704 = vrot.lane.b32.xlu1 %v700_v28, %s7074_s13  ;;  %1536 = vrot.lane.b32.xlu0 %v1531_v45, %s7074_s13  ;;  %v1805_v43 = vstv %s5100_s7  ;;  %v1076_v28 = vstv %s5105_s24  ;;  %s5145_s24 = sld [smem:[#allocation5 + $0x18]]  ;;  %s5229_s7 = sld [smem:[#allocation5 + $0x4c]] }
 0x181   : > { %v802_v55 = vadd.f32 %v800_v49, %v752_v47  ;;  %v1807_v60 = vmul.f32 %v1805_v43, %v4921_v57 }
 0x182   : > { %v749_v63 = vpop.permute.xlu1 %748  ;;  %v829_v58 = vpop.permute.xlu0 %828 }
 0x183   : > { %v753_v1 = vadd.f32 %v749_v63, %v697_v53  ;;  %v834_v10 = vadd.f32 %v829_v58, %v802_v55  ;;  %v894_v53 = vmul.f32 %v893_v13, %v4818_v48  ;;  %v1077_v63 = vmul.f32 %v1076_v28, %v4840_v62 }
 0x184   : > { %706 = vrot.lane.b32.xlu1 %v701_v59, %s7074_s13  ;;  %1592 = vrot.lane.b32.xlu0 %v1587_v0, %s7073_s5  ;;  %v1078_v48 = vmul.f32 %v1076_v28, %v4847_v3  ;;  %v1214_v13 = vstv %s5128_s19  ;;  %s5299_s19 = sld [smem:[#allocation5 + $0x55]] }
 0x185   : > { %v803_v44 = vadd.f32 %v801_v2, %v753_v1  ;;  %v976_v2 = vmul.f32 %v975_v22, %v4830_v56  ;;  %v1215_v22 = vmul.f32 %v1214_v13, %v4854_v8 }
 0x186   : > { %v831_v11 = vpop.permute.xlu1 %830  ;;  %v885_v16 = vpop.permute.xlu0 %884 }
 0x187   : > { %v890_v23 = vadd.f32 %v885_v16, %v834_v10  ;;  %v835_v30 = vadd.f32 %v831_v11, %v803_v44 }
 0x188   : > { %760 = vrot.lane.b32.xlu1 %v756_v52, %s7073_s5  ;;  %1674 = vrot.lane.b32.xlu0 %v1669_v18, %s7074_s13  ;;  %v1032_v52 = vmul.f32 %v1031_v33, %v4830_v56  ;;  %v1352_v56 = vstv %s5145_s24  ;;  %s5321_s24 = sld [smem:[#allocation5 + $0x56]] }
 0x189   : > { %v940_v31 = vadd.f32 %v938_v26, %v890_v23 }
 0x18a   : > { %v887_v37 = vpop.permute.xlu1 %886  ;;  %v967_v36 = vpop.permute.xlu0 %966 }
 0x18b   : > { %v891_v40 = vadd.f32 %v887_v37, %v835_v30  ;;  %v972_v45 = vadd.f32 %v967_v36, %v940_v31  ;;  %v1115_v31 = vmul.f32 %v1114_v42, %v4840_v62  ;;  %v1216_v36 = vmul.f32 %v1214_v13, %v4862_v12 }
 0x18c   : > { %842 = vrot.lane.b32.xlu1 %v838_v38, %s7074_s13  ;;  %1730 = vrot.lane.b32.xlu0 %v1725_v4, %s7073_s5  ;;  %v1353_v42 = vmul.f32 %v1352_v56, %v4870_v17 }
 0x18d   : > { %v941_v47 = vadd.f32 %v939_v14, %v891_v40  ;;  %v1171_v14 = vmul.f32 %v1170_v61, %v4840_v62  ;;  %v1491_v62 = vstv %s5158_s1  ;;  %s5335_s1 = sld [smem:[#allocation5 + $0x58]] }
 0x18e   : > { %v969_v49 = vpop.permute.xlu1 %968  ;;  %v1023_v7 = vpop.permute.xlu0 %1022 }
 0x18f   : > { %v1028_v55 = vadd.f32 %v1023_v7, %v972_v45  ;;  %v973_v58 = vadd.f32 %v969_v49, %v941_v47  ;;  %v1253_v7 = vmul.f32 %v1252_v15, %v4854_v8  ;;  %v1492_v15 = vmul.f32 %v1491_v62, %v4886_v27 }
 0x190   : > { %898 = vrot.lane.b32.xlu1 %v894_v53, %s7073_s5  ;;  %1812 = vrot.lane.b32.xlu0 %v1807_v60, %s7074_s13  ;;  %v1354_v60 = vmul.f32 %v1352_v56, %v4882_v25 }
 0x191   : > { %v1079_v59 = vadd.f32 %v1077_v63, %v1028_v55  ;;  %v1309_v63 = vmul.f32 %v1308_v39, %v4854_v8  ;;  %v1629_v8 = vstv %s5171_s16  ;;  %s5338_s16 = sld [smem:[#allocation5 + $0x2d]] }
 0x192   : > { %v1025_v0 = vpop.permute.xlu1 %1024  ;;  %v1106_v1 = vpop.permute.xlu0 %1105 }
 0x193   : > { %v1029_v6 = vadd.f32 %v1025_v0, %v973_v58  ;;  %v1111_v10 = vadd.f32 %v1106_v1, %v1079_v59 }
 0x194   : > { %980 = vrot.lane.b32.xlu1 %v976_v2, %s7074_s13  ;;  %v1391_v2 = vmul.f32 %v1390_v54, %v4870_v17 }
 0x195   : > { %v1080_v44 = vadd.f32 %v1078_v48, %v1029_v6 }
 0x196   : > { %v1108_v11 = vpop.permute.xlu1 %1107  ;;  %v1162_v16 = vpop.permute.xlu0 %1161 }
 0x197   : > { %v1167_v18 = vadd.f32 %v1162_v16, %v1111_v10  ;;  %v1112_v3 = vadd.f32 %v1108_v11, %v1080_v44  ;;  %v1493_v10 = vmul.f32 %v1491_v62, %v4894_v34  ;;  %v1447_v11 = vmul.f32 %v1446_v9, %v4870_v17 }
 0x198   : > { %1036 = vrot.lane.b32.xlu1 %v1032_v52, %s7073_s5  ;;  %v1767_v17 = vstv %s5184_s17  ;;  %s5354_s17 = sld [smem:[#allocation5 + $0x59]] }
 0x199   : > { %v1217_v23 = vadd.f32 %v1215_v22, %v1167_v18  ;;  %v1630_v18 = vmul.f32 %v1629_v8, %v4901_v41 }
 0x19a   : > { %v1164_v26 = vpop.permute.xlu1 %1163  ;;  %v1244_v30 = vpop.permute.xlu0 %1243 }
 0x19b   : > { %v1168_v37 = vadd.f32 %v1164_v26, %v1112_v3  ;;  %v1249_v33 = vadd.f32 %v1244_v30, %v1217_v23  ;;  %v1530_v3 = vmul.f32 %v1529_v35, %v4886_v27  ;;  %v1768_v35 = vmul.f32 %v1767_v17, %v4913_v51 }
 0x19c   : > { %1119 = vrot.lane.b32.xlu1 %v1115_v31, %s7074_s13  ;;  %v1631_v31 = vmul.f32 %v1629_v8, %v4907_v46  ;;  %v1668_v46 = vmul.f32 %v1667_v5, %v4901_v41 }
 0x19d   : > { %v1218_v38 = vadd.f32 %v1216_v36, %v1168_v37  ;;  %v1586_v36 = vmul.f32 %v1585_v50, %v4886_v27 }
 0x19e   : > { %v1246_v4 = vpop.permute.xlu1 %1245  ;;  %v1300_v40 = vpop.permute.xlu0 %1299 }
 0x19f   : > { %v1305_v28 = vadd.f32 %v1300_v40, %v1249_v33  ;;  %v1250_v12 = vadd.f32 %v1246_v4, %v1218_v38 }
 0x1a0   : > { %1175 = vrot.lane.b32.xlu1 %v1171_v14, %s7073_s5 }
 0x1a1   : > { %v1355_v45 = vadd.f32 %v1353_v42, %v1305_v28 }
 0x1a2   : > { %v1302_v47 = vpop.permute.xlu1 %1301  ;;  %v1382_v49 = vpop.permute.xlu0 %1381 }
 0x1a3   : > { %v1306_v53 = vadd.f32 %v1302_v47, %v1250_v12  ;;  %v1387_v61 = vadd.f32 %v1382_v49, %v1355_v45  ;;  %v1769_v12 = vmul.f32 %v1767_v17, %v4921_v57  ;;  %v1724_v45 = vmul.f32 %v1723_v29, %v4901_v41 }
 0x1a4   : > { %1257 = vrot.lane.b32.xlu1 %v1253_v7, %s7074_s13 }
 0x1a5   : > { %v1356_v55 = vadd.f32 %v1354_v60, %v1306_v53  ;;  %v1806_v60 = vmul.f32 %v1805_v43, %v4913_v51 }
 0x1a6   : > { %v1384_v58 = vpop.permute.xlu1 %1383  ;;  %v1438_v59 = vpop.permute.xlu0 %1437 }
 0x1a7   : > { %v1443_v0 = vadd.f32 %v1438_v59, %v1387_v61  ;;  %v1388_v25 = vadd.f32 %v1384_v58, %v1356_v55  ;;  %v1861_v55 = vstv %s5206_s21  ;;  %s5367_s21 = sld [smem:[#allocation5 + $0x5b]] }
 0x1a8   : > { %1313 = vrot.lane.b32.xlu1 %v1309_v63, %s7073_s5  ;;  %v1862_v43 = vmul.f32 %v1861_v55, %v4913_v51 }
 0x1a9   : > { %v1494_v1 = vadd.f32 %v1492_v15, %v1443_v0 }
 0x1aa   : > { %v1440_v6 = vpop.permute.xlu1 %1439  ;;  %v1521_v48 = vpop.permute.xlu0 %1520 }
 0x1ab   : > { %v1444_v13 = vadd.f32 %v1440_v6, %v1388_v25  ;;  %v1526_v39 = vadd.f32 %v1521_v48, %v1494_v1  ;;  %v298_v1 = vstv %s5213_s22  ;;  %v354_v6 = vstv %s5219_s30  ;;  %s5371_s22 = sld [smem:[#allocation5 + $0x30]]  ;;  %s5382_s30 = sld [smem:[#allocation5 + $0x5c]] }
 0x1ac   : > { %1395 = vrot.lane.b32.xlu1 %v1391_v2, %s7074_s13  ;;  %v300_v51 = vmul.f32 %v298_v1, %v4774_v19 }
 0x1ad   : > { %v1495_v44 = vadd.f32 %v1493_v10, %v1444_v13  ;;  %v5248_v10 = vld [vmem:[#allocation2] sm:$0xff] }
 0x1ae   : > { %v1523_v16 = vpop.permute.xlu1 %1522  ;;  %v1577_v54 = vpop.permute.xlu0 %1576  ;;  %v355_v8 = vmul.f32 %v5248_v10, %v354_v6 }
 0x1af   : > { %v1582_v52 = vadd.f32 %v1577_v54, %v1526_v39  ;;  %v1527_v34 = vadd.f32 %v1523_v16, %v1495_v44  ;;  %v436_v39 = vstv %s5229_s7  ;;  %v252_v54 = vstv %s3933_s2  ;;  %s5394_s7 = sld [smem:[#allocation5 + $0x33]]  ;;  %s5435_s2 = sld [smem:[#allocation5 + $0x39]] }
 0x1b0   : > { %1451 = vrot.lane.b32.xlu1 %v1447_v11, %s7073_s5  ;;  %v437_v44 = vmul.f32 %v436_v39, %v4780_v24  ;;  %v492_v11 = vstv %s5243_s8  ;;  %s5412_s8 = sld [smem:[#allocation5 + $0x36]] }
 0x1b1   : > { %v1632_v22 = vadd.f32 %v1630_v18, %v1582_v52  ;;  %v493_v18 = vmul.f32 %v492_v11, %v4780_v24 }
 0x1b2   : > { %v1579_v23 = vpop.permute.xlu1 %1578  ;;  %v1659_v26 = vpop.permute.xlu0 %1658 }
 0x1b3   : > { %v1583_v30 = vadd.f32 %v1579_v23, %v1527_v34  ;;  %v1664_v9 = vadd.f32 %v1659_v26, %v1632_v22  ;;  %v5269_v34 = vld [vmem:[#allocation2 + $0x8] sm:$0xff]  ;;  %v253_v23 = vmul.f32 %v5248_v10, %v252_v54  ;;  %v238_v26 = vstv %s3930_s29  ;;  %s5469_s29 = sld [smem:[#allocation5 + $0x3f]] }
 0x1b4   : > { %1534 = vrot.lane.b32.xlu1 %v1530_v3, %s7074_s13  ;;  %v254_v22 = vmul.f32 %v5269_v34, %v252_v54  ;;  %v574_v3 = vstv %s5254_s20  ;;  %v907_v54 = vstv %s5321_s24  ;;  %s5453_s20 = sld [smem:[#allocation5 + $0x3c]] }
 0x1b5   : > { %v1633_v37 = vadd.f32 %v1631_v31, %v1583_v30  ;;  %v575_v31 = vmul.f32 %v574_v3, %v4794_v32  ;;  %s5542_s24 = sld [smem:[#allocation5 + $0x64]] }
 0x1b6   : > { %v1661_v56 = vpop.permute.xlu1 %1660  ;;  %v1715_v33 = vpop.permute.xlu0 %1714  ;;  %v256_v17 = vadd.f32 %v254_v22, %v238_v26 }
 0x1b7   : > { %v1720_v38 = vadd.f32 %v1715_v33, %v1664_v9  ;;  %v1665_v4 = vadd.f32 %v1661_v56, %v1633_v37  ;;  %v630_v9 = vstv %s5261_s14  ;;  %v255_v37 = vadd.f32 %v253_v23, %v238_v26  ;;  %v5290_v33 = vld [vmem:[#allocation2 + $0x2] sm:$0xff]  ;;  %s5477_s14 = sld [smem:[#allocation5 + $0x42]] }
 0x1b8   : > { %1590 = vrot.lane.b32.xlu1 %v1586_v36, %s7073_s5 }
 0x1b9   : > { %v1770_v40 = vadd.f32 %v1768_v35, %v1720_v38  ;;  %v631_v38 = vmul.f32 %v5290_v33, %v630_v9 }
 0x1ba   : > { %v1717_v14 = vpop.permute.xlu1 %1716  ;;  %v1797_v28 = vpop.permute.xlu0 %1796 }
 0x1bb   : > { %v1721_v42 = vadd.f32 %v1717_v14, %v1665_v4  ;;  %v1802_v27 = vadd.f32 %v1797_v28, %v1770_v40  ;;  %v1863_v4 = vmul.f32 %v1861_v55, %v4921_v57  ;;  %v713_v40 = vstv %s5273_s27  ;;  %v5309_v57 = vld [vmem:[#allocation2 + $0x18] sm:$0xff]  ;;  %s5486_s27 = sld [smem:[#allocation5 + $0x45]] }
 0x1bc   : > { %1672 = vrot.lane.b32.xlu1 %v1668_v46, %s7074_s13  ;;  %v390_v14 = vstv %s5275_s12  ;;  %s5519_s12 = sld [smem:[#allocation5 + $0x5e]] }
 0x1bd   : > { %v1771_v50 = vadd.f32 %v1769_v12, %v1721_v42  ;;  %v5305_v42 = vld [vmem:[#allocation2 + $0x9] sm:$0xff] }
 0x1be   : > { %v1799_v47 = vpop.permute.xlu1 %1798  ;;  %v1853_v49 = vpop.permute.xlu0 %1852  ;;  %v392_v12 = vmul.f32 %v5305_v42, %v390_v14 }
 0x1bf   : > { %v1858_v7 = vadd.f32 %v1853_v49, %v1802_v27  ;;  %v1803_v5 = vadd.f32 %v1799_v47, %v1771_v50  ;;  %v714_v50 = vmul.f32 %v5309_v57, %v713_v40 }
 0x1c0   : > { %1728 = vrot.lane.b32.xlu1 %v1724_v45, %s7073_s5  ;;  %v5314_v45 = vld [vmem:[#allocation2 + $0x1] sm:$0xff] }
 0x1c1   : > { %v1904_v53 = vmul.f32 0.2, %v1858_v7  ;;  %vm1902_vm3 = vcmp.gt.f32.partialorder %v1858_v7, 0.0  ;;  %v391_v47 = vmul.f32 %v5314_v45, %v390_v14  ;;  %v1045_v14 = vstv %s5354_s17 }
 0x1c2   : > { %v1855_v62 = vpop.permute.xlu1 %1854  ;;  %v5231_v59 = vpop.permute.xlu0 %565 }
 0x1c3   : > { %v1859_v61 = vadd.f32 %v1855_v62, %v1803_v5  ;;  %v5222_v29 = vsel %vm1902_vm3, %v1858_v7, %v1904_v53  ;;  %v299_v7 = vmul.f32 %v5248_v10, %v298_v1  ;;  %v769_v5 = vstv %s5285_s15  ;;  %v5340_v1 = vld [vmem:[#allocation2 + $0xa] sm:$0xff]  ;;  %s5525_s15 = sld [smem:[#allocation5 + $0x5f]] }
 0x1c4   : > { %1810 = vrot.lane.b32.xlu1 %v1806_v60, %s7074_s13  ;;  %v1909_v0 = vsel %vm1908_vm5, %v5222_v29, 0.0 }
 0x1c5   : > { %v1905_v41 = vmul.f32 0.2, %v1859_v61  ;;  %vm1903_vm4 = vcmp.gt.f32.partialorder %v1859_v61, 0.0 }
 0x1c6   : > { %v290_v63 = vpop.permute.xlu1 %289  ;;  %v5246_v48 = vpop.permute.xlu0 %762 }
 0x1c7   : > { %v5227_v58 = vsel %vm1903_vm4, %v1859_v61, %v1905_v41  ;;  %v295_v35 = vadd.f32 %v290_v63, %v255_v37  ;;  %v528_v61 = vstv %s5288_s9  ;;  %v770_v41 = vmul.f32 %v5309_v57, %v769_v5  ;;  %s5532_s9 = sld [smem:[#allocation5 + $0x61]] }
 0x1c8   : > { %1866 = vrot.lane.b32.xlu1 %v1862_v43, %s7073_s5  ;;  %v1910_v15 = vsel %vm1908_vm5, %v5227_v58, 0.0 }
 0x1c9   : > { %v1911_v25 = vadd.f32 %v1910_v15, %v1909_v0  ;;  %v356_v0 = vmul.f32 %v5269_v34, %v354_v6  ;;  %v851_v15 = vstv %s5299_s19  ;;  %s5537_s19 = sld [smem:[#allocation5 + $0x62]] }
 0x1ca   : > { %v292_v2 = vpop.permute.xlu1 %291  ;;  %v5263_v16 = vpop.permute.xlu0 %844 }
 0x1cb   : > { %1912 = vadd.xlane.f32.xlu0 %v1911_v25  ;;  %v296_v36 = vadd.f32 %v292_v2, %v256_v17  ;;  %v530_v2 = vmul.f32 %v5340_v1, %v528_v61 }
 0x1cc   : > { %305 = vrot.lane.b32.xlu1 %v300_v51, %s7074_s13 }
 0x1ce   : > { %v346_v13 = vpop.permute.xlu1 %345  ;;  %v5279_v30 = vpop.permute.xlu0 %900 }
 0x1cf   : > { %v351_v28 = vadd.f32 %v346_v13, %v295_v35  ;;  %v5344_v13 = vld [vmem:[#allocation2 + $0x19] sm:$0xff] }
 0x1d0   : > { %359 = vrot.lane.b32.xlu1 %v355_v8, %s7073_s5  ;;  %v852_v6 = vmul.f32 %v5344_v13, %v851_v15  ;;  %v529_v8 = vmul.f32 %v5290_v33, %v528_v61  ;;  %v908_v23 = vmul.f32 %v5344_v13, %v907_v54 }
 0x1d1   : > { %v393_v53 = vadd.f32 %v391_v47, %v351_v28 }
 0x1d2   : > { %v348_v19 = vpop.permute.xlu1 %347  ;;  %v5301_v46 = vpop.permute.xlu0 %982 }
 0x1d3   : > { %v352_v32 = vadd.f32 %v348_v19, %v296_v36 }
 0x1d4   : > { %441 = vrot.lane.b32.xlu1 %v437_v44, %s7074_s13  ;;  %v438_v44 = vmul.f32 %v5305_v42, %v436_v39  ;;  %v494_v39 = vmul.f32 %v5305_v42, %v492_v11 }
 0x1d5   : > { %v394_v49 = vadd.f32 %v392_v12, %v352_v32  ;;  %v5387_v32 = vld [vmem:[#allocation2 + $0x20] sm:$0xff] }
 0x1d6   : > { %v428_v52 = vpop.permute.xlu1 %427  ;;  %v5325_v62 = vpop.permute.xlu0 %1038 }
 0x1d7   : > { %v433_v63 = vadd.f32 %v428_v52, %v393_v53 }
 0x1d8   : > { %497 = vrot.lane.b32.xlu1 %v493_v18, %s7073_s5 }
 0x1da   : > { %v430_v24 = vpop.permute.xlu1 %429  ;;  %v5356_v52 = vpop.permute.xlu0 %1121 }
 0x1db   : > { %v434_v60 = vadd.f32 %v430_v24, %v394_v49  ;;  %v989_v24 = vstv %s5335_s1  ;;  %v632_v49 = vmul.f32 %v5340_v1, %v630_v9  ;;  %s5547_s1 = sld [smem:[#allocation5 + $0x65]] }
 0x1dc   : > { %579 = vrot.lane.b32.xlu1 %v575_v31, %s7074_s13  ;;  %v667_v31 = vstv %s5338_s16  ;;  %s5552_s16 = sld [smem:[#allocation5 + $0x67]] }
 0x1dd   : > { %v668_v28 = vmul.f32 %v5309_v57, %v667_v31 }
 0x1de   : > { %v484_v56 = vpop.permute.xlu1 %483  ;;  %v5375_v36 = vpop.permute.xlu0 %1177 }
 0x1df   : > { %v489_v25 = vadd.f32 %v484_v56, %v433_v63 }
 0x1e0   : > { %635 = vrot.lane.b32.xlu1 %v631_v38, %s7073_s5  ;;  %v5377_v38 = vld [vmem:[#allocation2 + $0x1a] sm:$0xff] }
 0x1e1   : > { %1868 = vrot.lane.b32.xlu0 %v1863_v4, %s7073_s5  ;;  %v531_v18 = vadd.f32 %v529_v8, %v489_v25  ;;  %v990_v11 = vmul.f32 %v5377_v38, %v989_v24  ;;  %v669_v4 = vmul.f32 %v5387_v32, %v667_v31  ;;  %v1184_v25 = vstv %s5382_s30  ;;  %s5579_s30 = sld [smem:[#allocation5 + $0x6b]] }
 0x1e2   : > { %v486_v27 = vpop.permute.xlu1 %485  ;;  %v5403_v53 = vpop.permute.xlu0 %1259 }
 0x1e3   : > { %v490_v43 = vadd.f32 %v486_v27, %v434_v60  ;;  %v571_v17 = vadd.f32 %v5231_v59, %v531_v18  ;;  %v576_v59 = vmul.f32 %v5340_v1, %v574_v3  ;;  %v805_v60 = vstv %s5371_s22  ;;  %s5568_s22 = sld [smem:[#allocation5 + $0x6a]] }
 0x1e4   : > { %718 = vrot.lane.b32.xlu1 %v714_v50, %s7074_s13  ;;  %v1046_v50 = vmul.f32 %v5377_v38, %v1045_v14  ;;  %v943_v18 = vstv %s5394_s7  ;;  %s5594_s7 = sld [smem:[#allocation5 + $0x48]] }
 0x1e5   : > { %303 = vrot.lane.b32.xlu0 %v299_v7, %s7074_s13  ;;  %v532_v19 = vadd.f32 %v530_v2, %v490_v43  ;;  %v1128_v7 = vstv %s5367_s21  ;;  %v5414_v43 = vld [vmem:[#allocation2 + $0x30] sm:$0xff]  ;;  %s5557_s21 = sld [smem:[#allocation5 + $0x68]] }
 0x1e6   : > { %v568_v55 = vpop.permute.xlu1 %567 }
 0x1e7   : > { %v572_v26 = vadd.f32 %v568_v55, %v532_v19  ;;  %v5407_v55 = vld [vmem:[#allocation2 + $0x21] sm:$0xff] }
 0x1e8   : > { %774 = vrot.lane.b32.xlu1 %v770_v41, %s7073_s5  ;;  %v807_v41 = vmul.f32 %v5407_v55, %v805_v60 }
 0x1e9   : > { %361 = vrot.lane.b32.xlu0 %v356_v0, %s7073_s5  ;;  %v1129_v0 = vmul.f32 %v5414_v43, %v1128_v7 }
 0x1ea   : > { %v622_v51 = vpop.permute.xlu1 %621 }
 0x1eb   : > { %v627_v35 = vadd.f32 %v622_v51, %v571_v17 }
 0x1ec   : > { %856 = vrot.lane.b32.xlu1 %v852_v6, %s7074_s13  ;;  %v715_v6 = vmul.f32 %v5387_v32, %v713_v40 }
 0x1ed   : > { %443 = vrot.lane.b32.xlu0 %v438_v44, %s7074_s13  ;;  %v670_v3 = vadd.f32 %v668_v28, %v627_v35  ;;  %v1316_v44 = vpop.permute.xlu0 %1315 }
 0x1ee   : > { %v624_v22 = vpop.permute.xlu1 %623 }
 0x1ef   : > { %v628_v37 = vadd.f32 %v624_v22, %v572_v26  ;;  %v5431_v26 = vld [vmem:[#allocation2 + $0x22] sm:$0xff] }
 0x1f0   : > { %912 = vrot.lane.b32.xlu1 %v908_v23, %s7073_s5  ;;  %v1185_v23 = vmul.f32 %v5414_v43, %v1184_v25  ;;  %v945_v40 = vmul.f32 %v5431_v26, %v943_v18 }
 0x1f1   : > { %499 = vrot.lane.b32.xlu0 %v494_v39, %s7073_s5  ;;  %v671_v12 = vadd.f32 %v669_v4, %v628_v37  ;;  %v1082_v37 = vstv %s5412_s8  ;;  %v1398_v4 = vpop.permute.xlu0 %1397  ;;  %s5598_s8 = sld [smem:[#allocation6 + $0x2]] }
 0x1f2   : > { %v705_v56 = vpop.permute.xlu1 %704 }
 0x1f3   : > { %v710_v61 = vadd.f32 %v705_v56, %v670_v3  ;;  %v1220_v3 = vstv %s5435_s2  ;;  %s5605_s2 = sld [smem:[#allocation5 + $0x4b]] }
 0x1f4   : > { %994 = vrot.lane.b32.xlu1 %v990_v11, %s7074_s13 }
 0x1f5   : > { %581 = vrot.lane.b32.xlu0 %v576_v59, %s7074_s13  ;;  %v944_v59 = vmul.f32 %v5377_v38, %v943_v18 }
 0x1f6   : > { %v707_v27 = vpop.permute.xlu1 %706 }
 0x1f7   : > { %v711_v47 = vadd.f32 %v707_v27, %v671_v12 }
 0x1f8   : > { %1050 = vrot.lane.b32.xlu1 %v1046_v50, %s7073_s5 }
 0x1f9   : > { %v767_v63 = vadd.f32 %v5246_v48, %v711_v47  ;;  %637 = vrot.lane.b32.xlu0 %v632_v49, %s7073_s5  ;;  %v806_v48 = vmul.f32 %v5344_v13, %v805_v60  ;;  %v1454_v60 = vpop.permute.xlu0 %1453 }
 0x1fa   : > { %v761_v9 = vpop.permute.xlu1 %760 }
 0x1fb   : > { %v809_v2 = vadd.f32 %v807_v41, %v767_v63  ;;  %v766_v51 = vadd.f32 %v761_v9, %v710_v61 }
 0x1fc   : > { %1133 = vrot.lane.b32.xlu1 %v1129_v0, %s7074_s13  ;;  %v991_v0 = vmul.f32 %v5431_v26, %v989_v24 }
 0x1fd   : > { %v849_v8 = vadd.f32 %v5263_v16, %v809_v2  ;;  %720 = vrot.lane.b32.xlu0 %v715_v6, %s7074_s13  ;;  %v808_v19 = vadd.f32 %v806_v48, %v766_v51  ;;  %v771_v16 = vmul.f32 %v5387_v32, %v769_v5  ;;  %v5448_v5 = vld [vmem:[#allocation2 + $0x38] sm:$0xff]  ;;  %v1358_v51 = vstv %s5453_s20  ;;  %s5613_s20 = sld [smem:[#allocation5 + $0x4e]] }
 0x1fe   : > { %v843_v22 = vpop.permute.xlu1 %842  ;;  %v1084_v28 = vmul.f32 %v5448_v5, %v1082_v37 }
 0x1ff   : > { %v905_v39 = vadd.f32 %v5279_v30, %v849_v8  ;;  %v848_v17 = vadd.f32 %v843_v22, %v808_v19  ;;  %v853_v30 = vmul.f32 %v5407_v55, %v851_v15  ;;  %v909_v15 = vmul.f32 %v5407_v55, %v907_v54  ;;  %v1537_v8 = vpop.permute.xlu0 %1536 }
 0x200   : > { %1189 = vrot.lane.b32.xlu1 %v1185_v23, %s7073_s5  ;;  %v1083_v54 = vmul.f32 %v5414_v43, %v1082_v37 }
 0x201   : > { %v947_v31 = vadd.f32 %v945_v40, %v905_v39  ;;  %776 = vrot.lane.b32.xlu0 %v771_v16, %s7073_s5  ;;  %v5479_v39 = vld [vmem:[#allocation2 + $0x31] sm:$0xff] }
 0x202   : > { %v899_v56 = vpop.permute.xlu1 %898  ;;  %v1221_v16 = vmul.f32 %v5479_v39, %v1220_v3 }
 0x203   : > { %v987_v11 = vadd.f32 %v5301_v46, %v947_v31  ;;  %v904_v35 = vadd.f32 %v899_v56, %v848_v17  ;;  %v1497_v31 = vstv %s5469_s29  ;;  %v1593_v37 = vpop.permute.xlu0 %1592  ;;  %s5622_s29 = sld [smem:[#allocation5 + $0x6d]] }
 0x205   : > { %v1043_v12 = vadd.f32 %v5325_v62, %v987_v11  ;;  %858 = vrot.lane.b32.xlu0 %v853_v30, %s7074_s13  ;;  %v946_v27 = vadd.f32 %v944_v59, %v904_v35  ;;  %v5461_v62 = vld [vmem:[#allocation2 + $0x39] sm:$0xff]  ;;  %v5483_v11 = vld [vmem:[#allocation2 + $0x50] sm:$0xff] }
 0x206   : > { %v981_v46 = vpop.permute.xlu1 %980  ;;  %v1222_v61 = vmul.f32 %v5461_v62, %v1220_v3  ;;  %v1499_v35 = vmul.f32 %v5483_v11, %v1497_v31 }
 0x207   : > { %v1086_v50 = vadd.f32 %v1084_v28, %v1043_v12  ;;  %v986_v49 = vadd.f32 %v981_v46, %v946_v27  ;;  %v1635_v28 = vstv %s5477_s14  ;;  %v1675_v3 = vpop.permute.xlu0 %1674  ;;  %s5624_s14 = sld [smem:[#allocation5 + $0x51]] }
 0x209   : > { %v1126_v47 = vadd.f32 %v5356_v52, %v1086_v50  ;;  %914 = vrot.lane.b32.xlu0 %v909_v15, %s7073_s5  ;;  %v5489_v50 = vld [vmem:[#allocation2 + $0x32] sm:$0xff] }
 0x20a   : > { %v1037_v41 = vpop.permute.xlu1 %1036 }
 0x20b   : > { %v1182_v63 = vadd.f32 %v5375_v36, %v1126_v47  ;;  %v1042_v9 = vadd.f32 %v1037_v41, %v986_v49  ;;  %v5474_v36 = vld [vmem:[#allocation2 + $0x3a] sm:$0xff]  ;;  %v5492_v47 = vld [vmem:[#allocation2 + $0x51] sm:$0xff] }
 0x20c   : > { %v1360_v18 = vmul.f32 %v5474_v36, %v1358_v51  ;;  %v1637_v49 = vmul.f32 %v5492_v47, %v1635_v28 }
 0x20d   : > { %v1224_v52 = vadd.f32 %v1222_v61, %v1182_v63  ;;  %996 = vrot.lane.b32.xlu0 %v991_v0, %s7074_s13  ;;  %v1085_v2 = vadd.f32 %v1083_v54, %v1042_v9  ;;  %v1773_v63 = vstv %s5486_s27  ;;  %v1731_v54 = vpop.permute.xlu0 %1730  ;;  %s5632_s27 = sld [smem:[#allocation5 + $0x70]] }
 0x20e   : > { %v1120_v6 = vpop.permute.xlu1 %1119 }
 0x20f   : > { %v1264_v48 = vadd.f32 %v5403_v53, %v1224_v52  ;;  %v1125_v24 = vadd.f32 %v1120_v6, %v1085_v2  ;;  %v5496_v6 = vld [vmem:[#allocation2 + $0x52] sm:$0xff] }
 0x211   : > { %v1320_v19 = vadd.f32 %v1316_v44, %v1264_v48  ;;  %v1775_v48 = vmul.f32 %v5496_v6, %v1773_v63 }
 0x212   : > { %v1176_v22 = vpop.permute.xlu1 %1175 }
 0x213   : > { %v1362_v23 = vadd.f32 %v1360_v18, %v1320_v19  ;;  %v1181_v40 = vadd.f32 %v1176_v22, %v1125_v24 }
 0x215   : > { %v1402_v17 = vadd.f32 %v1398_v4, %v1362_v23  ;;  %v1223_v53 = vadd.f32 %v1221_v16, %v1181_v40  ;;  %v1359_v4 = vmul.f32 %v5489_v50, %v1358_v51 }
 0x216   : > { %v1258_v44 = vpop.permute.xlu1 %1257 }
 0x217   : > { %v1458_v56 = vadd.f32 %v1454_v60, %v1402_v17  ;;  %v1263_v59 = vadd.f32 %v1258_v44, %v1223_v53  ;;  %v5502_v17 = vld [vmem:[#allocation2 + $0x49] sm:$0xff] }
 0x218   : > { %v1636_v53 = vmul.f32 %v5502_v17, %v1635_v28 }
 0x219   : > { %v1501_v30 = vadd.f32 %v1499_v35, %v1458_v56 }
 0x21a   : > { %v1314_v12 = vpop.permute.xlu1 %1313 }
 0x21b   : > { %v1541_v27 = vadd.f32 %v1537_v8, %v1501_v30  ;;  %v1319_v46 = vadd.f32 %v1314_v12, %v1263_v59  ;;  %v5499_v8 = vld [vmem:[#allocation2 + $0x48] sm:$0xff] }
 0x21c   : > { %v1498_v19 = vmul.f32 %v5499_v8, %v1497_v31  ;;  %v5505_v59 = vld [vmem:[#allocation2 + $0x4a] sm:$0xff] }
 0x21d   : > { %v1597_v15 = vadd.f32 %v1593_v37, %v1541_v27  ;;  %v1361_v60 = vadd.f32 %v1359_v4, %v1319_v46  ;;  %v1774_v12 = vmul.f32 %v5505_v59, %v1773_v63  ;;  %v1813_v46 = vpop.permute.xlu0 %1812 }
 0x21e   : > { %v1396_v61 = vpop.permute.xlu1 %1395 }
 0x21f   : > { %v1639_v41 = vadd.f32 %v1637_v49, %v1597_v15  ;;  %v1401_v0 = vadd.f32 %v1396_v61, %v1361_v60 }
 0x221   : > { %v1679_v9 = vadd.f32 %v1675_v3, %v1639_v41 }
 0x222   : > { %v1452_v52 = vpop.permute.xlu1 %1451 }
 0x223   : > { %v1735_v2 = vadd.f32 %v1731_v54, %v1679_v9  ;;  %v1457_v51 = vadd.f32 %v1452_v52, %v1401_v0 }
 0x225   : > { %v1777_v18 = vadd.f32 %v1775_v48, %v1735_v2  ;;  %v1500_v24 = vadd.f32 %v1498_v19, %v1457_v51 }
 0x226   : > { %v1535_v22 = vpop.permute.xlu1 %1534 }
 0x227   : > { %v1540_v23 = vadd.f32 %v1535_v22, %v1500_v24  ;;  %v1817_v61 = vadd.f32 %v1813_v46, %v1777_v18 }
 0x22a   : > { %v1591_v40 = vpop.permute.xlu1 %1590 }
 0x22b   : > { %v1596_v16 = vadd.f32 %v1591_v40, %v1540_v23  ;;  %v1047_v23 = vmul.f32 %v5431_v26, %v1045_v14  ;;  %v1130_v40 = vmul.f32 %v5448_v5, %v1128_v7 }
 0x22d   : > { %v1638_v37 = vadd.f32 %v1636_v53, %v1596_v16  ;;  %v1186_v16 = vmul.f32 %v5448_v5, %v1184_v25  ;;  %v1266_v53 = vstv %s5519_s12  ;;  %s5640_s12 = sld [smem:[#allocation5 + $0x71]] }
 0x22e   : > { %v1673_v44 = vpop.permute.xlu1 %1672  ;;  %v1268_v14 = vmul.f32 %v5461_v62, %v1266_v53 }
 0x22f   : > { %v1678_v56 = vadd.f32 %v1673_v44, %v1638_v37  ;;  %v1322_v37 = vstv %s5525_s15  ;;  %v1404_v44 = vstv %s5532_s9  ;;  %s5646_s15 = sld [smem:[#allocation5 + $0x54]]  ;;  %s5653_s9 = sld [smem:[#allocation5 + $0x73]] }
 0x230   : > { %v1324_v7 = vmul.f32 %v5461_v62, %v1322_v37  ;;  %v1406_v25 = vmul.f32 %v5474_v36, %v1404_v44 }
 0x232   : > { %v1729_v35 = vpop.permute.xlu1 %1728 }
 0x233   : > { %v1734_v30 = vadd.f32 %v1729_v35, %v1678_v56  ;;  %v1460_v56 = vstv %s5537_s19  ;;  %s5672_s19 = sld [smem:[#allocation5 + $0x76]] }
 0x234   : > { %v1462_v35 = vmul.f32 %v5474_v36, %v1460_v56 }
 0x235   : > { %v1776_v31 = vadd.f32 %v1774_v12, %v1734_v30  ;;  %v1543_v30 = vstv %s5542_s24  ;;  %s5674_s24 = sld [smem:[#allocation5 + $0x57]] }
 0x236   : > { %v1811_v27 = vpop.permute.xlu1 %1810  ;;  %v1545_v12 = vmul.f32 %v5483_v11, %v1543_v30 }
 0x237   : > { %v1816_v3 = vadd.f32 %v1811_v27, %v1776_v31  ;;  %v1599_v31 = vstv %s5547_s1  ;;  %s5682_s1 = sld [smem:[#allocation5 + $0x77]] }
 0x23a   : > { %v1867_v4 = vpop.permute.xlu1 %1866 }
 0x23b   : > { %v1872_v15 = vadd.f32 %v1867_v4, %v1816_v3  ;;  %v1601_v4 = vmul.f32 %v5483_v11, %v1599_v31 }
 0x23d   : > { %v1957_v41 = vmul.f32 0.2, %v1872_v15  ;;  %vm1955_vm6 = vcmp.gt.f32.partialorder %v1872_v15, 0.0 }
 0x23f   : > { %v5508_v2 = vsel %vm1955_vm6, %v1872_v15, %v1957_v41 }
 0x240   : > { %v1961_v19 = vsel %vm1908_vm5, %v5508_v2, 0.0 }
 0x258   : > { %v1913_v49 = vpop.xlane.xlu0 %1912 }
 0x259   : > { %v1914_v60 = vrot.slane %v1913_v49, 4 }
 0x25b   : > { %v1915_v28 = vadd.f32 %v1914_v60, %v1913_v49  ;;  %v1681_v49 = vstv %s5552_s16  ;;  %s5685_s16 = sld [smem:[#allocation5 + $0x5a]] }
 0x25c   : > { %v1869_v9 = vpop.permute.xlu0 %1868  ;;  %v1683_v41 = vmul.f32 %v5492_v47, %v1681_v49 }
 0x25d   : > { %v1873_v0 = vadd.f32 %v1869_v9, %v1817_v61  ;;  %v1916_v54 = vrot.slane %v1915_v28, 2 }
 0x25f   : > { %vm1956_vm7 = vcmp.gt.f32.partialorder %v1873_v0, 0.0  ;;  %v1958_v52 = vmul.f32 0.2, %v1873_v0  ;;  %v1917_v63 = vadd.f32 %v1916_v54, %v1915_v28  ;;  %v1819_v54 = vstv %s5568_s22  ;;  %s5711_s22 = sld [smem:[#allocation5 + $0x5d]] }
 0x261   : > { %v1918_v48 = vrot.slane %v1917_v63, 1  ;;  %v5510_v51 = vsel %vm1956_vm7, %v1873_v0, %v1958_v52  ;;  %v1821_v52 = vmul.f32 %v5496_v6, %v1819_v54 }
 0x262   : > { %v1962_v18 = vsel %vm1908_vm5, %v5510_v51, 0.0 }
 0x263   : > { %v1919_v24 = vadd.f32 %v1918_v48, %v1917_v63  ;;  %v1963_v22 = vadd.f32 %v1962_v18, %v1961_v19  ;;  %v1875_v63 = vstv %s5579_s30  ;;  %v1267_v19 = vmul.f32 %v5479_v39, %v1266_v53  ;;  %v5591_v18 = vpop.permute.xlu0 %303  ;;  %s5717_s30 = sld [smem:[#allocation5 + $0x7c]] }
 0x264   : > { %v1877_v48 = vmul.f32 %v5496_v6, %v1875_v63 }
 0x265   : > { %4230 = vpush %v1919_v24  ;;  %1964 = vadd.xlane.f32.xlu0 %v1963_v22  ;;  %v1323_v24 = vmul.f32 %v5479_v39, %v1322_v37  ;;  %v240_v37 = vstv %s5598_s8  ;;  %s5734_s8 = sld [smem:[#allocation5 + $0x60]] }
 0x267   : > { %v362_v22 = vpop.permute.xlu0 %361 }
 0x27b   : > { %1052 = vrot.lane.b32.xlu0 %v1047_v23, %s7073_s5  ;;  %v1405_v23 = vmul.f32 %v5489_v50, %v1404_v44 }
 0x27f   : > { %1135 = vrot.lane.b32.xlu0 %v1130_v40, %s7074_s13  ;;  %v258_v40 = vstv %s5594_s7  ;;  %s5727_s7 = sld [smem:[#allocation5 + $0x7d]] }
 0x280   : > { %v260_v53 = vmul.f32 %v5269_v34, %v258_v40 }
 0x283   : > { %1191 = vrot.lane.b32.xlu0 %v1186_v16, %s7073_s5  ;;  %v1461_v16 = vmul.f32 %v5489_v50, %v1460_v56 }
 0x287   : > { %1273 = vrot.lane.b32.xlu0 %v1268_v14, %s7074_s13  ;;  %v444_v14 = vpop.permute.xlu0 %443 }
 0x28b   : > { %1329 = vrot.lane.b32.xlu0 %v1324_v7, %s7073_s5  ;;  %v306_v7 = vpop.permute.xlu1 %305 }
 0x28f   : > { %1411 = vrot.lane.b32.xlu0 %v1406_v25, %s7074_s13  ;;  %v1544_v25 = vmul.f32 %v5499_v8, %v1543_v30 }
 0x293   : > { %1467 = vrot.lane.b32.xlu0 %v1462_v35, %s7073_s5  ;;  %v262_v35 = vadd.f32 %v260_v53, %v240_v37  ;;  %v450_v53 = vstv %s5632_s27  ;;  %s5856_s27 = sld [smem:[#allocation5 + $0x82]] }
 0x295   : > { %v310_v44 = vadd.f32 %v306_v7, %v262_v35 }
 0x296   : > { %s4231_s17 = spop %4230 }
 0x297   : > { %v1921_v27 = vstv %s4231_s17  ;;  %1550 = vrot.lane.b32.xlu0 %v1545_v12, %s7074_s13  ;;  %v500_v12 = vpop.permute.xlu0 %499  ;;  %v366_v56 = vadd.f32 %v362_v22, %v310_v44  ;;  %v811_v44 = vstv %s5646_s15  ;;  %s5691_s17 = sld [smem:[#allocation5 + $0x79]] }
 0x298   : > { %v1922_v46 = vmul.f32 0.00390625, %v1921_v27  ;;  %v1600_v27 = vmul.f32 %v5499_v8, %v1599_v31  ;;  %v534_v31 = vstv %s5613_s20  ;;  %s5755_s20 = sld [smem:[#allocation5 + $0x63]] }
 0x29a   : > { %v5562_v3 = vsub.f32 %v5222_v29, %v1922_v46  ;;  %v5565_v15 = vsub.f32 %v5227_v58, %v1922_v46  ;;  %v1737_v58 = vstv %s5557_s21  ;;  %v396_v46 = vstv %s5605_s2  ;;  %s5702_s21 = sld [smem:[#allocation5 + $0x7a]]  ;;  %s5737_s2 = sld [smem:[#allocation5 + $0x7f]] }
 0x29b   : > { %1606 = vrot.lane.b32.xlu0 %v1601_v4, %s7073_s5  ;;  %v1739_v0 = vmul.f32 %v5492_v47, %v1737_v58  ;;  %v398_v4 = vmul.f32 %v5305_v42, %v396_v46 }
 0x29c   : > { %v1925_v60 = vmul.f32 %v5562_v3, %v5562_v3  ;;  %v1926_v61 = vmul.f32 %v5565_v15, %v5565_v15 }
 0x29d   : > { %v400_v30 = vadd.f32 %v398_v4, %v366_v56 }
 0x29e   : > { %v1927_v29 = vsel %vm1908_vm5, %v1925_v60, 0.0  ;;  %v1928_v28 = vsel %vm1908_vm5, %v1926_v61, 0.0  ;;  %v1682_v60 = vmul.f32 %v5502_v17, %v1681_v49  ;;  %v582_v61 = vpop.permute.xlu0 %581  ;;  %v1820_v49 = vmul.f32 %v5505_v59, %v1819_v54 }
 0x29f   : > { %1688 = vrot.lane.b32.xlu0 %v1683_v41, %s7074_s13  ;;  %v1929_v9 = vadd.f32 %v1928_v28, %v1927_v29  ;;  %v1738_v41 = vmul.f32 %v5502_v17, %v1737_v58  ;;  %v448_v29 = vadd.f32 %v444_v14, %v400_v30 }
 0x2a1   : > { %1930 = vadd.xlane.f32.xlu1 %v1929_v9  ;;  %v504_v28 = vadd.f32 %v500_v12, %v448_v29  ;;  %v536_v9 = vmul.f32 %v5340_v1, %v534_v31 }
 0x2a2   : > { %v638_v42 = vpop.permute.xlu0 %637 }
 0x2a3   : > { %1744 = vrot.lane.b32.xlu0 %v1739_v0, %s7073_s5  ;;  %v538_v58 = vadd.f32 %v536_v9, %v504_v28  ;;  %v1876_v0 = vmul.f32 %v5505_v59, %v1875_v63 }
 0x2a7   : > { %1826 = vrot.lane.b32.xlu0 %v1821_v52, %s7074_s13  ;;  %v721_v52 = vpop.permute.xlu0 %720 }
 0x2ab   : > { %1882 = vrot.lane.b32.xlu0 %v1877_v48, %s7073_s5  ;;  %v586_v48 = vadd.f32 %v582_v61, %v538_v58  ;;  %v777_v22 = vpop.permute.xlu0 %776  ;;  %v397_v61 = vmul.f32 %v5314_v45, %v396_v46  ;;  %v949_v46 = vstv %s5674_s24  ;;  %s5809_s24 = sshll.u32 %s4622_s26, 7 }
 0x2ad   : > { %v642_v1 = vadd.f32 %v638_v42, %v586_v48 }
 0x2b2   : > { %1271 = vrot.lane.b32.xlu1 %v1267_v19, %s7074_s13  ;;  %v312_v19 = vstv %s5622_s29  ;;  %s5844_s29 = sld [smem:[#allocation5 + $0x80]] }
 0x2b3   : > { %v314_v54 = vmul.f32 %v5269_v34, %v312_v19 }
 0x2b6   : > { %1327 = vrot.lane.b32.xlu1 %v1323_v24, %s7073_s5  ;;  %v673_v24 = vstv %s5624_s14  ;;  %s5767_s14 = sld [smem:[#allocation5 + $0x66]] }
 0x2b7   : > { %v675_v63 = vmul.f32 %v5387_v32, %v673_v24  ;;  %v451_v32 = vmul.f32 %v5314_v45, %v450_v53 }
 0x2b9   : > { %v677_v34 = vadd.f32 %v675_v63, %v642_v1 }
 0x2ba   : > { %1409 = vrot.lane.b32.xlu1 %v1405_v23, %s7074_s13  ;;  %v369_v23 = vmul.f32 %v5248_v10, %v368_v20  ;;  %v360_v20 = vpop.permute.xlu1 %359 }
 0x2bb   : > { %v725_v7 = vadd.f32 %v721_v52, %v677_v34 }
 0x2bd   : > { %v781_v35 = vadd.f32 %v777_v22, %v725_v7 }
 0x2be   : > { %1465 = vrot.lane.b32.xlu1 %v1461_v16, %s7073_s5  ;;  %v259_v16 = vmul.f32 %v5248_v10, %v258_v40  ;;  %v859_v10 = vpop.permute.xlu0 %858 }
 0x2c0   : > { %v261_v14 = vadd.f32 %v259_v16, %v240_v37  ;;  %v813_v37 = vmul.f32 %v5407_v55, %v811_v44  ;;  %v644_v55 = vstv %s5660_s18  ;;  %v535_v16 = vmul.f32 %v5290_v33, %v534_v31  ;;  %s5897_s18 = sld [smem:[#allocation5 + $0x88]] }
 0x2c1   : > { %v645_v28 = vmul.f32 %v5290_v33, %v644_v55 }
 0x2c2   : > { %1548 = vrot.lane.b32.xlu1 %v1544_v25, %s7074_s13  ;;  %v506_v25 = vstv %s5640_s12  ;;  %v309_v40 = vadd.f32 %v5591_v18, %v261_v14  ;;  %v815_v4 = vadd.f32 %v813_v37, %v781_v35  ;;  %v442_v18 = vpop.permute.xlu1 %441  ;;  %s5869_s12 = sld [smem:[#allocation5 + $0x83]] }
 0x2c3   : > { %v507_v12 = vmul.f32 %v5314_v45, %v506_v25 }
 0x2c4   : > { %v365_v56 = vadd.f32 %v360_v20, %v309_v40  ;;  %v863_v29 = vadd.f32 %v859_v10, %v815_v4  ;;  %v1226_v4 = vstv %s5711_s22  ;;  %s5828_s22 = sld [smem:[#allocation9 + %s5809_s24]] }
 0x2c6   : > { %1604 = vrot.lane.b32.xlu1 %v1600_v27, %s7073_s5  ;;  %v588_v27 = vstv %s5653_s9  ;;  %v498_v45 = vpop.permute.xlu1 %497  ;;  %s5888_s9 = sld [smem:[#allocation5 + $0x86]] }
 0x2c7   : > { %v589_v30 = vmul.f32 %v5290_v33, %v588_v27  ;;  %v921_v33 = vstv %s5702_s21  ;;  %s5937_s21 = sld [smem:[#allocation5 + $0x8e]] }
 0x2ca   : > { %1686 = vrot.lane.b32.xlu1 %v1682_v60, %s7074_s13  ;;  %v915_v60 = vpop.permute.xlu0 %914  ;;  %v580_v22 = vpop.permute.xlu1 %579 }
 0x2cb   : > { %v919_v42 = vadd.f32 %v915_v60, %v863_v29  ;;  %v1003_v60 = vstv %s5717_s30  ;;  %v1228_v29 = vmul.f32 %v5461_v62, %v1226_v4  ;;  %s5946_s30 = sld [smem:[#allocation5 + $0x8f]] }
 0x2ce   : > { %1742 = vrot.lane.b32.xlu1 %v1738_v41, %s7073_s5  ;;  %v399_v41 = vadd.f32 %v397_v61, %v365_v56  ;;  %v997_v9 = vpop.permute.xlu0 %996  ;;  %v636_v31 = vpop.permute.xlu1 %635  ;;  %v922_v56 = vmul.f32 %v5344_v13, %v921_v33 }
 0x2d0   : > { %v447_v58 = vadd.f32 %v442_v18, %v399_v41 }
 0x2d2   : > { %1824 = vrot.lane.b32.xlu1 %v1820_v49, %s7074_s13  ;;  %v727_v49 = vstv %s5672_s19  ;;  %v503_v63 = vadd.f32 %v498_v45, %v447_v58  ;;  %v674_v45 = vmul.f32 %v5309_v57, %v673_v24  ;;  %v1059_v58 = vstv %s5727_s7  ;;  %s5908_s19 = sld [smem:[#allocation5 + $0x89]]  ;;  %s7075_s7 = smov 1  }
 0x2d3   : > { %v728_v52 = vmul.f32 %v5309_v57, %v727_v49 }
 0x2d4   : > { %v537_v7 = vadd.f32 %v535_v16, %v503_v63  ;;  %v1364_v63 = vstv %s5734_s8 }
 0x2d6   : > { %1880 = vrot.lane.b32.xlu1 %v1876_v0, %s7073_s5  ;;  %v951_v0 = vmul.f32 %v5431_v26, %v949_v46  ;;  %v585_v37 = vadd.f32 %v580_v22, %v537_v7 }
 0x2d8   : > { %v953_v48 = vadd.f32 %v951_v0, %v919_v42  ;;  %v641_v61 = vadd.f32 %v636_v31, %v585_v37  ;;  %v1004_v42 = vmul.f32 %v5377_v38, %v1003_v60  ;;  %v1503_v31 = vstv %s5755_s20  ;;  %s5877_s20 = sld [smem:[#allocation5 + $0x85]] }
 0x2da   : > { %319 = vrot.lane.b32.xlu1 %v314_v54, %s7074_s13  ;;  %v783_v54 = vstv %s5682_s1  ;;  %v1001_v34 = vadd.f32 %v997_v9, %v953_v48  ;;  %v1060_v48 = vmul.f32 %v5377_v38, %v1059_v58  ;;  %s5917_s1 = sld [smem:[#allocation5 + $0x8b]] }
 0x2db   : > { %v784_v26 = vmul.f32 %v5309_v57, %v783_v54 }
 0x2de   : > { %373 = vrot.lane.b32.xlu1 %v369_v23, %s7073_s5  ;;  %v1088_v23 = vstv %s5685_s16  ;;  %s1945_s16 = sadd.s32 1, %s5809_s24 }
 0x2df   : > { %v1090_v10 = vmul.f32 %v5448_v5, %v1088_v23  ;;  %s5833_s8 = sld [smem:[#allocation9 + %s1945_s16]] }
 0x2e0   : > { %s5998_s16 = sld [smem:[#allocation5 + $0x75]] }
 0x2e2   : > { %455 = vrot.lane.b32.xlu1 %v451_v32, %s7074_s13  ;;  %v865_v32 = vstv %s5691_s17  ;;  %s5928_s17 = sld [smem:[#allocation5 + $0x8c]] }
 0x2e3   : > { %v866_v40 = vmul.f32 %v5344_v13, %v865_v32 }
 0x2e6   : > { %511 = vrot.lane.b32.xlu1 %v507_v12, %s7073_s5 }
 0x2ea   : > { %593 = vrot.lane.b32.xlu1 %v589_v30, %s7074_s13 }
 0x2ee   : > { %649 = vrot.lane.b32.xlu1 %v645_v28, %s7073_s5  ;;  %v719_v28 = vpop.permute.xlu1 %718 }
 0x2f2   : > { %732 = vrot.lane.b32.xlu1 %v728_v52, %s7074_s13  ;;  %v5705_v1 = vpop.xlane.xlu0 %1964  ;;  %v676_v52 = vadd.f32 %v674_v45, %v641_v61  ;;  %v775_v16 = vpop.permute.xlu1 %774  ;;  %v1505_v61 = vmul.f32 %v5483_v11, %v1503_v31  ;;  %v1641_v45 = vstv %s5767_s14  ;;  %s3932_s14 = sld [smem:[#allocation6 + $0x3]] }
 0x2f4   : > { %v724_v24 = vadd.f32 %v719_v28, %v676_v52 }
 0x2f6   : > { %788 = vrot.lane.b32.xlu1 %v784_v26, %s7073_s5  ;;  %v1053_v14 = vpop.permute.xlu0 %1052  ;;  %v1142_v26 = vstv %s5737_s2  ;;  %s3935_s2 = sld [smem:[#allocation5 + $0x6c]] }
 0x2f7   : > { %v1057_v20 = vadd.f32 %v1053_v14, %v1001_v34  ;;  %v1366_v14 = vmul.f32 %v5474_v36, %v1364_v63  ;;  %v1143_v7 = vmul.f32 %v5414_v43, %v1142_v26 }
 0x2f9   : > { %v1092_v35 = vadd.f32 %v1090_v10, %v1057_v20 }
 0x2fa   : > { %870 = vrot.lane.b32.xlu1 %v866_v40, %s7074_s13  ;;  %v1136_v12 = vpop.permute.xlu0 %1135  ;;  %v780_v40 = vadd.f32 %v775_v16, %v724_v24 }
 0x2fb   : > { %v1140_v18 = vadd.f32 %v1136_v12, %v1092_v35  ;;  %v857_v35 = vpop.permute.xlu1 %856  ;;  %v812_v12 = vmul.f32 %v5344_v13, %v811_v44  ;;  %v1643_v44 = vmul.f32 %v5492_v47, %v1641_v45 }
 0x2fe   : > { %926 = vrot.lane.b32.xlu1 %v922_v56, %s7073_s5  ;;  %v1192_v30 = vpop.permute.xlu0 %1191 }
 0x2ff   : > { %v1196_v41 = vadd.f32 %v1192_v30, %v1140_v18  ;;  %v814_v18 = vadd.f32 %v812_v12, %v780_v40 }
 0x301   : > { %v1230_v9 = vadd.f32 %v1228_v29, %v1196_v41  ;;  %v913_v29 = vpop.permute.xlu1 %912 }
 0x302   : > { %1008 = vrot.lane.b32.xlu1 %v1004_v42, %s7074_s13  ;;  %v1274_v0 = vpop.permute.xlu0 %1273  ;;  %v862_v42 = vadd.f32 %v857_v35, %v814_v18  ;;  %v1089_v18 = vmul.f32 %v5414_v43, %v1088_v23 }
 0x303   : > { %v1278_v22 = vadd.f32 %v1274_v0, %v1230_v9 }
 0x304   : > { %v918_v52 = vadd.f32 %v913_v29, %v862_v42 }
 0x306   : > { %1064 = vrot.lane.b32.xlu1 %v1060_v48, %s7073_s5  ;;  %v1330_v57 = vpop.permute.xlu0 %1329  ;;  %v995_v48 = vpop.permute.xlu1 %994 }
 0x307   : > { %v1334_v34 = vadd.f32 %v1330_v57, %v1278_v22  ;;  %v950_v22 = vmul.f32 %v5377_v38, %v949_v46  ;;  %v1966_v38 = vrot.slane %v5705_v1, 4 }
 0x309   : > { %v1368_v20 = vadd.f32 %v1366_v14, %v1334_v34  ;;  %v952_v24 = vadd.f32 %v950_v22, %v918_v52  ;;  %v1779_v34 = vstv %s5776_s4  ;;  %v1227_v52 = vmul.f32 %v5479_v39, %v1226_v4 }
 0x30a   : > { %1147 = vrot.lane.b32.xlu1 %v1143_v7, %s7074_s13  ;;  %v1412_v10 = vpop.permute.xlu0 %1411  ;;  %v1051_v7 = vpop.permute.xlu1 %1050  ;;  %v1781_v35 = vmul.f32 %v5496_v6, %v1779_v34 }
 0x30b   : > { %v1416_v37 = vadd.f32 %v1412_v10, %v1368_v20  ;;  %v1000_v10 = vadd.f32 %v995_v48, %v952_v24 }
 0x30e   : > { %v1468_v56 = vpop.permute.xlu0 %1467 }
 0x30f   : > { %v1472_v30 = vadd.f32 %v1468_v56, %v1416_v37  ;;  %v1056_v37 = vadd.f32 %v1051_v7, %v1000_v10  ;;  %v1134_v56 = vpop.permute.xlu1 %1133 }
 0x311   : > { %v1507_v41 = vadd.f32 %v1505_v61, %v1472_v30  ;;  %v1091_v46 = vadd.f32 %v1089_v18, %v1056_v37  ;;  %v1967_v61 = vadd.f32 %v1966_v38, %v5705_v1  ;;  %v1504_v18 = vmul.f32 %v5499_v8, %v1503_v31 }
 0x312   : > { %v1551_v28 = vpop.permute.xlu0 %1550 }
 0x313   : > { %v1555_v9 = vadd.f32 %v1551_v28, %v1507_v41  ;;  %v1190_v30 = vpop.permute.xlu1 %1189  ;;  %v1139_v41 = vadd.f32 %v1134_v56, %v1091_v46  ;;  %v1968_v28 = vrot.slane %v1967_v61, 2 }
 0x315   : > { %v1195_v42 = vadd.f32 %v1190_v30, %v1139_v41 }
 0x316   : > { %v1607_v0 = vpop.permute.xlu0 %1606 }
 0x317   : > { %v1611_v13 = vadd.f32 %v1607_v0, %v1555_v9  ;;  %v1229_v48 = vadd.f32 %v1227_v52, %v1195_v42 }
 0x319   : > { %v1645_v16 = vadd.f32 %v1643_v44, %v1611_v13  ;;  %v1969_v44 = vadd.f32 %v1968_v28, %v1967_v61 }
 0x31a   : > { %v1689_v57 = vpop.permute.xlu0 %1688 }
 0x31b   : > { %v1693_v14 = vadd.f32 %v1689_v57, %v1645_v16  ;;  %v1970_v24 = vrot.slane %v1969_v44, 1 }
 0x31e   : > { %v1745_v20 = vpop.permute.xlu0 %1744 }
 0x31f   : > { %v1749_v40 = vadd.f32 %v1745_v20, %v1693_v14  ;;  %v1365_v14 = vmul.f32 %v5489_v50, %v1364_v63  ;;  %v1642_v63 = vmul.f32 %v5502_v17, %v1641_v45 }
 0x321   : > { %v1783_v12 = vadd.f32 %v1781_v35, %v1749_v40  ;;  %v1971_v35 = vadd.f32 %v1970_v24, %v1969_v44 }
 0x32e   : > { %v1931_v29 = vpop.xlane.xlu1 %1930 }
 0x32f   : > { %v1932_v9 = vrot.slane %v1931_v29, 4 }
 0x331   : > { %v1933_v0 = vadd.f32 %v1932_v9, %v1931_v29  ;;  %v1827_v29 = vpop.permute.xlu0 %1826 }
 0x332   : > { %v1272_v13 = vpop.permute.xlu1 %1271 }
 0x333   : > { %v1934_v23 = vrot.slane %v1933_v0, 2  ;;  %v1277_v22 = vadd.f32 %v1272_v13, %v1229_v48  ;;  %v1831_v13 = vadd.f32 %v1827_v29, %v1783_v12  ;;  %v1780_v48 = vmul.f32 %v5505_v59, %v1779_v34 }
 0x335   : > { %v1935_v16 = vadd.f32 %v1934_v23, %v1933_v0  ;;  %v1883_v0 = vpop.permute.xlu0 %1882 }
 0x336   : > { %v1328_v57 = vpop.permute.xlu1 %1327  ;;  %v1887_v23 = vadd.f32 %v1883_v0, %v1831_v13  ;;  %v1198_v13 = vstv %s5844_s29  ;;  %s6012_s29 = sld [smem:[#allocation5 + $0x7e]] }
 0x337   : > { %v1333_v1 = vadd.f32 %v1328_v57, %v1277_v22  ;;  %v1936_v7 = vrot.slane %v1935_v16, 1 }
 0x338   : > { %vm2008_vm8 = vcmp.gt.f32.partialorder %v1887_v23, 0.0 }
 0x339   : > { %v1367_v20 = vadd.f32 %v1365_v14, %v1333_v1  ;;  %v1937_v10 = vadd.f32 %v1936_v7, %v1935_v16  ;;  %v2010_v16 = vmul.f32 0.2, %v1887_v23 }
 0x33a   : > { %v1410_v40 = vpop.permute.xlu1 %1409 }
 0x33b   : > { %4232 = vpush %v1937_v10  ;;  %v1415_v4 = vadd.f32 %v1410_v40, %v1367_v20  ;;  %v5800_v14 = vsel %vm2008_vm8, %v1887_v23, %v2010_v16  ;;  %v5882_v23 = vld [vmem:[#allocation2 + $0x20] sm:$0xff]  ;;  %v1418_v16 = vstv %s5877_s20  ;;  %s6026_s20 = sld [smem:[#allocation5 + $0x87]] }
 0x33c   : > { %4234 = vpush %v1971_v35  ;;  %v2014_v34 = vsel %vm1908_vm5, %v5800_v14, 0.0 }
 0x33e   : > { %v1466_v37 = vpop.permute.xlu1 %1465 }
 0x33f   : > { %v1471_v56 = vadd.f32 %v1466_v37, %v1415_v4 }
 0x341   : > { %v1506_v38 = vadd.f32 %v1504_v18, %v1471_v56 }
 0x342   : > { %v1549_v46 = vpop.permute.xlu1 %1548 }
 0x343   : > { %v1554_v30 = vadd.f32 %v1549_v46, %v1506_v38 }
 0x346   : > { %v1605_v61 = vpop.permute.xlu1 %1604 }
 0x347   : > { %v1610_v41 = vadd.f32 %v1605_v61, %v1554_v30  ;;  %v5821_v30 = vld [vmem:[#allocation2] sm:$0xff] }
 0x348   : > { %v313_v61 = vmul.f32 %v5821_v30, %v312_v19  ;;  %v5837_v19 = vld [vmem:[#allocation2 + $0x9] sm:$0xff] }
 0x349   : > { %v1644_v28 = vadd.f32 %v1642_v63, %v1610_v41  ;;  %v452_v63 = vmul.f32 %v5837_v19, %v450_v53 }
 0x34a   : > { %v1687_v42 = vpop.permute.xlu1 %1686 }
 0x34b   : > { %v1692_v9 = vadd.f32 %v1687_v42, %v1644_v28  ;;  %v1949_v28 = vstv %s5828_s22  ;;  %s6004_s22 = sld [smem:[#allocation5 + $0x78]] }
 0x34e   : > { %v1743_v52 = vpop.permute.xlu1 %1742 }
 0x34f   : > { %v1748_v44 = vadd.f32 %v1743_v52, %v1692_v9  ;;  %v1952_v9 = vstv %s5833_s8  ;;  %v5863_v52 = vld [vmem:[#allocation2 + $0xa] sm:$0xff]  ;;  %s6008_s8 = sld [smem:[#allocation5 + $0x7b]] }
 0x351   : > { %v1782_v22 = vadd.f32 %v1780_v48, %v1748_v44  ;;  %v646_v44 = vmul.f32 %v5863_v52, %v644_v55  ;;  %v1280_v48 = vstv %s5856_s27  ;;  %s6017_s27 = sld [smem:[#allocation5 + $0x81]] }
 0x352   : > { %v1825_v31 = vpop.permute.xlu1 %1824 }
 0x353   : > { %v1830_v57 = vadd.f32 %v1825_v31, %v1782_v22  ;;  %v729_v22 = vmul.f32 %v5882_v23, %v727_v49  ;;  %v785_v31 = vmul.f32 %v5882_v23, %v783_v54  ;;  %v1419_v49 = vmul.f32 %v5489_v50, %v1418_v16 }
 0x356   : > { %v1881_v24 = vpop.permute.xlu1 %1880 }
 0x357   : > { %v1886_v1 = vadd.f32 %v1881_v24, %v1830_v57  ;;  %v5902_v57 = vld [vmem:[#allocation2 + $0x21] sm:$0xff] }
 0x358   : > { %v867_v24 = vmul.f32 %v5902_v57, %v865_v32 }
 0x359   : > { %vm2007_vm9 = vcmp.gt.f32.partialorder %v1886_v1, 0.0  ;;  %v2009_v45 = vmul.f32 0.2, %v1886_v1 }
 0x35b   : > { %v5802_v7 = vsel %vm2007_vm9, %v1886_v1, %v2009_v45  ;;  %v923_v1 = vmul.f32 %v5902_v57, %v921_v33  ;;  %v1557_v45 = vstv %s5897_s18  ;;  %s6033_s18 = sld [smem:[#allocation5 + $0x8d]] }
 0x35c   : > { %v2013_v12 = vsel %vm1908_vm5, %v5802_v7, 0.0  ;;  %v1558_v32 = vmul.f32 %v5499_v8, %v1557_v45 }
 0x35d   : > { %v2015_v20 = vadd.f32 %v2014_v34, %v2013_v12  ;;  %v5922_v12 = vld [vmem:[#allocation2 + $0x22] sm:$0xff] }
 0x35e   : > { %v1005_v34 = vmul.f32 %v5922_v12, %v1003_v60 }
 0x35f   : > { %2016 = vadd.xlane.f32.xlu0 %v2015_v20  ;;  %v1061_v20 = vmul.f32 %v5922_v12, %v1059_v58  ;;  %v5951_v58 = vld [vmem:[#allocation2 + $0x38] sm:$0xff] }
 0x36c   : > { %s4233_s4 = spop %4232 }
 0x36d   : > { %v1939_v10 = vstv %s4233_s4  ;;  %s4235_s15 = spop %4234  ;;  %s3947_s4 = sld [smem:[#allocation5 + $0x6f]] }
 0x36e   : > { %v1940_v40 = vmul.f32 0.00390625, %v1939_v10  ;;  %v1973_v35 = vstv %s4235_s15  ;;  %v1695_v10 = vstv %s5917_s1  ;;  %s5994_s15 = sld [smem:[#allocation5 + $0x72]]  ;;  %s2151_s1 = sld [smem:[#allocation8]] }
 0x36f   : > { %v1974_v4 = vmul.f32 0.00390625, %v1973_v35  ;;  %v1696_v60 = vmul.f32 %v5502_v17, %v1695_v10  ;;  %v1751_v35 = vstv %s5928_s17  ;;  %s4084_s17 = sld [smem:[#allocation7 + $0x25]] }
 0x370   : > { %v1941_v37 = vadd.f32 1e-05, %v1940_v40  ;;  %v1144_v40 = vmul.f32 %v5448_v5, %v1142_v26  ;;  %v1282_v26 = vmul.f32 %v5461_v62, %v1280_v48 }
 0x371   : > { %v5812_v56 = vsub.f32 %v5508_v2, %v1974_v4  ;;  %v5815_v18 = vsub.f32 %v5510_v51, %v1974_v4  ;;  %v1200_v4 = vmul.f32 %v5951_v58, %v1198_v13 }
 0x372   : > { %4305 = vrsqrt.f32 %v1941_v37  ;;  %v1833_v37 = vstv %s5937_s21  ;;  %s6052_s21 = sld [smem:[#allocation8 + $0x1]] }
 0x373   : > { %v1977_v38 = vmul.f32 %v5812_v56, %v5812_v56  ;;  %v1978_v46 = vmul.f32 %v5815_v18, %v5815_v18  ;;  %v1834_v5 = vmul.f32 %v5505_v59, %v1833_v37 }
 0x375   : > { %317 = vrot.lane.b32.xlu0 %v313_v61, %s7074_s13  ;;  %v1979_v2 = vsel %vm1908_vm5, %v1977_v38, 0.0  ;;  %v1980_v51 = vsel %vm1908_vm5, %v1978_v46, 0.0  ;;  %v1889_v46 = vstv %s5946_s30  ;;  %v5965_v61 = vld [vmem:[#allocation2 + $0x39] sm:$0xff]  ;;  %s6054_s30 = sld [smem:[#allocation8 + $0x2]] }
 0x376   : > { %v1981_v41 = vadd.f32 %v1980_v51, %v1979_v2 }
 0x378   : > { %1982 = vadd.xlane.f32.xlu1 %v1981_v41  ;;  %v320_v41 = vpop.permute.xlu1 %319 }
 0x379   : > { %375 = vrot.lane.b32.xlu0 %v4878_v21, %s7073_s5  ;;  %v508_v21 = vmul.f32 %v5837_v19, %v506_v25  ;;  %v1199_v25 = vmul.f32 %v5414_v43, %v1198_v13  ;;  %v1336_v43 = vstv %s5869_s12  ;;  %s6022_s12 = sld [smem:[#allocation5 + $0x84]] }
 0x37a   : > { %v1337_v55 = vmul.f32 %v5479_v39, %v1336_v43  ;;  %v1338_v2 = vmul.f32 %v5965_v61, %v1336_v43 }
 0x37c   : > { %v5842_v29 = vpop.eup %4305 }
 0x37d   : > { %457 = vrot.lane.b32.xlu0 %v452_v63, %s7074_s13  ;;  %v1947_v42 = vmul.f32 %v5842_v29, %v5562_v3  ;;  %v590_v3 = vmul.f32 %v5863_v52, %v588_v27  ;;  %v1281_v27 = vmul.f32 %v5479_v39, %v1280_v48  ;;  %v1474_v39 = vstv %s5888_s9  ;;  %s6030_s9 = sld [smem:[#allocation5 + $0x8a]] }
 0x37e   : > { %v1475_v54 = vmul.f32 %v5489_v50, %v1474_v39  ;;  %v1613_v50 = vstv %s5908_s19  ;;  %v1948_v38 = vmul.f32 %v5842_v29, %v5565_v15  ;;  %v1420_v15 = vmul.f32 %v5474_v36, %v1418_v16  ;;  %v374_v29 = vpop.permute.xlu1 %373  ;;  %s4083_s19 = sld [smem:[#allocation7 + $0x1]] }
 0x37f   : > { %v1950_v0 = vmul.f32 %v1949_v28, %v1947_v42  ;;  %v1614_v33 = vmul.f32 %v5499_v8, %v1613_v50  ;;  %v1752_v8 = vmul.f32 %v5502_v17, %v1751_v35  ;;  %v1890_v17 = vmul.f32 %v5505_v59, %v1889_v46 }
 0x380   : > { %v1951_v51 = vmul.f32 %v1949_v28, %v1948_v38  ;;  %v1476_v59 = vmul.f32 %v5474_v36, %v1474_v39  ;;  %v1559_v63 = vmul.f32 %v5483_v11, %v1557_v45  ;;  %v1615_v28 = vmul.f32 %v5483_v11, %v1613_v50  ;;  %v4346_v45 = vld [vmem:[#allocation2 + $0x1] sm:$0xff] }
 0x381   : > { %513 = vrot.lane.b32.xlu0 %v508_v21, %s7073_s5  ;;  %v5861_v53 = vadd.f32 %v1952_v9, %v1950_v0  ;;  %v1697_v42 = vmul.f32 %v5492_v47, %v1695_v10  ;;  %v1753_v21 = vmul.f32 %v5492_v47, %v1751_v35  ;;  %v1835_v0 = vmul.f32 %v5496_v6, %v1833_v37 }
 0x382   : > { %v1954_v62 = vadd.f32 %v1952_v9, %v1951_v51  ;;  %v456_v9 = vpop.permute.xlu1 %455  ;;  %v264_v48 = vstv %s3935_s2  ;;  %s6056_s2 = sld [smem:[#allocation8 + $0x3]] }
 0x385   : > { %595 = vrot.lane.b32.xlu0 %v590_v3, %s7074_s13  ;;  %v1891_v3 = vmul.f32 %v5496_v6, %v1889_v46 }
 0x386   : > { %v512_v36 = vpop.permute.xlu1 %511 }
 0x389   : > { %1203 = vrot.lane.b32.xlu1 %v1199_v25, %s7073_s5  ;;  %651 = vrot.lane.b32.xlu0 %v646_v44, %s7073_s5 }
 0x38a   : > { %v594_v13 = vpop.permute.xlu1 %593 }
 0x38d   : > { %1285 = vrot.lane.b32.xlu1 %v1281_v27, %s7074_s13  ;;  %734 = vrot.lane.b32.xlu0 %v729_v22, %s7074_s13  ;;  %v265_v27 = vmul.f32 %v5821_v30, %v264_v48  ;;  %v242_v22 = vstv %s3932_s14  ;;  %s6058_s14 = sld [smem:[#allocation7 + $0x49]] }
 0x38e   : > { %v650_v11 = vpop.permute.xlu1 %649 }
 0x38f   : > { %v267_v16 = vadd.f32 %v265_v27, %v242_v22  ;;  %v4349_v27 = vld [vmem:[#allocation2 + $0x19] sm:$0xff] }
 0x391   : > { %1341 = vrot.lane.b32.xlu1 %v1337_v55, %s7073_s5  ;;  %790 = vrot.lane.b32.xlu0 %v785_v31, %s7073_s5  ;;  %v4345_v55 = vld [vmem:[#allocation2 + $0x8] sm:$0xff] }
 0x392   : > { %v733_v25 = vpop.permute.xlu1 %732  ;;  %v266_v31 = vmul.f32 %v4345_v55, %v264_v48 }
 0x394   : > { %v268_v39 = vadd.f32 %v266_v31, %v242_v22 }
 0x395   : > { %1423 = vrot.lane.b32.xlu1 %v1419_v49, %s7074_s13  ;;  %872 = vrot.lane.b32.xlu0 %v867_v24, %s7074_s13  ;;  %v402_v49 = vstv %s3947_s4  ;;  %s6060_s4 = sld [smem:[#allocation7]] }
 0x396   : > { %v789_v44 = vpop.permute.xlu1 %788  ;;  %v404_v10 = vmul.f32 %v5837_v19, %v402_v49 }
 0x399   : > { %1479 = vrot.lane.b32.xlu1 %v1475_v54, %s7073_s5  ;;  %928 = vrot.lane.b32.xlu0 %v923_v1, %s7073_s5  ;;  %v324_v1 = vadd.f32 %v320_v41, %v268_v39  ;;  %v955_v39 = vstv %s6008_s8  ;;  %s6072_s8 = sld [smem:[#allocation7 + $0x6c]] }
 0x39a   : > { %v5991_v47 = vpop.permute.xlu1 %870 }
 0x39d   : > { %1562 = vrot.lane.b32.xlu1 %v1558_v32, %s7074_s13  ;;  %1010 = vrot.lane.b32.xlu0 %v1005_v34, %s7074_s13  ;;  %v403_v32 = vmul.f32 %v4346_v45, %v402_v49 }
 0x39e   : > { %v5996_v6 = vpop.permute.xlu1 %926 }
 0x3a1   : > { %1618 = vrot.lane.b32.xlu1 %v1614_v33, %s7073_s5  ;;  %1066 = vrot.lane.b32.xlu0 %v1061_v20, %s7073_s5 }
 0x3a2   : > { %v6000_v50 = vpop.permute.xlu1 %1008 }
 0x3a5   : > { %1700 = vrot.lane.b32.xlu1 %v1696_v60, %s7074_s13  ;;  %1149 = vrot.lane.b32.xlu0 %v1144_v40, %s7074_s13  ;;  %v540_v60 = vstv %s5994_s15  ;;  %s6062_s15 = sld [smem:[#allocation7 + $0x24]] }
 0x3a6   : > { %v542_v19 = vmul.f32 %v5863_v52, %v540_v60 }
 0x3a9   : > { %1756 = vrot.lane.b32.xlu1 %v1752_v8, %s7073_s5  ;;  %1205 = vrot.lane.b32.xlu0 %v1200_v4, %s7073_s5  ;;  %v4347_v4 = vld [vmem:[#allocation2 + $0x2] sm:$0xff] }
 0x3aa   : > { %v541_v37 = vmul.f32 %v4347_v4, %v540_v60  ;;  %v1094_v4 = vstv %s6012_s29  ;;  %s6088_s29 = sld [smem:[#allocation7 + $0x2]] }
 0x3ad   : > { %1838 = vrot.lane.b32.xlu1 %v1834_v5, %s7074_s13  ;;  %1287 = vrot.lane.b32.xlu0 %v1282_v26, %s7074_s13  ;;  %v1065_v26 = vpop.permute.xlu1 %1064 }
 0x3b1   : > { %1894 = vrot.lane.b32.xlu1 %v1890_v17, %s7073_s5  ;;  %1343 = vrot.lane.b32.xlu0 %v1338_v2, %s7073_s5  ;;  %v679_v17 = vstv %s5998_s16  ;;  %s6064_s16 = sld [smem:[#allocation7 + $0x48]] }
 0x3b2   : > { %v681_v31 = vmul.f32 %v5882_v23, %v679_v17 }
 0x3b5   : > { %2121 = vrot.lane.b32.xlu1 %v1954_v62, %s7075_s7  ;;  %1425 = vrot.lane.b32.xlu0 %v1420_v15, %s7074_s13 }
 0x3b9   : > { %1481 = vrot.lane.b32.xlu0 %v1476_v59, %s7073_s5  ;;  %v4348_v59 = vld [vmem:[#allocation2 + $0x18] sm:$0xff] }
 0x3ba   : > { %v680_v41 = vmul.f32 %v4348_v59, %v679_v17 }
 0x3bd   : > { %1564 = vrot.lane.b32.xlu0 %v1559_v63, %s7074_s13 }
 0x3c1   : > { %1620 = vrot.lane.b32.xlu0 %v1615_v28, %s7073_s5 }
 0x3c5   : > { %1702 = vrot.lane.b32.xlu0 %v1697_v42, %s7074_s13  ;;  %v1148_v42 = vpop.permute.xlu1 %1147 }
 0x3c9   : > { %1758 = vrot.lane.b32.xlu0 %v1753_v21, %s7073_s5 }
 0x3cd   : > { %1840 = vrot.lane.b32.xlu0 %v1835_v0, %s7074_s13 }
 0x3d1   : > { %1896 = vrot.lane.b32.xlu0 %v1891_v3, %s7073_s5 }
 0x3ec   : > { %v2017_v43 = vpop.xlane.xlu0 %2016 }
 0x3ed   : > { %v2018_v51 = vrot.slane %v2017_v43, 4 }
 0x3f0   : > { %v318_v24 = vpop.permute.xlu0 %317 }
 0x3f1   : > { %v323_v54 = vadd.f32 %v318_v24, %v267_v16 }
 0x3f3   : > { %v379_v34 = vadd.f32 %v374_v29, %v323_v54 }
 0x3f4   : > { %v376_v30 = vpop.permute.xlu0 %375 }
 0x3f5   : > { %v405_v33 = vadd.f32 %v403_v32, %v379_v34  ;;  %v380_v20 = vadd.f32 %v376_v30, %v324_v1  ;;  %v4350_v34 = vld [vmem:[#allocation2 + $0x1a] sm:$0xff] }
 0x3f6   : > { %v956_v30 = vmul.f32 %v4350_v34, %v955_v39 }
 0x3f7   : > { %v461_v40 = vadd.f32 %v456_v9, %v405_v33  ;;  %v406_v35 = vadd.f32 %v404_v10, %v380_v20  ;;  %v2019_v9 = vadd.f32 %v2018_v51, %v2017_v43 }
 0x3f8   : > { %v458_v8 = vpop.permute.xlu0 %457 }
 0x3f9   : > { %v517_v5 = vadd.f32 %v512_v36, %v461_v40  ;;  %v462_v46 = vadd.f32 %v458_v8, %v406_v35  ;;  %v817_v36 = vstv %s6004_s22  ;;  %s6070_s22 = sld [smem:[#allocation7 + $0x6d]] }
 0x3fa   : > { %v819_v35 = vmul.f32 %v5902_v57, %v817_v36  ;;  %v1232_v57 = vstv %s6017_s27  ;;  %s4088_s27 = sld [smem:[#allocation7 + $0x26]] }
 0x3fb   : > { %v543_v38 = vadd.f32 %v541_v37, %v517_v5 }
 0x3fc   : > { %v514_v2 = vpop.permute.xlu0 %513 }
 0x3fd   : > { %v599_v62 = vadd.f32 %v594_v13, %v543_v38  ;;  %v518_v15 = vadd.f32 %v514_v2, %v462_v46  ;;  %v818_v13 = vmul.f32 %v4349_v27, %v817_v36 }
 0x3ff   : > { %v655_v63 = vadd.f32 %v650_v11, %v599_v62  ;;  %v544_v29 = vadd.f32 %v542_v19, %v518_v15  ;;  %v2020_v11 = vrot.slane %v2019_v9, 2 }
 0x400   : > { %v596_v28 = vpop.permute.xlu0 %595 }
 0x401   : > { %v682_v21 = vadd.f32 %v680_v41, %v655_v63  ;;  %v600_v3 = vadd.f32 %v596_v28, %v544_v29  ;;  %v2021_v45 = vadd.f32 %v2020_v11, %v2019_v9  ;;  %v957_v29 = vmul.f32 %v5922_v12, %v955_v39  ;;  %v4352_v9 = vld [vmem:[#allocation2 + $0x31] sm:$0xff] }
 0x402   : > { %v1096_v12 = vmul.f32 %v5951_v58, %v1094_v4 }
 0x403   : > { %v738_v0 = vadd.f32 %v733_v25, %v682_v21  ;;  %v2022_v8 = vrot.slane %v2021_v45, 1  ;;  %v1233_v21 = vmul.f32 %v4352_v9, %v1232_v57  ;;  %v4358_v9 = vld [vmem:[#allocation2 + $0x50] sm:$0xff] }
 0x404   : > { %v652_v48 = vpop.permute.xlu0 %651 }
 0x405   : > { %v1983_v22 = vpop.xlane.xlu1 %1982  ;;  %v656_v55 = vadd.f32 %v652_v48, %v600_v3  ;;  %v794_v52 = vadd.f32 %v789_v44, %v738_v0  ;;  %v2023_v62 = vadd.f32 %v2022_v8, %v2021_v45  ;;  %v1370_v48 = vstv %s6022_s12  ;;  %s4090_s12 = sld [smem:[#allocation7 + $0x6e]] }
 0x406   : > { %v1984_v16 = vrot.slane %v1983_v22, 4 }
 0x407   : > { %v820_v49 = vadd.f32 %v818_v13, %v794_v52  ;;  %v683_v24 = vadd.f32 %v681_v31, %v656_v55 }
 0x408   : > { %v1985_v43 = vadd.f32 %v1984_v16, %v1983_v22  ;;  %v735_v54 = vpop.permute.xlu0 %734 }
 0x409   : > { %v1204_v1 = vpop.permute.xlu1 %1203  ;;  %v876_v25 = vadd.f32 %v5991_v47, %v820_v49  ;;  %v739_v23 = vadd.f32 %v735_v54, %v683_v24  ;;  %v1509_v24 = vstv %s6026_s20  ;;  %s4095_s20 = sld [smem:[#allocation7 + $0x4]] }
 0x40a   : > { %v1986_v32 = vrot.slane %v1985_v43, 2 }
 0x40b   : > { %v932_v44 = vadd.f32 %v5996_v6, %v876_v25  ;;  %v4351_v6 = vld [vmem:[#allocation2 + $0x30] sm:$0xff]  ;;  %v4354_v25 = vld [vmem:[#allocation2 + $0x48] sm:$0xff] }
 0x40c   : > { %v791_v33 = vpop.permute.xlu0 %790  ;;  %v1987_v20 = vadd.f32 %v1986_v32, %v1985_v43  ;;  %v1095_v17 = vmul.f32 %v4351_v6, %v1094_v4  ;;  %v1510_v45 = vmul.f32 %v4354_v25, %v1509_v24 }
 0x40d   : > { %v958_v10 = vadd.f32 %v956_v30, %v932_v44  ;;  %v1286_v60 = vpop.permute.xlu1 %1285  ;;  %v795_v40 = vadd.f32 %v791_v33, %v739_v23  ;;  %v1234_v23 = vmul.f32 %v5965_v61, %v1232_v57  ;;  %v1647_v33 = vstv %s6030_s9  ;;  %s4096_s9 = sld [smem:[#allocation7 + $0x28]] }
 0x40e   : > { %v1988_v47 = vrot.slane %v1987_v20, 1 }
 0x40f   : > { %v1014_v37 = vadd.f32 %v6000_v50, %v958_v10  ;;  %v821_v5 = vadd.f32 %v819_v35, %v795_v40  ;;  %v4355_v35 = vld [vmem:[#allocation2 + $0x49] sm:$0xff] }
 0x410   : > { %v873_v38 = vpop.permute.xlu0 %872  ;;  %v1989_v46 = vadd.f32 %v1988_v47, %v1987_v20  ;;  %v1648_v8 = vmul.f32 %v4355_v35, %v1647_v33 }
 0x411   : > { %v1070_v2 = vadd.f32 %v1065_v26, %v1014_v37  ;;  %v1342_v51 = vpop.permute.xlu1 %1341  ;;  %v877_v19 = vadd.f32 %v873_v38, %v821_v5  ;;  %v1785_v5 = vstv %s6033_s18  ;;  %s4097_s18 = sld [smem:[#allocation7 + $0x4c]] }
 0x412   : > { %4236 = vpush %v1989_v46 }
 0x413   : > { %v1097_v15 = vadd.f32 %v1095_v17, %v1070_v2  ;;  %4238 = vpush %v2023_v62  ;;  %v4356_v2 = vld [vmem:[#allocation2 + $0x3a] sm:$0xff] }
 0x414   : > { %v929_v59 = vpop.permute.xlu0 %928 }
 0x415   : > { %v1153_v41 = vadd.f32 %v1148_v42, %v1097_v15  ;;  %v1424_v63 = vpop.permute.xlu1 %1423  ;;  %v933_v50 = vadd.f32 %v929_v59, %v877_v19  ;;  %v4353_v42 = vld [vmem:[#allocation2 + $0x32] sm:$0xff]  ;;  %v4357_v15 = vld [vmem:[#allocation2 + $0x4a] sm:$0xff] }
 0x416   : > { %v1371_v52 = vmul.f32 %v4353_v42, %v1370_v48  ;;  %v1786_v61 = vmul.f32 %v4357_v15, %v1785_v5  ;;  %v4364_v15 = vld [vmem:[%s4711_s3 + $0x18] sm:$0xff] }
 0x417   : > { %v1209_v28 = vadd.f32 %v1204_v1, %v1153_v41  ;;  %v959_v26 = vadd.f32 %v957_v29, %v933_v50 }
 0x418   : > { %v1011_v36 = vpop.permute.xlu0 %1010 }
 0x419   : > { %v1235_v0 = vadd.f32 %v1233_v21, %v1209_v28  ;;  %v1480_v3 = vpop.permute.xlu1 %1479  ;;  %v1015_v13 = vadd.f32 %v1011_v36, %v959_v26  ;;  %v1511_v21 = vmul.f32 %v4358_v9, %v1509_v24  ;;  %v4367_v9 = vld [vmem:[%s4711_s3 + $0x30] sm:$0xff] }
 0x41b   : > { %v1291_v27 = vadd.f32 %v1286_v60, %v1235_v0 }
 0x41c   : > { %v1067_v22 = vpop.permute.xlu0 %1066 }
 0x41d   : > { %v1347_v55 = vadd.f32 %v1342_v51, %v1291_v27  ;;  %v1563_v31 = vpop.permute.xlu1 %1562  ;;  %v1071_v11 = vadd.f32 %v1067_v22, %v1015_v13  ;;  %v1372_v51 = vmul.f32 %v4356_v2, %v1370_v48  ;;  %v4359_v27 = vld [vmem:[#allocation2 + $0x51] sm:$0xff] }
 0x41e   : > { %v1649_v13 = vmul.f32 %v4359_v27, %v1647_v33 }
 0x41f   : > { %v1373_v16 = vadd.f32 %v1371_v52, %v1347_v55  ;;  %v1098_v49 = vadd.f32 %v1096_v12, %v1071_v11  ;;  %v4360_v12 = vld [vmem:[#allocation2 + $0x52] sm:$0xff] }
 0x420   : > { %v1150_v43 = vpop.permute.xlu0 %1149 }
 0x421   : > { %v1429_v39 = vadd.f32 %v1424_v63, %v1373_v16  ;;  %v1619_v54 = vpop.permute.xlu1 %1618  ;;  %v1154_v32 = vadd.f32 %v1150_v43, %v1098_v49  ;;  %v1787_v16 = vmul.f32 %v4360_v12, %v1785_v5  ;;  %v2156_v5 = vstv %s6054_s30  ;;  %s6180_s30 = sld [smem:[#allocation7 + $0x71]] }
 0x423   : > { %v1485_v1 = vadd.f32 %v1480_v3, %v1429_v39 }
 0x424   : > { %v1206_v34 = vpop.permute.xlu0 %1205 }
 0x425   : > { %v1512_v30 = vadd.f32 %v1510_v45, %v1485_v1  ;;  %v1701_v44 = vpop.permute.xlu1 %1700  ;;  %v1210_v58 = vadd.f32 %v1206_v34, %v1154_v32 }
 0x427   : > { %v1568_v20 = vadd.f32 %v1563_v31, %v1512_v30  ;;  %v1236_v10 = vadd.f32 %v1234_v23, %v1210_v58 }
 0x428   : > { %v1288_v60 = vpop.permute.xlu0 %1287 }
 0x429   : > { %v1624_v40 = vadd.f32 %v1619_v54, %v1568_v20  ;;  %v1757_v4 = vpop.permute.xlu1 %1756  ;;  %v1292_v37 = vadd.f32 %v1288_v60, %v1236_v10  ;;  %v2194_v20 = vstv %s4083_s19  ;;  %v2152_v60 = vstv %s2151_s1  ;;  %s4098_s19 = sld [smem:[#allocation7 + $0x70]]  ;;  %s6162_s1 = sld [smem:[#allocation7 + $0x5]] }
 0x42b   : > { %v1650_v47 = vadd.f32 %v1648_v8, %v1624_v40  ;;  %v2208_v8 = vstv %s4084_s17  ;;  %s6168_s17 = sld [smem:[#allocation7 + $0x29]] }
 0x42c   : > { %v1344_v38 = vpop.permute.xlu0 %1343 }
 0x42d   : > { %v1706_v46 = vadd.f32 %v1701_v44, %v1650_v47  ;;  %v1839_v6 = vpop.permute.xlu1 %1838  ;;  %v1348_v17 = vadd.f32 %v1344_v38, %v1292_v37  ;;  %v4361_v47 = vld [vmem:[%s4711_s3] sm:$0xff]  ;;  %v4362_v38 = vld [vmem:[%s4711_s3 + $0x8] sm:$0xff] }
 0x42e   : > { %v2159_v37 = vadd.f32 %v4361_v47, %v2152_v60  ;;  %v2292_v47 = vstv %s4090_s12  ;;  %s4091_s12 = sld [smem:[#allocation7 + $0x3]] }
 0x42f   : > { %v1762_v62 = vadd.f32 %v1757_v4, %v1706_v46  ;;  %v1374_v19 = vadd.f32 %v1372_v51, %v1348_v17  ;;  %v2154_v4 = vstv %s6052_s21  ;;  %v2160_v46 = vadd.f32 %v4362_v38, %v2152_v60  ;;  %v4363_v51 = vld [vmem:[%s4711_s3 + $0x10] sm:$0xff]  ;;  %s6175_s21 = sld [smem:[#allocation7 + $0x4d]] }
 0x430   : > { %v1426_v57 = vpop.permute.xlu0 %1425 }
 0x431   : > { %v1788_v59 = vadd.f32 %v1786_v61, %v1762_v62  ;;  %v1895_v41 = vpop.permute.xlu1 %1894  ;;  %v1430_v63 = vadd.f32 %v1426_v57, %v1374_v19  ;;  %v2161_v62 = vadd.f32 %v4363_v51, %v2154_v4  ;;  %v2162_v61 = vadd.f32 %v4364_v15, %v2154_v4 }
 0x432   : > { %v2222_v19 = vstv %s6058_s14  ;;  %v2170_v57 = vstv %s6060_s4  ;;  %v2346_v51 = vstv %s4096_s9  ;;  %s1995_s9 = sadd.s32 2, %s5809_s24 }
 0x433   : > { %v1844_v42 = vadd.f32 %v1839_v6, %v1788_v59  ;;  %v2158_v6 = vstv %s6056_s2  ;;  %v4365_v59 = vld [vmem:[%s4711_s3 + $0x20] sm:$0xff]  ;;  %s6185_s2 = sld [smem:[#allocation7 + $0x7]] }
 0x434   : > { %v1482_v50 = vpop.permute.xlu0 %1481 }
 0x435   : > { %v2122_v29 = vpop.permute.xlu1 %2121  ;;  %v1486_v28 = vadd.f32 %v1482_v50, %v1430_v63  ;;  %v1900_v49 = vadd.f32 %v1895_v41, %v1844_v42  ;;  %v2163_v41 = vadd.f32 %v4365_v59, %v2156_v5  ;;  %v4366_v63 = vld [vmem:[%s4711_s3 + $0x28] sm:$0xff] }
 0x436   : > { %2144 = vst.msk [vmem:[#allocation3 + $0x9] sm:$0xff] %vm226_vm2, %v2122_v29  ;;  %v2164_v50 = vadd.f32 %v4366_v63, %v2156_v5  ;;  %v2176_v29 = vstv %s6062_s15  ;;  %s6192_s15 = sld [smem:[#allocation7 + $0x2b]] }
 0x437   : > { %v1513_v26 = vadd.f32 %v1511_v21, %v1486_v28  ;;  %v2061_v39 = vmul.f32 0.2, %v1900_v49  ;;  %vm2059_vm10 = vcmp.gt.f32.partialorder %v1900_v49, 0.0  ;;  %v2182_v28 = vstv %s6064_s16  ;;  %s6199_s16 = sld [smem:[#allocation7 + $0x4f]] }
 0x438   : > { %v1565_v36 = vpop.permute.xlu0 %1564  ;;  %v2165_v21 = vadd.f32 %v4367_v9, %v2158_v6 }
 0x439   : > { %v1569_v0 = vadd.f32 %v1565_v36, %v1513_v26  ;;  %v6039_v32 = vsel %vm2059_vm10, %v1900_v49, %v2061_v39  ;;  %v4368_v26 = vld [vmem:[%s4711_s3 + $0x38] sm:$0xff]  ;;  %s4089_s3 = sld [smem:[#allocation7 + $0x4a]] }
 0x43a   : > { %v2065_v30 = vsel %vm1908_vm5, %v6039_v32, 0.0  ;;  %v2166_v36 = vadd.f32 %v4368_v26, %v2158_v6  ;;  %v2332_v6 = vstv %s4095_s20  ;;  %s6267_s20 = sld [smem:[#allocation7 + $0x27]] }
 0x43c   : > { %v1621_v3 = vpop.permute.xlu0 %1620 }
 0x43d   : > { %v1625_v48 = vadd.f32 %v1621_v3, %v1569_v0  ;;  %v2236_v0 = vstv %s6070_s22  ;;  %v2188_v3 = vstv %s6072_s8  ;;  %v6148_v38 = vld [vmem:[#allocation3 + $0x9] sm:$0xff]  ;;  %s6204_s22 = sld [smem:[#allocation7 + $0x73]]  ;;  %s6215_s8 = sld [smem:[#allocation7 + $0x8]] }
 0x43f   : > { %v1651_v22 = vadd.f32 %v1649_v13, %v1625_v48 }
 0x440   : > { %v1703_v55 = vpop.permute.xlu0 %1702 }
 0x441   : > { %v1707_v52 = vadd.f32 %v1703_v55, %v1651_v22 }
 0x443   : > { %s6188_s14 = spop %4236 }
 0x444   : > { %v1759_v31 = vpop.permute.xlu0 %1758  ;;  %s4239_s4 = spop %4238 }
 0x445   : > { %v1763_v11 = vadd.f32 %v1759_v31, %v1707_v52 }
 0x447   : > { %v1789_v43 = vadd.f32 %v1787_v16, %v1763_v11 }
 0x448   : > { %v1841_v24 = vpop.permute.xlu0 %1840 }
 0x449   : > { %v1845_v54 = vadd.f32 %v1841_v24, %v1789_v43 }
 0x44c   : > { %v1897_v1 = vpop.permute.xlu0 %1896 }
 0x44d   : > { %v1901_v25 = vadd.f32 %v1897_v1, %v1845_v54 }
 0x44f   : > { %vm2060_vm11 = vcmp.gt.f32.partialorder %v1901_v25, 0.0  ;;  %v2062_v45 = vmul.f32 0.2, %v1901_v25 }
 0x451   : > { %v6041_v34 = vsel %vm2060_vm11, %v1901_v25, %v2062_v45 }
 0x452   : > { %v2066_v44 = vsel %vm1908_vm5, %v6041_v34, 0.0 }
 0x453   : > { %v2067_v58 = vadd.f32 %v2066_v44, %v2065_v30  ;;  %v2250_v30 = vstv %s6088_s29  ;;  %s6224_s29 = sld [smem:[#allocation7 + $0x2c]] }
 0x455   : > { %2068 = vadd.xlane.f32.xlu0 %v2067_v58 }
 0x46b   : > { %2119 = vrot.lane.b32.xlu0 %v5861_v53, %s7075_s7 }
 0x4e2   : > { %v6049_v23 = vpop.xlane.xlu0 %2068 }
 0x4e6   : > { %v2120_v33 = vpop.permute.xlu0 %2119 }
 0x4e7   : > { %2143 = vst.msk [vmem:[#allocation3 + $0x1] sm:$0xff] %vm226_vm2, %v2120_v33 }
 0x4ee   : > { %v6066_v53 = vld [vmem:[#allocation3] sm:$0xff]  ;;  %v6068_v10 = vld [vmem:[#allocation3 + $0x8] sm:$0xff] }
 0x4ef   : > { %v2196_v40 = vmul.f32 %v2194_v20, %v6068_v10  ;;  %v2195_v35 = vmul.f32 %v2194_v20, %v6066_v53  ;;  %v2210_v17 = vmul.f32 %v2208_v8, %v6068_v10  ;;  %v2209_v2 = vmul.f32 %v2208_v8, %v6066_v53 }
 0x4f0   : > { %v2224_v48 = vmul.f32 %v2222_v19, %v6068_v10  ;;  %v2223_v27 = vmul.f32 %v2222_v19, %v6066_v53  ;;  %v2172_v13 = vmul.f32 %v2170_v57, %v6068_v10  ;;  %v2171_v22 = vmul.f32 %v2170_v57, %v6066_v53 }
 0x4f1   : > { %2201 = vrot.lane.b32.xlu1 %v2196_v40, %s7074_s13  ;;  %2199 = vrot.lane.b32.xlu0 %v2195_v35, %s7074_s13  ;;  %v2178_v55 = vmul.f32 %v2176_v29, %v6068_v10  ;;  %v2177_v42 = vmul.f32 %v2176_v29, %v6066_v53  ;;  %v2184_v52 = vmul.f32 %v2182_v28, %v6068_v10  ;;  %v2264_v20 = vstv %s4088_s27  ;;  %s6231_s27 = sld [smem:[#allocation7 + $0x50]] }
 0x4f2   : > { %v2183_v31 = vmul.f32 %v2182_v28, %v6066_v53  ;;  %v6111_v11 = vadd.f32 %v2172_v13, %v2160_v46  ;;  %v6113_v12 = vadd.f32 %v2171_v22, %v2159_v37  ;;  %v2190_v16 = vmul.f32 %v2188_v3, %v6068_v10  ;;  %v6150_v46 = vld [vmem:[#allocation3 + $0x1] sm:$0xff] }
 0x4f3   : > { %v6116_v49 = vadd.f32 %v2178_v55, %v2162_v61  ;;  %v6118_v43 = vadd.f32 %v2177_v42, %v2161_v62  ;;  %v6120_v24 = vadd.f32 %v2184_v52, %v2164_v50  ;;  %v2238_v54 = vmul.f32 %v2236_v0, %v6068_v10 }
 0x4f4   : > { %v6122_v39 = vadd.f32 %v2183_v31, %v2163_v41  ;;  %v2237_v1 = vmul.f32 %v2236_v0, %v6066_v53  ;;  %v6126_v25 = vadd.f32 %v2190_v16, %v2166_v36  ;;  %v2189_v45 = vmul.f32 %v2188_v3, %v6066_v53  ;;  %v6195_v36 = vld [vmem:[#allocation3 + $0x2] sm:$0xff] }
 0x4f5   : > { %2215 = vrot.lane.b32.xlu1 %v2210_v17, %s7074_s13  ;;  %2213 = vrot.lane.b32.xlu0 %v2209_v2, %s7074_s13  ;;  %v2252_v58 = vmul.f32 %v2250_v30, %v6068_v10  ;;  %v2251_v33 = vmul.f32 %v2250_v30, %v6066_v53  ;;  %v2266_v60 = vmul.f32 %v2264_v20, %v6068_v10  ;;  %v2278_v35 = vstv %s4089_s3  ;;  %s6236_s3 = sld [smem:[#allocation7 + $0x74]] }
 0x4f6   : > { %v6132_v44 = vadd.f32 %v2189_v45, %v2165_v21  ;;  %v2265_v40 = vmul.f32 %v2264_v20, %v6066_v53  ;;  %v2280_v8 = vmul.f32 %v2278_v35, %v6068_v10  ;;  %v2279_v4 = vmul.f32 %v2278_v35, %v6066_v53 }
 0x4f7   : > { %v2294_v37 = vmul.f32 %v2292_v47, %v6068_v10  ;;  %v2293_v5 = vmul.f32 %v2292_v47, %v6066_v53  ;;  %v2334_v17 = vmul.f32 %v2332_v6, %v6148_v38  ;;  %v2333_v2 = vmul.f32 %v2332_v6, %v6150_v46 }
 0x4f8   : > { %v2348_v53 = vmul.f32 %v2346_v51, %v6148_v38  ;;  %v2347_v10 = vmul.f32 %v2346_v51, %v6150_v46  ;;  %v2360_v62 = vstv %s4097_s18  ;;  %v2374_v19 = vstv %s4098_s19  ;;  %s6272_s18 = sld [smem:[#allocation7 + $0x4b]] }
 0x4f9   : > { %2229 = vrot.lane.b32.xlu1 %v2224_v48, %s7074_s13  ;;  %2227 = vrot.lane.b32.xlu0 %v2223_v27, %s7074_s13  ;;  %v2362_v15 = vmul.f32 %v2360_v62, %v6148_v38  ;;  %v2361_v61 = vmul.f32 %v2360_v62, %v6150_v46  ;;  %v2376_v57 = vmul.f32 %v2374_v19, %v6148_v38  ;;  %v2388_v41 = vstv %s6162_s1  ;;  %s6275_s19 = sld [smem:[#allocation9 + %s1995_s9]]  ;;  %s1997_s1 = sadd.s32 3, %s5809_s24 }
 0x4fa   : > { %v2375_v59 = vmul.f32 %v2374_v19, %v6150_v46  ;;  %v2389_v63 = vmul.f32 %v2388_v41, %v6150_v46  ;;  %v2402_v50 = vstv %s6168_s17  ;;  %v2416_v28 = vstv %s6175_s21  ;;  %s6283_s17 = sld [smem:[#allocation7 + $0x6f]] }
 0x4fb   : > { %v2403_v29 = vmul.f32 %v2402_v50, %v6150_v46  ;;  %v2417_v9 = vmul.f32 %v2416_v28, %v6150_v46  ;;  %v2430_v21 = vstv %s6180_s30  ;;  %v2025_v0 = vstv %s4239_s4  ;;  %s6287_s21 = sld [smem:[#allocation9 + %s1997_s1]] }
 0x4fc   : > { %v2431_v26 = vmul.f32 %v2430_v21, %v6150_v46  ;;  %v2470_v3 = vstv %s6185_s2  ;;  %v2026_v27 = vmul.f32 0.00390625, %v2025_v0  ;;  %v2484_v13 = vstv %s6192_s15  ;;  %s6326_s30 = sld [smem:[#allocation7 + $0x6]]  ;;  %s6328_s2 = sld [smem:[#allocation7 + $0x2a]] }
 0x4fd   : > { %2243 = vrot.lane.b32.xlu1 %v2238_v54, %s7074_s13  ;;  %2241 = vrot.lane.b32.xlu0 %v2237_v1, %s7074_s13  ;;  %v2471_v48 = vmul.f32 %v2470_v3, %v6195_v36  ;;  %v2485_v22 = vmul.f32 %v2484_v13, %v6195_v36  ;;  %v2498_v52 = vstv %s6199_s16  ;;  %v2526_v30 = vstv %s6215_s8  ;;  %s6337_s4 = sld [smem:[#allocation7 + $0x72]]  ;;  %s4120_s16 = sld [smem:[#allocation7 + $0x2e]] }
 0x4fe   : > { %v6208_v55 = vsub.f32 %v5802_v7, %v2026_v27  ;;  %v6211_v42 = vsub.f32 %v5800_v14, %v2026_v27  ;;  %v2499_v31 = vmul.f32 %v2498_v52, %v6195_v36  ;;  %v2512_v7 = vstv %s6204_s22  ;;  %s4119_s15 = sld [smem:[#allocation7 + $0xa]]  ;;  %s6373_s8 = sld [smem:[#allocation7 + $0x76]] }
 0x4ff   : > { %v2513_v14 = vmul.f32 %v2512_v7, %v6195_v36  ;;  %v2540_v20 = vstv %s6224_s29  ;;  %v2390_v47 = vmul.f32 %v2388_v41, %v6148_v38  ;;  %v2432_v6 = vmul.f32 %v2430_v21, %v6148_v38  ;;  %s6368_s22 = sld [smem:[#allocation7 + $0x52]]  ;;  %s6375_s29 = sld [smem:[#allocation7 + $0xb]] }
 0x500   : > { %v2029_v16 = vmul.f32 %v6208_v55, %v6208_v55  ;;  %v2030_v54 = vmul.f32 %v6211_v42, %v6211_v42  ;;  %v2308_v21 = vstv %s4091_s12  ;;  %s6386_s12 = sld [smem:[#allocation7 + $0x51]]  ;;  %s6393_s9 = sld [smem:[#allocation7 + $0x2f]] }
 0x501   : > { %2257 = vrot.lane.b32.xlu1 %v2252_v58, %s7073_s5  ;;  %2255 = vrot.lane.b32.xlu0 %v2251_v33, %s7073_s5  ;;  %v2527_v33 = vmul.f32 %v2526_v30, %v6195_v36  ;;  %s4131_s1 = sld [smem:[#allocation7 + $0xd]] }
 0x502   : > { %v2031_v1 = vsel %vm1908_vm5, %v2029_v16, 0.0  ;;  %v2032_v45 = vsel %vm1908_vm5, %v2030_v54, 0.0 }
 0x503   : > { %v2033_v58 = vadd.f32 %v2032_v45, %v2031_v1 }
 0x505   : > { %2271 = vrot.lane.b32.xlu1 %v2266_v60, %s7073_s5  ;;  %2269 = vrot.lane.b32.xlu0 %v2265_v40, %s7073_s5  ;;  %v2541_v60 = vmul.f32 %v2540_v20, %v6195_v36  ;;  %v2554_v40 = vstv %s6231_s27  ;;  %s6378_s27 = sld [smem:[#allocation7 + $0x9]] }
 0x506   : > { %v2555_v35 = vmul.f32 %v2554_v40, %v6195_v36 }
 0x509   : > { %2285 = vrot.lane.b32.xlu1 %v2280_v8, %s7073_s5  ;;  %2283 = vrot.lane.b32.xlu0 %v2279_v4, %s7073_s5  ;;  %v2568_v8 = vstv %s6236_s3  ;;  %s6380_s3 = sld [smem:[#allocation7 + $0x2d]] }
 0x50a   : > { %v2569_v4 = vmul.f32 %v2568_v8, %v6195_v36 }
 0x50d   : > { %2299 = vrot.lane.b32.xlu1 %v2294_v37, %s7073_s5  ;;  %2297 = vrot.lane.b32.xlu0 %v2293_v5, %s7073_s5  ;;  %v2404_v37 = vmul.f32 %v2402_v50, %v6148_v38  ;;  %v2418_v5 = vmul.f32 %v2416_v28, %v6148_v38 }
 0x511   : > { %2339 = vrot.lane.b32.xlu1 %v2334_v17, %s7074_s13  ;;  %2337 = vrot.lane.b32.xlu0 %v2333_v2, %s7074_s13  ;;  %v6257_v17 = vld [vmem:[#allocation3 + $0xa] sm:$0xff]  ;;  %v1991_v2 = vstv %s6188_s14  ;;  %s6331_s14 = sld [smem:[#allocation7 + $0x4e]] }
 0x512   : > { %v2472_v51 = vmul.f32 %v2470_v3, %v6257_v17  ;;  %v2514_v50 = vmul.f32 %v2512_v7, %v6257_v17  ;;  %v2542_v27 = vmul.f32 %v2540_v20, %v6257_v17 }
 0x515   : > { %2353 = vrot.lane.b32.xlu1 %v2348_v53, %s7074_s13  ;;  %2351 = vrot.lane.b32.xlu0 %v2347_v10, %s7074_s13  ;;  %v1992_v53 = vmul.f32 0.00390625, %v1991_v2  ;;  %v2570_v2 = vmul.f32 %v2568_v8, %v6257_v17 }
 0x519   : > { %2367 = vrot.lane.b32.xlu1 %v2362_v15, %s7074_s13  ;;  %2365 = vrot.lane.b32.xlu0 %v2361_v61, %s7074_s13  ;;  %v2486_v15 = vmul.f32 %v2484_v13, %v6257_v17  ;;  %v1993_v61 = vadd.f32 1e-05, %v1992_v53  ;;  %v2314_v13 = vstv %s6267_s20  ;;  %v2326_v53 = vstv %s6283_s17  ;;  %s6388_s20 = sld [smem:[#allocation7 + $0x75]]  ;;  %s4132_s17 = sld [smem:[#allocation7 + $0x31]] }
 0x51b   : > { %4307 = vrsqrt.f32 %v1993_v61 }
 0x51d   : > { %2381 = vrot.lane.b32.xlu1 %v2376_v57, %s7074_s13  ;;  %2379 = vrot.lane.b32.xlu0 %v2375_v59, %s7074_s13  ;;  %v2500_v59 = vmul.f32 %v2498_v52, %v6257_v17 }
 0x521   : > { %2393 = vrot.lane.b32.xlu0 %v2389_v63, %s7073_s5 }
 0x525   : > { %2407 = vrot.lane.b32.xlu0 %v2403_v29, %s7073_s5  ;;  %v4308_v16 = vpop.eup %4307 }
 0x529   : > { %2421 = vrot.lane.b32.xlu0 %v2417_v9, %s7073_s5  ;;  %v2528_v9 = vmul.f32 %v2526_v30, %v6257_v17  ;;  %v2556_v30 = vmul.f32 %v2554_v40, %v6257_v17 }
 0x52d   : > { %2435 = vrot.lane.b32.xlu0 %v2431_v26, %s7073_s5 }
 0x531   : > { %2475 = vrot.lane.b32.xlu0 %v2471_v48, %s7074_s13 }
 0x535   : > { %2489 = vrot.lane.b32.xlu0 %v2485_v22, %s7074_s13 }
 0x539   : > { %2503 = vrot.lane.b32.xlu0 %v2499_v31, %s7074_s13  ;;  %v2310_v31 = vmul.f32 %v2308_v21, %v6148_v38 }
 0x53d   : > { %2517 = vrot.lane.b32.xlu0 %v2513_v14, %s7074_s13 }
 0x541   : > { %2034 = vadd.xlane.f32.xlu1 %v2033_v58  ;;  %2531 = vrot.lane.b32.xlu0 %v2527_v33, %s7073_s5  ;;  %v2316_v58 = vmul.f32 %v2314_v13, %v6148_v38  ;;  %v2320_v33 = vstv %s6272_s18  ;;  %s6414_s18 = sld [smem:[#allocation7 + $0x53]] }
 0x545   : > { %2545 = vrot.lane.b32.xlu0 %v2541_v60, %s7073_s5 }
 0x549   : > { %2559 = vrot.lane.b32.xlu0 %v2555_v35, %s7073_s5  ;;  %v2001_v35 = vstv %s6275_s19  ;;  %s4126_s19 = sld [smem:[#allocation7 + $0x77]] }
 0x54d   : > { %2573 = vrot.lane.b32.xlu0 %v2569_v4, %s7073_s5 }
 0x552   : > { %2395 = vrot.lane.b32.xlu1 %v2390_v47, %s7073_s5 }
 0x556   : > { %2409 = vrot.lane.b32.xlu1 %v2404_v37, %s7073_s5 }
 0x55a   : > { %2423 = vrot.lane.b32.xlu1 %v2418_v5, %s7073_s5 }
 0x55e   : > { %2437 = vrot.lane.b32.xlu1 %v2432_v6, %s7073_s5 }
 0x562   : > { %2477 = vrot.lane.b32.xlu1 %v2472_v51, %s7074_s13  ;;  %v2322_v51 = vmul.f32 %v2320_v33, %v6148_v38 }
 0x563   : > { %v2202_v10 = vpop.permute.xlu1 %2201  ;;  %v2200_v62 = vpop.permute.xlu0 %2199 }
 0x564   : > { %v2206_v26 = vadd.f32 %v2202_v10, %v6111_v11  ;;  %v2205_v0 = vadd.f32 %v2200_v62, %v6113_v12  ;;  %v2309_v11 = vmul.f32 %v2308_v21, %v6150_v46 }
 0x566   : > { %2491 = vrot.lane.b32.xlu1 %v2486_v15, %s7074_s13  ;;  %v2004_v15 = vstv %s6287_s21  ;;  %s4133_s21 = sld [smem:[#allocation7 + $0x55]] }
 0x567   : > { %v2216_v19 = vpop.permute.xlu1 %2215  ;;  %v2214_v57 = vpop.permute.xlu0 %2213 }
 0x568   : > { %v2220_v12 = vadd.f32 %v2216_v19, %v6116_v49  ;;  %v2219_v54 = vadd.f32 %v2214_v57, %v6118_v43  ;;  %v1999_v49 = vmul.f32 %v4308_v16, %v5812_v56  ;;  %v2315_v43 = vmul.f32 %v2314_v13, %v6150_v46 }
 0x569   : > { %v2000_v56 = vmul.f32 %v4308_v16, %v5815_v18  ;;  %v2452_v16 = vstv %s6328_s2  ;;  %s4135_s2 = sld [smem:[#allocation7 + $0xe]] }
 0x56a   : > { %2505 = vrot.lane.b32.xlu1 %v2500_v59, %s7074_s13 }
 0x56b   : > { %v2230_v41 = vpop.permute.xlu1 %2229  ;;  %v2228_v63 = vpop.permute.xlu0 %2227 }
 0x56c   : > { %v2234_v4 = vadd.f32 %v2230_v41, %v6120_v24  ;;  %v2233_v47 = vadd.f32 %v2228_v63, %v6122_v39  ;;  %v2002_v24 = vmul.f32 %v2001_v35, %v1999_v49  ;;  %v2321_v39 = vmul.f32 %v2320_v33, %v6150_v46 }
 0x56d   : > { %v2003_v41 = vmul.f32 %v2001_v35, %v2000_v56  ;;  %v2328_v63 = vmul.f32 %v2326_v53, %v6148_v38 }
 0x56e   : > { %2519 = vrot.lane.b32.xlu1 %v2514_v50, %s7074_s13  ;;  %v2005_v21 = vadd.f32 %v2004_v15, %v2002_v24 }
 0x56f   : > { %v2244_v29 = vpop.permute.xlu1 %2243  ;;  %v2242_v28 = vpop.permute.xlu0 %2241 }
 0x570   : > { %v2248_v61 = vadd.f32 %v2244_v29, %v6126_v25  ;;  %v2247_v19 = vadd.f32 %v2242_v28, %v6132_v44  ;;  %v2006_v28 = vadd.f32 %v2004_v15, %v2003_v41 }
 0x572   : > { %2533 = vrot.lane.b32.xlu1 %v2528_v9, %s7073_s5 }
 0x573   : > { %v2258_v3 = vpop.permute.xlu1 %2257  ;;  %v2256_v48 = vpop.permute.xlu0 %2255 }
 0x574   : > { %v2262_v22 = vadd.f32 %v2258_v3, %v2206_v26  ;;  %v2261_v52 = vadd.f32 %v2256_v48, %v2205_v0  ;;  %v2327_v26 = vmul.f32 %v2326_v53, %v6150_v46 }
 0x576   : > { %2547 = vrot.lane.b32.xlu1 %v2542_v27, %s7073_s5  ;;  %v6292_v7 = vadd.f32 %v2310_v31, %v2262_v22  ;;  %v2311_v14 = vadd.f32 %v2309_v11, %v2261_v52  ;;  %v2446_v27 = vstv %s6326_s30  ;;  %s4134_s30 = sld [smem:[#allocation7 + $0x79]] }
 0x577   : > { %v2272_v1 = vpop.permute.xlu1 %2271  ;;  %v2270_v45 = vpop.permute.xlu0 %2269  ;;  %v2447_v22 = vmul.f32 %v2446_v27, %v6195_v36 }
 0x578   : > { %v2276_v20 = vadd.f32 %v2272_v1, %v2220_v12  ;;  %v2275_v60 = vadd.f32 %v2270_v45, %v2219_v54  ;;  %v2453_v54 = vmul.f32 %v2452_v16, %v6195_v36 }
 0x57a   : > { %2561 = vrot.lane.b32.xlu1 %v2556_v30, %s7073_s5  ;;  %v6305_v37 = vadd.f32 %v2316_v58, %v2276_v20  ;;  %v2317_v40 = vadd.f32 %v2315_v43, %v2275_v60  ;;  %v2458_v30 = vstv %s6331_s14  ;;  %v2464_v43 = vstv %s6337_s4  ;;  %s4136_s14 = sld [smem:[#allocation7 + $0x32]]  ;;  %s4137_s4 = sld [smem:[#allocation7 + $0x56]] }
 0x57b   : > { %v2286_v5 = vpop.permute.xlu1 %2285  ;;  %v2284_v6 = vpop.permute.xlu0 %2283  ;;  %v2459_v33 = vmul.f32 %v2458_v30, %v6195_v36 }
 0x57c   : > { %v2290_v10 = vadd.f32 %v2286_v5, %v2234_v4  ;;  %v2289_v62 = vadd.f32 %v2284_v6, %v2233_v47  ;;  %v2465_v4 = vmul.f32 %v2464_v43, %v6195_v36 }
 0x57e   : > { %2575 = vrot.lane.b32.xlu1 %v2570_v2, %s7073_s5  ;;  %v6318_v57 = vadd.f32 %v2322_v51, %v2290_v10  ;;  %v2323_v8 = vadd.f32 %v2321_v39, %v2289_v62  ;;  %v2070_v2 = vrot.slane %v6049_v23, 4 }
 0x57f   : > { %v2300_v59 = vpop.permute.xlu1 %2299  ;;  %v2298_v18 = vpop.permute.xlu0 %2297 }
 0x580   : > { %v2304_v50 = vadd.f32 %v2300_v59, %v2248_v61  ;;  %v2303_v9 = vadd.f32 %v2298_v18, %v2247_v19  ;;  %v2071_v56 = vadd.f32 %v2070_v2, %v6049_v23 }
 0x582   : > { %2123 = vrot.lane.b32.xlu1 %v2005_v21, %s7075_s7  ;;  %v6323_v25 = vadd.f32 %v2328_v63, %v2304_v50  ;;  %v2329_v44 = vadd.f32 %v2327_v26, %v2303_v9  ;;  %v2072_v10 = vrot.slane %v2071_v56, 2  ;;  %v2454_v21 = vmul.f32 %v2452_v16, %v6257_v17 }
 0x583   : > { %v2338_v29 = vpop.permute.xlu0 %2337 }
 0x584   : > { %v2343_v48 = vadd.f32 %v2338_v29, %v2311_v14  ;;  %v2073_v61 = vadd.f32 %v2072_v10, %v2071_v56 }
 0x586   : > { %2125 = vrot.lane.b32.xlu1 %v2006_v28, %s7075_s7  ;;  %v2074_v23 = vrot.slane %v2073_v61, 1 }
 0x587   : > { %v2352_v0 = vpop.permute.xlu0 %2351 }
 0x588   : > { %v2357_v52 = vadd.f32 %v2352_v0, %v2317_v40  ;;  %v2340_v40 = vpop.permute.xlu1 %2339  ;;  %v2075_v28 = vadd.f32 %v2074_v23, %v2073_v61 }
 0x589   : > { %v2344_v24 = vadd.f32 %v2340_v40, %v6292_v7 }
 0x58b   : > { %v2366_v3 = vpop.permute.xlu0 %2365 }
 0x58c   : > { %v2371_v14 = vadd.f32 %v2366_v3, %v2323_v8  ;;  %v2354_v5 = vpop.permute.xlu1 %2353  ;;  %v2448_v8 = vmul.f32 %v2446_v27, %v6257_v17  ;;  %v2466_v27 = vmul.f32 %v2464_v43, %v6257_v17  ;;  %v2609_v43 = vstv %s4119_s15  ;;  %s4138_s15 = sld [smem:[#allocation7 + $0x7a]] }
 0x58d   : > { %v2358_v59 = vadd.f32 %v2354_v5, %v6305_v37  ;;  %v2460_v37 = vmul.f32 %v2458_v30, %v6257_v17  ;;  %v2623_v5 = vstv %s4120_s16  ;;  %s4143_s16 = sld [smem:[#allocation7 + $0x10]] }
 0x58f   : > { %v2380_v38 = vpop.permute.xlu0 %2379 }
 0x590   : > { %v2385_v20 = vadd.f32 %v2380_v38, %v2329_v44  ;;  %v2368_v6 = vpop.permute.xlu1 %2367 }
 0x591   : > { %v2372_v7 = vadd.f32 %v2368_v6, %v6318_v57 }
 0x593   : > { %v2394_v46 = vpop.permute.xlu0 %2393 }
 0x594   : > { %v2399_v13 = vadd.f32 %v2394_v46, %v2343_v48  ;;  %v2382_v51 = vpop.permute.xlu1 %2381 }
 0x595   : > { %v2386_v3 = vadd.f32 %v2382_v51, %v6323_v25  ;;  %v2637_v51 = vstv %s6368_s22  ;;  %s4144_s22 = sld [smem:[#allocation7 + $0x34]] }
 0x596   : > { %v6334_v31 = vadd.f32 %v2447_v22, %v2399_v13 }
 0x597   : > { %v2408_v11 = vpop.permute.xlu0 %2407 }
 0x598   : > { %v2413_v12 = vadd.f32 %v2408_v11, %v2357_v52 }
 0x59a   : > { %v6340_v1 = vadd.f32 %v2453_v54, %v2413_v12 }
 0x59b   : > { %v2422_v45 = vpop.permute.xlu0 %2421 }
 0x59c   : > { %v2427_v58 = vadd.f32 %v2422_v45, %v2371_v14 }
 0x59e   : > { %v6344_v60 = vadd.f32 %v2459_v33, %v2427_v58 }
 0x59f   : > { %v2436_v49 = vpop.permute.xlu0 %2435 }
 0x5a0   : > { %v2441_v35 = vadd.f32 %v2436_v49, %v2385_v20 }
 0x5a2   : > { %v6348_v47 = vadd.f32 %v2465_v4, %v2441_v35 }
 0x5a3   : > { %v2476_v52 = vpop.permute.xlu0 %2475 }
 0x5a7   : > { %v2490_v16 = vpop.permute.xlu0 %2489 }
 0x5a8   : > { %v2495_v10 = vadd.f32 %v2490_v16, %v6340_v1  ;;  %v2585_v1 = vstv %s6378_s27  ;;  %s4146_s27 = sld [smem:[#allocation7 + $0x7c]] }
 0x5ab   : > { %v2504_v14 = vpop.permute.xlu0 %2503 }
 0x5af   : > { %v2518_v30 = vpop.permute.xlu0 %2517 }
 0x5b3   : > { %v2532_v25 = vpop.permute.xlu0 %2531 }
 0x5b7   : > { %v2546_v17 = vpop.permute.xlu0 %2545 }
 0x5bb   : > { %v2560_v40 = vpop.permute.xlu0 %2559 }
 0x5ce   : > { %v2035_v53 = vpop.xlane.xlu1 %2034 }
 0x5cf   : > { %v2036_v62 = vrot.slane %v2035_v53, 4 }
 0x5d1   : > { %v2037_v39 = vadd.f32 %v2036_v62, %v2035_v53  ;;  %v2481_v53 = vadd.f32 %v2476_v52, %v6334_v31  ;;  %v2574_v62 = vpop.permute.xlu0 %2573 }
 0x5d2   : > { %v2396_v15 = vpop.permute.xlu1 %2395 }
 0x5d3   : > { %v2400_v19 = vadd.f32 %v2396_v15, %v2344_v24  ;;  %v2038_v36 = vrot.slane %v2037_v39, 2  ;;  %v2509_v24 = vadd.f32 %v2504_v14, %v6344_v60  ;;  %v2591_v60 = vstv %s6380_s3  ;;  %s4147_s3 = sld [smem:[#allocation7 + $0x11]] }
 0x5d5   : > { %v2039_v18 = vadd.f32 %v2038_v36, %v2037_v39  ;;  %v6355_v41 = vadd.f32 %v2448_v8, %v2400_v19  ;;  %v2523_v39 = vadd.f32 %v2518_v30, %v6348_v47  ;;  %v2537_v19 = vadd.f32 %v2532_v25, %v2481_v53 }
 0x5d6   : > { %v2410_v63 = vpop.permute.xlu1 %2409  ;;  %v2551_v36 = vadd.f32 %v2546_v17, %v2495_v10  ;;  %v2651_v8 = vstv %s6373_s8  ;;  %v2761_v10 = vstv %s4132_s17  ;;  %s4145_s8 = sld [smem:[#allocation7 + $0x58]] }
 0x5d7   : > { %v2414_v50 = vadd.f32 %v2410_v63, %v2358_v59  ;;  %v2040_v9 = vrot.slane %v2039_v18, 1  ;;  %v2665_v59 = vstv %s6375_s29  ;;  %v2579_v31 = vadd.f32 %v2574_v62, %v2523_v39 }
 0x5d9   : > { %v2041_v26 = vadd.f32 %v2040_v9, %v2039_v18  ;;  %v6359_v44 = vadd.f32 %v2454_v21, %v2414_v50  ;;  %v2565_v18 = vadd.f32 %v2560_v40, %v2509_v24  ;;  %v2775_v24 = vstv %s4133_s21 }
 0x5da   : > { %v2424_v29 = vpop.permute.xlu1 %2423 }
 0x5db   : > { %v2428_v0 = vadd.f32 %v2424_v29, %v2372_v7  ;;  %4240 = vpush %v2041_v26  ;;  %v2597_v7 = vstv %s6386_s12  ;;  %v2603_v26 = vstv %s6388_s20  ;;  %s6514_s12 = sld [smem:[#allocation7 + $0x35]]  ;;  %s6520_s20 = sld [smem:[#allocation7 + $0x59]] }
 0x5dc   : > { %4242 = vpush %v2075_v28 }
 0x5dd   : > { %v6363_v38 = vadd.f32 %v2460_v37, %v2428_v0 }
 0x5de   : > { %v2438_v48 = vpop.permute.xlu1 %2437 }
 0x5df   : > { %v2442_v46 = vadd.f32 %v2438_v48, %v2386_v3 }
 0x5e1   : > { %v2468_v13 = vadd.f32 %v2466_v27, %v2442_v46 }
 0x5e2   : > { %v2478_v57 = vpop.permute.xlu1 %2477 }
 0x5e3   : > { %v2482_v47 = vadd.f32 %v2478_v57, %v6355_v41 }
 0x5e6   : > { %v2492_v22 = vpop.permute.xlu1 %2491 }
 0x5e7   : > { %v2496_v63 = vadd.f32 %v2492_v22, %v6359_v44  ;;  %v2679_v44 = vstv %s6393_s9  ;;  %s2047_s9 = sadd.s32 4, %s5809_s24 }
 0x5ea   : > { %v2506_v11 = vpop.permute.xlu1 %2505 }
 0x5eb   : > { %v2510_v23 = vadd.f32 %v2506_v11, %v6363_v38 }
 0x5ee   : > { %v2520_v12 = vpop.permute.xlu1 %2519 }
 0x5ef   : > { %v2524_v50 = vadd.f32 %v2520_v12, %v2468_v13 }
 0x5f2   : > { %v2534_v54 = vpop.permute.xlu1 %2533 }
 0x5f3   : > { %v2538_v29 = vadd.f32 %v2534_v54, %v2482_v47 }
 0x5f6   : > { %v2548_v45 = vpop.permute.xlu1 %2547 }
 0x5f7   : > { %v2552_v28 = vadd.f32 %v2548_v45, %v2496_v63 }
 0x5fa   : > { %v2562_v58 = vpop.permute.xlu1 %2561 }
 0x5fb   : > { %v2566_v0 = vadd.f32 %v2562_v58, %v2510_v23  ;;  %v2845_v23 = vstv %s4138_s15  ;;  %s4139_s15 = sld [smem:[#allocation7 + $0xf]] }
 0x5fe   : > { %v2576_v33 = vpop.permute.xlu1 %2575 }
 0x5ff   : > { %v2580_v37 = vadd.f32 %v2576_v33, %v2524_v50 }
 0x602   : > { %v2124_v20 = vpop.permute.xlu1 %2123 }
 0x603   : > { %2145 = vst.msk [vmem:[#allocation3 + $0x19] sm:$0xff] %vm226_vm2, %v2124_v20  ;;  %v2693_v20 = vstv %s6414_s18  ;;  %s6527_s18 = sld [smem:[#allocation7 + $0x7d]] }
 0x606   : > { %v2126_v49 = vpop.permute.xlu1 %2125 }
 0x607   : > { %2146 = vst.msk [vmem:[#allocation3 + $0x21] sm:$0xff] %vm226_vm2, %v2126_v49 }
 0x60a   : > { %v6370_v35 = vld [vmem:[#allocation3 + $0x18] sm:$0xff] }
 0x60b   : > { %v2610_v4 = vmul.f32 %v2609_v43, %v6370_v35  ;;  %v2624_v56 = vmul.f32 %v2623_v5, %v6370_v35  ;;  %v2638_v61 = vmul.f32 %v2637_v51, %v6370_v35  ;;  %v2652_v21 = vmul.f32 %v2651_v8, %v6370_v35 }
 0x60c   : > { %v2666_v41 = vmul.f32 %v2665_v59, %v6370_v35  ;;  %v2586_v3 = vmul.f32 %v2585_v1, %v6370_v35  ;;  %v2592_v46 = vmul.f32 %v2591_v60, %v6370_v35  ;;  %v2598_v13 = vmul.f32 %v2597_v7, %v6370_v35  ;;  %s4241_s29 = spop %4240 }
 0x60d   : > { %2614 = vrot.lane.b32.xlu0 %v2610_v4, %s7074_s13  ;;  %v2604_v11 = vmul.f32 %v2603_v26, %v6370_v35  ;;  %v2680_v25 = vmul.f32 %v2679_v44, %v6370_v35  ;;  %v2694_v49 = vmul.f32 %v2693_v20, %v6370_v35  ;;  %s4243_s21 = spop %4242 }
 0x60e   : > { %v6382_v6 = vld [vmem:[#allocation3 + $0x20] sm:$0xff]  ;;  %v6426_v57 = vadd.f32 %v2586_v3, %v2537_v19  ;;  %v6432_v16 = vadd.f32 %v2592_v46, %v2551_v36  ;;  %v6436_v54 = vadd.f32 %v2598_v13, %v2565_v18  ;;  %v2803_v36 = vstv %s4135_s2  ;;  %s6561_s2 = sld [smem:[#allocation7 + $0x30]] }
 0x60f   : > { %v2611_v2 = vmul.f32 %v2609_v43, %v6382_v6  ;;  %v2625_v15 = vmul.f32 %v2623_v5, %v6382_v6  ;;  %v2639_v9 = vmul.f32 %v2637_v51, %v6382_v6  ;;  %v2587_v38 = vmul.f32 %v2585_v1, %v6382_v6  ;;  %v6458_v5 = vld [vmem:[#allocation3 + $0x19] sm:$0xff]  ;;  %v6464_v53 = vld [vmem:[#allocation3 + $0x21] sm:$0xff] }
 0x610   : > { %v2653_v48 = vmul.f32 %v2651_v8, %v6382_v6  ;;  %v2593_v27 = vmul.f32 %v2591_v60, %v6382_v6  ;;  %v2599_v52 = vmul.f32 %v2597_v7, %v6382_v6  ;;  %v2605_v14 = vmul.f32 %v2603_v26, %v6382_v6 }
 0x611   : > { %2616 = vrot.lane.b32.xlu1 %v2611_v2, %s7074_s13  ;;  %2628 = vrot.lane.b32.xlu0 %v2624_v56, %s7074_s13  ;;  %v6428_v22 = vadd.f32 %v2587_v38, %v2538_v29  ;;  %v6443_v30 = vadd.f32 %v2604_v11, %v2579_v31  ;;  %v2667_v33 = vmul.f32 %v2665_v59, %v6382_v6  ;;  %v2707_v43 = vstv %s4126_s19  ;;  %s6529_s19 = sld [smem:[#allocation9 + %s2047_s9]] }
 0x612   : > { %v6434_v12 = vadd.f32 %v2593_v27, %v2552_v28  ;;  %v6441_v45 = vadd.f32 %v2599_v52, %v2566_v0  ;;  %v6445_v58 = vadd.f32 %v2605_v14, %v2580_v37  ;;  %v2681_v17 = vmul.f32 %v2679_v44, %v6382_v6  ;;  %v6500_v28 = vld [vmem:[#allocation3 + $0x22] sm:$0xff]  ;;  %s6628_s9 = sld [smem:[#allocation7 + $0x36]] }
 0x613   : > { %v2695_v4 = vmul.f32 %v2693_v20, %v6382_v6  ;;  %v2708_v40 = vmul.f32 %v2707_v43, %v6370_v35  ;;  %v2747_v2 = vstv %s4131_s1  ;;  %v2709_v56 = vmul.f32 %v2707_v43, %v6382_v6  ;;  %s2049_s1 = sadd.s32 5, %s5809_s24 }
 0x614   : > { %v2748_v51 = vmul.f32 %v2747_v2, %v6458_v5  ;;  %v2749_v35 = vmul.f32 %v2747_v2, %v6464_v53  ;;  %v2762_v62 = vmul.f32 %v2761_v10, %v6458_v5  ;;  %v2763_v6 = vmul.f32 %v2761_v10, %v6464_v53  ;;  %s6535_s17 = sld [smem:[#allocation9 + %s2049_s1]] }
 0x615   : > { %2630 = vrot.lane.b32.xlu1 %v2625_v15, %s7074_s13  ;;  %2642 = vrot.lane.b32.xlu0 %v2638_v61, %s7074_s13  ;;  %v2776_v39 = vmul.f32 %v2775_v24, %v6458_v5  ;;  %v2789_v15 = vstv %s4134_s30  ;;  %v2777_v61 = vmul.f32 %v2775_v24, %v6464_v53  ;;  %v2804_v59 = vmul.f32 %v2803_v36, %v6458_v5  ;;  %s4127_s30 = sld [smem:[#allocation7 + $0xc]] }
 0x616   : > { %v2790_v19 = vmul.f32 %v2789_v15, %v6458_v5  ;;  %v2791_v8 = vmul.f32 %v2789_v15, %v6464_v53  ;;  %v2817_v18 = vstv %s4136_s14  ;;  %v2805_v31 = vmul.f32 %v2803_v36, %v6464_v53  ;;  %s6563_s14 = sld [smem:[#allocation7 + $0x54]] }
 0x617   : > { %v2818_v1 = vmul.f32 %v2817_v18, %v6458_v5  ;;  %v2831_v60 = vstv %s4137_s4  ;;  %v2819_v47 = vmul.f32 %v2817_v18, %v6464_v53  ;;  %v2885_v7 = vstv %s4143_s16  ;;  %s6569_s4 = sld [smem:[#allocation7 + $0x78]]  ;;  %s4140_s16 = sld [smem:[#allocation7 + $0x33]] }
 0x618   : > { %v2832_v63 = vmul.f32 %v2831_v60, %v6458_v5  ;;  %v2833_v50 = vmul.f32 %v2831_v60, %v6464_v53  ;;  %v2847_v26 = vmul.f32 %v2845_v23, %v6464_v53  ;;  %v2899_v0 = vstv %s4144_s22  ;;  %s6596_s22 = sld [smem:[#allocation7 + $0x57]]  ;;  %s6651_s1 = sld [smem:[#allocation7 + $0x14]] }
 0x619   : > { %2644 = vrot.lane.b32.xlu1 %v2639_v9, %s7074_s13  ;;  %2656 = vrot.lane.b32.xlu0 %v2652_v21, %s7074_s13  ;;  %v2846_v9 = vmul.f32 %v2845_v23, %v6458_v5  ;;  %v6494_v21 = vld [vmem:[#allocation3 + $0x1a] sm:$0xff]  ;;  %v2043_v37 = vstv %s4241_s29  ;;  %v2913_v3 = vstv %s4145_s8  ;;  %s6599_s8 = sld [smem:[#allocation7 + $0x7b]] }
 0x61a   : > { %v2886_v29 = vmul.f32 %v2885_v7, %v6494_v21  ;;  %v2900_v44 = vmul.f32 %v2899_v0, %v6494_v21  ;;  %v2044_v38 = vmul.f32 0.00390625, %v2043_v37  ;;  %v2914_v46 = vmul.f32 %v2913_v3, %v6494_v21  ;;  %s4155_s29 = sld [smem:[#allocation7 + $0x13]] }
 0x61b   : > { %v2927_v27 = vstv %s4146_s27  ;;  %v2915_v52 = vmul.f32 %v2913_v3, %v6500_v28  ;;  %v2941_v14 = vstv %s4147_s3  ;;  %v2053_v10 = vstv %s6529_s19  ;;  %s4156_s27 = sld [smem:[#allocation7 + $0x37]]  ;;  %s6622_s3 = sld [smem:[#allocation7 + $0x5b]] }
 0x61c   : > { %v2045_v13 = vadd.f32 1e-05, %v2044_v38  ;;  %v2928_v11 = vmul.f32 %v2927_v27, %v6494_v21  ;;  %v2943_v20 = vmul.f32 %v2941_v14, %v6500_v28  ;;  %s6636_s19 = sld [smem:[#allocation7 + $0x7e]] }
 0x61d   : > { %2658 = vrot.lane.b32.xlu1 %v2653_v48, %s7074_s13  ;;  %2670 = vrot.lane.b32.xlu0 %v2666_v41, %s7073_s5  ;;  %v2887_v41 = vmul.f32 %v2885_v7, %v6500_v28  ;;  %v2901_v48 = vmul.f32 %v2899_v0, %v6500_v28  ;;  %v2729_v0 = vstv %s6561_s2  ;;  %s4167_s2 = sld [smem:[#allocation7 + $0x16]] }
 0x61e   : > { %4309 = vrsqrt.f32 %v2045_v13 }
 0x621   : > { %2672 = vrot.lane.b32.xlu1 %v2667_v33, %s7073_s5  ;;  %2684 = vrot.lane.b32.xlu0 %v2680_v25, %s7073_s5  ;;  %v2929_v33 = vmul.f32 %v2927_v27, %v6500_v28  ;;  %v2942_v25 = vmul.f32 %v2941_v14, %v6494_v21 }
 0x625   : > { %2686 = vrot.lane.b32.xlu1 %v2681_v17, %s7073_s5  ;;  %2698 = vrot.lane.b32.xlu0 %v2694_v49, %s7073_s5  ;;  %v2955_v17 = vstv %s6514_s12  ;;  %s6624_s12 = sld [smem:[#allocation7 + $0x7f]] }
 0x626   : > { %v2957_v49 = vmul.f32 %v2955_v17, %v6500_v28 }
 0x628   : > { %v4310_v43 = vpop.eup %4309 }
 0x629   : > { %2700 = vrot.lane.b32.xlu1 %v2695_v4, %s7073_s5  ;;  %2712 = vrot.lane.b32.xlu0 %v2708_v40, %s7073_s5  ;;  %v2969_v4 = vstv %s6520_s20  ;;  %v2052_v2 = vmul.f32 %v4310_v43, %v6211_v42  ;;  %s6626_s20 = sld [smem:[#allocation7 + $0x12]] }
 0x62a   : > { %v2971_v40 = vmul.f32 %v2969_v4, %v6500_v28  ;;  %v2970_v38 = vmul.f32 %v2969_v4, %v6494_v21 }
 0x62b   : > { %v2055_v24 = vmul.f32 %v2053_v10, %v2052_v2  ;;  %v2741_v2 = vstv %s6569_s4  ;;  %s4169_s4 = sld [smem:[#allocation7 + $0x5e]] }
 0x62d   : > { %2714 = vrot.lane.b32.xlu1 %v2709_v56, %s7073_s5  ;;  %2752 = vrot.lane.b32.xlu0 %v2748_v51, %s7074_s13  ;;  %v2077_v56 = vstv %s4243_s21  ;;  %v2983_v51 = vstv %s6527_s18  ;;  %s6630_s18 = sld [smem:[#allocation7 + $0x5a]]  ;;  %s4161_s21 = sld [smem:[#allocation7 + $0x5c]] }
 0x631   : > { %2754 = vrot.lane.b32.xlu1 %v2749_v35, %s7074_s13  ;;  %2766 = vrot.lane.b32.xlu0 %v2762_v62, %s7074_s13  ;;  %v2078_v35 = vmul.f32 0.00390625, %v2077_v56  ;;  %v2985_v62 = vmul.f32 %v2983_v51, %v6500_v28 }
 0x633   : > { %v6550_v15 = vsub.f32 %v6041_v34, %v2078_v35 }
 0x635   : > { %2768 = vrot.lane.b32.xlu1 %v2763_v6, %s7074_s13  ;;  %2780 = vrot.lane.b32.xlu0 %v2776_v39, %s7074_s13  ;;  %v2056_v6 = vstv %s6535_s17  ;;  %v6547_v39 = vsub.f32 %v6039_v32, %v2078_v35  ;;  %s4160_s17 = sld [smem:[#allocation7 + $0x38]] }
 0x636   : > { %v2058_v42 = vadd.f32 %v2056_v6, %v2055_v24 }
 0x639   : > { %2782 = vrot.lane.b32.xlu1 %v2777_v61, %s7074_s13  ;;  %2794 = vrot.lane.b32.xlu0 %v2790_v19, %s7074_s13  ;;  %v2081_v61 = vmul.f32 %v6547_v39, %v6547_v39  ;;  %v2082_v19 = vmul.f32 %v6550_v15, %v6550_v15 }
 0x63b   : > { %v2083_v36 = vsel %vm1908_vm5, %v2081_v61, 0.0 }
 0x63d   : > { %2796 = vrot.lane.b32.xlu1 %v2791_v8, %s7074_s13  ;;  %2808 = vrot.lane.b32.xlu0 %v2804_v59, %s7073_s5  ;;  %v2084_v8 = vsel %vm1908_vm5, %v2082_v19, 0.0 }
 0x63e   : > { %v2085_v59 = vadd.f32 %v2084_v8, %v2083_v36 }
 0x641   : > { %2810 = vrot.lane.b32.xlu1 %v2805_v31, %s7073_s5  ;;  %2822 = vrot.lane.b32.xlu0 %v2818_v1, %s7073_s5 }
 0x645   : > { %2824 = vrot.lane.b32.xlu1 %v2819_v47, %s7073_s5  ;;  %2836 = vrot.lane.b32.xlu0 %v2832_v63, %s7073_s5  ;;  %v2723_v63 = vstv %s4127_s30  ;;  %s4162_s30 = sld [smem:[#allocation7 + $0x80]] }
 0x646   : > { %v2725_v13 = vmul.f32 %v2723_v63, %v6464_v53 }
 0x649   : > { %2838 = vrot.lane.b32.xlu1 %v2833_v50, %s7073_s5  ;;  %2850 = vrot.lane.b32.xlu0 %v2846_v9, %s7073_s5 }
 0x64d   : > { %2852 = vrot.lane.b32.xlu1 %v2847_v26, %s7073_s5  ;;  %2890 = vrot.lane.b32.xlu0 %v2886_v29, %s7074_s13  ;;  %v2956_v26 = vmul.f32 %v2955_v17, %v6494_v21  ;;  %v2724_v29 = vmul.f32 %v2723_v63, %v6458_v5  ;;  %v2731_v17 = vmul.f32 %v2729_v0, %v6464_v53  ;;  %v2861_v63 = vstv %s4139_s15  ;;  %s4170_s15 = sld [smem:[#allocation7 + $0x82]] }
 0x651   : > { %2892 = vrot.lane.b32.xlu1 %v2887_v41, %s7074_s13  ;;  %2904 = vrot.lane.b32.xlu0 %v2900_v44, %s7074_s13 }
 0x655   : > { %2906 = vrot.lane.b32.xlu1 %v2901_v48, %s7074_s13  ;;  %2918 = vrot.lane.b32.xlu0 %v2914_v46, %s7074_s13  ;;  %v2051_v48 = vmul.f32 %v4310_v43, %v6208_v55  ;;  %v2984_v55 = vmul.f32 %v2983_v51, %v6494_v21 }
 0x657   : > { %v2054_v4 = vmul.f32 %v2053_v10, %v2051_v48  ;;  %v2742_v10 = vmul.f32 %v2741_v2, %v6458_v5  ;;  %v2873_v48 = vstv %s6596_s22  ;;  %s4172_s22 = sld [smem:[#allocation7 + $0x3b]] }
 0x659   : > { %2920 = vrot.lane.b32.xlu1 %v2915_v52, %s7074_s13  ;;  %2932 = vrot.lane.b32.xlu0 %v2928_v11, %s7074_s13  ;;  %v2730_v52 = vmul.f32 %v2729_v0, %v6458_v5  ;;  %v2735_v11 = vstv %s6563_s14  ;;  %v2057_v19 = vadd.f32 %v2056_v6, %v2054_v4  ;;  %s4168_s14 = sld [smem:[#allocation7 + $0x3a]] }
 0x65a   : > { %v2737_v51 = vmul.f32 %v2735_v11, %v6464_v53 }
 0x65d   : > { %2934 = vrot.lane.b32.xlu1 %v2929_v33, %s7074_s13  ;;  %2946 = vrot.lane.b32.xlu0 %v2942_v25, %s7073_s5 }
 0x661   : > { %2948 = vrot.lane.b32.xlu1 %v2943_v20, %s7073_s5 }
 0x665   : > { %2962 = vrot.lane.b32.xlu1 %v2957_v49, %s7073_s5 }
 0x669   : > { %2976 = vrot.lane.b32.xlu1 %v2971_v40, %s7073_s5  ;;  %v2736_v40 = vmul.f32 %v2735_v11, %v6458_v5 }
 0x66d   : > { %2990 = vrot.lane.b32.xlu1 %v2985_v62, %s7073_s5 }
 0x671   : > { %2129 = vrot.lane.b32.xlu1 %v2058_v42, %s7075_s7 }
 0x67c   : > { %2086 = vadd.xlane.f32.xlu0 %v2085_v59 }
 0x67f   : > { %v2615_v32 = vpop.permute.xlu0 %2614 }
 0x680   : > { %v2620_v23 = vadd.f32 %v2615_v32, %v6426_v57 }
 0x683   : > { %v2617_v18 = vpop.permute.xlu1 %2616  ;;  %v2629_v34 = vpop.permute.xlu0 %2628 }
 0x684   : > { %v2621_v37 = vadd.f32 %v2617_v18, %v6428_v22  ;;  %v2634_v41 = vadd.f32 %v2629_v34, %v6432_v16  ;;  %v2743_v18 = vmul.f32 %v2741_v2, %v6464_v53  ;;  %v2867_v53 = vstv %s4140_s16  ;;  %s4171_s16 = sld [smem:[#allocation7 + $0x17]] }
 0x687   : > { %v2631_v31 = vpop.permute.xlu1 %2630  ;;  %v2643_v1 = vpop.permute.xlu0 %2642 }
 0x688   : > { %v2635_v22 = vadd.f32 %v2631_v31, %v6434_v12  ;;  %v2648_v16 = vadd.f32 %v2643_v1, %v6436_v54 }
 0x68b   : > { %v2645_v60 = vpop.permute.xlu1 %2644  ;;  %v2657_v47 = vpop.permute.xlu0 %2656 }
 0x68c   : > { %v2649_v12 = vadd.f32 %v2645_v60, %v6441_v45  ;;  %v2662_v54 = vadd.f32 %v2657_v47, %v6443_v30 }
 0x68f   : > { %v2659_v50 = vpop.permute.xlu1 %2658  ;;  %v2671_v9 = vpop.permute.xlu0 %2670 }
 0x690   : > { %v2676_v7 = vadd.f32 %v2671_v9, %v2620_v23  ;;  %v2663_v36 = vadd.f32 %v2659_v50, %v6445_v58 }
 0x692   : > { %2960 = vrot.lane.b32.xlu0 %v2956_v26, %s7073_s5  ;;  %v2726_v44 = vadd.f32 %v2724_v29, %v2676_v7  ;;  %v2862_v7 = vmul.f32 %v2861_v63, %v6494_v21 }
 0x693   : > { %v2673_v3 = vpop.permute.xlu1 %2672  ;;  %v2685_v57 = vpop.permute.xlu0 %2684 }
 0x694   : > { %v2677_v46 = vadd.f32 %v2673_v3, %v2621_v37  ;;  %v2690_v27 = vadd.f32 %v2685_v57, %v2634_v41 }
 0x696   : > { %2974 = vrot.lane.b32.xlu0 %v2970_v38, %s7073_s5  ;;  %v2727_v14 = vadd.f32 %v2725_v13, %v2677_v46  ;;  %v2732_v33 = vadd.f32 %v2730_v52, %v2690_v27  ;;  %v2868_v38 = vmul.f32 %v2867_v53, %v6494_v21 }
 0x697   : > { %v2687_v25 = vpop.permute.xlu1 %2686  ;;  %v2699_v20 = vpop.permute.xlu0 %2698 }
 0x698   : > { %v2691_v49 = vadd.f32 %v2687_v25, %v2635_v22  ;;  %v2704_v43 = vadd.f32 %v2699_v20, %v2648_v16  ;;  %v2874_v25 = vmul.f32 %v2873_v48, %v6494_v21  ;;  %v2879_v20 = vstv %s6599_s8  ;;  %s4173_s8 = sld [smem:[#allocation7 + $0x5f]] }
 0x69a   : > { %2988 = vrot.lane.b32.xlu0 %v2984_v55, %s7073_s5  ;;  %v2733_v56 = vadd.f32 %v2731_v17, %v2691_v49  ;;  %v2738_v35 = vadd.f32 %v2736_v40, %v2704_v43 }
 0x69b   : > { %v2701_v62 = vpop.permute.xlu1 %2700  ;;  %v2713_v24 = vpop.permute.xlu0 %2712 }
 0x69c   : > { %v2705_v42 = vadd.f32 %v2701_v62, %v2649_v12  ;;  %v2718_v61 = vadd.f32 %v2713_v24, %v2662_v54  ;;  %v2875_v54 = vmul.f32 %v2873_v48, %v6500_v28 }
 0x69e   : > { %2127 = vrot.lane.b32.xlu0 %v2057_v19, %s7075_s7  ;;  %v2739_v45 = vadd.f32 %v2737_v51, %v2705_v42  ;;  %v2744_v30 = vadd.f32 %v2742_v10, %v2718_v61  ;;  %v2881_v61 = vmul.f32 %v2879_v20, %v6500_v28 }
 0x69f   : > { %v2715_v8 = vpop.permute.xlu1 %2714  ;;  %v2753_v59 = vpop.permute.xlu0 %2752 }
 0x6a0   : > { %v2719_v32 = vadd.f32 %v2715_v8, %v2663_v36  ;;  %v2758_v58 = vadd.f32 %v2753_v59, %v2726_v44  ;;  %v2863_v44 = vmul.f32 %v2861_v63, %v6500_v28 }
 0x6a2   : > { %v2745_v34 = vadd.f32 %v2743_v18, %v2719_v32 }
 0x6a3   : > { %v2755_v31 = vpop.permute.xlu1 %2754  ;;  %v2767_v1 = vpop.permute.xlu0 %2766 }
 0x6a4   : > { %v2759_v26 = vadd.f32 %v2755_v31, %v2727_v14  ;;  %v2772_v29 = vadd.f32 %v2767_v1, %v2732_v33  ;;  %v2869_v33 = vmul.f32 %v2867_v53, %v6500_v28 }
 0x6a7   : > { %v2769_v60 = vpop.permute.xlu1 %2768  ;;  %v2781_v47 = vpop.permute.xlu0 %2780 }
 0x6a8   : > { %v2773_v46 = vadd.f32 %v2769_v60, %v2733_v56  ;;  %v2786_v27 = vadd.f32 %v2781_v47, %v2738_v35  ;;  %v2880_v56 = vmul.f32 %v2879_v20, %v6494_v21 }
 0x6ab   : > { %v2783_v6 = vpop.permute.xlu1 %2782  ;;  %v2795_v5 = vpop.permute.xlu0 %2794 }
 0x6ac   : > { %v2787_v55 = vadd.f32 %v2783_v6, %v2739_v45  ;;  %v2800_v17 = vadd.f32 %v2795_v5, %v2744_v30 }
 0x6af   : > { %v2797_v23 = vpop.permute.xlu1 %2796  ;;  %v2809_v50 = vpop.permute.xlu0 %2808 }
 0x6b0   : > { %v2814_v9 = vadd.f32 %v2809_v50, %v2758_v58  ;;  %v2801_v35 = vadd.f32 %v2797_v23, %v2745_v34 }
 0x6b2   : > { %v6601_v0 = vadd.f32 %v2862_v7, %v2814_v9 }
 0x6b3   : > { %v2811_v37 = vpop.permute.xlu1 %2810  ;;  %v2823_v41 = vpop.permute.xlu0 %2822 }
 0x6b4   : > { %v2815_v3 = vadd.f32 %v2811_v37, %v2759_v26  ;;  %v2828_v57 = vadd.f32 %v2823_v41, %v2772_v29  ;;  %v3024_v29 = vstv %s4155_s29  ;;  %s4174_s29 = sld [smem:[#allocation7 + $0x83]] }
 0x6b6   : > { %v6606_v13 = vadd.f32 %v2863_v44, %v2815_v3  ;;  %v6608_v52 = vadd.f32 %v2868_v38, %v2828_v57  ;;  %v3038_v44 = vstv %s4156_s27  ;;  %s4179_s27 = sld [smem:[#allocation7 + $0x19]] }
 0x6b7   : > { %v2825_v11 = vpop.permute.xlu1 %2824  ;;  %v2837_v22 = vpop.permute.xlu0 %2836 }
 0x6b8   : > { %v2829_v16 = vadd.f32 %v2825_v11, %v2773_v46  ;;  %v2842_v14 = vadd.f32 %v2837_v22, %v2786_v27  ;;  %v3052_v46 = vstv %s6622_s3  ;;  %v3066_v27 = vstv %s6624_s12  ;;  %s4180_s3 = sld [smem:[#allocation7 + $0x3d]] }
 0x6ba   : > { %v6613_v49 = vadd.f32 %v2869_v33, %v2829_v16  ;;  %v6615_v43 = vadd.f32 %v2874_v25, %v2842_v14 }
 0x6bb   : > { %v2839_v4 = vpop.permute.xlu1 %2838  ;;  %v2851_v40 = vpop.permute.xlu0 %2850 }
 0x6bc   : > { %v2843_v2 = vadd.f32 %v2839_v4, %v2787_v55  ;;  %v2856_v12 = vadd.f32 %v2851_v40, %v2800_v17  ;;  %v3012_v40 = vstv %s6630_s18  ;;  %s4183_s18 = sld [smem:[#allocation7 + $0x1a]] }
 0x6be   : > { %v2877_v62 = vadd.f32 %v2875_v54, %v2843_v2  ;;  %v2882_v24 = vadd.f32 %v2880_v56, %v2856_v12  ;;  %v3018_v56 = vstv %s6636_s19  ;;  %s4184_s19 = sld [smem:[#allocation7 + $0x3e]] }
 0x6bf   : > { %v2853_v51 = vpop.permute.xlu1 %2852  ;;  %v2891_v21 = vpop.permute.xlu0 %2890 }
 0x6c0   : > { %v2857_v42 = vadd.f32 %v2853_v51, %v2801_v35  ;;  %v2896_v38 = vadd.f32 %v2891_v21, %v6601_v0 }
 0x6c2   : > { %v2883_v19 = vadd.f32 %v2881_v61, %v2857_v42 }
 0x6c3   : > { %v2893_v10 = vpop.permute.xlu1 %2892  ;;  %v2905_v34 = vpop.permute.xlu0 %2904 }
 0x6c4   : > { %v2897_v48 = vadd.f32 %v2893_v10, %v6606_v13  ;;  %v2910_v11 = vadd.f32 %v2905_v34, %v6608_v52  ;;  %v3000_v52 = vstv %s6626_s20  ;;  %s4181_s20 = sld [smem:[#allocation7 + $0x61]] }
 0x6c7   : > { %v2907_v36 = vpop.permute.xlu1 %2906  ;;  %v2919_v1 = vpop.permute.xlu0 %2918 }
 0x6c8   : > { %v2911_v22 = vadd.f32 %v2907_v36, %v6613_v49  ;;  %v2924_v16 = vadd.f32 %v2919_v1, %v6615_v43  ;;  %v3006_v43 = vstv %s6628_s9  ;;  %s4182_s9 = sld [smem:[#allocation7 + $0x85]] }
 0x6cb   : > { %v2921_v45 = vpop.permute.xlu1 %2920  ;;  %v2933_v60 = vpop.permute.xlu0 %2932 }
 0x6cc   : > { %v2925_v14 = vadd.f32 %v2921_v45, %v2877_v62  ;;  %v2938_v33 = vadd.f32 %v2933_v60, %v2882_v24  ;;  %v3080_v60 = vstv %s6651_s1  ;;  %s4185_s1 = sld [smem:[#allocation7 + $0x62]] }
 0x6cf   : > { %v2935_v30 = vpop.permute.xlu1 %2934  ;;  %v2947_v47 = vpop.permute.xlu0 %2946 }
 0x6d0   : > { %v2939_v0 = vadd.f32 %v2935_v30, %v2883_v19  ;;  %v2952_v20 = vadd.f32 %v2947_v47, %v2896_v38 }
 0x6d3   : > { %v2949_v8 = vpop.permute.xlu1 %2948 }
 0x6d4   : > { %v2953_v55 = vadd.f32 %v2949_v8, %v2897_v48  ;;  %v3176_v48 = vstv %s4168_s14 }
 0x6d7   : > { %v2963_v59 = vpop.permute.xlu1 %2962 }
 0x6d8   : > { %v2967_v17 = vadd.f32 %v2963_v59, %v2911_v22  ;;  %v3204_v22 = vstv %s4170_s15  ;;  %s4166_s15 = sld [smem:[#allocation7 + $0x81]] }
 0x6db   : > { %v2977_v32 = vpop.permute.xlu1 %2976 }
 0x6dc   : > { %v2981_v4 = vadd.f32 %v2977_v32, %v2925_v14 }
 0x6df   : > { %v2991_v18 = vpop.permute.xlu1 %2990 }
 0x6e0   : > { %v2995_v49 = vadd.f32 %v2991_v18, %v2939_v0 }
 0x6e3   : > { %v2130_v31 = vpop.permute.xlu1 %2129 }
 0x6e4   : > { %2148 = vst.msk [vmem:[#allocation3 + $0x39] sm:$0xff] %vm226_vm2, %v2130_v31 }
 0x709   : > { %v2087_v6 = vpop.xlane.xlu0 %2086 }
 0x70a   : > { %v2088_v5 = vrot.slane %v2087_v6, 4 }
 0x70c   : > { %v2089_v28 = vadd.f32 %v2088_v5, %v2087_v6 }
 0x70d   : > { %v2961_v63 = vpop.permute.xlu0 %2960 }
 0x70e   : > { %v2090_v58 = vrot.slane %v2089_v28, 2  ;;  %v2966_v2 = vadd.f32 %v2961_v63, %v2910_v11 }
 0x710   : > { %v2091_v23 = vadd.f32 %v2090_v58, %v2089_v28  ;;  %v3094_v28 = vstv %s4160_s17  ;;  %s2099_s17 = sadd.s32 6, %s5809_s24 }
 0x711   : > { %v2975_v50 = vpop.permute.xlu0 %2974 }
 0x712   : > { %v2092_v9 = vrot.slane %v2091_v23, 1  ;;  %v2980_v12 = vadd.f32 %v2975_v50, %v2924_v16 }
 0x714   : > { %v2093_v7 = vadd.f32 %v2092_v9, %v2091_v23  ;;  %v3108_v23 = vstv %s4161_s21  ;;  %s4186_s21 = sld [smem:[#allocation7 + $0x86]] }
 0x715   : > { %v2989_v53 = vpop.permute.xlu0 %2988 }
 0x716   : > { %4244 = vpush %v2093_v7  ;;  %v2994_v54 = vadd.f32 %v2989_v53, %v2938_v33  ;;  %v3122_v7 = vstv %s4162_s30  ;;  %v3218_v33 = vstv %s4171_s16  ;;  %s2100_s30 = sld [smem:[#allocation9 + %s2099_s17]] }
 0x717   : > { %s4175_s16 = sld [smem:[#allocation7 + $0x18]]  ;;  %s6824_s17 = sld [smem:[#allocation7 + $0x1d]] }
 0x719   : > { %v2128_v26 = vpop.permute.xlu0 %2127 }
 0x71a   : > { %2147 = vst.msk [vmem:[#allocation3 + $0x31] sm:$0xff] %vm226_vm2, %v2128_v26 }
 0x721   : > { %v6632_v37 = vld [vmem:[#allocation3 + $0x30] sm:$0xff]  ;;  %v6634_v41 = vld [vmem:[#allocation3 + $0x38] sm:$0xff] }
 0x722   : > { %v3026_v3 = vmul.f32 %v3024_v29, %v6634_v41  ;;  %v3025_v57 = vmul.f32 %v3024_v29, %v6632_v37  ;;  %v3040_v13 = vmul.f32 %v3038_v44, %v6634_v41  ;;  %v3039_v25 = vmul.f32 %v3038_v44, %v6632_v37  ;;  %v6706_v29 = vld [vmem:[#allocation3 + $0x39] sm:$0xff] }
 0x723   : > { %v3054_v35 = vmul.f32 %v3052_v46, %v6634_v41  ;;  %v3053_v62 = vmul.f32 %v3052_v46, %v6632_v37  ;;  %v3002_v24 = vmul.f32 %v3000_v52, %v6634_v41  ;;  %v3001_v51 = vmul.f32 %v3000_v52, %v6632_v37 }
 0x724   : > { %3031 = vrot.lane.b32.xlu1 %v3026_v3, %s7074_s13  ;;  %3029 = vrot.lane.b32.xlu0 %v3025_v57, %s7074_s13  ;;  %v3008_v42 = vmul.f32 %v3006_v43, %v6634_v41  ;;  %v3007_v61 = vmul.f32 %v3006_v43, %v6632_v37  ;;  %v3014_v19 = vmul.f32 %v3012_v40, %v6634_v41  ;;  %v6708_v3 = vld [vmem:[#allocation3 + $0x31] sm:$0xff]  ;;  %v3162_v57 = vstv %s4167_s2  ;;  %s2101_s2 = sadd.s32 7, %s5809_s24  ;;  %s4163_s24 = sld [smem:[#allocation7 + $0x15]] }
 0x725   : > { %v3013_v10 = vmul.f32 %v3012_v40, %v6632_v37  ;;  %v6669_v36 = vadd.f32 %v3002_v24, %v2953_v55  ;;  %v6671_v45 = vadd.f32 %v3001_v51, %v2952_v20  ;;  %v3020_v30 = vmul.f32 %v3018_v56, %v6634_v41  ;;  %s2102_s14 = sld [smem:[#allocation9 + %s2101_s2]] }
 0x726   : > { %v6674_v8 = vadd.f32 %v3008_v42, %v2967_v17  ;;  %v6676_v59 = vadd.f32 %v3007_v61, %v2966_v2  ;;  %v6678_v32 = vadd.f32 %v3014_v19, %v2981_v4  ;;  %v3068_v31 = vmul.f32 %v3066_v27, %v6634_v41  ;;  %v6742_v2 = vld [vmem:[#allocation3 + $0x3a] sm:$0xff]  ;;  %s4198_s2 = sld [smem:[#allocation7 + $0x89]] }
 0x727   : > { %v6680_v18 = vadd.f32 %v3013_v10, %v2980_v12  ;;  %v3067_v21 = vmul.f32 %v3066_v27, %v6632_v37  ;;  %v6684_v34 = vadd.f32 %v3020_v30, %v2995_v49  ;;  %v3019_v1 = vmul.f32 %v3018_v56, %v6632_v37  ;;  %v6744_v12 = vld [vmem:[#allocation3 + $0x32] sm:$0xff] }
 0x728   : > { %3045 = vrot.lane.b32.xlu1 %v3040_v13, %s7074_s13  ;;  %3043 = vrot.lane.b32.xlu0 %v3039_v25, %s7074_s13  ;;  %v3082_v6 = vmul.f32 %v3080_v60, %v6634_v41  ;;  %v3081_v5 = vmul.f32 %v3080_v60, %v6632_v37  ;;  %v3096_v63 = vmul.f32 %v3094_v28, %v6634_v41  ;;  %v3190_v46 = vstv %s4169_s4  ;;  %s4165_s4 = sld [smem:[#allocation7 + $0x5d]] }
 0x729   : > { %v6690_v47 = vadd.f32 %v3019_v1, %v2994_v54  ;;  %v3095_v58 = vmul.f32 %v3094_v28, %v6632_v37  ;;  %v3110_v50 = vmul.f32 %v3108_v23, %v6634_v41  ;;  %v3109_v9 = vmul.f32 %v3108_v23, %v6632_v37 }
 0x72a   : > { %v3124_v53 = vmul.f32 %v3122_v7, %v6634_v41  ;;  %v3123_v26 = vmul.f32 %v3122_v7, %v6632_v37  ;;  %v3164_v44 = vmul.f32 %v3162_v57, %v6706_v29  ;;  %v3163_v38 = vmul.f32 %v3162_v57, %v6708_v3 }
 0x72b   : > { %v3178_v37 = vmul.f32 %v3176_v48, %v6706_v29  ;;  %v3177_v41 = vmul.f32 %v3176_v48, %v6708_v3  ;;  %v3192_v27 = vmul.f32 %v3190_v46, %v6706_v29  ;;  %v3191_v11 = vmul.f32 %v3190_v46, %v6708_v3 }
 0x72c   : > { %3059 = vrot.lane.b32.xlu1 %v3054_v35, %s7074_s13  ;;  %3057 = vrot.lane.b32.xlu0 %v3053_v62, %s7074_s13  ;;  %v3206_v16 = vmul.f32 %v3204_v22, %v6706_v29  ;;  %v3205_v14 = vmul.f32 %v3204_v22, %v6708_v3  ;;  %v3220_v0 = vmul.f32 %v3218_v33, %v6706_v29  ;;  %v3232_v25 = vstv %s4172_s22  ;;  %s4176_s22 = sld [smem:[#allocation7 + $0x3c]] }
 0x72d   : > { %v3219_v13 = vmul.f32 %v3218_v33, %v6708_v3  ;;  %v3234_v20 = vmul.f32 %v3232_v25, %v6706_v29  ;;  %v3233_v55 = vmul.f32 %v3232_v25, %v6708_v3  ;;  %v3246_v17 = vstv %s4173_s8  ;;  %s4177_s8 = sld [smem:[#allocation7 + $0x60]] }
 0x72e   : > { %v3248_v52 = vmul.f32 %v3246_v17, %v6706_v29  ;;  %v3247_v4 = vmul.f32 %v3246_v17, %v6708_v3  ;;  %v3260_v49 = vstv %s4174_s29  ;;  %v3300_v54 = vstv %s4179_s27  ;;  %s4178_s29 = sld [smem:[#allocation7 + $0x84]] }
 0x72f   : > { %v3262_v43 = vmul.f32 %v3260_v49, %v6706_v29  ;;  %v3261_v40 = vmul.f32 %v3260_v49, %v6708_v3  ;;  %v3302_v35 = vmul.f32 %v3300_v54, %v6742_v2  ;;  %v3301_v62 = vmul.f32 %v3300_v54, %v6744_v12  ;;  %s4191_s27 = sld [smem:[#allocation7 + $0x1c]] }
 0x730   : > { %3073 = vrot.lane.b32.xlu1 %v3068_v31, %s7074_s13  ;;  %3071 = vrot.lane.b32.xlu0 %v3067_v21, %s7074_s13  ;;  %v3314_v24 = vstv %s4180_s3  ;;  %v3328_v19 = vstv %s4181_s20  ;;  %s4192_s3 = sld [smem:[#allocation7 + $0x40]] }
 0x731   : > { %v3316_v42 = vmul.f32 %v3314_v24, %v6742_v2  ;;  %v3315_v61 = vmul.f32 %v3314_v24, %v6744_v12  ;;  %v3330_v30 = vmul.f32 %v3328_v19, %v6742_v2  ;;  %v3329_v31 = vmul.f32 %v3328_v19, %v6744_v12  ;;  %s4194_s20 = sld [smem:[#allocation7 + $0x88]] }
 0x732   : > { %v3342_v21 = vstv %s4182_s9  ;;  %v3150_v19 = vstv %s4165_s4  ;;  %s4187_s9 = sld [smem:[#allocation7 + $0x1b]] }
 0x733   : > { %v3344_v1 = vmul.f32 %v3342_v21, %v6742_v2  ;;  %v3343_v60 = vmul.f32 %v3342_v21, %v6744_v12  ;;  %s4206_s4 = sld [smem:[#allocation7 + $0x8b]] }
 0x734   : > { %3087 = vrot.lane.b32.xlu1 %v3082_v6, %s7073_s5  ;;  %3085 = vrot.lane.b32.xlu0 %v3081_v5, %s7073_s5  ;;  %v3356_v6 = vstv %s4183_s18  ;;  %s4188_s18 = sld [smem:[#allocation7 + $0x3f]] }
 0x735   : > { %v3358_v5 = vmul.f32 %v3356_v6, %v6742_v2  ;;  %v3357_v28 = vmul.f32 %v3356_v6, %v6744_v12  ;;  %v3152_v6 = vmul.f32 %v3150_v19, %v6706_v29 }
 0x738   : > { %3101 = vrot.lane.b32.xlu1 %v3096_v63, %s7073_s5  ;;  %3099 = vrot.lane.b32.xlu0 %v3095_v58, %s7073_s5  ;;  %v3370_v63 = vstv %s4184_s19  ;;  %s4189_s19 = sld [smem:[#allocation7 + $0x63]] }
 0x739   : > { %v3372_v58 = vmul.f32 %v3370_v63, %v6742_v2  ;;  %v3371_v23 = vmul.f32 %v3370_v63, %v6744_v12 }
 0x73c   : > { %3115 = vrot.lane.b32.xlu1 %v3110_v50, %s7073_s5  ;;  %3113 = vrot.lane.b32.xlu0 %v3109_v9, %s7073_s5  ;;  %v3384_v9 = vstv %s4185_s1  ;;  %s4190_s1 = sld [smem:[#allocation7 + $0x87]] }
 0x73d   : > { %v3386_v7 = vmul.f32 %v3384_v9, %v6742_v2 }
 0x740   : > { %3129 = vrot.lane.b32.xlu1 %v3124_v53, %s7073_s5  ;;  %3127 = vrot.lane.b32.xlu0 %v3123_v26, %s7073_s5  ;;  %v3385_v53 = vmul.f32 %v3384_v9, %v6744_v12 }
 0x744   : > { %3169 = vrot.lane.b32.xlu1 %v3164_v44, %s7074_s13  ;;  %3167 = vrot.lane.b32.xlu0 %v3163_v38, %s7074_s13  ;;  %v3398_v44 = vstv %s4186_s21  ;;  %v2105_v38 = vstv %s2100_s30  ;;  %s6832_s21 = sld [smem:[#allocation7 + $0x41]]  ;;  %s4197_s30 = sld [smem:[#allocation7 + $0x65]] }
 0x745   : > { %v3400_v48 = vmul.f32 %v3398_v44, %v6742_v2 }
 0x747   : > { %s4245_s12 = spop %4244 }
 0x748   : > { %3183 = vrot.lane.b32.xlu1 %v3178_v37, %s7074_s13  ;;  %3181 = vrot.lane.b32.xlu0 %v3177_v41, %s7074_s13  ;;  %v2095_v56 = vstv %s4245_s12  ;;  %v3399_v37 = vmul.f32 %v3398_v44, %v6744_v12  ;;  %s4193_s12 = sld [smem:[#allocation7 + $0x64]] }
 0x749   : > { %v2096_v51 = vmul.f32 0.00390625, %v2095_v56 }
 0x74b   : > { %v2097_v10 = vadd.f32 1e-05, %v2096_v51 }
 0x74c   : > { %3197 = vrot.lane.b32.xlu1 %v3192_v27, %s7074_s13  ;;  %3195 = vrot.lane.b32.xlu0 %v3191_v11, %s7074_s13  ;;  %v2108_v27 = vstv %s2102_s14  ;;  %s4203_s14 = sld [smem:[#allocation7 + $0x1f]] }
 0x74d   : > { %4311 = vrsqrt.f32 %v2097_v10 }
 0x750   : > { %3211 = vrot.lane.b32.xlu1 %v3206_v16, %s7074_s13  ;;  %3209 = vrot.lane.b32.xlu0 %v3205_v14, %s7074_s13 }
 0x754   : > { %3225 = vrot.lane.b32.xlu1 %v3220_v0, %s7073_s5  ;;  %3223 = vrot.lane.b32.xlu0 %v3219_v13, %s7073_s5 }
 0x757   : > { %v4312_v50 = vpop.eup %4311 }
 0x758   : > { %3239 = vrot.lane.b32.xlu1 %v3234_v20, %s7073_s5  ;;  %3237 = vrot.lane.b32.xlu0 %v3233_v55, %s7073_s5  ;;  %v2104_v26 = vmul.f32 %v4312_v50, %v6550_v15  ;;  %v2103_v57 = vmul.f32 %v4312_v50, %v6547_v39 }
 0x75a   : > { %v2107_v41 = vmul.f32 %v2105_v38, %v2104_v26  ;;  %v2106_v46 = vmul.f32 %v2105_v38, %v2103_v57 }
 0x75c   : > { %3253 = vrot.lane.b32.xlu1 %v3248_v52, %s7073_s5  ;;  %3251 = vrot.lane.b32.xlu0 %v3247_v4, %s7073_s5  ;;  %v2110_v15 = vadd.f32 %v2108_v27, %v2107_v41  ;;  %v2109_v11 = vadd.f32 %v2108_v27, %v2106_v46 }
 0x760   : > { %3267 = vrot.lane.b32.xlu1 %v3262_v43, %s7073_s5  ;;  %3265 = vrot.lane.b32.xlu0 %v3261_v40, %s7073_s5  ;;  %v3138_v43 = vstv %s4163_s24  ;;  %s4204_s24 = sld [smem:[#allocation7 + $0x43]] }
 0x761   : > { %v3140_v56 = vmul.f32 %v3138_v43, %v6706_v29 }
 0x764   : > { %3307 = vrot.lane.b32.xlu1 %v3302_v35, %s7074_s13  ;;  %3305 = vrot.lane.b32.xlu0 %v3301_v62, %s7074_s13  ;;  %v3139_v35 = vmul.f32 %v3138_v43, %v6708_v3 }
 0x768   : > { %3321 = vrot.lane.b32.xlu1 %v3316_v42, %s7074_s13  ;;  %3319 = vrot.lane.b32.xlu0 %v3315_v61, %s7074_s13 }
 0x76c   : > { %3335 = vrot.lane.b32.xlu1 %v3330_v30, %s7074_s13  ;;  %3333 = vrot.lane.b32.xlu0 %v3329_v31, %s7074_s13 }
 0x770   : > { %3349 = vrot.lane.b32.xlu1 %v3344_v1, %s7074_s13  ;;  %3347 = vrot.lane.b32.xlu0 %v3343_v60, %s7074_s13 }
 0x774   : > { %3363 = vrot.lane.b32.xlu1 %v3358_v5, %s7073_s5  ;;  %3361 = vrot.lane.b32.xlu0 %v3357_v28, %s7073_s5  ;;  %v3151_v5 = vmul.f32 %v3150_v19, %v6708_v3  ;;  %v3156_v28 = vstv %s4166_s15  ;;  %s4207_s15 = sld [smem:[#allocation7 + $0x20]] }
 0x775   : > { %v3157_v26 = vmul.f32 %v3156_v28, %v6708_v3 }
 0x778   : > { %3377 = vrot.lane.b32.xlu1 %v3372_v58, %s7073_s5  ;;  %3375 = vrot.lane.b32.xlu0 %v3371_v23, %s7073_s5 }
 0x77c   : > { %3391 = vrot.lane.b32.xlu1 %v3386_v7, %s7073_s5  ;;  %3389 = vrot.lane.b32.xlu0 %v3385_v53, %s7073_s5  ;;  %v3158_v53 = vmul.f32 %v3156_v28, %v6706_v29 }
 0x780   : > { %3405 = vrot.lane.b32.xlu1 %v3400_v48, %s7073_s5  ;;  %3403 = vrot.lane.b32.xlu0 %v3399_v37, %s7073_s5 }
 0x784   : > { %2133 = vrot.lane.b32.xlu1 %v2110_v15, %s7075_s7  ;;  %2131 = vrot.lane.b32.xlu0 %v2109_v11, %s7075_s7  ;;  %s4164_s7 = sld [smem:[#allocation7 + $0x39]] }
 0x796   : > { %v3032_v39 = vpop.permute.xlu1 %3031  ;;  %v3030_v22 = vpop.permute.xlu0 %3029 }
 0x797   : > { %v3036_v16 = vadd.f32 %v3032_v39, %v6669_v36  ;;  %v3035_v14 = vadd.f32 %v3030_v22, %v6671_v45 }
 0x79a   : > { %v3046_v33 = vpop.permute.xlu1 %3045  ;;  %v3044_v0 = vpop.permute.xlu0 %3043 }
 0x79b   : > { %v3050_v13 = vadd.f32 %v3046_v33, %v6674_v8  ;;  %v3049_v25 = vadd.f32 %v3044_v0, %v6676_v59 }
 0x79e   : > { %v3060_v20 = vpop.permute.xlu1 %3059  ;;  %v3058_v55 = vpop.permute.xlu0 %3057 }
 0x79f   : > { %v3064_v17 = vadd.f32 %v3060_v20, %v6678_v32  ;;  %v3063_v52 = vadd.f32 %v3058_v55, %v6680_v18  ;;  %v3144_v32 = vstv %s4164_s7  ;;  %s4205_s7 = sld [smem:[#allocation7 + $0x67]] }
 0x7a0   : > { %v3145_v61 = vmul.f32 %v3144_v32, %v6708_v3 }
 0x7a2   : > { %v3074_v4 = vpop.permute.xlu1 %3073  ;;  %v3072_v49 = vpop.permute.xlu0 %3071 }
 0x7a3   : > { %v3078_v36 = vadd.f32 %v3074_v4, %v6684_v34  ;;  %v3077_v45 = vadd.f32 %v3072_v49, %v6690_v47  ;;  %v3146_v47 = vmul.f32 %v3144_v32, %v6706_v29  ;;  %v3282_v49 = vstv %s4176_s22  ;;  %s4209_s22 = sld [smem:[#allocation7 + $0x68]] }
 0x7a6   : > { %v3088_v40 = vpop.permute.xlu1 %3087  ;;  %v3086_v8 = vpop.permute.xlu0 %3085 }
 0x7a7   : > { %v3092_v54 = vadd.f32 %v3088_v40, %v3036_v16  ;;  %v3091_v59 = vadd.f32 %v3086_v8, %v3035_v14 }
 0x7a9   : > { %v3142_v18 = vadd.f32 %v3140_v56, %v3092_v54  ;;  %v3141_v62 = vadd.f32 %v3139_v35, %v3091_v59  ;;  %v3284_v59 = vmul.f32 %v3282_v49, %v6742_v2  ;;  %v3283_v56 = vmul.f32 %v3282_v49, %v6744_v12 }
 0x7aa   : > { %v3102_v24 = vpop.permute.xlu1 %3101  ;;  %v3100_v51 = vpop.permute.xlu0 %3099  ;;  %v3288_v35 = vstv %s4177_s8  ;;  %s4210_s8 = sld [smem:[#allocation7 + $0x8c]] }
 0x7ab   : > { %v3106_v42 = vadd.f32 %v3102_v24, %v3050_v13  ;;  %v3105_v34 = vadd.f32 %v3100_v51, %v3049_v25  ;;  %v3276_v13 = vstv %s4175_s16  ;;  %s4208_s16 = sld [smem:[#allocation7 + $0x44]] }
 0x7ac   : > { %v3277_v4 = vmul.f32 %v3276_v13, %v6744_v12 }
 0x7ad   : > { %v3148_v10 = vadd.f32 %v3146_v47, %v3106_v42  ;;  %v3147_v30 = vadd.f32 %v3145_v61, %v3105_v34  ;;  %v3290_v34 = vmul.f32 %v3288_v35, %v6742_v2  ;;  %v3289_v47 = vmul.f32 %v3288_v35, %v6744_v12 }
 0x7ae   : > { %v3116_v31 = vpop.permute.xlu1 %3115  ;;  %v3114_v21 = vpop.permute.xlu0 %3113  ;;  %v3294_v61 = vstv %s4178_s29  ;;  %v3481_v35 = vstv %s4194_s20  ;;  %s4215_s29 = sld [smem:[#allocation7 + $0x22]]  ;;  %s4219_s20 = sld [smem:[#allocation7 + $0x23]] }
 0x7af   : > { %v3120_v1 = vadd.f32 %v3116_v31, %v3064_v17  ;;  %v3119_v60 = vadd.f32 %v3114_v21, %v3063_v52  ;;  %v3278_v52 = vmul.f32 %v3276_v13, %v6742_v2 }
 0x7b1   : > { %v3154_v63 = vadd.f32 %v3152_v6, %v3120_v1  ;;  %v3153_v58 = vadd.f32 %v3151_v5, %v3119_v60  ;;  %v3296_v60 = vmul.f32 %v3294_v61, %v6742_v2  ;;  %v3295_v6 = vmul.f32 %v3294_v61, %v6744_v12 }
 0x7b2   : > { %v3130_v23 = vpop.permute.xlu1 %3129  ;;  %v3128_v50 = vpop.permute.xlu0 %3127 }
 0x7b3   : > { %v3134_v9 = vadd.f32 %v3130_v23, %v3078_v36  ;;  %v3133_v7 = vadd.f32 %v3128_v50, %v3077_v45 }
 0x7b5   : > { %v3160_v57 = vadd.f32 %v3158_v53, %v3134_v9  ;;  %v3159_v44 = vadd.f32 %v3157_v26, %v3133_v7 }
 0x7b6   : > { %v3170_v38 = vpop.permute.xlu1 %3169  ;;  %v3168_v48 = vpop.permute.xlu0 %3167 }
 0x7b7   : > { %v3174_v37 = vadd.f32 %v3170_v38, %v3142_v18  ;;  %v3173_v41 = vadd.f32 %v3168_v48, %v3141_v62 }
 0x7ba   : > { %v3184_v46 = vpop.permute.xlu1 %3183  ;;  %v3182_v27 = vpop.permute.xlu0 %3181 }
 0x7bb   : > { %v3188_v15 = vadd.f32 %v3184_v46, %v3148_v10  ;;  %v3187_v11 = vadd.f32 %v3182_v27, %v3147_v30 }
 0x7be   : > { %v3198_v39 = vpop.permute.xlu1 %3197  ;;  %v3196_v22 = vpop.permute.xlu0 %3195 }
 0x7bf   : > { %v3202_v16 = vadd.f32 %v3198_v39, %v3154_v63  ;;  %v3201_v14 = vadd.f32 %v3196_v22, %v3153_v58 }
 0x7c2   : > { %v3212_v33 = vpop.permute.xlu1 %3211  ;;  %v3210_v29 = vpop.permute.xlu0 %3209 }
 0x7c3   : > { %v3216_v0 = vadd.f32 %v3212_v33, %v3160_v57  ;;  %v3215_v3 = vadd.f32 %v3210_v29, %v3159_v44 }
 0x7c6   : > { %v3226_v25 = vpop.permute.xlu1 %3225  ;;  %v3224_v20 = vpop.permute.xlu0 %3223 }
 0x7c7   : > { %v3230_v55 = vadd.f32 %v3226_v25, %v3174_v37  ;;  %v3229_v17 = vadd.f32 %v3224_v20, %v3173_v41 }
 0x7c9   : > { %v3280_v36 = vadd.f32 %v3278_v52, %v3230_v55  ;;  %v3279_v45 = vadd.f32 %v3277_v4, %v3229_v17  ;;  %v3439_v4 = vstv %s4191_s27  ;;  %s4216_s27 = sld [smem:[#allocation7 + $0x46]] }
 0x7ca   : > { %v3240_v43 = vpop.permute.xlu1 %3239  ;;  %v3238_v40 = vpop.permute.xlu0 %3237 }
 0x7cb   : > { %v3244_v8 = vadd.f32 %v3240_v43, %v3188_v15  ;;  %v3243_v54 = vadd.f32 %v3238_v40, %v3187_v11  ;;  %v3453_v40 = vstv %s4192_s3  ;;  %s4217_s3 = sld [smem:[#allocation7 + $0x6a]] }
 0x7cd   : > { %v3286_v32 = vadd.f32 %v3284_v59, %v3244_v8  ;;  %v3285_v18 = vadd.f32 %v3283_v56, %v3243_v54  ;;  %v3467_v59 = vstv %s4193_s12  ;;  %s4218_s12 = sld [smem:[#allocation7 + $0x8e]] }
 0x7ce   : > { %v3254_v62 = vpop.permute.xlu1 %3253  ;;  %v3252_v24 = vpop.permute.xlu0 %3251 }
 0x7cf   : > { %v3258_v51 = vadd.f32 %v3254_v62, %v3202_v16  ;;  %v3257_v42 = vadd.f32 %v3252_v24, %v3201_v14  ;;  %v3421_v62 = vstv %s4188_s18  ;;  %v3427_v24 = vstv %s4189_s19  ;;  %s4221_s18 = sld [smem:[#allocation7 + $0x6b]]  ;;  %s4222_s19 = sld [smem:[#allocation7 + $0x8f]] }
 0x7d1   : > { %v3292_v19 = vadd.f32 %v3290_v34, %v3258_v51  ;;  %v3291_v10 = vadd.f32 %v3289_v47, %v3257_v42  ;;  %v3433_v51 = vstv %s4190_s1  ;;  %v3495_v47 = vstv %s6824_s17  ;;  %s4201_s1 = sld [smem:[#allocation7 + $0x66]]  ;;  %s4202_s17 = sld [smem:[#allocation7 + $0x8a]] }
 0x7d2   : > { %v3268_v30 = vpop.permute.xlu1 %3267  ;;  %v3266_v31 = vpop.permute.xlu0 %3265 }
 0x7d3   : > { %v3272_v21 = vadd.f32 %v3268_v30, %v3216_v0  ;;  %v3271_v1 = vadd.f32 %v3266_v31, %v3215_v3 }
 0x7d5   : > { %v3298_v5 = vadd.f32 %v3296_v60, %v3272_v21  ;;  %v3297_v28 = vadd.f32 %v3295_v6, %v3271_v1 }
 0x7d6   : > { %v3308_v63 = vpop.permute.xlu1 %3307  ;;  %v3306_v58 = vpop.permute.xlu0 %3305 }
 0x7d7   : > { %v3312_v23 = vadd.f32 %v3308_v63, %v3280_v36  ;;  %v3311_v50 = vadd.f32 %v3306_v58, %v3279_v45 }
 0x7da   : > { %v3322_v9 = vpop.permute.xlu1 %3321  ;;  %v3320_v7 = vpop.permute.xlu0 %3319 }
 0x7db   : > { %v3326_v53 = vadd.f32 %v3322_v9, %v3286_v32  ;;  %v3325_v26 = vadd.f32 %v3320_v7, %v3285_v18  ;;  %v3415_v18 = vstv %s4187_s9  ;;  %s4220_s9 = sld [smem:[#allocation7 + $0x47]] }
 0x7de   : > { %v3336_v57 = vpop.permute.xlu1 %3335  ;;  %v3334_v44 = vpop.permute.xlu0 %3333 }
 0x7df   : > { %v3340_v38 = vadd.f32 %v3336_v57, %v3292_v19  ;;  %v3339_v48 = vadd.f32 %v3334_v44, %v3291_v10 }
 0x7e2   : > { %v3350_v37 = vpop.permute.xlu1 %3349  ;;  %v3348_v41 = vpop.permute.xlu0 %3347 }
 0x7e3   : > { %v3354_v46 = vadd.f32 %v3350_v37, %v3298_v5  ;;  %v3353_v2 = vadd.f32 %v3348_v41, %v3297_v28  ;;  %v3537_v41 = vstv %s4198_s2  ;;  %s6972_s2 = sld [smem:[#allocation7 + $0x69]] }
 0x7e6   : > { %v3364_v27 = vpop.permute.xlu1 %3363  ;;  %v3362_v12 = vpop.permute.xlu0 %3361 }
 0x7e7   : > { %v6810_v15 = vadd.f32 %v3364_v27, %v3312_v23  ;;  %v6812_v11 = vadd.f32 %v3362_v12, %v3311_v50  ;;  %v3577_v12 = vstv %s4203_s14  ;;  %s6976_s14 = sld [smem:[#allocation7 + $0x8d]] }
 0x7ea   : > { %v3378_v39 = vpop.permute.xlu1 %3377  ;;  %v3376_v22 = vpop.permute.xlu0 %3375 }
 0x7eb   : > { %v3382_v16 = vadd.f32 %v3378_v39, %v3326_v53  ;;  %v3381_v14 = vadd.f32 %v3376_v22, %v3325_v26  ;;  %v3509_v26 = vstv %s6832_s21  ;;  %v3591_v22 = vstv %s4204_s24  ;;  %s4211_s21 = sld [smem:[#allocation7 + $0x21]]  ;;  %s7076_s24 = sshll.u32 %s4705_s0, 6 }
 0x7ee   : > { %v3392_v33 = vpop.permute.xlu1 %3391  ;;  %v3390_v29 = vpop.permute.xlu0 %3389 }
 0x7ef   : > { %v3396_v0 = vadd.f32 %v3392_v33, %v3340_v38  ;;  %v3395_v3 = vadd.f32 %v3390_v29, %v3339_v48  ;;  %v3523_v38 = vstv %s4197_s30  ;;  %v3605_v33 = vstv %s4205_s7  ;;  %s4212_s30 = sld [smem:[#allocation7 + $0x45]]  ;;  %s159_s7 = scalar_lea.vmem [#allocation13], %s7076_s24 }
 0x7f2   : > { %v3406_v13 = vpop.permute.xlu1 %3405  ;;  %v3404_v25 = vpop.permute.xlu0 %3403 }
 0x7f3   : > { %v3410_v20 = vadd.f32 %v3406_v13, %v3354_v46  ;;  %v3409_v55 = vadd.f32 %v3404_v25, %v3353_v2 }
 0x7f6   : > { %v2134_v17 = vpop.permute.xlu1 %2133  ;;  %v2132_v52 = vpop.permute.xlu0 %2131 }
 0x7f7   : > { %2150 = vst.msk [vmem:[#allocation3 + $0x51] sm:$0xff] %vm226_vm2, %v2134_v17  ;;  %2149 = vst.msk [vmem:[#allocation3 + $0x49] sm:$0xff] %vm226_vm2, %v2132_v52  ;;  %v3647_v52 = vstv %s4208_s16 }
 0x7fe   : > { %v6816_v49 = vld [vmem:[#allocation3 + $0x48] sm:$0xff]  ;;  %v6818_v36 = vld [vmem:[#allocation3 + $0x50] sm:$0xff] }
 0x7ff   : > { %v3440_v45 = vmul.f32 %v3439_v4, %v6816_v49  ;;  %v3441_v43 = vmul.f32 %v3439_v4, %v6818_v36  ;;  %v3454_v8 = vmul.f32 %v3453_v40, %v6816_v49  ;;  %v3455_v54 = vmul.f32 %v3453_v40, %v6818_v36  ;;  %v6881_v2 = vld [vmem:[#allocation3 + $0x49] sm:$0xff] }
 0x800   : > { %v3468_v56 = vmul.f32 %v3467_v59, %v6816_v49  ;;  %v3469_v32 = vmul.f32 %v3467_v59, %v6818_v36  ;;  %v3483_v42 = vmul.f32 %v3481_v35, %v6818_v36  ;;  %v3482_v34 = vmul.f32 %v3481_v35, %v6816_v49  ;;  %v6920_v35 = vld [vmem:[#allocation3 + $0x52] sm:$0xff] }
 0x801   : > { %3444 = vrot.lane.b32.xlu0 %v3440_v45, %s7074_s13  ;;  %3446 = vrot.lane.b32.xlu1 %v3441_v43, %s7074_s13  ;;  %v3417_v61 = vmul.f32 %v3415_v18, %v6818_v36  ;;  %v3416_v19 = vmul.f32 %v3415_v18, %v6816_v49  ;;  %v3423_v10 = vmul.f32 %v3421_v62, %v6818_v36  ;;  %v3675_v40 = vstv %s4210_s8 }
 0x802   : > { %v3422_v30 = vmul.f32 %v3421_v62, %v6816_v49  ;;  %v3429_v31 = vmul.f32 %v3427_v24, %v6818_v36  ;;  %v3428_v21 = vmul.f32 %v3427_v24, %v6816_v49  ;;  %v3435_v1 = vmul.f32 %v3433_v51, %v6818_v36 }
 0x803   : > { %v3434_v60 = vmul.f32 %v3433_v51, %v6816_v49  ;;  %v6849_v6 = vadd.f32 %v3417_v61, %v6810_v15  ;;  %v6852_v5 = vadd.f32 %v3416_v19, %v6812_v11  ;;  %v6854_v28 = vadd.f32 %v3423_v10, %v3382_v16  ;;  %v6884_v15 = vld [vmem:[#allocation3 + $0x51] sm:$0xff] }
 0x804   : > { %v6856_v63 = vadd.f32 %v3422_v30, %v3381_v14  ;;  %v6859_v58 = vadd.f32 %v3429_v31, %v3396_v0  ;;  %v6861_v23 = vadd.f32 %v3428_v21, %v3395_v3  ;;  %v6863_v50 = vadd.f32 %v3435_v1, %v3410_v20 }
 0x805   : > { %3458 = vrot.lane.b32.xlu0 %v3454_v8, %s7074_s13  ;;  %3460 = vrot.lane.b32.xlu1 %v3455_v54, %s7074_s13  ;;  %v6865_v9 = vadd.f32 %v3434_v60, %v3409_v55  ;;  %v3496_v7 = vmul.f32 %v3495_v47, %v6816_v49  ;;  %v3497_v53 = vmul.f32 %v3495_v47, %v6818_v36  ;;  %v3619_v3 = vstv %s4206_s4  ;;  %v6917_v54 = vld [vmem:[#allocation3 + $0x4a] sm:$0xff]  ;;  %s4229_s4 = sshll.u32 %s4622_s26, 10  ;;  %s3835_s26 = scalar_lea.sflag [#allocation12], %s4705_s0 }
 0x806   : > { %v3510_v57 = vmul.f32 %v3509_v26, %v6816_v49  ;;  %v3511_v44 = vmul.f32 %v3509_v26, %v6818_v36  ;;  %v3524_v48 = vmul.f32 %v3523_v38, %v6816_v49  ;;  %v3525_v37 = vmul.f32 %v3523_v38, %v6818_v36  ;;  %s6998_s8 = scalar_lea.hbm %s7048_s6, %s4229_s4 }
 0x807   : > { %v3538_v46 = vmul.f32 %v3537_v41, %v6816_v49  ;;  %v3539_v27 = vmul.f32 %v3537_v41, %v6818_v36  ;;  %v3578_v11 = vmul.f32 %v3577_v12, %v6881_v2  ;;  %v3579_v39 = vmul.f32 %v3577_v12, %v6884_v15 }
 0x808   : > { %v3592_v16 = vmul.f32 %v3591_v22, %v6881_v2  ;;  %v3593_v14 = vmul.f32 %v3591_v22, %v6884_v15  ;;  %v3606_v29 = vmul.f32 %v3605_v33, %v6881_v2  ;;  %v3607_v0 = vmul.f32 %v3605_v33, %v6884_v15 }
 0x809   : > { %3472 = vrot.lane.b32.xlu0 %v3468_v56, %s7074_s13  ;;  %3474 = vrot.lane.b32.xlu1 %v3469_v32, %s7074_s13  ;;  %v3620_v13 = vmul.f32 %v3619_v3, %v6881_v2  ;;  %v3621_v25 = vmul.f32 %v3619_v3, %v6884_v15  ;;  %v3633_v20 = vstv %s4207_s15  ;;  %v3648_v4 = vmul.f32 %v3647_v52, %v6881_v2  ;;  %s3848_s15 = sshll.u32 %s159_s7, 4  ;;  %s7000_s15 = int_to_ptr.vmem [resolvable:$true] %s3848_s15 }
 0x80a   : > { %v3634_v55 = vmul.f32 %v3633_v20, %v6881_v2  ;;  %v3635_v17 = vmul.f32 %v3633_v20, %v6884_v15  ;;  %v3649_v49 = vmul.f32 %v3647_v52, %v6884_v15  ;;  %v3661_v36 = vstv %s4209_s22 }
 0x80b   : > { %v3662_v45 = vmul.f32 %v3661_v36, %v6881_v2  ;;  %v3663_v43 = vmul.f32 %v3661_v36, %v6884_v15  ;;  %v3676_v8 = vmul.f32 %v3675_v40, %v6881_v2  ;;  %v3677_v59 = vmul.f32 %v3675_v40, %v6884_v15 }
 0x80c   : > { %v3715_v56 = vstv %s4215_s29  ;;  %v3729_v62 = vstv %s4216_s27  ;;  %v3757_v61 = vstv %s4218_s12  ;;  %v3771_v30 = vstv %s4219_s20  ;;  %s4457_s29 = scalar_lea.vmem %s7000_s15, 1024  ;;  %s4539_s27 = smov [#allocation13]  }
 0x80d   : > { %3486 = vrot.lane.b32.xlu0 %v3482_v34, %s7074_s13  ;;  %3488 = vrot.lane.b32.xlu1 %v3483_v42, %s7074_s13  ;;  %v3716_v32 = vmul.f32 %v3715_v56, %v6917_v54  ;;  %v3717_v18 = vmul.f32 %v3715_v56, %v6920_v35  ;;  %v3730_v24 = vmul.f32 %v3729_v62, %v6917_v54  ;;  %v3743_v42 = vstv %s4217_s3  ;;  %p4458_p1 = scmp.ne.s32.totalorder %s7000_s15, %s4457_s29  ;;  %s4461_s3 = sshll.u32 %s4539_s27, 4  ;;  %s4462_s3 = int_to_ptr.vmem [resolvable:$false] %s4461_s3 }
 0x80e   : > { %v3731_v51 = vmul.f32 %v3729_v62, %v6920_v35  ;;  %v3744_v34 = vmul.f32 %v3743_v42, %v6917_v54  ;;  %v3745_v47 = vmul.f32 %v3743_v42, %v6920_v35  ;;  %v3758_v19 = vmul.f32 %v3757_v61, %v6917_v54  ;;  %s4463_s12 = scalar_lea.vmem %s4462_s3, 2048  ;;  %p4464_p3 = scmp.lt.s32.totalorder %s7000_s15, %s4462_s3 }
 0x80f   : > { %v3759_v10 = vmul.f32 %v3757_v61, %v6920_v35  ;;  %v3772_v31 = vmul.f32 %v3771_v30, %v6917_v54  ;;  %v3773_v21 = vmul.f32 %v3771_v30, %v6920_v35  ;;  %v3785_v1 = vstv %s4220_s9  ;;  %p4459_p7 = pnand %p4458_p1, %p7077_p6  ;;  %p4465_p5 = scmp.lt.s32.totalorder %s4463_s12, %s4457_s29 }
 0x810   : > { %v3786_v60 = vmul.f32 %v3785_v1, %v6917_v54 }
 0x811   : > { %3500 = vrot.lane.b32.xlu0 %v3496_v7, %s7073_s5  ;;  %3502 = vrot.lane.b32.xlu1 %v3497_v53, %s7073_s5  ;;  %v3787_v7 = vmul.f32 %v3785_v1, %v6920_v35  ;;  %v3799_v53 = vstv %s4221_s18  ;;  %p4460_p8 = pneg %p4459_p7  ;;  %p4466_p9 = por %p4465_p5, %p4464_p3 }
 0x812   : > { %v3800_v26 = vmul.f32 %v3799_v53, %v6917_v54 }
 0x813   : > { %p4467_p11 = pnand %p4466_p9, %p4460_p8 }
 0x815   : > { %3514 = vrot.lane.b32.xlu0 %v3510_v57, %s7073_s5  ;;  %3516 = vrot.lane.b32.xlu1 %v3511_v44, %s7073_s5  ;;  %v3801_v57 = vmul.f32 %v3799_v53, %v6920_v35  ;;  %v3813_v44 = vstv %s4222_s19 }
 0x816   : > { %v3814_v38 = vmul.f32 %v3813_v44, %v6917_v54 }
 0x819   : > { %3528 = vrot.lane.b32.xlu0 %v3524_v48, %s7073_s5  ;;  %3530 = vrot.lane.b32.xlu1 %v3525_v37, %s7073_s5  ;;  %v3815_v48 = vmul.f32 %v3813_v44, %v6920_v35 }
 0x81d   : > { %3542 = vrot.lane.b32.xlu0 %v3538_v46, %s7073_s5  ;;  %3544 = vrot.lane.b32.xlu1 %v3539_v27, %s7073_s5 }
 0x821   : > { %3582 = vrot.lane.b32.xlu0 %v3578_v11, %s7074_s13  ;;  %3584 = vrot.lane.b32.xlu1 %v3579_v39, %s7074_s13 }
 0x825   : > { %3596 = vrot.lane.b32.xlu0 %v3592_v16, %s7074_s13  ;;  %3598 = vrot.lane.b32.xlu1 %v3593_v14, %s7074_s13 }
 0x829   : > { %3610 = vrot.lane.b32.xlu0 %v3606_v29, %s7074_s13  ;;  %3612 = vrot.lane.b32.xlu1 %v3607_v0, %s7074_s13 }
 0x82d   : > { %3624 = vrot.lane.b32.xlu0 %v3620_v13, %s7074_s13  ;;  %3626 = vrot.lane.b32.xlu1 %v3621_v25, %s7074_s13 }
 0x831   : > { %3638 = vrot.lane.b32.xlu0 %v3634_v55, %s7073_s5  ;;  %3640 = vrot.lane.b32.xlu1 %v3635_v17, %s7073_s5 }
 0x835   : > { %3652 = vrot.lane.b32.xlu0 %v3648_v4, %s7073_s5  ;;  %3654 = vrot.lane.b32.xlu1 %v3649_v49, %s7073_s5 }
 0x839   : > { %3666 = vrot.lane.b32.xlu0 %v3662_v45, %s7073_s5  ;;  %3668 = vrot.lane.b32.xlu1 %v3663_v43, %s7073_s5  ;;  %v3565_v43 = vstv %s4201_s1 }
 0x83d   : > { %3680 = vrot.lane.b32.xlu0 %v3676_v8, %s7073_s5  ;;  %3682 = vrot.lane.b32.xlu1 %v3677_v59, %s7073_s5 }
 0x841   : > { %3720 = vrot.lane.b32.xlu0 %v3716_v32, %s7074_s13  ;;  %3722 = vrot.lane.b32.xlu1 %v3717_v18, %s7074_s13  ;;  %v3566_v18 = vmul.f32 %v3565_v43, %v6881_v2 }
 0x845   : > { %3734 = vrot.lane.b32.xlu0 %v3730_v24, %s7074_s13  ;;  %3736 = vrot.lane.b32.xlu1 %v3731_v51, %s7074_s13  ;;  %v3567_v24 = vmul.f32 %v3565_v43, %v6884_v15  ;;  %v3571_v51 = vstv %s4202_s17 }
 0x849   : > { %3748 = vrot.lane.b32.xlu0 %v3744_v34, %s7074_s13  ;;  %3750 = vrot.lane.b32.xlu1 %v3745_v47, %s7074_s13 }
 0x84d   : > { %3762 = vrot.lane.b32.xlu0 %v3758_v19, %s7074_s13  ;;  %3764 = vrot.lane.b32.xlu1 %v3759_v10, %s7074_s13  ;;  %s4199_s13 = sld [smem:[#allocation7 + $0x1e]]  ;;  %v3572_v10 = vmul.f32 %v3571_v51, %v6881_v2 }
 0x851   : > { %3776 = vrot.lane.b32.xlu0 %v3772_v31, %s7073_s5  ;;  %3778 = vrot.lane.b32.xlu1 %v3773_v21, %s7073_s5  ;;  %v3573_v31 = vmul.f32 %v3571_v51, %v6884_v15 }
 0x853   : > { %v3553_v13 = vstv %s4199_s13 }
 0x854   : > { %v3555_v17 = vmul.f32 %v3553_v13, %v6884_v15 }
 0x855   : > { %3790 = vrot.lane.b32.xlu0 %v3786_v60, %s7073_s5  ;;  %3792 = vrot.lane.b32.xlu1 %v3787_v7, %s7073_s5 }
 0x859   : > { %3804 = vrot.lane.b32.xlu0 %v3800_v26, %s7073_s5  ;;  %3806 = vrot.lane.b32.xlu1 %v3801_v57, %s7073_s5 }
 0x85d   : > { %3818 = vrot.lane.b32.xlu0 %v3814_v38, %s7073_s5  ;;  %3820 = vrot.lane.b32.xlu1 %v3815_v48, %s7073_s5  ;;  %s4200_s5 = sld [smem:[#allocation7 + $0x42]] }
 0x873   : > { %v3445_v37 = vpop.permute.xlu0 %3444  ;;  %v3447_v41 = vpop.permute.xlu1 %3446 }
 0x874   : > { %v3450_v46 = vadd.f32 %v3445_v37, %v6852_v5  ;;  %v3451_v27 = vadd.f32 %v3447_v41, %v6849_v6  ;;  %v3691_v37 = vstv %s4211_s21 }
 0x877   : > { %v3459_v12 = vpop.permute.xlu0 %3458  ;;  %v3461_v11 = vpop.permute.xlu1 %3460 }
 0x878   : > { %v3464_v39 = vadd.f32 %v3459_v12, %v6856_v63  ;;  %v3465_v22 = vadd.f32 %v3461_v11, %v6854_v28  ;;  %v3554_v28 = vmul.f32 %v3553_v13, %v6881_v2  ;;  %v3692_v12 = vmul.f32 %v3691_v37, %v6917_v54 }
 0x87b   : > { %v3473_v16 = vpop.permute.xlu0 %3472  ;;  %v3475_v14 = vpop.permute.xlu1 %3474 }
 0x87c   : > { %v3478_v33 = vadd.f32 %v3473_v16, %v6861_v23  ;;  %v3479_v29 = vadd.f32 %v3475_v14, %v6859_v58  ;;  %v3559_v23 = vstv %s4200_s5 }
 0x87d   : > { %v3561_v45 = vmul.f32 %v3559_v23, %v6884_v15 }
 0x87f   : > { %v3487_v0 = vpop.permute.xlu0 %3486  ;;  %v3489_v3 = vpop.permute.xlu1 %3488 }
 0x880   : > { %v3492_v5 = vadd.f32 %v3487_v0, %v6865_v9  ;;  %v3493_v6 = vadd.f32 %v3489_v3, %v6863_v50  ;;  %v3560_v9 = vmul.f32 %v3559_v23, %v6881_v2 }
 0x883   : > { %v3501_v25 = vpop.permute.xlu0 %3500  ;;  %v3503_v63 = vpop.permute.xlu1 %3502 }
 0x884   : > { %v3506_v20 = vadd.f32 %v3501_v25, %v3450_v46  ;;  %v3507_v55 = vadd.f32 %v3503_v63, %v3451_v27  ;;  %v3703_v63 = vstv %s6972_s2 }
 0x886   : > { %v3556_v58 = vadd.f32 %v3554_v28, %v3506_v20  ;;  %v3557_v4 = vadd.f32 %v3555_v17, %v3507_v55 }
 0x887   : > { %v3515_v52 = vpop.permute.xlu0 %3514  ;;  %v3517_v49 = vpop.permute.xlu1 %3516 }
 0x888   : > { %v3520_v36 = vadd.f32 %v3515_v52, %v3464_v39  ;;  %v3521_v50 = vadd.f32 %v3517_v49, %v3465_v22  ;;  %v3693_v39 = vmul.f32 %v3691_v37, %v6920_v35  ;;  %v3697_v22 = vstv %s4212_s30 }
 0x889   : > { %v3699_v25 = vmul.f32 %v3697_v22, %v6920_v35 }
 0x88a   : > { %v3562_v40 = vadd.f32 %v3560_v9, %v3520_v36  ;;  %v3563_v59 = vadd.f32 %v3561_v45, %v3521_v50  ;;  %v3705_v36 = vmul.f32 %v3703_v63, %v6920_v35  ;;  %v3709_v9 = vstv %s6976_s14 }
 0x88b   : > { %v3529_v8 = vpop.permute.xlu0 %3528  ;;  %v3531_v56 = vpop.permute.xlu1 %3530 }
 0x88c   : > { %v3534_v32 = vadd.f32 %v3529_v8, %v3478_v33  ;;  %v3535_v62 = vadd.f32 %v3531_v56, %v3479_v29 }
 0x88e   : > { %v3568_v42 = vadd.f32 %v3566_v18, %v3534_v32  ;;  %v3569_v47 = vadd.f32 %v3567_v24, %v3535_v62  ;;  %v3710_v32 = vmul.f32 %v3709_v9, %v6917_v54  ;;  %v3711_v62 = vmul.f32 %v3709_v9, %v6920_v35 }
 0x88f   : > { %v3543_v34 = vpop.permute.xlu0 %3542  ;;  %v3545_v61 = vpop.permute.xlu1 %3544 }
 0x890   : > { %v3548_v19 = vadd.f32 %v3543_v34, %v3492_v5  ;;  %v3549_v30 = vadd.f32 %v3545_v61, %v3493_v6  ;;  %v3698_v6 = vmul.f32 %v3697_v22, %v6917_v54 }
 0x892   : > { %v3574_v21 = vadd.f32 %v3572_v10, %v3548_v19  ;;  %v3575_v60 = vadd.f32 %v3573_v31, %v3549_v30 }
 0x893   : > { %v3583_v1 = vpop.permute.xlu0 %3582  ;;  %v3585_v7 = vpop.permute.xlu1 %3584 }
 0x894   : > { %v3588_v41 = vadd.f32 %v3583_v1, %v3556_v58  ;;  %v3589_v2 = vadd.f32 %v3585_v7, %v3557_v4  ;;  %v3704_v4 = vmul.f32 %v3703_v63, %v6917_v54 }
 0x897   : > { %v3597_v53 = vpop.permute.xlu0 %3596  ;;  %v3599_v26 = vpop.permute.xlu1 %3598 }
 0x898   : > { %v3602_v16 = vadd.f32 %v3597_v53, %v3562_v40  ;;  %v3603_v33 = vadd.f32 %v3599_v26, %v3563_v59 }
 0x89b   : > { %v3611_v57 = vpop.permute.xlu0 %3610  ;;  %v3613_v44 = vpop.permute.xlu1 %3612 }
 0x89c   : > { %v3616_v20 = vadd.f32 %v3611_v57, %v3568_v42  ;;  %v3617_v55 = vadd.f32 %v3613_v44, %v3569_v47 }
 0x89f   : > { %v3625_v38 = vpop.permute.xlu0 %3624  ;;  %v3627_v48 = vpop.permute.xlu1 %3626 }
 0x8a0   : > { %v3630_v50 = vadd.f32 %v3625_v38, %v3574_v21  ;;  %v3631_v43 = vadd.f32 %v3627_v48, %v3575_v60 }
 0x8a3   : > { %v3639_v46 = vpop.permute.xlu0 %3638  ;;  %v3641_v27 = vpop.permute.xlu1 %3640 }
 0x8a4   : > { %v3644_v15 = vadd.f32 %v3639_v46, %v3588_v41  ;;  %v3645_v11 = vadd.f32 %v3641_v27, %v3589_v2 }
 0x8a6   : > { %v3694_v14 = vadd.f32 %v3692_v12, %v3644_v15  ;;  %v3695_v0 = vadd.f32 %v3693_v39, %v3645_v11 }
 0x8a7   : > { %v3653_v29 = vpop.permute.xlu0 %3652  ;;  %v3655_v3 = vpop.permute.xlu1 %3654 }
 0x8a8   : > { %v3658_v5 = vadd.f32 %v3653_v29, %v3602_v16  ;;  %v3659_v13 = vadd.f32 %v3655_v3, %v3603_v33 }
 0x8aa   : > { %v3700_v28 = vadd.f32 %v3698_v6, %v3658_v5  ;;  %v3701_v23 = vadd.f32 %v3699_v25, %v3659_v13 }
 0x8ab   : > { %v3667_v17 = vpop.permute.xlu0 %3666  ;;  %v3669_v58 = vpop.permute.xlu1 %3668 }
 0x8ac   : > { %v3672_v52 = vadd.f32 %v3667_v17, %v3616_v20  ;;  %v3673_v49 = vadd.f32 %v3669_v58, %v3617_v55 }
 0x8ae   : > { %v3706_v45 = vadd.f32 %v3704_v4, %v3672_v52  ;;  %v3707_v8 = vadd.f32 %v3705_v36, %v3673_v49 }
 0x8af   : > { %v3681_v40 = vpop.permute.xlu0 %3680  ;;  %v3683_v59 = vpop.permute.xlu1 %3682 }
 0x8b0   : > { %v3686_v56 = vadd.f32 %v3681_v40, %v3630_v50  ;;  %v3687_v18 = vadd.f32 %v3683_v59, %v3631_v43 }
 0x8b2   : > { %v3712_v24 = vadd.f32 %v3710_v32, %v3686_v56  ;;  %v3713_v42 = vadd.f32 %v3711_v62, %v3687_v18 }
 0x8b3   : > { %v3721_v51 = vpop.permute.xlu0 %3720  ;;  %v3723_v34 = vpop.permute.xlu1 %3722 }
 0x8b4   : > { %v3726_v21 = vadd.f32 %v3721_v51, %v3694_v14  ;;  %v3727_v1 = vadd.f32 %v3723_v34, %v3695_v0 }
 0x8b7   : > { %v3735_v47 = vpop.permute.xlu0 %3734  ;;  %v3737_v61 = vpop.permute.xlu1 %3736 }
 0x8b8   : > { %v3740_v26 = vadd.f32 %v3735_v47, %v3700_v28  ;;  %v3741_v35 = vadd.f32 %v3737_v61, %v3701_v23 }
 0x8bb   : > { %v3749_v19 = vpop.permute.xlu0 %3748  ;;  %v3751_v10 = vpop.permute.xlu1 %3750 }
 0x8bc   : > { %v3754_v37 = vadd.f32 %v3749_v19, %v3706_v45  ;;  %v3755_v41 = vadd.f32 %v3751_v10, %v3707_v8 }
 0x8bf   : > { %v3763_v30 = vpop.permute.xlu0 %3762  ;;  %v3765_v31 = vpop.permute.xlu1 %3764 }
 0x8c0   : > { %v3768_v12 = vadd.f32 %v3763_v30, %v3712_v24  ;;  %v3769_v11 = vadd.f32 %v3765_v31, %v3713_v42 }
 0x8c3   : > { %v3777_v60 = vpop.permute.xlu0 %3776  ;;  %v3779_v7 = vpop.permute.xlu1 %3778 }
 0x8c4   : > { %v3782_v53 = vadd.f32 %v3777_v60, %v3726_v21  ;;  %v3783_v54 = vadd.f32 %v3779_v7, %v3727_v1 }
 0x8c6   : > { %3826 = vst.msk [vmem:[%s159_s7] sm:$0xff] %vm1908_vm5, %v3782_v53  ;;  %3827 = vst.msk [vmem:[%s159_s7 + $0x8] sm:$0xff] %vm1908_vm5, %v3783_v54 }
 0x8c7   : > { %v3791_v57 = vpop.permute.xlu0 %3790  ;;  %v3793_v44 = vpop.permute.xlu1 %3792 }
 0x8c8   : > { %v3796_v38 = vadd.f32 %v3791_v57, %v3740_v26  ;;  %v3797_v48 = vadd.f32 %v3793_v44, %v3741_v35 }
 0x8ca   : > { %3828 = vst.msk [vmem:[%s159_s7 + $0x10] sm:$0xff] %vm1908_vm5, %v3796_v38  ;;  %3829 = vst.msk [vmem:[%s159_s7 + $0x18] sm:$0xff] %vm1908_vm5, %v3797_v48 }
 0x8cb   : > { %v3805_v2 = vpop.permute.xlu0 %3804  ;;  %v3807_v46 = vpop.permute.xlu1 %3806 }
 0x8cc   : > { %v3810_v27 = vadd.f32 %v3805_v2, %v3754_v37  ;;  %v3811_v15 = vadd.f32 %v3807_v46, %v3755_v41 }
 0x8ce   : > { %3830 = vst.msk [vmem:[%s159_s7 + $0x20] sm:$0xff] %vm1908_vm5, %v3810_v27  ;;  %3831 = vst.msk [vmem:[%s159_s7 + $0x28] sm:$0xff] %vm1908_vm5, %v3811_v15 }
 0x8cf   : > { %v3819_v39 = vpop.permute.xlu0 %3818  ;;  %v3821_v22 = vpop.permute.xlu1 %3820 }
 0x8d0   : > { %v3824_v16 = vadd.f32 %v3819_v39, %v3768_v12  ;;  %v3825_v14 = vadd.f32 %v3821_v22, %v3769_v11 }
 0x8d2   : > { %3832 = vst.msk [vmem:[%s159_s7 + $0x30] sm:$0xff] %vm1908_vm5, %v3824_v16  ;;  %3833 = vst.msk [vmem:[%s159_s7 + $0x38] sm:$0xff] %vm1908_vm5, %v3825_v14 }
 0x8d3   : > { %4470 = shalt.err (!%p4467_p11)
}
 0x8d4   : > { %s4471_s20 = scalar_lea.hbm %s6998_s8, 1024  ;;  %s4475_s19 = scalar_lea.hbm %s7048_s6, 2048 }
 0x8d5   : > { %p4472_p13 = scmp.ne.s32.totalorder %s6998_s8, %s4471_s20  ;;  %p4476_p4 = scmp.lt.u32.totalorder %s6998_s8, %s7048_s6 }
 0x8d6   : > { %p4477_p10 = scmp.lt.u32.totalorder %s4475_s19, %s4471_s20  ;;  %p4479_p1 = scmp.lt.u32.totalorder %s4471_s20, %s6998_s8 }
 0x8d7   : > { %p4473_p0 = pnand %p4472_p13, %p7077_p6 }
 0x8d8   : > { %p4478_p12 = por %p4477_p10, %p4476_p4 }
 0x8d9   : > { %p4474_p2 = pneg %p4473_p0 }
 0x8da   : > { %p4480_p7 = por %p4479_p1, %p4478_p12 }
 0x8dc   : > { %p4481_p8 = pnand %p4480_p7, %p4474_p2 }
 0x8de   : > { %4484 = shalt.err (!%p4481_p8)
}
 0x8df   : > { %s4540_s1 = smov 128   ;;  %s4541_s17 = smov 8  }
 0x8e0   : > { %4248 = dma.vmem_to_hbm [thread:$0]  (%p7077_p6), %s7000_s15, 1024, %s6998_s8, %s3835_s26, %s4540_s1, %s4540_s1, %s4541_s17  }
 0x8e1 PF: > { %s3863_s21 = sand.u32 1, %s4513_s23   ;;  %p7078_p3 = scmp.ne.s32.totalorder %s7070_s11, 0 }
 0x8e2   : > { %p7079_p5 = scmp.ge.s32.totalorder %s4525_s25, 2  ;;  %s3864_s30 = scalar_lea.sflag [#allocation12], %s3863_s21 }
 0x8e4   : > { %p4255_p9 = pnand %p7079_p5, %p7078_p3 }
 0x8e6   : > { %4508 = dma.done.wait (!%p4255_p9), %s3864_s30, 1024  }
 0x8e7   : > { %4510 = vsyncadd (!%p4255_p9), %s3864_s30, 4294966272  ;;  %s7080_s23 = sld [smem:[#allocation17_spill]]  ;;  %s7081_s4 = sld [smem:[#allocation18_spill]] }
 0x8e8   : > { %s7082_s24 = sld [smem:[#allocation19_spill]]  ;;  %p39_p11 = scmp.ge.s32.totalorder %s4626_s28, 4  }
 0x8e9   : > { %s7083_s25 = smov %s4626_s28 }
 0x8ea   :  { %41 = sbr.rel (!%p39_p11) target bundleno = 58 (0x3a), region = 75 }
 0x8f1   :  { %3869 = vsyncpa [#allocation11], 1 }
 0x8f2   :  { %3871 = vsyncpa [#allocation11 + $0x1], 1 }
 0x8f3   :  { %3872 = vsyncpa [#allocation12], 1 }
 0x8f4   :  { %3874 = vsyncpa [#allocation12 + $0x1], 1 }

</bundles_post_ra>
